<compile_context>
chip_gen: v7x
topology: tpu7x:2x2x1
jax: 0.10.0
libtpu: 0.0.40
codegen_flags: <defaults>
</compile_context>

<pallas_src>
import functools
import math

import numpy as np

import jax
import jax.numpy as jnp
from jax.experimental import pallas as pl
from jax.experimental.pallas import tpu as pltpu

BN_EPS = 1e-5


def _round_up(x, m):
    return (x + m - 1) // m * m


# --------------------------------------------------------------------------
# Kernel 1: generic tiled matmul  y = act(x @ w + bias)   (bf16 MXU, f32 acc)
# --------------------------------------------------------------------------

def _mm_bias_act_kernel(x_ref, w_ref, b_ref, o_ref, acc_ref, *, act):
    @pl.when(pl.program_id(2) == 0)
    def _init():
        acc_ref[...] = jnp.zeros_like(acc_ref)

    acc_ref[...] += jnp.dot(x_ref[...], w_ref[...],
                            preferred_element_type=jnp.float32)

    @pl.when(pl.program_id(2) == pl.num_programs(2) - 1)
    def _finalize():
        y = acc_ref[...] + b_ref[...]
        if act == "relu":
            y = jnp.maximum(y, 0.0)
        elif act == "sigmoid":
            y = jax.nn.sigmoid(y)
        o_ref[...] = y


def matmul_bias_act(x2d, w, bias, act, *, tm=256, tn=256, tk=512):
    """act((M,K) @ (K,N) + bias), tiled, bf16 operands, f32 accumulation."""
    M, K = x2d.shape
    K2, N = w.shape
    assert K == K2
    tm = min(tm, _round_up(M, 8))
    tn = min(tn, _round_up(N, 128))
    tk = min(tk, _round_up(K, 128))
    Mp, Np, Kp = _round_up(M, tm), _round_up(N, tn), _round_up(K, tk)

    xb = x2d.astype(jnp.bfloat16)
    wb = w.astype(jnp.bfloat16)
    if (Mp, Kp) != (M, K):
        xb = jnp.pad(xb, ((0, Mp - M), (0, Kp - K)))
    if (Kp, Np) != (K, N):
        wb = jnp.pad(wb, ((0, Kp - K), (0, Np - N)))
    if bias is None:
        bias = jnp.zeros((N,), jnp.float32)
    b2 = jnp.pad(bias.astype(jnp.float32), (0, Np - N)).reshape(1, Np)

    out = pl.pallas_call(
        functools.partial(_mm_bias_act_kernel, act=act),
        out_shape=jax.ShapeDtypeStruct((Mp, Np), jnp.float32),
        grid=(Mp // tm, Np // tn, Kp // tk),
        in_specs=[
            pl.BlockSpec((tm, tk), lambda i, j, k: (i, k)),
            pl.BlockSpec((tk, tn), lambda i, j, k: (k, j)),
            pl.BlockSpec((1, tn), lambda i, j, k: (0, j)),
        ],
        out_specs=pl.BlockSpec((tm, tn), lambda i, j, k: (i, j)),
        scratch_shapes=[pltpu.VMEM((tm, tn), jnp.float32)],
        compiler_params=pltpu.CompilerParams(
            dimension_semantics=("parallel", "parallel", "arbitrary")),
    )(xb, wb, b2)
    if (Mp, Np) != (M, N):
        out = out[:M, :N]
    return out


# --------------------------------------------------------------------------
# Kernel 2: global average pool (channels-last, channels on the lane axis)
# --------------------------------------------------------------------------

def _gap_kernel(x_ref, o_ref):
    o_ref[...] = jnp.mean(x_ref[...], axis=0, keepdims=True)   # (HW,C) -> (1,C)


def global_avg_pool(x_hw_c):
    B, HW, C = x_hw_c.shape
    out = pl.pallas_call(
        _gap_kernel,
        out_shape=jax.ShapeDtypeStruct((B, 1, C), jnp.float32),
        grid=(B,),
        in_specs=[pl.BlockSpec((None, HW, C), lambda b: (b, 0, 0))],
        out_specs=pl.BlockSpec((None, 1, C), lambda b: (b, 0, 0)),
        compiler_params=pltpu.CompilerParams(dimension_semantics=("parallel",)),
    )(x_hw_c)
    return out.reshape(B, C)


# --------------------------------------------------------------------------
# Kernel 3: fused consumers of low_level_feat
#   out_channel = low_feat * ch_mask
#   sp          = relu(low_feat @ w_sp + b_sp)
#   pooled      = [max_c(sp), mean_c(sp)]
# --------------------------------------------------------------------------

def _fused_low_kernel(low_ref, w_ref, b_ref, chm_ref, outc_ref, pooled_ref):
    low = low_ref[...]                                     # (tm, C) f32
    outc_ref[...] = low * chm_ref[...]                     # (tm,C) * (1,C)
    sp = jnp.dot(low.astype(jnp.bfloat16), w_ref[...],
                 preferred_element_type=jnp.float32)       # (tm, 128)
    sp = jnp.maximum(sp + b_ref[...], 0.0)
    mx = jnp.max(sp, axis=-1, keepdims=True)
    av = jnp.mean(sp, axis=-1, keepdims=True)
    pooled_ref[...] = jnp.concatenate([mx, av], axis=-1)   # (tm, 2)


def fused_low_consumers(low3, w_sp, b_sp, chm3):
    B, HW, C = low3.shape
    N = w_sp.shape[1]
    tm = HW
    for cand in (512, 256, 128, 64, 32, 16, 8):
        if HW % cand == 0:
            tm = cand
            break
    outc, pooled = pl.pallas_call(
        _fused_low_kernel,
        out_shape=(jax.ShapeDtypeStruct((B, HW, C), jnp.float32),
                   jax.ShapeDtypeStruct((B, HW, 2), jnp.float32)),
        grid=(B, HW // tm),
        in_specs=[
            pl.BlockSpec((None, tm, C), lambda b, i: (b, i, 0)),
            pl.BlockSpec((C, N), lambda b, i: (0, 0)),
            pl.BlockSpec((1, N), lambda b, i: (0, 0)),
            pl.BlockSpec((None, 1, C), lambda b, i: (b, 0, 0)),
        ],
        out_specs=[
            pl.BlockSpec((None, tm, C), lambda b, i: (b, i, 0)),
            pl.BlockSpec((None, tm, 2), lambda b, i: (b, i, 0)),
        ],
        compiler_params=pltpu.CompilerParams(
            dimension_semantics=("parallel", "parallel")),
    )(low3, w_sp.astype(jnp.bfloat16), b_sp.reshape(1, N), chm3)
    return outc, pooled


# --------------------------------------------------------------------------
# Kernel 4: spatial mask  sigmoid(conv5x5(2->1))  as a 50-tap VPU weighted sum
# --------------------------------------------------------------------------

def _spatial_mask_kernel(p_ref, w_ref, o_ref, *, H, W):
    acc = jnp.zeros((H, W), jnp.float32)
    for c in range(2):
        for dy in range(5):
            for dx in range(5):
                acc = acc + w_ref[c * 25 + dy * 5 + dx] * \
                    p_ref[c, dy:dy + H, dx:dx + W]
    o_ref[...] = jax.nn.sigmoid(acc + w_ref[50])


def spatial_mask_conv(planes_padded, w_flat, H, W):
    B = planes_padded.shape[0]
    Hp, Wp = H + 4, W + 4
    return pl.pallas_call(
        functools.partial(_spatial_mask_kernel, H=H, W=W),
        out_shape=jax.ShapeDtypeStruct((B, H, W), jnp.float32),
        grid=(B,),
        in_specs=[
            pl.BlockSpec((None, 2, Hp, Wp), lambda b: (b, 0, 0, 0)),
            pl.BlockSpec(memory_space=pltpu.MemorySpace.SMEM),
        ],
        out_specs=pl.BlockSpec((None, H, W), lambda b: (b, 0, 0)),
        compiler_params=pltpu.CompilerParams(dimension_semantics=("parallel",)),
    )(planes_padded, w_flat)


# --------------------------------------------------------------------------
# Kernel 5: NCHW broadcast mask multiply  (B,C,H,W) * (B,1,H,W)
# --------------------------------------------------------------------------

def _mask_mul_kernel(x_ref, m_ref, o_ref):
    o_ref[...] = x_ref[...] * m_ref[...]


def nchw_mask_mul(x_nchw, mask_b1hw):
    B, C, H, W = x_nchw.shape
    tc = C
    for cand in (256, 128, 64, 32, 16, 8):
        if C % cand == 0:
            tc = cand
            break
    return pl.pallas_call(
        _mask_mul_kernel,
        out_shape=jax.ShapeDtypeStruct((B, C, H, W), jnp.float32),
        grid=(B, C // tc),
        in_specs=[
            pl.BlockSpec((None, tc, H, W), lambda b, c: (b, c, 0, 0)),
            pl.BlockSpec((None, 1, H, W), lambda b, c: (b, 0, 0, 0)),
        ],
        out_specs=pl.BlockSpec((None, tc, H, W), lambda b, c: (b, c, 0, 0)),
        compiler_params=pltpu.CompilerParams(
            dimension_semantics=("parallel", "parallel")),
    )(x_nchw, mask_b1hw)


# --------------------------------------------------------------------------
# Glue: im2col, bilinear matrices, parameter construction, full forward
# --------------------------------------------------------------------------

def _im2col(x_nhwc, k, pad):
    """kxk patches; column order (dy, dx, cin) to match (kh,kw,cin,cout) weights."""
    B, H, W, C = x_nhwc.shape
    xp = jnp.pad(x_nhwc, ((0, 0), (pad, pad), (pad, pad), (0, 0)))
    cols = [xp[:, dy:dy + H, dx:dx + W, :] for dy in range(k) for dx in range(k)]
    return jnp.concatenate(cols, axis=-1)


def _bilinear_matrix(n_in, n_out):
    """(n_out, n_in) interpolation matrix, F.interpolate align_corners=True."""
    m = np.zeros((n_out, n_in), np.float32)
    scale = (n_in - 1) / (n_out - 1) if n_out > 1 else 0.0
    for o in range(n_out):
        pos = o * scale
        i0 = min(int(math.floor(pos)), n_in - 1)
        i1 = min(i0 + 1, n_in - 1)
        t = pos - i0
        m[o, i0] += 1.0 - t
        m[o, i1] += t
    return jnp.asarray(m)


def _bn_fold(c):
    # Fresh BatchNorm in eval mode: gamma=1, beta=0, running_mean=0, running_var=1.
    gamma = jnp.ones((c,), jnp.float32)
    beta = jnp.zeros((c,), jnp.float32)
    mean = jnp.zeros((c,), jnp.float32)
    var = jnp.ones((c,), jnp.float32)
    scale = gamma / jnp.sqrt(var + BN_EPS)
    bias = beta - mean * scale
    return scale, bias


def _kaiming(key, shape, fan_in):
    return jax.random.normal(key, shape, jnp.float32) * math.sqrt(2.0 / fan_in)


def init_params(key):
    ks = jax.random.split(key, 6)
    p = {}
    s, b = _bn_fold(256)        # conv_low_level_feat: 3x3, 256->256, BN+ReLU
    p["w_low"] = _kaiming(ks[0], (9 * 256, 256), 9 * 256) * s[None, :]
    p["b_low"] = b
    p["w_res"] = _kaiming(ks[1], (2048, 512), 2048)        # conv_from_resnet 1x1
    p["b_res"] = jnp.zeros((512,), jnp.float32)
    s, b = _bn_fold(256)        # global_avg_pool conv: 1x1, 512->256, BN+ReLU
    p["w_gap"] = _kaiming(ks[2], (512, 256), 512) * s[None, :]
    p["b_gap"] = b
    s, b = _bn_fold(256)        # conv_high_level_feat: 1x1, 256->256, BN+Sigmoid
    p["w_high"] = _kaiming(ks[3], (256, 256), 256) * s[None, :]
    p["b_high"] = b
    s, b = _bn_fold(128)        # conv_spatial_mask: 1x1, 256->128, BN+ReLU
    p["w_sp"] = _kaiming(ks[4], (256, 128), 256) * s[None, :]
    p["b_sp"] = b
    s, b = _bn_fold(1)          # conv_spatial_mask2: 5x5, 2->1, BN+Sigmoid
    p["w_sp2"] = _kaiming(ks[5], (2, 5, 5), 2 * 5 * 5) * s[0]
    p["b_sp2"] = b[0]
    return p


def attention_modules_forward(x_nchw, low_nchw, params):
    x = x_nchw.astype(jnp.float32)                       # (B, 2048, Hx, Wx)
    B, Cx, Hx, Wx = x.shape
    low_nhwc = jnp.transpose(low_nchw, (0, 2, 3, 1)).astype(jnp.float32)
    _, Hl, Wl, Cl = low_nhwc.shape

    # ---- low_level_feat = ReLU(BN(Conv3x3(low))): im2col + tiled bf16 matmul ----
    # TODO(synk): replace host-side im2col (9x HBM blowup) with an in-kernel
    # halo-tiled direct convolution; the K axis is at least tiled by the matmul.
    low_cols = _im2col(low_nhwc, 3, 1).reshape(B * Hl * Wl, 9 * Cl)
    low_feat = matmul_bias_act(low_cols, params["w_low"], params["b_low"],
                               "relu")                                   # (B*Hl*Wl, 256)

    # ---- channel-attention mask; GAP commutes with the linear 1x1 convs, so
    #      pool x first (exact) and run the tiny (B,*) matmul chain ----
    x_hw_c = jnp.transpose(x.reshape(B, Cx, Hx * Wx), (0, 2, 1))          # (B, HW, 2048)
    gap = global_avg_pool(x_hw_c)                                         # (B, 2048)
    h512 = matmul_bias_act(gap, params["w_res"], params["b_res"], "none")
    h256 = matmul_bias_act(h512, params["w_gap"], params["b_gap"], "relu")
    ch_mask = matmul_bias_act(h256, params["w_high"], params["b_high"],
                              "sigmoid")                                  # (B, 256)

    # ---- fused low_feat consumers: out_channel, sp=ReLU(1x1), channel max/avg ----
    outc_flat, pooled = fused_low_consumers(
        low_feat.reshape(B, Hl * Wl, Cl), params["w_sp"], params["b_sp"],
        ch_mask.reshape(B, 1, Cl))
    out_channel = jnp.transpose(outc_flat.reshape(B, Hl, Wl, Cl), (0, 3, 1, 2))

    # ---- spatial mask: 5x5 conv 2->1 + sigmoid as 50 VPU taps ----
    planes = jnp.transpose(pooled.reshape(B, Hl, Wl, 2), (0, 3, 1, 2))    # (B,2,Hl,Wl)
    planes = jnp.pad(planes, ((0, 0), (0, 0), (2, 2), (2, 2)))
    w_flat = jnp.concatenate([params["w_sp2"].reshape(-1),
                              params["b_sp2"].reshape(1)])
    mask_sp = spatial_mask_conv(planes, w_flat, Hl, Wl)                   # (B, Hl, Wl)

    # ---- out_spatial: separable align_corners bilinear upsample of x (NCHW),
    #      two tiled MXU matmuls, then broadcast mask multiply ----
    IhT = _bilinear_matrix(Hx, Hl).T                                      # (Hx, Hl)
    IwT = _bilinear_matrix(Wx, Wl).T                                      # (Wx, Wl)
    xh = jnp.transpose(x, (0, 1, 3, 2)).reshape(B * Cx * Wx, Hx)
    t1 = matmul_bias_act(xh, IhT, None, "none")                           # (B*Cx*Wx, Hl)
    t1 = jnp.transpose(t1.reshape(B * Cx, Wx, Hl), (0, 2, 1)).reshape(B * Cx * Hl, Wx)
    up = matmul_bias_act(t1, IwT, None, "none").reshape(B, Cx, Hl, Wl)    # NCHW
    out_spatial = nchw_mask_mul(up, mask_sp.reshape(B, 1, Hl, Wl))

    return out_spatial, out_channel


# --------------------------------------------------------------------------
# Pure-JAX f32 reference (follows the PyTorch op order)
# --------------------------------------------------------------------------

def reference_forward(x_nchw, low_nchw, params):
    x = x_nchw.astype(jnp.float32)
    low = low_nchw.astype(jnp.float32)
    B, Cx, Hx, Wx = x.shape
    Hl, Wl = low.shape[2], low.shape[3]

    def conv_nchw(inp, w_mat, k, pad, bias):
        cin, cout = inp.shape[1], w_mat.shape[1]
        w = w_mat.reshape(k, k, cin, cout)                 # HWIO
        out = jax.lax.conv_general_dilated(
            inp, w, window_strides=(1, 1), padding=[(pad, pad), (pad, pad)],
            dimension_numbers=("NCHW", "HWIO", "NCHW"))
        return out + bias.reshape(1, cout, 1, 1)

    def conv1x1(inp, w_mat, bias):
        return jnp.einsum("bchw,cd->bdhw", inp, w_mat) + bias.reshape(1, -1, 1, 1)

    low_feat = jax.nn.relu(conv_nchw(low, params["w_low"], 3, 1, params["b_low"]))
    xr = conv1x1(x, params["w_res"], params["b_res"])
    gap = jnp.mean(xr, axis=(2, 3), keepdims=True)
    ch = jax.nn.relu(conv1x1(gap, params["w_gap"], params["b_gap"]))
    ch_mask = jax.nn.sigmoid(conv1x1(ch, params["w_high"], params["b_high"]))
    out_channel = low_feat * ch_mask
    sp = jax.nn.relu(conv1x1(low_feat, params["w_sp"], params["b_sp"]))
    merge = jnp.concatenate([jnp.max(sp, axis=1, keepdims=True),
                             jnp.mean(sp, axis=1, keepdims=True)], axis=1)
    w2 = jnp.transpose(params["w_sp2"], (1, 2, 0))[..., None]             # (5,5,2,1)
    mask_sp = jax.lax.conv_general_dilated(
        merge, w2, (1, 1), [(2, 2), (2, 2)],
        dimension_numbers=("NCHW", "HWIO", "NCHW")) + params["b_sp2"]
    mask_sp = jax.nn.sigmoid(mask_sp)
    Ih = _bilinear_matrix(Hx, Hl)
    Iw = _bilinear_matrix(Wx, Wl)
    up = jnp.einsum("oh,pw,bchw->bcop", Ih, Iw, x)
    out_spatial = up * mask_sp
    return out_spatial, out_channel


# --------------------------------------------------------------------------

if __name__ == "__main__":
    root = jax.random.PRNGKey(0)
    k_x, k_low, k_par = jax.random.split(root, 3)

    B, Hx, Wx, Hl, Wl = 2, 4, 4, 8, 8
    # PyTorch-convention NCHW inputs (channel counts fixed by the module).
    x = jax.random.normal(k_x, (B, 2048, Hx, Wx), jnp.float32)
    low_level_feat = jax.random.normal(k_low, (B, 256, Hl, Wl), jnp.float32)
    params = init_params(k_par)

    fwd = jax.jit(attention_modules_forward)
    out_spatial, out_channel = fwd(x, low_level_feat, params)
    jax.block_until_ready((out_spatial, out_channel))

    assert out_spatial.shape == (B, 2048, Hl, Wl), out_spatial.shape
    assert out_channel.shape == (B, 256, Hl, Wl), out_channel.shape
    assert bool(jnp.isfinite(out_spatial).all())
    assert bool(jnp.isfinite(out_channel).all())

    ref_spatial, ref_channel = reference_forward(x, low_level_feat, params)
    max_sp = float(jnp.max(jnp.abs(out_spatial - ref_spatial)))
    max_ch = float(jnp.max(jnp.abs(out_channel - ref_channel)))
    mean_sp = float(jnp.mean(jnp.abs(out_spatial - ref_spatial)))
    mean_ch = float(jnp.mean(jnp.abs(out_channel - ref_channel)))
    # bf16 MXU operands (f32 accumulation) => small deviation from the f32 reference.
    assert max_sp < 0.5 and mean_sp < 0.05, (max_sp, mean_sp)
    assert max_ch < 0.15 and mean_ch < 0.02, (max_ch, mean_ch)

    print("KERNEL_OK")
</pallas_src>

<mosaic_0001>
module attributes {stable_mosaic.version = 11 : i64} {
  func.func @_gap_kernel(%arg0: i32, %arg1: memref<1x16x2048xf32, #tpu.memory_space<vmem>>, %arg2: memref<1x1x2048xf32, #tpu.memory_space<vmem>>) attributes {dimension_semantics = [#tpu.dimension_semantics<parallel>], iteration_bounds = array<i64: 2>, scalar_prefetch = 0 : i64, scratch_operands = 0 : i64, tpu.core_type = #tpu.core_type<tc>, window_params = [{transform_indices = @transform_0, window_bounds = array<i64: 1, 16, 2048>}, {transform_indices = @transform_1, window_bounds = array<i64: 1, 1, 2048>}]} {
    %c0 = arith.constant 0 : index
    %c0_0 = arith.constant 0 : index
    %c0_1 = arith.constant 0 : index
    %0 = vector.load %arg1[%c0, %c0_0, %c0_1] : memref<1x16x2048xf32, #tpu.memory_space<vmem>>, vector<1x16x2048xf32>
    %1 = vector.shape_cast %0 : vector<1x16x2048xf32> to vector<16x2048xf32>
    %cst = arith.constant dense<0.000000e+00> : vector<2048xf32>
    %2 = vector.multi_reduction <add>, %1, %cst [0] : vector<16x2048xf32> to vector<2048xf32>
    %3 = vector.shape_cast %2 : vector<2048xf32> to vector<1x2048xf32>
    %cst_2 = arith.constant 1.600000e+01 : f32
    %4 = vector.broadcast %cst_2 : f32 to vector<1x2048xf32>
    %5 = arith.divf %3, %4 : vector<1x2048xf32>
    %c0_3 = arith.constant 0 : index
    %c0_4 = arith.constant 0 : index
    %c0_5 = arith.constant 0 : index
    %6 = vector.load %arg2[%c0_3, %c0_4, %c0_5] : memref<1x1x2048xf32, #tpu.memory_space<vmem>>, vector<1x1x2048xf32>
    %7 = vector.shape_cast %6 : vector<1x1x2048xf32> to vector<1x2048xf32>
    %8 = vector.shape_cast %5 : vector<1x2048xf32> to vector<1x1x2048xf32>
    tpu.vector_store %arg2[%c0_3, %c0_4, %c0_5], %8 {strides = array<i32>} : memref<1x1x2048xf32, #tpu.memory_space<vmem>>, vector<1x1x2048xf32>,
    return
  }
  func.func @transform_0(%arg0: i32) -> (i32, i32, i32) {
    %c0_i32 = arith.constant 0 : i32
    %c0_i32_0 = arith.constant 0 : i32
    %c0_i32_1 = arith.constant 0 : i32
    return %arg0, %c0_i32, %c0_i32_0 : i32, i32, i32
  }
  func.func @transform_1(%arg0: i32) -> (i32, i32, i32) {
    %c0_i32 = arith.constant 0 : i32
    %c0_i32_0 = arith.constant 0 : i32
    %c0_i32_1 = arith.constant 0 : i32
    return %arg0, %c0_i32, %c0_i32_0 : i32, i32, i32
  }
}

module attributes {stable_mosaic.version = 11 : i64} {
  func.func @_mm_bias_act_kernel(%arg0: i32, %arg1: i32, %arg2: i32, %arg3: memref<128x512xbf16, #tpu.memory_space<vmem>>, %arg4: memref<512x256xbf16, #tpu.memory_space<vmem>>, %arg5: memref<1x256xf32, #tpu.memory_space<vmem>>, %arg6: memref<128x256xf32, #tpu.memory_space<vmem>>, %arg7: memref<128x256xf32, #tpu.memory_space<vmem>>) attributes {dimension_semantics = [#tpu.dimension_semantics<parallel>, #tpu.dimension_semantics<parallel>, #tpu.dimension_semantics<arbitrary>], iteration_bounds = array<i64: 1, 1, 5>, scalar_prefetch = 0 : i64, scratch_operands = 1 : i64, tpu.core_type = #tpu.core_type<tc>, window_params = [{transform_indices = @transform_0, window_bounds = array<i64: 128, 512>}, {transform_indices = @transform_1, window_bounds = array<i64: 512, 256>}, {transform_indices = @transform_2, window_bounds = array<i64: 1, 256>}, {transform_indices = @transform_3, window_bounds = array<i64: 128, 256>}]} {
    %c0_i32 = arith.constant 0 : i32
    %0 = arith.cmpi eq, %arg2, %c0_i32 : i32
    %1 = arith.extui %0 : i1 to i32
    %c0_i32_0 = arith.constant 0 : i32
    %2 = arith.cmpi ne, %1, %c0_i32_0 : i32
    scf.if %2 {
      %cst_9 = arith.constant 0.000000e+00 : f32
      %12 = vector.broadcast %cst_9 : f32 to vector<128x256xf32>
      %c0_10 = arith.constant 0 : index
      %c0_11 = arith.constant 0 : index
      %13 = vector.load %arg7[%c0_10, %c0_11] : memref<128x256xf32, #tpu.memory_space<vmem>>, vector<128x256xf32>
      tpu.vector_store %arg7[%c0_10, %c0_11], %12 {strides = array<i32>} : memref<128x256xf32, #tpu.memory_space<vmem>>, vector<128x256xf32>,
    } else {
    }
    %c0 = arith.constant 0 : index
    %c0_1 = arith.constant 0 : index
    %3 = vector.load %arg7[%c0, %c0_1] : memref<128x256xf32, #tpu.memory_space<vmem>>, vector<128x256xf32>
    %c0_2 = arith.constant 0 : index
    %c0_3 = arith.constant 0 : index
    %4 = vector.load %arg3[%c0_2, %c0_3] : memref<128x512xbf16, #tpu.memory_space<vmem>>, vector<128x512xbf16>
    %c0_4 = arith.constant 0 : index
    %c0_5 = arith.constant 0 : index
    %5 = vector.load %arg4[%c0_4, %c0_5] : memref<512x256xbf16, #tpu.memory_space<vmem>>, vector<512x256xbf16>
    %cst = arith.constant dense<0.000000e+00> : vector<128x256xf32>
    %6 = tpu.matmul %4, %5, %cst {dimension_numbers = #tpu.dot_dimension_numbers<[1], [0], [0], [1], [0, 0, 1, 1], [], []>} : vector<128x512xbf16>, vector<512x256xbf16>, vector<128x256xf32> -> vector<128x256xf32>
    %7 = arith.addf %3, %6 : vector<128x256xf32>
    %c0_6 = arith.constant 0 : index
    %c0_7 = arith.constant 0 : index
    %8 = vector.load %arg7[%c0_6, %c0_7] : memref<128x256xf32, #tpu.memory_space<vmem>>, vector<128x256xf32>
    tpu.vector_store %arg7[%c0_6, %c0_7], %7 {strides = array<i32>} : memref<128x256xf32, #tpu.memory_space<vmem>>, vector<128x256xf32>,
    %c4_i32 = arith.constant 4 : i32
    %9 = arith.cmpi eq, %arg2, %c4_i32 : i32
    %10 = arith.extui %9 : i1 to i32
    %c0_i32_8 = arith.constant 0 : i32
    %11 = arith.cmpi ne, %10, %c0_i32_8 : i32
    scf.if %11 {
      %c0_9 = arith.constant 0 : index
      %c0_10 = arith.constant 0 : index
      %12 = vector.load %arg7[%c0_9, %c0_10] : memref<128x256xf32, #tpu.memory_space<vmem>>, vector<128x256xf32>
      %c0_11 = arith.constant 0 : index
      %c0_12 = arith.constant 0 : index
      %13 = vector.load %arg5[%c0_11, %c0_12] : memref<1x256xf32, #tpu.memory_space<vmem>>, vector<1x256xf32>
      %14 = vector.broadcast %13 : vector<1x256xf32> to vector<128x256xf32>
      %15 = arith.addf %12, %14 : vector<128x256xf32>
      %cst_13 = arith.constant 0.000000e+00 : f32
      %16 = vector.broadcast %cst_13 : f32 to vector<128x256xf32>
      %17 = arith.maximumf %15, %16 : vector<128x256xf32>
      %c0_14 = arith.constant 0 : index
      %c0_15 = arith.constant 0 : index
      %18 = vector.load %arg6[%c0_14, %c0_15] : memref<128x256xf32, #tpu.memory_space<vmem>>, vector<128x256xf32>
      tpu.vector_store %arg6[%c0_14, %c0_15], %17 {strides = array<i32>} : memref<128x256xf32, #tpu.memory_space<vmem>>, vector<128x256xf32>,
    } else {
    }
    return
  }
  func.func @transform_0(%arg0: i32, %arg1: i32, %arg2: i32) -> (i32, i32) {
    %c0_i32 = arith.constant 0 : i32
    return %arg0, %arg2 : i32, i32
  }
  func.func @transform_1(%arg0: i32, %arg1: i32, %arg2: i32) -> (i32, i32) {
    %c0_i32 = arith.constant 0 : i32
    return %arg2, %arg1 : i32, i32
  }
  func.func @transform_2(%arg0: i32, %arg1: i32, %arg2: i32) -> (i32, i32) {
    %c0_i32 = arith.constant 0 : i32
    %c0_i32_0 = arith.constant 0 : i32
    return %c0_i32, %arg1 : i32, i32
  }
  func.func @transform_3(%arg0: i32, %arg1: i32, %arg2: i32) -> (i32, i32) {
    %c0_i32 = arith.constant 0 : i32
    return %arg0, %arg1 : i32, i32
  }
}

module attributes {stable_mosaic.version = 11 : i64} {
  func.func @_mm_bias_act_kernel(%arg0: i32, %arg1: i32, %arg2: i32, %arg3: memref<8x512xbf16, #tpu.memory_space<vmem>>, %arg4: memref<512x256xbf16, #tpu.memory_space<vmem>>, %arg5: memref<1x256xf32, #tpu.memory_space<vmem>>, %arg6: memref<8x256xf32, #tpu.memory_space<vmem>>, %arg7: memref<8x256xf32, #tpu.memory_space<vmem>>) attributes {dimension_semantics = [#tpu.dimension_semantics<parallel>, #tpu.dimension_semantics<parallel>, #tpu.dimension_semantics<arbitrary>], iteration_bounds = array<i64: 1, 2, 4>, scalar_prefetch = 0 : i64, scratch_operands = 1 : i64, tpu.core_type = #tpu.core_type<tc>, window_params = [{transform_indices = @transform_0, window_bounds = array<i64: 8, 512>}, {transform_indices = @transform_1, window_bounds = array<i64: 512, 256>}, {transform_indices = @transform_2, window_bounds = array<i64: 1, 256>}, {transform_indices = @transform_3, window_bounds = array<i64: 8, 256>}]} {
    %c0_i32 = arith.constant 0 : i32
    %0 = arith.cmpi eq, %arg2, %c0_i32 : i32
    %1 = arith.extui %0 : i1 to i32
    %c0_i32_0 = arith.constant 0 : i32
    %2 = arith.cmpi ne, %1, %c0_i32_0 : i32
    scf.if %2 {
      %cst_9 = arith.constant 0.000000e+00 : f32
      %12 = vector.broadcast %cst_9 : f32 to vector<8x256xf32>
      %c0_10 = arith.constant 0 : index
      %c0_11 = arith.constant 0 : index
      %13 = vector.load %arg7[%c0_10, %c0_11] : memref<8x256xf32, #tpu.memory_space<vmem>>, vector<8x256xf32>
      tpu.vector_store %arg7[%c0_10, %c0_11], %12 {strides = array<i32>} : memref<8x256xf32, #tpu.memory_space<vmem>>, vector<8x256xf32>,
    } else {
    }
    %c0 = arith.constant 0 : index
    %c0_1 = arith.constant 0 : index
    %3 = vector.load %arg7[%c0, %c0_1] : memref<8x256xf32, #tpu.memory_space<vmem>>, vector<8x256xf32>
    %c0_2 = arith.constant 0 : index
    %c0_3 = arith.constant 0 : index
    %4 = vector.load %arg3[%c0_2, %c0_3] : memref<8x512xbf16, #tpu.memory_space<vmem>>, vector<8x512xbf16>
    %c0_4 = arith.constant 0 : index
    %c0_5 = arith.constant 0 : index
    %5 = vector.load %arg4[%c0_4, %c0_5] : memref<512x256xbf16, #tpu.memory_space<vmem>>, vector<512x256xbf16>
    %cst = arith.constant dense<0.000000e+00> : vector<8x256xf32>
    %6 = tpu.matmul %4, %5, %cst {dimension_numbers = #tpu.dot_dimension_numbers<[1], [0], [0], [1], [0, 0, 1, 1], [], []>} : vector<8x512xbf16>, vector<512x256xbf16>, vector<8x256xf32> -> vector<8x256xf32>
    %7 = arith.addf %3, %6 : vector<8x256xf32>
    %c0_6 = arith.constant 0 : index
    %c0_7 = arith.constant 0 : index
    %8 = vector.load %arg7[%c0_6, %c0_7] : memref<8x256xf32, #tpu.memory_space<vmem>>, vector<8x256xf32>
    tpu.vector_store %arg7[%c0_6, %c0_7], %7 {strides = array<i32>} : memref<8x256xf32, #tpu.memory_space<vmem>>, vector<8x256xf32>,
    %c3_i32 = arith.constant 3 : i32
    %9 = arith.cmpi eq, %arg2, %c3_i32 : i32
    %10 = arith.extui %9 : i1 to i32
    %c0_i32_8 = arith.constant 0 : i32
    %11 = arith.cmpi ne, %10, %c0_i32_8 : i32
    scf.if %11 {
      %c0_9 = arith.constant 0 : index
      %c0_10 = arith.constant 0 : index
      %12 = vector.load %arg7[%c0_9, %c0_10] : memref<8x256xf32, #tpu.memory_space<vmem>>, vector<8x256xf32>
      %c0_11 = arith.constant 0 : index
      %c0_12 = arith.constant 0 : index
      %13 = vector.load %arg5[%c0_11, %c0_12] : memref<1x256xf32, #tpu.memory_space<vmem>>, vector<1x256xf32>
      %14 = vector.broadcast %13 : vector<1x256xf32> to vector<8x256xf32>
      %15 = arith.addf %12, %14 : vector<8x256xf32>
      %c0_13 = arith.constant 0 : index
      %c0_14 = arith.constant 0 : index
      %16 = vector.load %arg6[%c0_13, %c0_14] : memref<8x256xf32, #tpu.memory_space<vmem>>, vector<8x256xf32>
      tpu.vector_store %arg6[%c0_13, %c0_14], %15 {strides = array<i32>} : memref<8x256xf32, #tpu.memory_space<vmem>>, vector<8x256xf32>,
    } else {
    }
    return
  }
  func.func @transform_0(%arg0: i32, %arg1: i32, %arg2: i32) -> (i32, i32) {
    %c0_i32 = arith.constant 0 : i32
    return %arg0, %arg2 : i32, i32
  }
  func.func @transform_1(%arg0: i32, %arg1: i32, %arg2: i32) -> (i32, i32) {
    %c0_i32 = arith.constant 0 : i32
    return %arg2, %arg1 : i32, i32
  }
  func.func @transform_2(%arg0: i32, %arg1: i32, %arg2: i32) -> (i32, i32) {
    %c0_i32 = arith.constant 0 : i32
    %c0_i32_0 = arith.constant 0 : i32
    return %c0_i32, %arg1 : i32, i32
  }
  func.func @transform_3(%arg0: i32, %arg1: i32, %arg2: i32) -> (i32, i32) {
    %c0_i32 = arith.constant 0 : i32
    return %arg0, %arg1 : i32, i32
  }
}

module attributes {stable_mosaic.version = 11 : i64} {
  func.func @_mm_bias_act_kernel(%arg0: i32, %arg1: i32, %arg2: i32, %arg3: memref<8x512xbf16, #tpu.memory_space<vmem>>, %arg4: memref<512x256xbf16, #tpu.memory_space<vmem>>, %arg5: memref<1x256xf32, #tpu.memory_space<vmem>>, %arg6: memref<8x256xf32, #tpu.memory_space<vmem>>, %arg7: memref<8x256xf32, #tpu.memory_space<vmem>>) attributes {dimension_semantics = [#tpu.dimension_semantics<parallel>, #tpu.dimension_semantics<parallel>, #tpu.dimension_semantics<arbitrary>], iteration_bounds = array<i64: 1, 1, 1>, scalar_prefetch = 0 : i64, scratch_operands = 1 : i64, tpu.core_type = #tpu.core_type<tc>, window_params = [{transform_indices = @transform_0, window_bounds = array<i64: 8, 512>}, {transform_indices = @transform_1, window_bounds = array<i64: 512, 256>}, {transform_indices = @transform_2, window_bounds = array<i64: 1, 256>}, {transform_indices = @transform_3, window_bounds = array<i64: 8, 256>}]} {
    %c0_i32 = arith.constant 0 : i32
    %0 = arith.cmpi eq, %arg2, %c0_i32 : i32
    %1 = arith.extui %0 : i1 to i32
    %c0_i32_0 = arith.constant 0 : i32
    %2 = arith.cmpi ne, %1, %c0_i32_0 : i32
    scf.if %2 {
      %cst_10 = arith.constant 0.000000e+00 : f32
      %12 = vector.broadcast %cst_10 : f32 to vector<8x256xf32>
      %c0_11 = arith.constant 0 : index
      %c0_12 = arith.constant 0 : index
      %13 = vector.load %arg7[%c0_11, %c0_12] : memref<8x256xf32, #tpu.memory_space<vmem>>, vector<8x256xf32>
      tpu.vector_store %arg7[%c0_11, %c0_12], %12 {strides = array<i32>} : memref<8x256xf32, #tpu.memory_space<vmem>>, vector<8x256xf32>,
    } else {
    }
    %c0 = arith.constant 0 : index
    %c0_1 = arith.constant 0 : index
    %3 = vector.load %arg7[%c0, %c0_1] : memref<8x256xf32, #tpu.memory_space<vmem>>, vector<8x256xf32>
    %c0_2 = arith.constant 0 : index
    %c0_3 = arith.constant 0 : index
    %4 = vector.load %arg3[%c0_2, %c0_3] : memref<8x512xbf16, #tpu.memory_space<vmem>>, vector<8x512xbf16>
    %c0_4 = arith.constant 0 : index
    %c0_5 = arith.constant 0 : index
    %5 = vector.load %arg4[%c0_4, %c0_5] : memref<512x256xbf16, #tpu.memory_space<vmem>>, vector<512x256xbf16>
    %cst = arith.constant dense<0.000000e+00> : vector<8x256xf32>
    %6 = tpu.matmul %4, %5, %cst {dimension_numbers = #tpu.dot_dimension_numbers<[1], [0], [0], [1], [0, 0, 1, 1], [], []>} : vector<8x512xbf16>, vector<512x256xbf16>, vector<8x256xf32> -> vector<8x256xf32>
    %7 = arith.addf %3, %6 : vector<8x256xf32>
    %c0_6 = arith.constant 0 : index
    %c0_7 = arith.constant 0 : index
    %8 = vector.load %arg7[%c0_6, %c0_7] : memref<8x256xf32, #tpu.memory_space<vmem>>, vector<8x256xf32>
    tpu.vector_store %arg7[%c0_6, %c0_7], %7 {strides = array<i32>} : memref<8x256xf32, #tpu.memory_space<vmem>>, vector<8x256xf32>,
    %c0_i32_8 = arith.constant 0 : i32
    %9 = arith.cmpi eq, %arg2, %c0_i32_8 : i32
    %10 = arith.extui %9 : i1 to i32
    %c0_i32_9 = arith.constant 0 : i32
    %11 = arith.cmpi ne, %10, %c0_i32_9 : i32
    scf.if %11 {
      %c0_10 = arith.constant 0 : index
      %c0_11 = arith.constant 0 : index
      %12 = vector.load %arg7[%c0_10, %c0_11] : memref<8x256xf32, #tpu.memory_space<vmem>>, vector<8x256xf32>
      %c0_12 = arith.constant 0 : index
      %c0_13 = arith.constant 0 : index
      %13 = vector.load %arg5[%c0_12, %c0_13] : memref<1x256xf32, #tpu.memory_space<vmem>>, vector<1x256xf32>
      %14 = vector.broadcast %13 : vector<1x256xf32> to vector<8x256xf32>
      %15 = arith.addf %12, %14 : vector<8x256xf32>
      %cst_14 = arith.constant 0.000000e+00 : f32
      %16 = vector.broadcast %cst_14 : f32 to vector<8x256xf32>
      %17 = arith.maximumf %15, %16 : vector<8x256xf32>
      %c0_15 = arith.constant 0 : index
      %c0_16 = arith.constant 0 : index
      %18 = vector.load %arg6[%c0_15, %c0_16] : memref<8x256xf32, #tpu.memory_space<vmem>>, vector<8x256xf32>
      tpu.vector_store %arg6[%c0_15, %c0_16], %17 {strides = array<i32>} : memref<8x256xf32, #tpu.memory_space<vmem>>, vector<8x256xf32>,
    } else {
    }
    return
  }
  func.func @transform_0(%arg0: i32, %arg1: i32, %arg2: i32) -> (i32, i32) {
    %c0_i32 = arith.constant 0 : i32
    return %arg0, %arg2 : i32, i32
  }
  func.func @transform_1(%arg0: i32, %arg1: i32, %arg2: i32) -> (i32, i32) {
    %c0_i32 = arith.constant 0 : i32
    return %arg2, %arg1 : i32, i32
  }
  func.func @transform_2(%arg0: i32, %arg1: i32, %arg2: i32) -> (i32, i32) {
    %c0_i32 = arith.constant 0 : i32
    %c0_i32_0 = arith.constant 0 : i32
    return %c0_i32, %arg1 : i32, i32
  }
  func.func @transform_3(%arg0: i32, %arg1: i32, %arg2: i32) -> (i32, i32) {
    %c0_i32 = arith.constant 0 : i32
    return %arg0, %arg1 : i32, i32
  }
}

module attributes {stable_mosaic.version = 11 : i64} {
  func.func @_mm_bias_act_kernel(%arg0: i32, %arg1: i32, %arg2: i32, %arg3: memref<8x256xbf16, #tpu.memory_space<vmem>>, %arg4: memref<256x256xbf16, #tpu.memory_space<vmem>>, %arg5: memref<1x256xf32, #tpu.memory_space<vmem>>, %arg6: memref<8x256xf32, #tpu.memory_space<vmem>>, %arg7: memref<8x256xf32, #tpu.memory_space<vmem>>) attributes {dimension_semantics = [#tpu.dimension_semantics<parallel>, #tpu.dimension_semantics<parallel>, #tpu.dimension_semantics<arbitrary>], iteration_bounds = array<i64: 1, 1, 1>, scalar_prefetch = 0 : i64, scratch_operands = 1 : i64, tpu.core_type = #tpu.core_type<tc>, window_params = [{transform_indices = @transform_0, window_bounds = array<i64: 8, 256>}, {transform_indices = @transform_1, window_bounds = array<i64: 256, 256>}, {transform_indices = @transform_2, window_bounds = array<i64: 1, 256>}, {transform_indices = @transform_3, window_bounds = array<i64: 8, 256>}]} {
    %c0_i32 = arith.constant 0 : i32
    %0 = arith.cmpi eq, %arg2, %c0_i32 : i32
    %1 = arith.extui %0 : i1 to i32
    %c0_i32_0 = arith.constant 0 : i32
    %2 = arith.cmpi ne, %1, %c0_i32_0 : i32
    scf.if %2 {
      %cst_10 = arith.constant 0.000000e+00 : f32
      %12 = vector.broadcast %cst_10 : f32 to vector<8x256xf32>
      %c0_11 = arith.constant 0 : index
      %c0_12 = arith.constant 0 : index
      %13 = vector.load %arg7[%c0_11, %c0_12] : memref<8x256xf32, #tpu.memory_space<vmem>>, vector<8x256xf32>
      tpu.vector_store %arg7[%c0_11, %c0_12], %12 {strides = array<i32>} : memref<8x256xf32, #tpu.memory_space<vmem>>, vector<8x256xf32>,
    } else {
    }
    %c0 = arith.constant 0 : index
    %c0_1 = arith.constant 0 : index
    %3 = vector.load %arg7[%c0, %c0_1] : memref<8x256xf32, #tpu.memory_space<vmem>>, vector<8x256xf32>
    %c0_2 = arith.constant 0 : index
    %c0_3 = arith.constant 0 : index
    %4 = vector.load %arg3[%c0_2, %c0_3] : memref<8x256xbf16, #tpu.memory_space<vmem>>, vector<8x256xbf16>
    %c0_4 = arith.constant 0 : index
    %c0_5 = arith.constant 0 : index
    %5 = vector.load %arg4[%c0_4, %c0_5] : memref<256x256xbf16, #tpu.memory_space<vmem>>, vector<256x256xbf16>
    %cst = arith.constant dense<0.000000e+00> : vector<8x256xf32>
    %6 = tpu.matmul %4, %5, %cst {dimension_numbers = #tpu.dot_dimension_numbers<[1], [0], [0], [1], [0, 0, 1, 1], [], []>} : vector<8x256xbf16>, vector<256x256xbf16>, vector<8x256xf32> -> vector<8x256xf32>
    %7 = arith.addf %3, %6 : vector<8x256xf32>
    %c0_6 = arith.constant 0 : index
    %c0_7 = arith.constant 0 : index
    %8 = vector.load %arg7[%c0_6, %c0_7] : memref<8x256xf32, #tpu.memory_space<vmem>>, vector<8x256xf32>
    tpu.vector_store %arg7[%c0_6, %c0_7], %7 {strides = array<i32>} : memref<8x256xf32, #tpu.memory_space<vmem>>, vector<8x256xf32>,
    %c0_i32_8 = arith.constant 0 : i32
    %9 = arith.cmpi eq, %arg2, %c0_i32_8 : i32
    %10 = arith.extui %9 : i1 to i32
    %c0_i32_9 = arith.constant 0 : i32
    %11 = arith.cmpi ne, %10, %c0_i32_9 : i32
    scf.if %11 {
      %c0_10 = arith.constant 0 : index
      %c0_11 = arith.constant 0 : index
      %12 = vector.load %arg7[%c0_10, %c0_11] : memref<8x256xf32, #tpu.memory_space<vmem>>, vector<8x256xf32>
      %c0_12 = arith.constant 0 : index
      %c0_13 = arith.constant 0 : index
      %13 = vector.load %arg5[%c0_12, %c0_13] : memref<1x256xf32, #tpu.memory_space<vmem>>, vector<1x256xf32>
      %14 = vector.broadcast %13 : vector<1x256xf32> to vector<8x256xf32>
      %15 = arith.addf %12, %14 : vector<8x256xf32>
      %16 = arith.negf %15 : vector<8x256xf32>
      %17 = math.exp %16 : vector<8x256xf32>
      %cst_14 = arith.constant 1.000000e+00 : f32
      %18 = vector.broadcast %cst_14 : f32 to vector<8x256xf32>
      %19 = arith.addf %18, %17 : vector<8x256xf32>
      %20 = arith.divf %18, %19 : vector<8x256xf32>
      %c0_15 = arith.constant 0 : index
      %c0_16 = arith.constant 0 : index
      %21 = vector.load %arg6[%c0_15, %c0_16] : memref<8x256xf32, #tpu.memory_space<vmem>>, vector<8x256xf32>
      tpu.vector_store %arg6[%c0_15, %c0_16], %20 {strides = array<i32>} : memref<8x256xf32, #tpu.memory_space<vmem>>, vector<8x256xf32>,
    } else {
    }
    return
  }
  func.func @transform_0(%arg0: i32, %arg1: i32, %arg2: i32) -> (i32, i32) {
    %c0_i32 = arith.constant 0 : i32
    return %arg0, %arg2 : i32, i32
  }
  func.func @transform_1(%arg0: i32, %arg1: i32, %arg2: i32) -> (i32, i32) {
    %c0_i32 = arith.constant 0 : i32
    return %arg2, %arg1 : i32, i32
  }
  func.func @transform_2(%arg0: i32, %arg1: i32, %arg2: i32) -> (i32, i32) {
    %c0_i32 = arith.constant 0 : i32
    %c0_i32_0 = arith.constant 0 : i32
    return %c0_i32, %arg1 : i32, i32
  }
  func.func @transform_3(%arg0: i32, %arg1: i32, %arg2: i32) -> (i32, i32) {
    %c0_i32 = arith.constant 0 : i32
    return %arg0, %arg1 : i32, i32
  }
}

module attributes {stable_mosaic.version = 11 : i64} {
  func.func @_fused_low_kernel(%arg0: i32, %arg1: i32, %arg2: memref<1x64x256xf32, #tpu.memory_space<vmem>>, %arg3: memref<256x128xbf16, #tpu.memory_space<vmem>>, %arg4: memref<1x128xf32, #tpu.memory_space<vmem>>, %arg5: memref<1x1x256xf32, #tpu.memory_space<vmem>>, %arg6: memref<1x64x256xf32, #tpu.memory_space<vmem>>, %arg7: memref<1x64x2xf32, #tpu.memory_space<vmem>>) attributes {dimension_semantics = [#tpu.dimension_semantics<parallel>, #tpu.dimension_semantics<parallel>], iteration_bounds = array<i64: 2, 1>, scalar_prefetch = 0 : i64, scratch_operands = 0 : i64, tpu.core_type = #tpu.core_type<tc>, window_params = [{transform_indices = @transform_0, window_bounds = array<i64: 1, 64, 256>}, {pipeline_mode = #tpu.pipeline_mode<synchronous>, transform_indices = @transform_1, window_bounds = array<i64: 256, 128>}, {pipeline_mode = #tpu.pipeline_mode<synchronous>, transform_indices = @transform_2, window_bounds = array<i64: 1, 128>}, {transform_indices = @transform_3, window_bounds = array<i64: 1, 1, 256>}, {transform_indices = @transform_4, window_bounds = array<i64: 1, 64, 256>}, {transform_indices = @transform_5, window_bounds = array<i64: 1, 64, 2>}]} {
    %c0 = arith.constant 0 : index
    %c0_0 = arith.constant 0 : index
    %c0_1 = arith.constant 0 : index
    %0 = vector.load %arg2[%c0, %c0_0, %c0_1] : memref<1x64x256xf32, #tpu.memory_space<vmem>>, vector<1x64x256xf32>
    %1 = vector.shape_cast %0 : vector<1x64x256xf32> to vector<64x256xf32>
    %c0_2 = arith.constant 0 : index
    %c0_3 = arith.constant 0 : index
    %c0_4 = arith.constant 0 : index
    %2 = vector.load %arg5[%c0_2, %c0_3, %c0_4] : memref<1x1x256xf32, #tpu.memory_space<vmem>>, vector<1x1x256xf32>
    %3 = vector.shape_cast %2 : vector<1x1x256xf32> to vector<1x256xf32>
    %4 = vector.broadcast %3 : vector<1x256xf32> to vector<64x256xf32>
    %5 = arith.mulf %1, %4 : vector<64x256xf32>
    %c0_5 = arith.constant 0 : index
    %c0_6 = arith.constant 0 : index
    %c0_7 = arith.constant 0 : index
    %6 = vector.load %arg6[%c0_5, %c0_6, %c0_7] : memref<1x64x256xf32, #tpu.memory_space<vmem>>, vector<1x64x256xf32>
    %7 = vector.shape_cast %6 : vector<1x64x256xf32> to vector<64x256xf32>
    %8 = vector.shape_cast %5 : vector<64x256xf32> to vector<1x64x256xf32>
    tpu.vector_store %arg6[%c0_5, %c0_6, %c0_7], %8 {strides = array<i32>} : memref<1x64x256xf32, #tpu.memory_space<vmem>>, vector<1x64x256xf32>,
    %9 = arith.truncf %1 : vector<64x256xf32> to vector<64x256xbf16>
    %c0_8 = arith.constant 0 : index
    %c0_9 = arith.constant 0 : index
    %10 = vector.load %arg3[%c0_8, %c0_9] : memref<256x128xbf16, #tpu.memory_space<vmem>>, vector<256x128xbf16>
    %cst = arith.constant dense<0.000000e+00> : vector<64x128xf32>
    %11 = tpu.matmul %9, %10, %cst {dimension_numbers = #tpu.dot_dimension_numbers<[1], [0], [0], [1], [0, 0, 1, 1], [], []>} : vector<64x256xbf16>, vector<256x128xbf16>, vector<64x128xf32> -> vector<64x128xf32>
    %c0_10 = arith.constant 0 : index
    %c0_11 = arith.constant 0 : index
    %12 = vector.load %arg4[%c0_10, %c0_11] : memref<1x128xf32, #tpu.memory_space<vmem>>, vector<1x128xf32>
    %13 = vector.broadcast %12 : vector<1x128xf32> to vector<64x128xf32>
    %14 = arith.addf %11, %13 : vector<64x128xf32>
    %cst_12 = arith.constant 0.000000e+00 : f32
    %15 = vector.broadcast %cst_12 : f32 to vector<64x128xf32>
    %16 = arith.maximumf %14, %15 : vector<64x128xf32>
    %cst_13 = arith.constant dense<0xFF800000> : vector<64xf32>
    %17 = vector.multi_reduction <maximumf>, %16, %cst_13 [1] : vector<64x128xf32> to vector<64xf32>
    %18 = vector.shape_cast %17 : vector<64xf32> to vector<64x1xf32>
    %cst_14 = arith.constant dense<0.000000e+00> : vector<64xf32>
    %19 = vector.multi_reduction <add>, %16, %cst_14 [1] : vector<64x128xf32> to vector<64xf32>
    %20 = vector.shape_cast %19 : vector<64xf32> to vector<64x1xf32>
    %cst_15 = arith.constant 1.280000e+02 : f32
    %21 = vector.broadcast %cst_15 : f32 to vector<64x1xf32>
    %22 = arith.divf %20, %21 : vector<64x1xf32>
    %23 = tpu.concatenate %18, %22 in 1 : vector<64x1xf32>, vector<64x1xf32> -> vector<64x2xf32>
    %c0_16 = arith.constant 0 : index
    %c0_17 = arith.constant 0 : index
    %c0_18 = arith.constant 0 : index
    %24 = vector.load %arg7[%c0_16, %c0_17, %c0_18] : memref<1x64x2xf32, #tpu.memory_space<vmem>>, vector<1x64x2xf32>
    %25 = vector.shape_cast %24 : vector<1x64x2xf32> to vector<64x2xf32>
    %26 = vector.shape_cast %23 : vector<64x2xf32> to vector<1x64x2xf32>
    tpu.vector_store %arg7[%c0_16, %c0_17, %c0_18], %26 {strides = array<i32>} : memref<1x64x2xf32, #tpu.memory_space<vmem>>, vector<1x64x2xf32>,
    return
  }
  func.func @transform_0(%arg0: i32, %arg1: i32) -> (i32, i32, i32) {
    %c0_i32 = arith.constant 0 : i32
    %c0_i32_0 = arith.constant 0 : i32
    return %arg0, %arg1, %c0_i32 : i32, i32, i32
  }
  func.func @transform_1(%arg0: i32, %arg1: i32) -> (i32, i32) {
    %c0_i32 = arith.constant 0 : i32
    %c0_i32_0 = arith.constant 0 : i32
    %c0_i32_1 = arith.constant 0 : i32
    return %c0_i32, %c0_i32_0 : i32, i32
  }
  func.func @transform_2(%arg0: i32, %arg1: i32) -> (i32, i32) {
    %c0_i32 = arith.constant 0 : i32
    %c0_i32_0 = arith.constant 0 : i32
    %c0_i32_1 = arith.constant 0 : i32
    return %c0_i32, %c0_i32_0 : i32, i32
  }
  func.func @transform_3(%arg0: i32, %arg1: i32) -> (i32, i32, i32) {
    %c0_i32 = arith.constant 0 : i32
    %c0_i32_0 = arith.constant 0 : i32
    %c0_i32_1 = arith.constant 0 : i32
    return %arg0, %c0_i32, %c0_i32_0 : i32, i32, i32
  }
  func.func @transform_4(%arg0: i32, %arg1: i32) -> (i32, i32, i32) {
    %c0_i32 = arith.constant 0 : i32
    %c0_i32_0 = arith.constant 0 : i32
    return %arg0, %arg1, %c0_i32 : i32, i32, i32
  }
  func.func @transform_5(%arg0: i32, %arg1: i32) -> (i32, i32, i32) {
    %c0_i32 = arith.constant 0 : i32
    %c0_i32_0 = arith.constant 0 : i32
    return %arg0, %arg1, %c0_i32 : i32, i32, i32
  }
}

module attributes {stable_mosaic.version = 11 : i64} {
  func.func @_spatial_mask_kernel(%arg0: i32, %arg1: memref<1x2x12x12xf32, #tpu.memory_space<vmem>>, %arg2: memref<51xf32, #tpu.memory_space<smem>>, %arg3: memref<1x8x8xf32, #tpu.memory_space<vmem>>) attributes {dimension_semantics = [#tpu.dimension_semantics<parallel>], iteration_bounds = array<i64: 2>, scalar_prefetch = 0 : i64, scratch_operands = 0 : i64, tpu.core_type = #tpu.core_type<tc>, window_params = [{transform_indices = @transform_0, window_bounds = array<i64: 1, 2, 12, 12>}, {transform_indices = @transform_1, window_bounds = array<i64: 51>}, {transform_indices = @transform_2, window_bounds = array<i64: 1, 8, 8>}]} {
    %cst = arith.constant 0.000000e+00 : f32
    %0 = vector.broadcast %cst : f32 to vector<8x8xf32>
    %c0 = arith.constant 0 : index
    %1 = memref.load %arg2[%c0] : memref<51xf32, #tpu.memory_space<smem>>
    %c0_0 = arith.constant 0 : index
    %c0_1 = arith.constant 0 : index
    %c0_2 = arith.constant 0 : index
    %c0_3 = arith.constant 0 : index
    %2 = vector.load %arg1[%c0_0, %c0_1, %c0_2, %c0_3] : memref<1x2x12x12xf32, #tpu.memory_space<vmem>>, vector<1x1x8x8xf32>
    %3 = vector.shape_cast %2 : vector<1x1x8x8xf32> to vector<8x8xf32>
    %4 = vector.broadcast %1 : f32 to vector<8x8xf32>
    %5 = arith.mulf %4, %3 : vector<8x8xf32>
    %6 = arith.addf %0, %5 : vector<8x8xf32>
    %c1 = arith.constant 1 : index
    %7 = memref.load %arg2[%c1] : memref<51xf32, #tpu.memory_space<smem>>
    %c0_4 = arith.constant 0 : index
    %c0_5 = arith.constant 0 : index
    %c0_6 = arith.constant 0 : index
    %c1_7 = arith.constant 1 : index
    %8 = vector.load %arg1[%c0_4, %c0_5, %c0_6, %c1_7] : memref<1x2x12x12xf32, #tpu.memory_space<vmem>>, vector<1x1x8x8xf32>
    %9 = vector.shape_cast %8 : vector<1x1x8x8xf32> to vector<8x8xf32>
    %10 = vector.broadcast %7 : f32 to vector<8x8xf32>
    %11 = arith.mulf %10, %9 : vector<8x8xf32>
    %12 = arith.addf %6, %11 : vector<8x8xf32>
    %c2 = arith.constant 2 : index
    %13 = memref.load %arg2[%c2] : memref<51xf32, #tpu.memory_space<smem>>
    %c0_8 = arith.constant 0 : index
    %c0_9 = arith.constant 0 : index
    %c0_10 = arith.constant 0 : index
    %c2_11 = arith.constant 2 : index
    %14 = vector.load %arg1[%c0_8, %c0_9, %c0_10, %c2_11] : memref<1x2x12x12xf32, #tpu.memory_space<vmem>>, vector<1x1x8x8xf32>
    %15 = vector.shape_cast %14 : vector<1x1x8x8xf32> to vector<8x8xf32>
    %16 = vector.broadcast %13 : f32 to vector<8x8xf32>
    %17 = arith.mulf %16, %15 : vector<8x8xf32>
    %18 = arith.addf %12, %17 : vector<8x8xf32>
    %c3 = arith.constant 3 : index
    %19 = memref.load %arg2[%c3] : memref<51xf32, #tpu.memory_space<smem>>
    %c0_12 = arith.constant 0 : index
    %c0_13 = arith.constant 0 : index
    %c0_14 = arith.constant 0 : index
    %c3_15 = arith.constant 3 : index
    %20 = vector.load %arg1[%c0_12, %c0_13, %c0_14, %c3_15] : memref<1x2x12x12xf32, #tpu.memory_space<vmem>>, vector<1x1x8x8xf32>
    %21 = vector.shape_cast %20 : vector<1x1x8x8xf32> to vector<8x8xf32>
    %22 = vector.broadcast %19 : f32 to vector<8x8xf32>
    %23 = arith.mulf %22, %21 : vector<8x8xf32>
    %24 = arith.addf %18, %23 : vector<8x8xf32>
    %c4 = arith.constant 4 : index
    %25 = memref.load %arg2[%c4] : memref<51xf32, #tpu.memory_space<smem>>
    %c0_16 = arith.constant 0 : index
    %c0_17 = arith.constant 0 : index
    %c0_18 = arith.constant 0 : index
    %c4_19 = arith.constant 4 : index
    %26 = vector.load %arg1[%c0_16, %c0_17, %c0_18, %c4_19] : memref<1x2x12x12xf32, #tpu.memory_space<vmem>>, vector<1x1x8x8xf32>
    %27 = vector.shape_cast %26 : vector<1x1x8x8xf32> to vector<8x8xf32>
    %28 = vector.broadcast %25 : f32 to vector<8x8xf32>
    %29 = arith.mulf %28, %27 : vector<8x8xf32>
    %30 = arith.addf %24, %29 : vector<8x8xf32>
    %c5 = arith.constant 5 : index
    %31 = memref.load %arg2[%c5] : memref<51xf32, #tpu.memory_space<smem>>
    %c0_20 = arith.constant 0 : index
    %c0_21 = arith.constant 0 : index
    %c1_22 = arith.constant 1 : index
    %c0_23 = arith.constant 0 : index
    %32 = vector.load %arg1[%c0_20, %c0_21, %c1_22, %c0_23] : memref<1x2x12x12xf32, #tpu.memory_space<vmem>>, vector<1x1x8x8xf32>
    %33 = vector.shape_cast %32 : vector<1x1x8x8xf32> to vector<8x8xf32>
    %34 = vector.broadcast %31 : f32 to vector<8x8xf32>
    %35 = arith.mulf %34, %33 : vector<8x8xf32>
    %36 = arith.addf %30, %35 : vector<8x8xf32>
    %c6 = arith.constant 6 : index
    %37 = memref.load %arg2[%c6] : memref<51xf32, #tpu.memory_space<smem>>
    %c0_24 = arith.constant 0 : index
    %c0_25 = arith.constant 0 : index
    %c1_26 = arith.constant 1 : index
    %c1_27 = arith.constant 1 : index
    %38 = vector.load %arg1[%c0_24, %c0_25, %c1_26, %c1_27] : memref<1x2x12x12xf32, #tpu.memory_space<vmem>>, vector<1x1x8x8xf32>
    %39 = vector.shape_cast %38 : vector<1x1x8x8xf32> to vector<8x8xf32>
    %40 = vector.broadcast %37 : f32 to vector<8x8xf32>
    %41 = arith.mulf %40, %39 : vector<8x8xf32>
    %42 = arith.addf %36, %41 : vector<8x8xf32>
    %c7 = arith.constant 7 : index
    %43 = memref.load %arg2[%c7] : memref<51xf32, #tpu.memory_space<smem>>
    %c0_28 = arith.constant 0 : index
    %c0_29 = arith.constant 0 : index
    %c1_30 = arith.constant 1 : index
    %c2_31 = arith.constant 2 : index
    %44 = vector.load %arg1[%c0_28, %c0_29, %c1_30, %c2_31] : memref<1x2x12x12xf32, #tpu.memory_space<vmem>>, vector<1x1x8x8xf32>
    %45 = vector.shape_cast %44 : vector<1x1x8x8xf32> to vector<8x8xf32>
    %46 = vector.broadcast %43 : f32 to vector<8x8xf32>
    %47 = arith.mulf %46, %45 : vector<8x8xf32>
    %48 = arith.addf %42, %47 : vector<8x8xf32>
    %c8 = arith.constant 8 : index
    %49 = memref.load %arg2[%c8] : memref<51xf32, #tpu.memory_space<smem>>
    %c0_32 = arith.constant 0 : index
    %c0_33 = arith.constant 0 : index
    %c1_34 = arith.constant 1 : index
    %c3_35 = arith.constant 3 : index
    %50 = vector.load %arg1[%c0_32, %c0_33, %c1_34, %c3_35] : memref<1x2x12x12xf32, #tpu.memory_space<vmem>>, vector<1x1x8x8xf32>
    %51 = vector.shape_cast %50 : vector<1x1x8x8xf32> to vector<8x8xf32>
    %52 = vector.broadcast %49 : f32 to vector<8x8xf32>
    %53 = arith.mulf %52, %51 : vector<8x8xf32>
    %54 = arith.addf %48, %53 : vector<8x8xf32>
    %c9 = arith.constant 9 : index
    %55 = memref.load %arg2[%c9] : memref<51xf32, #tpu.memory_space<smem>>
    %c0_36 = arith.constant 0 : index
    %c0_37 = arith.constant 0 : index
    %c1_38 = arith.constant 1 : index
    %c4_39 = arith.constant 4 : index
    %56 = vector.load %arg1[%c0_36, %c0_37, %c1_38, %c4_39] : memref<1x2x12x12xf32, #tpu.memory_space<vmem>>, vector<1x1x8x8xf32>
    %57 = vector.shape_cast %56 : vector<1x1x8x8xf32> to vector<8x8xf32>
    %58 = vector.broadcast %55 : f32 to vector<8x8xf32>
    %59 = arith.mulf %58, %57 : vector<8x8xf32>
    %60 = arith.addf %54, %59 : vector<8x8xf32>
    %c10 = arith.constant 10 : index
    %61 = memref.load %arg2[%c10] : memref<51xf32, #tpu.memory_space<smem>>
    %c0_40 = arith.constant 0 : index
    %c0_41 = arith.constant 0 : index
    %c2_42 = arith.constant 2 : index
    %c0_43 = arith.constant 0 : index
    %62 = vector.load %arg1[%c0_40, %c0_41, %c2_42, %c0_43] : memref<1x2x12x12xf32, #tpu.memory_space<vmem>>, vector<1x1x8x8xf32>
    %63 = vector.shape_cast %62 : vector<1x1x8x8xf32> to vector<8x8xf32>
    %64 = vector.broadcast %61 : f32 to vector<8x8xf32>
    %65 = arith.mulf %64, %63 : vector<8x8xf32>
    %66 = arith.addf %60, %65 : vector<8x8xf32>
    %c11 = arith.constant 11 : index
    %67 = memref.load %arg2[%c11] : memref<51xf32, #tpu.memory_space<smem>>
    %c0_44 = arith.constant 0 : index
    %c0_45 = arith.constant 0 : index
    %c2_46 = arith.constant 2 : index
    %c1_47 = arith.constant 1 : index
    %68 = vector.load %arg1[%c0_44, %c0_45, %c2_46, %c1_47] : memref<1x2x12x12xf32, #tpu.memory_space<vmem>>, vector<1x1x8x8xf32>
    %69 = vector.shape_cast %68 : vector<1x1x8x8xf32> to vector<8x8xf32>
    %70 = vector.broadcast %67 : f32 to vector<8x8xf32>
    %71 = arith.mulf %70, %69 : vector<8x8xf32>
    %72 = arith.addf %66, %71 : vector<8x8xf32>
    %c12 = arith.constant 12 : index
    %73 = memref.load %arg2[%c12] : memref<51xf32, #tpu.memory_space<smem>>
    %c0_48 = arith.constant 0 : index
    %c0_49 = arith.constant 0 : index
    %c2_50 = arith.constant 2 : index
    %c2_51 = arith.constant 2 : index
    %74 = vector.load %arg1[%c0_48, %c0_49, %c2_50, %c2_51] : memref<1x2x12x12xf32, #tpu.memory_space<vmem>>, vector<1x1x8x8xf32>
    %75 = vector.shape_cast %74 : vector<1x1x8x8xf32> to vector<8x8xf32>
    %76 = vector.broadcast %73 : f32 to vector<8x8xf32>
    %77 = arith.mulf %76, %75 : vector<8x8xf32>
    %78 = arith.addf %72, %77 : vector<8x8xf32>
    %c13 = arith.constant 13 : index
    %79 = memref.load %arg2[%c13] : memref<51xf32, #tpu.memory_space<smem>>
    %c0_52 = arith.constant 0 : index
    %c0_53 = arith.constant 0 : index
    %c2_54 = arith.constant 2 : index
    %c3_55 = arith.constant 3 : index
    %80 = vector.load %arg1[%c0_52, %c0_53, %c2_54, %c3_55] : memref<1x2x12x12xf32, #tpu.memory_space<vmem>>, vector<1x1x8x8xf32>
    %81 = vector.shape_cast %80 : vector<1x1x8x8xf32> to vector<8x8xf32>
    %82 = vector.broadcast %79 : f32 to vector<8x8xf32>
    %83 = arith.mulf %82, %81 : vector<8x8xf32>
    %84 = arith.addf %78, %83 : vector<8x8xf32>
    %c14 = arith.constant 14 : index
    %85 = memref.load %arg2[%c14] : memref<51xf32, #tpu.memory_space<smem>>
    %c0_56 = arith.constant 0 : index
    %c0_57 = arith.constant 0 : index
    %c2_58 = arith.constant 2 : index
    %c4_59 = arith.constant 4 : index
    %86 = vector.load %arg1[%c0_56, %c0_57, %c2_58, %c4_59] : memref<1x2x12x12xf32, #tpu.memory_space<vmem>>, vector<1x1x8x8xf32>
    %87 = vector.shape_cast %86 : vector<1x1x8x8xf32> to vector<8x8xf32>
    %88 = vector.broadcast %85 : f32 to vector<8x8xf32>
    %89 = arith.mulf %88, %87 : vector<8x8xf32>
    %90 = arith.addf %84, %89 : vector<8x8xf32>
    %c15 = arith.constant 15 : index
    %91 = memref.load %arg2[%c15] : memref<51xf32, #tpu.memory_space<smem>>
    %c0_60 = arith.constant 0 : index
    %c0_61 = arith.constant 0 : index
    %c3_62 = arith.constant 3 : index
    %c0_63 = arith.constant 0 : index
    %92 = vector.load %arg1[%c0_60, %c0_61, %c3_62, %c0_63] : memref<1x2x12x12xf32, #tpu.memory_space<vmem>>, vector<1x1x8x8xf32>
    %93 = vector.shape_cast %92 : vector<1x1x8x8xf32> to vector<8x8xf32>
    %94 = vector.broadcast %91 : f32 to vector<8x8xf32>
    %95 = arith.mulf %94, %93 : vector<8x8xf32>
    %96 = arith.addf %90, %95 : vector<8x8xf32>
    %c16 = arith.constant 16 : index
    %97 = memref.load %arg2[%c16] : memref<51xf32, #tpu.memory_space<smem>>
    %c0_64 = arith.constant 0 : index
    %c0_65 = arith.constant 0 : index
    %c3_66 = arith.constant 3 : index
    %c1_67 = arith.constant 1 : index
    %98 = vector.load %arg1[%c0_64, %c0_65, %c3_66, %c1_67] : memref<1x2x12x12xf32, #tpu.memory_space<vmem>>, vector<1x1x8x8xf32>
    %99 = vector.shape_cast %98 : vector<1x1x8x8xf32> to vector<8x8xf32>
    %100 = vector.broadcast %97 : f32 to vector<8x8xf32>
    %101 = arith.mulf %100, %99 : vector<8x8xf32>
    %102 = arith.addf %96, %101 : vector<8x8xf32>
    %c17 = arith.constant 17 : index
    %103 = memref.load %arg2[%c17] : memref<51xf32, #tpu.memory_space<smem>>
    %c0_68 = arith.constant 0 : index
    %c0_69 = arith.constant 0 : index
    %c3_70 = arith.constant 3 : index
    %c2_71 = arith.constant 2 : index
    %104 = vector.load %arg1[%c0_68, %c0_69, %c3_70, %c2_71] : memref<1x2x12x12xf32, #tpu.memory_space<vmem>>, vector<1x1x8x8xf32>
    %105 = vector.shape_cast %104 : vector<1x1x8x8xf32> to vector<8x8xf32>
    %106 = vector.broadcast %103 : f32 to vector<8x8xf32>
    %107 = arith.mulf %106, %105 : vector<8x8xf32>
    %108 = arith.addf %102, %107 : vector<8x8xf32>
    %c18 = arith.constant 18 : index
    %109 = memref.load %arg2[%c18] : memref<51xf32, #tpu.memory_space<smem>>
    %c0_72 = arith.constant 0 : index
    %c0_73 = arith.constant 0 : index
    %c3_74 = arith.constant 3 : index
    %c3_75 = arith.constant 3 : index
    %110 = vector.load %arg1[%c0_72, %c0_73, %c3_74, %c3_75] : memref<1x2x12x12xf32, #tpu.memory_space<vmem>>, vector<1x1x8x8xf32>
    %111 = vector.shape_cast %110 : vector<1x1x8x8xf32> to vector<8x8xf32>
    %112 = vector.broadcast %109 : f32 to vector<8x8xf32>
    %113 = arith.mulf %112, %111 : vector<8x8xf32>
    %114 = arith.addf %108, %113 : vector<8x8xf32>
    %c19 = arith.constant 19 : index
    %115 = memref.load %arg2[%c19] : memref<51xf32, #tpu.memory_space<smem>>
    %c0_76 = arith.constant 0 : index
    %c0_77 = arith.constant 0 : index
    %c3_78 = arith.constant 3 : index
    %c4_79 = arith.constant 4 : index
    %116 = vector.load %arg1[%c0_76, %c0_77, %c3_78, %c4_79] : memref<1x2x12x12xf32, #tpu.memory_space<vmem>>, vector<1x1x8x8xf32>
    %117 = vector.shape_cast %116 : vector<1x1x8x8xf32> to vector<8x8xf32>
    %118 = vector.broadcast %115 : f32 to vector<8x8xf32>
    %119 = arith.mulf %118, %117 : vector<8x8xf32>
    %120 = arith.addf %114, %119 : vector<8x8xf32>
    %c20 = arith.constant 20 : index
    %121 = memref.load %arg2[%c20] : memref<51xf32, #tpu.memory_space<smem>>
    %c0_80 = arith.constant 0 : index
    %c0_81 = arith.constant 0 : index
    %c4_82 = arith.constant 4 : index
    %c0_83 = arith.constant 0 : index
    %122 = vector.load %arg1[%c0_80, %c0_81, %c4_82, %c0_83] : memref<1x2x12x12xf32, #tpu.memory_space<vmem>>, vector<1x1x8x8xf32>
    %123 = vector.shape_cast %122 : vector<1x1x8x8xf32> to vector<8x8xf32>
    %124 = vector.broadcast %121 : f32 to vector<8x8xf32>
    %125 = arith.mulf %124, %123 : vector<8x8xf32>
    %126 = arith.addf %120, %125 : vector<8x8xf32>
    %c21 = arith.constant 21 : index
    %127 = memref.load %arg2[%c21] : memref<51xf32, #tpu.memory_space<smem>>
    %c0_84 = arith.constant 0 : index
    %c0_85 = arith.constant 0 : index
    %c4_86 = arith.constant 4 : index
    %c1_87 = arith.constant 1 : index
    %128 = vector.load %arg1[%c0_84, %c0_85, %c4_86, %c1_87] : memref<1x2x12x12xf32, #tpu.memory_space<vmem>>, vector<1x1x8x8xf32>
    %129 = vector.shape_cast %128 : vector<1x1x8x8xf32> to vector<8x8xf32>
    %130 = vector.broadcast %127 : f32 to vector<8x8xf32>
    %131 = arith.mulf %130, %129 : vector<8x8xf32>
    %132 = arith.addf %126, %131 : vector<8x8xf32>
    %c22 = arith.constant 22 : index
    %133 = memref.load %arg2[%c22] : memref<51xf32, #tpu.memory_space<smem>>
    %c0_88 = arith.constant 0 : index
    %c0_89 = arith.constant 0 : index
    %c4_90 = arith.constant 4 : index
    %c2_91 = arith.constant 2 : index
    %134 = vector.load %arg1[%c0_88, %c0_89, %c4_90, %c2_91] : memref<1x2x12x12xf32, #tpu.memory_space<vmem>>, vector<1x1x8x8xf32>
    %135 = vector.shape_cast %134 : vector<1x1x8x8xf32> to vector<8x8xf32>
    %136 = vector.broadcast %133 : f32 to vector<8x8xf32>
    %137 = arith.mulf %136, %135 : vector<8x8xf32>
    %138 = arith.addf %132, %137 : vector<8x8xf32>
    %c23 = arith.constant 23 : index
    %139 = memref.load %arg2[%c23] : memref<51xf32, #tpu.memory_space<smem>>
    %c0_92 = arith.constant 0 : index
    %c0_93 = arith.constant 0 : index
    %c4_94 = arith.constant 4 : index
    %c3_95 = arith.constant 3 : index
    %140 = vector.load %arg1[%c0_92, %c0_93, %c4_94, %c3_95] : memref<1x2x12x12xf32, #tpu.memory_space<vmem>>, vector<1x1x8x8xf32>
    %141 = vector.shape_cast %140 : vector<1x1x8x8xf32> to vector<8x8xf32>
    %142 = vector.broadcast %139 : f32 to vector<8x8xf32>
    %143 = arith.mulf %142, %141 : vector<8x8xf32>
    %144 = arith.addf %138, %143 : vector<8x8xf32>
    %c24 = arith.constant 24 : index
    %145 = memref.load %arg2[%c24] : memref<51xf32, #tpu.memory_space<smem>>
    %c0_96 = arith.constant 0 : index
    %c0_97 = arith.constant 0 : index
    %c4_98 = arith.constant 4 : index
    %c4_99 = arith.constant 4 : index
    %146 = vector.load %arg1[%c0_96, %c0_97, %c4_98, %c4_99] : memref<1x2x12x12xf32, #tpu.memory_space<vmem>>, vector<1x1x8x8xf32>
    %147 = vector.shape_cast %146 : vector<1x1x8x8xf32> to vector<8x8xf32>
    %148 = vector.broadcast %145 : f32 to vector<8x8xf32>
    %149 = arith.mulf %148, %147 : vector<8x8xf32>
    %150 = arith.addf %144, %149 : vector<8x8xf32>
    %c25 = arith.constant 25 : index
    %151 = memref.load %arg2[%c25] : memref<51xf32, #tpu.memory_space<smem>>
    %c0_100 = arith.constant 0 : index
    %c1_101 = arith.constant 1 : index
    %c0_102 = arith.constant 0 : index
    %c0_103 = arith.constant 0 : index
    %152 = vector.load %arg1[%c0_100, %c1_101, %c0_102, %c0_103] : memref<1x2x12x12xf32, #tpu.memory_space<vmem>>, vector<1x1x8x8xf32>
    %153 = vector.shape_cast %152 : vector<1x1x8x8xf32> to vector<8x8xf32>
    %154 = vector.broadcast %151 : f32 to vector<8x8xf32>
    %155 = arith.mulf %154, %153 : vector<8x8xf32>
    %156 = arith.addf %150, %155 : vector<8x8xf32>
    %c26 = arith.constant 26 : index
    %157 = memref.load %arg2[%c26] : memref<51xf32, #tpu.memory_space<smem>>
    %c0_104 = arith.constant 0 : index
    %c1_105 = arith.constant 1 : index
    %c0_106 = arith.constant 0 : index
    %c1_107 = arith.constant 1 : index
    %158 = vector.load %arg1[%c0_104, %c1_105, %c0_106, %c1_107] : memref<1x2x12x12xf32, #tpu.memory_space<vmem>>, vector<1x1x8x8xf32>
    %159 = vector.shape_cast %158 : vector<1x1x8x8xf32> to vector<8x8xf32>
    %160 = vector.broadcast %157 : f32 to vector<8x8xf32>
    %161 = arith.mulf %160, %159 : vector<8x8xf32>
    %162 = arith.addf %156, %161 : vector<8x8xf32>
    %c27 = arith.constant 27 : index
    %163 = memref.load %arg2[%c27] : memref<51xf32, #tpu.memory_space<smem>>
    %c0_108 = arith.constant 0 : index
    %c1_109 = arith.constant 1 : index
    %c0_110 = arith.constant 0 : index
    %c2_111 = arith.constant 2 : index
    %164 = vector.load %arg1[%c0_108, %c1_109, %c0_110, %c2_111] : memref<1x2x12x12xf32, #tpu.memory_space<vmem>>, vector<1x1x8x8xf32>
    %165 = vector.shape_cast %164 : vector<1x1x8x8xf32> to vector<8x8xf32>
    %166 = vector.broadcast %163 : f32 to vector<8x8xf32>
    %167 = arith.mulf %166, %165 : vector<8x8xf32>
    %168 = arith.addf %162, %167 : vector<8x8xf32>
    %c28 = arith.constant 28 : index
    %169 = memref.load %arg2[%c28] : memref<51xf32, #tpu.memory_space<smem>>
    %c0_112 = arith.constant 0 : index
    %c1_113 = arith.constant 1 : index
    %c0_114 = arith.constant 0 : index
    %c3_115 = arith.constant 3 : index
    %170 = vector.load %arg1[%c0_112, %c1_113, %c0_114, %c3_115] : memref<1x2x12x12xf32, #tpu.memory_space<vmem>>, vector<1x1x8x8xf32>
    %171 = vector.shape_cast %170 : vector<1x1x8x8xf32> to vector<8x8xf32>
    %172 = vector.broadcast %169 : f32 to vector<8x8xf32>
    %173 = arith.mulf %172, %171 : vector<8x8xf32>
    %174 = arith.addf %168, %173 : vector<8x8xf32>
    %c29 = arith.constant 29 : index
    %175 = memref.load %arg2[%c29] : memref<51xf32, #tpu.memory_space<smem>>
    %c0_116 = arith.constant 0 : index
    %c1_117 = arith.constant 1 : index
    %c0_118 = arith.constant 0 : index
    %c4_119 = arith.constant 4 : index
    %176 = vector.load %arg1[%c0_116, %c1_117, %c0_118, %c4_119] : memref<1x2x12x12xf32, #tpu.memory_space<vmem>>, vector<1x1x8x8xf32>
    %177 = vector.shape_cast %176 : vector<1x1x8x8xf32> to vector<8x8xf32>
    %178 = vector.broadcast %175 : f32 to vector<8x8xf32>
    %179 = arith.mulf %178, %177 : vector<8x8xf32>
    %180 = arith.addf %174, %179 : vector<8x8xf32>
    %c30 = arith.constant 30 : index
    %181 = memref.load %arg2[%c30] : memref<51xf32, #tpu.memory_space<smem>>
    %c0_120 = arith.constant 0 : index
    %c1_121 = arith.constant 1 : index
    %c1_122 = arith.constant 1 : index
    %c0_123 = arith.constant 0 : index
    %182 = vector.load %arg1[%c0_120, %c1_121, %c1_122, %c0_123] : memref<1x2x12x12xf32, #tpu.memory_space<vmem>>, vector<1x1x8x8xf32>
    %183 = vector.shape_cast %182 : vector<1x1x8x8xf32> to vector<8x8xf32>
    %184 = vector.broadcast %181 : f32 to vector<8x8xf32>
    %185 = arith.mulf %184, %183 : vector<8x8xf32>
    %186 = arith.addf %180, %185 : vector<8x8xf32>
    %c31 = arith.constant 31 : index
    %187 = memref.load %arg2[%c31] : memref<51xf32, #tpu.memory_space<smem>>
    %c0_124 = arith.constant 0 : index
    %c1_125 = arith.constant 1 : index
    %c1_126 = arith.constant 1 : index
    %c1_127 = arith.constant 1 : index
    %188 = vector.load %arg1[%c0_124, %c1_125, %c1_126, %c1_127] : memref<1x2x12x12xf32, #tpu.memory_space<vmem>>, vector<1x1x8x8xf32>
    %189 = vector.shape_cast %188 : vector<1x1x8x8xf32> to vector<8x8xf32>
    %190 = vector.broadcast %187 : f32 to vector<8x8xf32>
    %191 = arith.mulf %190, %189 : vector<8x8xf32>
    %192 = arith.addf %186, %191 : vector<8x8xf32>
    %c32 = arith.constant 32 : index
    %193 = memref.load %arg2[%c32] : memref<51xf32, #tpu.memory_space<smem>>
    %c0_128 = arith.constant 0 : index
    %c1_129 = arith.constant 1 : index
    %c1_130 = arith.constant 1 : index
    %c2_131 = arith.constant 2 : index
    %194 = vector.load %arg1[%c0_128, %c1_129, %c1_130, %c2_131] : memref<1x2x12x12xf32, #tpu.memory_space<vmem>>, vector<1x1x8x8xf32>
    %195 = vector.shape_cast %194 : vector<1x1x8x8xf32> to vector<8x8xf32>
    %196 = vector.broadcast %193 : f32 to vector<8x8xf32>
    %197 = arith.mulf %196, %195 : vector<8x8xf32>
    %198 = arith.addf %192, %197 : vector<8x8xf32>
    %c33 = arith.constant 33 : index
    %199 = memref.load %arg2[%c33] : memref<51xf32, #tpu.memory_space<smem>>
    %c0_132 = arith.constant 0 : index
    %c1_133 = arith.constant 1 : index
    %c1_134 = arith.constant 1 : index
    %c3_135 = arith.constant 3 : index
    %200 = vector.load %arg1[%c0_132, %c1_133, %c1_134, %c3_135] : memref<1x2x12x12xf32, #tpu.memory_space<vmem>>, vector<1x1x8x8xf32>
    %201 = vector.shape_cast %200 : vector<1x1x8x8xf32> to vector<8x8xf32>
    %202 = vector.broadcast %199 : f32 to vector<8x8xf32>
    %203 = arith.mulf %202, %201 : vector<8x8xf32>
    %204 = arith.addf %198, %203 : vector<8x8xf32>
    %c34 = arith.constant 34 : index
    %205 = memref.load %arg2[%c34] : memref<51xf32, #tpu.memory_space<smem>>
    %c0_136 = arith.constant 0 : index
    %c1_137 = arith.constant 1 : index
    %c1_138 = arith.constant 1 : index
    %c4_139 = arith.constant 4 : index
    %206 = vector.load %arg1[%c0_136, %c1_137, %c1_138, %c4_139] : memref<1x2x12x12xf32, #tpu.memory_space<vmem>>, vector<1x1x8x8xf32>
    %207 = vector.shape_cast %206 : vector<1x1x8x8xf32> to vector<8x8xf32>
    %208 = vector.broadcast %205 : f32 to vector<8x8xf32>
    %209 = arith.mulf %208, %207 : vector<8x8xf32>
    %210 = arith.addf %204, %209 : vector<8x8xf32>
    %c35 = arith.constant 35 : index
    %211 = memref.load %arg2[%c35] : memref<51xf32, #tpu.memory_space<smem>>
    %c0_140 = arith.constant 0 : index
    %c1_141 = arith.constant 1 : index
    %c2_142 = arith.constant 2 : index
    %c0_143 = arith.constant 0 : index
    %212 = vector.load %arg1[%c0_140, %c1_141, %c2_142, %c0_143] : memref<1x2x12x12xf32, #tpu.memory_space<vmem>>, vector<1x1x8x8xf32>
    %213 = vector.shape_cast %212 : vector<1x1x8x8xf32> to vector<8x8xf32>
    %214 = vector.broadcast %211 : f32 to vector<8x8xf32>
    %215 = arith.mulf %214, %213 : vector<8x8xf32>
    %216 = arith.addf %210, %215 : vector<8x8xf32>
    %c36 = arith.constant 36 : index
    %217 = memref.load %arg2[%c36] : memref<51xf32, #tpu.memory_space<smem>>
    %c0_144 = arith.constant 0 : index
    %c1_145 = arith.constant 1 : index
    %c2_146 = arith.constant 2 : index
    %c1_147 = arith.constant 1 : index
    %218 = vector.load %arg1[%c0_144, %c1_145, %c2_146, %c1_147] : memref<1x2x12x12xf32, #tpu.memory_space<vmem>>, vector<1x1x8x8xf32>
    %219 = vector.shape_cast %218 : vector<1x1x8x8xf32> to vector<8x8xf32>
    %220 = vector.broadcast %217 : f32 to vector<8x8xf32>
    %221 = arith.mulf %220, %219 : vector<8x8xf32>
    %222 = arith.addf %216, %221 : vector<8x8xf32>
    %c37 = arith.constant 37 : index
    %223 = memref.load %arg2[%c37] : memref<51xf32, #tpu.memory_space<smem>>
    %c0_148 = arith.constant 0 : index
    %c1_149 = arith.constant 1 : index
    %c2_150 = arith.constant 2 : index
    %c2_151 = arith.constant 2 : index
    %224 = vector.load %arg1[%c0_148, %c1_149, %c2_150, %c2_151] : memref<1x2x12x12xf32, #tpu.memory_space<vmem>>, vector<1x1x8x8xf32>
    %225 = vector.shape_cast %224 : vector<1x1x8x8xf32> to vector<8x8xf32>
    %226 = vector.broadcast %223 : f32 to vector<8x8xf32>
    %227 = arith.mulf %226, %225 : vector<8x8xf32>
    %228 = arith.addf %222, %227 : vector<8x8xf32>
    %c38 = arith.constant 38 : index
    %229 = memref.load %arg2[%c38] : memref<51xf32, #tpu.memory_space<smem>>
    %c0_152 = arith.constant 0 : index
    %c1_153 = arith.constant 1 : index
    %c2_154 = arith.constant 2 : index
    %c3_155 = arith.constant 3 : index
    %230 = vector.load %arg1[%c0_152, %c1_153, %c2_154, %c3_155] : memref<1x2x12x12xf32, #tpu.memory_space<vmem>>, vector<1x1x8x8xf32>
    %231 = vector.shape_cast %230 : vector<1x1x8x8xf32> to vector<8x8xf32>
    %232 = vector.broadcast %229 : f32 to vector<8x8xf32>
    %233 = arith.mulf %232, %231 : vector<8x8xf32>
    %234 = arith.addf %228, %233 : vector<8x8xf32>
    %c39 = arith.constant 39 : index
    %235 = memref.load %arg2[%c39] : memref<51xf32, #tpu.memory_space<smem>>
    %c0_156 = arith.constant 0 : index
    %c1_157 = arith.constant 1 : index
    %c2_158 = arith.constant 2 : index
    %c4_159 = arith.constant 4 : index
    %236 = vector.load %arg1[%c0_156, %c1_157, %c2_158, %c4_159] : memref<1x2x12x12xf32, #tpu.memory_space<vmem>>, vector<1x1x8x8xf32>
    %237 = vector.shape_cast %236 : vector<1x1x8x8xf32> to vector<8x8xf32>
    %238 = vector.broadcast %235 : f32 to vector<8x8xf32>
    %239 = arith.mulf %238, %237 : vector<8x8xf32>
    %240 = arith.addf %234, %239 : vector<8x8xf32>
    %c40 = arith.constant 40 : index
    %241 = memref.load %arg2[%c40] : memref<51xf32, #tpu.memory_space<smem>>
    %c0_160 = arith.constant 0 : index
    %c1_161 = arith.constant 1 : index
    %c3_162 = arith.constant 3 : index
    %c0_163 = arith.constant 0 : index
    %242 = vector.load %arg1[%c0_160, %c1_161, %c3_162, %c0_163] : memref<1x2x12x12xf32, #tpu.memory_space<vmem>>, vector<1x1x8x8xf32>
    %243 = vector.shape_cast %242 : vector<1x1x8x8xf32> to vector<8x8xf32>
    %244 = vector.broadcast %241 : f32 to vector<8x8xf32>
    %245 = arith.mulf %244, %243 : vector<8x8xf32>
    %246 = arith.addf %240, %245 : vector<8x8xf32>
    %c41 = arith.constant 41 : index
    %247 = memref.load %arg2[%c41] : memref<51xf32, #tpu.memory_space<smem>>
    %c0_164 = arith.constant 0 : index
    %c1_165 = arith.constant 1 : index
    %c3_166 = arith.constant 3 : index
    %c1_167 = arith.constant 1 : index
    %248 = vector.load %arg1[%c0_164, %c1_165, %c3_166, %c1_167] : memref<1x2x12x12xf32, #tpu.memory_space<vmem>>, vector<1x1x8x8xf32>
    %249 = vector.shape_cast %248 : vector<1x1x8x8xf32> to vector<8x8xf32>
    %250 = vector.broadcast %247 : f32 to vector<8x8xf32>
    %251 = arith.mulf %250, %249 : vector<8x8xf32>
    %252 = arith.addf %246, %251 : vector<8x8xf32>
    %c42 = arith.constant 42 : index
    %253 = memref.load %arg2[%c42] : memref<51xf32, #tpu.memory_space<smem>>
    %c0_168 = arith.constant 0 : index
    %c1_169 = arith.constant 1 : index
    %c3_170 = arith.constant 3 : index
    %c2_171 = arith.constant 2 : index
    %254 = vector.load %arg1[%c0_168, %c1_169, %c3_170, %c2_171] : memref<1x2x12x12xf32, #tpu.memory_space<vmem>>, vector<1x1x8x8xf32>
    %255 = vector.shape_cast %254 : vector<1x1x8x8xf32> to vector<8x8xf32>
    %256 = vector.broadcast %253 : f32 to vector<8x8xf32>
    %257 = arith.mulf %256, %255 : vector<8x8xf32>
    %258 = arith.addf %252, %257 : vector<8x8xf32>
    %c43 = arith.constant 43 : index
    %259 = memref.load %arg2[%c43] : memref<51xf32, #tpu.memory_space<smem>>
    %c0_172 = arith.constant 0 : index
    %c1_173 = arith.constant 1 : index
    %c3_174 = arith.constant 3 : index
    %c3_175 = arith.constant 3 : index
    %260 = vector.load %arg1[%c0_172, %c1_173, %c3_174, %c3_175] : memref<1x2x12x12xf32, #tpu.memory_space<vmem>>, vector<1x1x8x8xf32>
    %261 = vector.shape_cast %260 : vector<1x1x8x8xf32> to vector<8x8xf32>
    %262 = vector.broadcast %259 : f32 to vector<8x8xf32>
    %263 = arith.mulf %262, %261 : vector<8x8xf32>
    %264 = arith.addf %258, %263 : vector<8x8xf32>
    %c44 = arith.constant 44 : index
    %265 = memref.load %arg2[%c44] : memref<51xf32, #tpu.memory_space<smem>>
    %c0_176 = arith.constant 0 : index
    %c1_177 = arith.constant 1 : index
    %c3_178 = arith.constant 3 : index
    %c4_179 = arith.constant 4 : index
    %266 = vector.load %arg1[%c0_176, %c1_177, %c3_178, %c4_179] : memref<1x2x12x12xf32, #tpu.memory_space<vmem>>, vector<1x1x8x8xf32>
    %267 = vector.shape_cast %266 : vector<1x1x8x8xf32> to vector<8x8xf32>
    %268 = vector.broadcast %265 : f32 to vector<8x8xf32>
    %269 = arith.mulf %268, %267 : vector<8x8xf32>
    %270 = arith.addf %264, %269 : vector<8x8xf32>
    %c45 = arith.constant 45 : index
    %271 = memref.load %arg2[%c45] : memref<51xf32, #tpu.memory_space<smem>>
    %c0_180 = arith.constant 0 : index
    %c1_181 = arith.constant 1 : index
    %c4_182 = arith.constant 4 : index
    %c0_183 = arith.constant 0 : index
    %272 = vector.load %arg1[%c0_180, %c1_181, %c4_182, %c0_183] : memref<1x2x12x12xf32, #tpu.memory_space<vmem>>, vector<1x1x8x8xf32>
    %273 = vector.shape_cast %272 : vector<1x1x8x8xf32> to vector<8x8xf32>
    %274 = vector.broadcast %271 : f32 to vector<8x8xf32>
    %275 = arith.mulf %274, %273 : vector<8x8xf32>
    %276 = arith.addf %270, %275 : vector<8x8xf32>
    %c46 = arith.constant 46 : index
    %277 = memref.load %arg2[%c46] : memref<51xf32, #tpu.memory_space<smem>>
    %c0_184 = arith.constant 0 : index
    %c1_185 = arith.constant 1 : index
    %c4_186 = arith.constant 4 : index
    %c1_187 = arith.constant 1 : index
    %278 = vector.load %arg1[%c0_184, %c1_185, %c4_186, %c1_187] : memref<1x2x12x12xf32, #tpu.memory_space<vmem>>, vector<1x1x8x8xf32>
    %279 = vector.shape_cast %278 : vector<1x1x8x8xf32> to vector<8x8xf32>
    %280 = vector.broadcast %277 : f32 to vector<8x8xf32>
    %281 = arith.mulf %280, %279 : vector<8x8xf32>
    %282 = arith.addf %276, %281 : vector<8x8xf32>
    %c47 = arith.constant 47 : index
    %283 = memref.load %arg2[%c47] : memref<51xf32, #tpu.memory_space<smem>>
    %c0_188 = arith.constant 0 : index
    %c1_189 = arith.constant 1 : index
    %c4_190 = arith.constant 4 : index
    %c2_191 = arith.constant 2 : index
    %284 = vector.load %arg1[%c0_188, %c1_189, %c4_190, %c2_191] : memref<1x2x12x12xf32, #tpu.memory_space<vmem>>, vector<1x1x8x8xf32>
    %285 = vector.shape_cast %284 : vector<1x1x8x8xf32> to vector<8x8xf32>
    %286 = vector.broadcast %283 : f32 to vector<8x8xf32>
    %287 = arith.mulf %286, %285 : vector<8x8xf32>
    %288 = arith.addf %282, %287 : vector<8x8xf32>
    %c48 = arith.constant 48 : index
    %289 = memref.load %arg2[%c48] : memref<51xf32, #tpu.memory_space<smem>>
    %c0_192 = arith.constant 0 : index
    %c1_193 = arith.constant 1 : index
    %c4_194 = arith.constant 4 : index
    %c3_195 = arith.constant 3 : index
    %290 = vector.load %arg1[%c0_192, %c1_193, %c4_194, %c3_195] : memref<1x2x12x12xf32, #tpu.memory_space<vmem>>, vector<1x1x8x8xf32>
    %291 = vector.shape_cast %290 : vector<1x1x8x8xf32> to vector<8x8xf32>
    %292 = vector.broadcast %289 : f32 to vector<8x8xf32>
    %293 = arith.mulf %292, %291 : vector<8x8xf32>
    %294 = arith.addf %288, %293 : vector<8x8xf32>
    %c49 = arith.constant 49 : index
    %295 = memref.load %arg2[%c49] : memref<51xf32, #tpu.memory_space<smem>>
    %c0_196 = arith.constant 0 : index
    %c1_197 = arith.constant 1 : index
    %c4_198 = arith.constant 4 : index
    %c4_199 = arith.constant 4 : index
    %296 = vector.load %arg1[%c0_196, %c1_197, %c4_198, %c4_199] : memref<1x2x12x12xf32, #tpu.memory_space<vmem>>, vector<1x1x8x8xf32>
    %297 = vector.shape_cast %296 : vector<1x1x8x8xf32> to vector<8x8xf32>
    %298 = vector.broadcast %295 : f32 to vector<8x8xf32>
    %299 = arith.mulf %298, %297 : vector<8x8xf32>
    %300 = arith.addf %294, %299 : vector<8x8xf32>
    %c50 = arith.constant 50 : index
    %301 = memref.load %arg2[%c50] : memref<51xf32, #tpu.memory_space<smem>>
    %302 = vector.broadcast %301 : f32 to vector<8x8xf32>
    %303 = arith.addf %300, %302 : vector<8x8xf32>
    %304 = arith.negf %303 : vector<8x8xf32>
    %305 = math.exp %304 : vector<8x8xf32>
    %cst_200 = arith.constant 1.000000e+00 : f32
    %306 = vector.broadcast %cst_200 : f32 to vector<8x8xf32>
    %307 = arith.addf %306, %305 : vector<8x8xf32>
    %308 = arith.divf %306, %307 : vector<8x8xf32>
    %c0_201 = arith.constant 0 : index
    %c0_202 = arith.constant 0 : index
    %c0_203 = arith.constant 0 : index
    %309 = vector.load %arg3[%c0_201, %c0_202, %c0_203] : memref<1x8x8xf32, #tpu.memory_space<vmem>>, vector<1x8x8xf32>
    %310 = vector.shape_cast %309 : vector<1x8x8xf32> to vector<8x8xf32>
    %311 = vector.shape_cast %308 : vector<8x8xf32> to vector<1x8x8xf32>
    tpu.vector_store %arg3[%c0_201, %c0_202, %c0_203], %311 {strides = array<i32>} : memref<1x8x8xf32, #tpu.memory_space<vmem>>, vector<1x8x8xf32>,
    return
  }
  func.func @transform_0(%arg0: i32) -> (i32, i32, i32, i32) {
    %c0_i32 = arith.constant 0 : i32
    %c0_i32_0 = arith.constant 0 : i32
    %c0_i32_1 = arith.constant 0 : i32
    %c0_i32_2 = arith.constant 0 : i32
    return %arg0, %c0_i32, %c0_i32_0, %c0_i32_1 : i32, i32, i32, i32
  }
  func.func @transform_1(%arg0: i32) -> i32 {
    %c0_i32 = arith.constant 0 : i32
    %c0_i32_0 = arith.constant 0 : i32
    return %c0_i32 : i32
  }
  func.func @transform_2(%arg0: i32) -> (i32, i32, i32) {
    %c0_i32 = arith.constant 0 : i32
    %c0_i32_0 = arith.constant 0 : i32
    %c0_i32_1 = arith.constant 0 : i32
    return %arg0, %c0_i32, %c0_i32_0 : i32, i32, i32
  }
}

module attributes {stable_mosaic.version = 11 : i64} {
  func.func @_mm_bias_act_kernel(%arg0: i32, %arg1: i32, %arg2: i32, %arg3: memref<256x128xbf16, #tpu.memory_space<vmem>>, %arg4: memref<128x128xbf16, #tpu.memory_space<vmem>>, %arg5: memref<1x128xf32, #tpu.memory_space<vmem>>, %arg6: memref<256x128xf32, #tpu.memory_space<vmem>>, %arg7: memref<256x128xf32, #tpu.memory_space<vmem>>) attributes {dimension_semantics = [#tpu.dimension_semantics<parallel>, #tpu.dimension_semantics<parallel>, #tpu.dimension_semantics<arbitrary>], iteration_bounds = array<i64: 64, 1, 1>, scalar_prefetch = 0 : i64, scratch_operands = 1 : i64, tpu.core_type = #tpu.core_type<tc>, window_params = [{transform_indices = @transform_0, window_bounds = array<i64: 256, 128>}, {transform_indices = @transform_1, window_bounds = array<i64: 128, 128>}, {transform_indices = @transform_2, window_bounds = array<i64: 1, 128>}, {transform_indices = @transform_3, window_bounds = array<i64: 256, 128>}]} {
    %c0_i32 = arith.constant 0 : i32
    %0 = arith.cmpi eq, %arg2, %c0_i32 : i32
    %1 = arith.extui %0 : i1 to i32
    %c0_i32_0 = arith.constant 0 : i32
    %2 = arith.cmpi ne, %1, %c0_i32_0 : i32
    scf.if %2 {
      %cst_10 = arith.constant 0.000000e+00 : f32
      %12 = vector.broadcast %cst_10 : f32 to vector<256x128xf32>
      %c0_11 = arith.constant 0 : index
      %c0_12 = arith.constant 0 : index
      %13 = vector.load %arg7[%c0_11, %c0_12] : memref<256x128xf32, #tpu.memory_space<vmem>>, vector<256x128xf32>
      tpu.vector_store %arg7[%c0_11, %c0_12], %12 {strides = array<i32>} : memref<256x128xf32, #tpu.memory_space<vmem>>, vector<256x128xf32>,
    } else {
    }
    %c0 = arith.constant 0 : index
    %c0_1 = arith.constant 0 : index
    %3 = vector.load %arg7[%c0, %c0_1] : memref<256x128xf32, #tpu.memory_space<vmem>>, vector<256x128xf32>
    %c0_2 = arith.constant 0 : index
    %c0_3 = arith.constant 0 : index
    %4 = vector.load %arg3[%c0_2, %c0_3] : memref<256x128xbf16, #tpu.memory_space<vmem>>, vector<256x128xbf16>
    %c0_4 = arith.constant 0 : index
    %c0_5 = arith.constant 0 : index
    %5 = vector.load %arg4[%c0_4, %c0_5] : memref<128x128xbf16, #tpu.memory_space<vmem>>, vector<128x128xbf16>
    %cst = arith.constant dense<0.000000e+00> : vector<256x128xf32>
    %6 = tpu.matmul %4, %5, %cst {dimension_numbers = #tpu.dot_dimension_numbers<[1], [0], [0], [1], [0, 0, 1, 1], [], []>} : vector<256x128xbf16>, vector<128x128xbf16>, vector<256x128xf32> -> vector<256x128xf32>
    %7 = arith.addf %3, %6 : vector<256x128xf32>
    %c0_6 = arith.constant 0 : index
    %c0_7 = arith.constant 0 : index
    %8 = vector.load %arg7[%c0_6, %c0_7] : memref<256x128xf32, #tpu.memory_space<vmem>>, vector<256x128xf32>
    tpu.vector_store %arg7[%c0_6, %c0_7], %7 {strides = array<i32>} : memref<256x128xf32, #tpu.memory_space<vmem>>, vector<256x128xf32>,
    %c0_i32_8 = arith.constant 0 : i32
    %9 = arith.cmpi eq, %arg2, %c0_i32_8 : i32
    %10 = arith.extui %9 : i1 to i32
    %c0_i32_9 = arith.constant 0 : i32
    %11 = arith.cmpi ne, %10, %c0_i32_9 : i32
    scf.if %11 {
      %c0_10 = arith.constant 0 : index
      %c0_11 = arith.constant 0 : index
      %12 = vector.load %arg7[%c0_10, %c0_11] : memref<256x128xf32, #tpu.memory_space<vmem>>, vector<256x128xf32>
      %c0_12 = arith.constant 0 : index
      %c0_13 = arith.constant 0 : index
      %13 = vector.load %arg5[%c0_12, %c0_13] : memref<1x128xf32, #tpu.memory_space<vmem>>, vector<1x128xf32>
      %14 = vector.broadcast %13 : vector<1x128xf32> to vector<256x128xf32>
      %15 = arith.addf %12, %14 : vector<256x128xf32>
      %c0_14 = arith.constant 0 : index
      %c0_15 = arith.constant 0 : index
      %16 = vector.load %arg6[%c0_14, %c0_15] : memref<256x128xf32, #tpu.memory_space<vmem>>, vector<256x128xf32>
      tpu.vector_store %arg6[%c0_14, %c0_15], %15 {strides = array<i32>} : memref<256x128xf32, #tpu.memory_space<vmem>>, vector<256x128xf32>,
    } else {
    }
    return
  }
  func.func @transform_0(%arg0: i32, %arg1: i32, %arg2: i32) -> (i32, i32) {
    %c0_i32 = arith.constant 0 : i32
    return %arg0, %arg2 : i32, i32
  }
  func.func @transform_1(%arg0: i32, %arg1: i32, %arg2: i32) -> (i32, i32) {
    %c0_i32 = arith.constant 0 : i32
    return %arg2, %arg1 : i32, i32
  }
  func.func @transform_2(%arg0: i32, %arg1: i32, %arg2: i32) -> (i32, i32) {
    %c0_i32 = arith.constant 0 : i32
    %c0_i32_0 = arith.constant 0 : i32
    return %c0_i32, %arg1 : i32, i32
  }
  func.func @transform_3(%arg0: i32, %arg1: i32, %arg2: i32) -> (i32, i32) {
    %c0_i32 = arith.constant 0 : i32
    return %arg0, %arg1 : i32, i32
  }
}

module attributes {stable_mosaic.version = 11 : i64} {
  func.func @_mm_bias_act_kernel(%arg0: i32, %arg1: i32, %arg2: i32, %arg3: memref<256x128xbf16, #tpu.memory_space<vmem>>, %arg4: memref<128x128xbf16, #tpu.memory_space<vmem>>, %arg5: memref<1x128xf32, #tpu.memory_space<vmem>>, %arg6: memref<256x128xf32, #tpu.memory_space<vmem>>, %arg7: memref<256x128xf32, #tpu.memory_space<vmem>>) attributes {dimension_semantics = [#tpu.dimension_semantics<parallel>, #tpu.dimension_semantics<parallel>, #tpu.dimension_semantics<arbitrary>], iteration_bounds = array<i64: 128, 1, 1>, scalar_prefetch = 0 : i64, scratch_operands = 1 : i64, tpu.core_type = #tpu.core_type<tc>, window_params = [{transform_indices = @transform_0, window_bounds = array<i64: 256, 128>}, {transform_indices = @transform_1, window_bounds = array<i64: 128, 128>}, {transform_indices = @transform_2, window_bounds = array<i64: 1, 128>}, {transform_indices = @transform_3, window_bounds = array<i64: 256, 128>}]} {
    %c0_i32 = arith.constant 0 : i32
    %0 = arith.cmpi eq, %arg2, %c0_i32 : i32
    %1 = arith.extui %0 : i1 to i32
    %c0_i32_0 = arith.constant 0 : i32
    %2 = arith.cmpi ne, %1, %c0_i32_0 : i32
    scf.if %2 {
      %cst_10 = arith.constant 0.000000e+00 : f32
      %12 = vector.broadcast %cst_10 : f32 to vector<256x128xf32>
      %c0_11 = arith.constant 0 : index
      %c0_12 = arith.constant 0 : index
      %13 = vector.load %arg7[%c0_11, %c0_12] : memref<256x128xf32, #tpu.memory_space<vmem>>, vector<256x128xf32>
      tpu.vector_store %arg7[%c0_11, %c0_12], %12 {strides = array<i32>} : memref<256x128xf32, #tpu.memory_space<vmem>>, vector<256x128xf32>,
    } else {
    }
    %c0 = arith.constant 0 : index
    %c0_1 = arith.constant 0 : index
    %3 = vector.load %arg7[%c0, %c0_1] : memref<256x128xf32, #tpu.memory_space<vmem>>, vector<256x128xf32>
    %c0_2 = arith.constant 0 : index
    %c0_3 = arith.constant 0 : index
    %4 = vector.load %arg3[%c0_2, %c0_3] : memref<256x128xbf16, #tpu.memory_space<vmem>>, vector<256x128xbf16>
    %c0_4 = arith.constant 0 : index
    %c0_5 = arith.constant 0 : index
    %5 = vector.load %arg4[%c0_4, %c0_5] : memref<128x128xbf16, #tpu.memory_space<vmem>>, vector<128x128xbf16>
    %cst = arith.constant dense<0.000000e+00> : vector<256x128xf32>
    %6 = tpu.matmul %4, %5, %cst {dimension_numbers = #tpu.dot_dimension_numbers<[1], [0], [0], [1], [0, 0, 1, 1], [], []>} : vector<256x128xbf16>, vector<128x128xbf16>, vector<256x128xf32> -> vector<256x128xf32>
    %7 = arith.addf %3, %6 : vector<256x128xf32>
    %c0_6 = arith.constant 0 : index
    %c0_7 = arith.constant 0 : index
    %8 = vector.load %arg7[%c0_6, %c0_7] : memref<256x128xf32, #tpu.memory_space<vmem>>, vector<256x128xf32>
    tpu.vector_store %arg7[%c0_6, %c0_7], %7 {strides = array<i32>} : memref<256x128xf32, #tpu.memory_space<vmem>>, vector<256x128xf32>,
    %c0_i32_8 = arith.constant 0 : i32
    %9 = arith.cmpi eq, %arg2, %c0_i32_8 : i32
    %10 = arith.extui %9 : i1 to i32
    %c0_i32_9 = arith.constant 0 : i32
    %11 = arith.cmpi ne, %10, %c0_i32_9 : i32
    scf.if %11 {
      %c0_10 = arith.constant 0 : index
      %c0_11 = arith.constant 0 : index
      %12 = vector.load %arg7[%c0_10, %c0_11] : memref<256x128xf32, #tpu.memory_space<vmem>>, vector<256x128xf32>
      %c0_12 = arith.constant 0 : index
      %c0_13 = arith.constant 0 : index
      %13 = vector.load %arg5[%c0_12, %c0_13] : memref<1x128xf32, #tpu.memory_space<vmem>>, vector<1x128xf32>
      %14 = vector.broadcast %13 : vector<1x128xf32> to vector<256x128xf32>
      %15 = arith.addf %12, %14 : vector<256x128xf32>
      %c0_14 = arith.constant 0 : index
      %c0_15 = arith.constant 0 : index
      %16 = vector.load %arg6[%c0_14, %c0_15] : memref<256x128xf32, #tpu.memory_space<vmem>>, vector<256x128xf32>
      tpu.vector_store %arg6[%c0_14, %c0_15], %15 {strides = array<i32>} : memref<256x128xf32, #tpu.memory_space<vmem>>, vector<256x128xf32>,
    } else {
    }
    return
  }
  func.func @transform_0(%arg0: i32, %arg1: i32, %arg2: i32) -> (i32, i32) {
    %c0_i32 = arith.constant 0 : i32
    return %arg0, %arg2 : i32, i32
  }
  func.func @transform_1(%arg0: i32, %arg1: i32, %arg2: i32) -> (i32, i32) {
    %c0_i32 = arith.constant 0 : i32
    return %arg2, %arg1 : i32, i32
  }
  func.func @transform_2(%arg0: i32, %arg1: i32, %arg2: i32) -> (i32, i32) {
    %c0_i32 = arith.constant 0 : i32
    %c0_i32_0 = arith.constant 0 : i32
    return %c0_i32, %arg1 : i32, i32
  }
  func.func @transform_3(%arg0: i32, %arg1: i32, %arg2: i32) -> (i32, i32) {
    %c0_i32 = arith.constant 0 : i32
    return %arg0, %arg1 : i32, i32
  }
}

module attributes {stable_mosaic.version = 11 : i64} {
  func.func @_mask_mul_kernel(%arg0: i32, %arg1: i32, %arg2: memref<1x256x8x8xf32, #tpu.memory_space<vmem>>, %arg3: memref<1x1x8x8xf32, #tpu.memory_space<vmem>>, %arg4: memref<1x256x8x8xf32, #tpu.memory_space<vmem>>) attributes {dimension_semantics = [#tpu.dimension_semantics<parallel>, #tpu.dimension_semantics<parallel>], iteration_bounds = array<i64: 2, 8>, scalar_prefetch = 0 : i64, scratch_operands = 0 : i64, tpu.core_type = #tpu.core_type<tc>, window_params = [{transform_indices = @transform_0, window_bounds = array<i64: 1, 256, 8, 8>}, {transform_indices = @transform_1, window_bounds = array<i64: 1, 1, 8, 8>}, {transform_indices = @transform_2, window_bounds = array<i64: 1, 256, 8, 8>}]} {
    %c0 = arith.constant 0 : index
    %c0_0 = arith.constant 0 : index
    %c0_1 = arith.constant 0 : index
    %c0_2 = arith.constant 0 : index
    %0 = vector.load %arg2[%c0, %c0_0, %c0_1, %c0_2] : memref<1x256x8x8xf32, #tpu.memory_space<vmem>>, vector<1x256x8x8xf32>
    %1 = vector.shape_cast %0 : vector<1x256x8x8xf32> to vector<256x8x8xf32>
    %c0_3 = arith.constant 0 : index
    %c0_4 = arith.constant 0 : index
    %c0_5 = arith.constant 0 : index
    %c0_6 = arith.constant 0 : index
    %2 = vector.load %arg3[%c0_3, %c0_4, %c0_5, %c0_6] : memref<1x1x8x8xf32, #tpu.memory_space<vmem>>, vector<1x1x8x8xf32>
    %3 = vector.shape_cast %2 : vector<1x1x8x8xf32> to vector<1x8x8xf32>
    %4 = vector.broadcast %3 : vector<1x8x8xf32> to vector<256x8x8xf32>
    %5 = arith.mulf %1, %4 : vector<256x8x8xf32>
    %c0_7 = arith.constant 0 : index
    %c0_8 = arith.constant 0 : index
    %c0_9 = arith.constant 0 : index
    %c0_10 = arith.constant 0 : index
    %6 = vector.load %arg4[%c0_7, %c0_8, %c0_9, %c0_10] : memref<1x256x8x8xf32, #tpu.memory_space<vmem>>, vector<1x256x8x8xf32>
    %7 = vector.shape_cast %6 : vector<1x256x8x8xf32> to vector<256x8x8xf32>
    %8 = vector.shape_cast %5 : vector<256x8x8xf32> to vector<1x256x8x8xf32>
    tpu.vector_store %arg4[%c0_7, %c0_8, %c0_9, %c0_10], %8 {strides = array<i32>} : memref<1x256x8x8xf32, #tpu.memory_space<vmem>>, vector<1x256x8x8xf32>,
    return
  }
  func.func @transform_0(%arg0: i32, %arg1: i32) -> (i32, i32, i32, i32) {
    %c0_i32 = arith.constant 0 : i32
    %c0_i32_0 = arith.constant 0 : i32
    %c0_i32_1 = arith.constant 0 : i32
    return %arg0, %arg1, %c0_i32, %c0_i32_0 : i32, i32, i32, i32
  }
  func.func @transform_1(%arg0: i32, %arg1: i32) -> (i32, i32, i32, i32) {
    %c0_i32 = arith.constant 0 : i32
    %c0_i32_0 = arith.constant 0 : i32
    %c0_i32_1 = arith.constant 0 : i32
    %c0_i32_2 = arith.constant 0 : i32
    return %arg0, %c0_i32, %c0_i32_0, %c0_i32_1 : i32, i32, i32, i32
  }
  func.func @transform_2(%arg0: i32, %arg1: i32) -> (i32, i32, i32, i32) {
    %c0_i32 = arith.constant 0 : i32
    %c0_i32_0 = arith.constant 0 : i32
    %c0_i32_1 = arith.constant 0 : i32
    return %arg0, %arg1, %c0_i32, %c0_i32_0 : i32, i32, i32, i32
  }
}

</mosaic_0001>

<bundles_post_ra>
// kernel: attention_modules_forward.11
= control target key start
LH: loop header
LB: loop body
LE: loop exit
PB: predicated region body
PF: predicated region fallthrough
CT: control target
= control target key end

     0   :  { %s486_s6 = smov 0   ;;  %s576_s0 = inlined_call_operand.vmem [shape: f32[2,16,2048], index: 0, kind: input, shape index: {}]   ;;  %s577_s1 = inlined_call_operand.vmem [shape: f32[2,1,2048], index: 1, kind: output, shape index: {}]  }
   0x1 LB: > { %s447_s7 = sadd.s32 4294967295, %s473_s6   ;;  %p451_p0 = scmp.ge.s32.totalorder %s473_s6, 1  ;;  %s473_s6 = sphi %s486_s6, %s11_s6  }
   0x2   : > { %p87_p1 = scmp.lt.s32.totalorder %s473_s6, 3 }
   0x4   : > { %p88_p2 = pnand %p451_p0, %p87_p1 }
   0x5   : > { %p106_p3 = scmp.lt.s32.totalorder (!%p88_p2), %s447_s7, 1  ;;  %v475_v0 = vmov (!%p88_p2), 1966171168   ;;  %v299_v2 = vlaneseq (!%p88_p2) }
   0x6   : > { %91 = sbr.rel (%p88_p2) target bundleno = 64 (0x40), region = 24  ;;  %v297_v1 = vunpack.c.l.s4 (!%p88_p2), %v475_v0 }
   0x7   : > { %v300_v8 = vshrl.u32 (!%p88_p2), %v299_v2, 7 }
   0x8   : > { %v298_v7 = vunpack.c.0.s8 (!%p88_p2), %v297_v1 }
   0xa   : > { %v518_v26 = vsub.s32 (!%p88_p2), %v298_v7, %v300_v8 }
   0xd   : > { %s579_s7 = smov (!%p106_p3, %s447_s7), 1 }
   0xe   : > { %s457_s8 = sshll.u32 %s579_s7, 8  ;;  %s454_s12 = sshll.u32 %s579_s7, 4 }
   0xf   : > { %s500_s11 = scalar_lea.vmem %s576_s0, %s457_s8  ;;  %s114_s15 = scalar_lea.vmem %s577_s1, %s454_s12 }
  0x10   : > { %v115_v3 = vld [vmem:[%s500_s11] sm:$0xff]  ;;  %v116_v4 = vld [vmem:[%s500_s11 + $0x8] sm:$0xff]  ;;  %v117_v5 = vld [vmem:[%s500_s11 + $0x10] sm:$0xff] }
  0x11   : > { %v118_v6 = vld [vmem:[%s500_s11 + $0x18] sm:$0xff]  ;;  %v119_v9 = vld [vmem:[%s500_s11 + $0x20] sm:$0xff]  ;;  %v120_v10 = vld [vmem:[%s500_s11 + $0x28] sm:$0xff] }
  0x12   : > { %v121_v11 = vld [vmem:[%s500_s11 + $0x30] sm:$0xff]  ;;  %v122_v12 = vld [vmem:[%s500_s11 + $0x38] sm:$0xff]  ;;  %v131_v13 = vld [vmem:[%s500_s11 + $0x80] sm:$0xff] }
  0x13   : > { %v132_v14 = vld [vmem:[%s500_s11 + $0x88] sm:$0xff]  ;;  %v133_v15 = vld [vmem:[%s500_s11 + $0x90] sm:$0xff]  ;;  %v134_v16 = vld [vmem:[%s500_s11 + $0x98] sm:$0xff]  ;;  %v147_v18 = vadd.f32 %v131_v13, %v115_v3 }
  0x14   : > { %v135_v17 = vld [vmem:[%s500_s11 + $0xa0] sm:$0xff]  ;;  %v154_v19 = vadd.f32 %v132_v14, %v116_v4  ;;  %v136_v20 = vld [vmem:[%s500_s11 + $0xa8] sm:$0xff]  ;;  %v137_v21 = vld [vmem:[%s500_s11 + $0xb0] sm:$0xff]  ;;  %v161_v23 = vadd.f32 %v133_v15, %v117_v5  ;;  %v168_v24 = vadd.f32 %v134_v16, %v118_v6 }
  0x15   : > { %v138_v22 = vld [vmem:[%s500_s11 + $0xb8] sm:$0xff]  ;;  %v175_v25 = vadd.f32 %v135_v17, %v119_v9  ;;  %v148_v27 = vrot.slane %v147_v18, 4  ;;  %v182_v29 = vadd.f32 %v136_v20, %v120_v10  ;;  %v189_v30 = vadd.f32 %v137_v21, %v121_v11  ;;  %v123_v55 = vld [vmem:[%s500_s11 + $0x40] sm:$0xff]  ;;  %v124_v56 = vld [vmem:[%s500_s11 + $0x48] sm:$0xff] }
  0x16   : > { %v155_v28 = vrot.slane %v154_v19, 4  ;;  %v162_v31 = vrot.slane %v161_v23, 4  ;;  %v169_v32 = vrot.slane %v168_v24, 4  ;;  %v196_v34 = vadd.f32 %v138_v22, %v122_v12  ;;  %v125_v61 = vld [vmem:[%s500_s11 + $0x50] sm:$0xff]  ;;  %v126_v62 = vld [vmem:[%s500_s11 + $0x58] sm:$0xff]  ;;  %v127_v63 = vld [vmem:[%s500_s11 + $0x60] sm:$0xff] }
  0x17   : > { %v176_v33 = vrot.slane %v175_v25, 4  ;;  %v149_v35 = vadd.f32 %v148_v27, %v147_v18  ;;  %v183_v37 = vrot.slane %v182_v29, 4  ;;  %v190_v38 = vrot.slane %v189_v30, 4  ;;  %v128_v4 = vld [vmem:[%s500_s11 + $0x68] sm:$0xff]  ;;  %v139_v5 = vld [vmem:[%s500_s11 + $0xc0] sm:$0xff]  ;;  %v141_v11 = vld [vmem:[%s500_s11 + $0xd0] sm:$0xff] }
  0x18   : > { %v156_v36 = vadd.f32 %v155_v28, %v154_v19  ;;  %v163_v39 = vadd.f32 %v162_v31, %v161_v23  ;;  %v170_v40 = vadd.f32 %v169_v32, %v168_v24  ;;  %v197_v42 = vrot.slane %v196_v34, 4  ;;  %v140_v6 = vld [vmem:[%s500_s11 + $0xc8] sm:$0xff]  ;;  %v142_v12 = vld [vmem:[%s500_s11 + $0xd8] sm:$0xff]  ;;  %v143_v13 = vld [vmem:[%s500_s11 + $0xe0] sm:$0xff] }
  0x19   : > { %v177_v41 = vadd.f32 %v176_v33, %v175_v25  ;;  %v150_v43 = vrot.slane %v149_v35, 2  ;;  %v184_v45 = vadd.f32 %v183_v37, %v182_v29  ;;  %v191_v46 = vadd.f32 %v190_v38, %v189_v30  ;;  %v129_v18 = vld [vmem:[%s500_s11 + $0x70] sm:$0xff]  ;;  %v144_v19 = vld [vmem:[%s500_s11 + $0xe8] sm:$0xff]  ;;  %v130_v25 = vld [vmem:[%s500_s11 + $0x78] sm:$0xff] }
  0x1a   : > { %v157_v44 = vrot.slane %v156_v36, 2  ;;  %v164_v47 = vrot.slane %v163_v39, 2  ;;  %v171_v48 = vrot.slane %v170_v40, 2  ;;  %v198_v50 = vadd.f32 %v197_v42, %v196_v34  ;;  %v145_v20 = vld [vmem:[%s500_s11 + $0xf0] sm:$0xff]  ;;  %v146_v27 = vld [vmem:[%s500_s11 + $0xf8] sm:$0xff] }
  0x1b   : > { %v178_v49 = vrot.slane %v177_v41, 2  ;;  %v151_v51 = vadd.f32 %v150_v43, %v149_v35  ;;  %v185_v53 = vrot.slane %v184_v45, 2  ;;  %v192_v54 = vrot.slane %v191_v46, 2 }
  0x1c   : > { %v158_v52 = vadd.f32 %v157_v44, %v156_v36  ;;  %v165_v57 = vadd.f32 %v164_v47, %v163_v39  ;;  %v172_v58 = vadd.f32 %v171_v48, %v170_v40  ;;  %v199_v60 = vrot.slane %v198_v50, 2 }
  0x1d   : > { %v179_v59 = vadd.f32 %v178_v49, %v177_v41  ;;  %v152_v0 = vrot.slane %v151_v51, 1  ;;  %v186_v2 = vadd.f32 %v185_v53, %v184_v45  ;;  %v193_v3 = vadd.f32 %v192_v54, %v191_v46 }
  0x1e   : > { %v159_v1 = vrot.slane %v158_v52, 1  ;;  %v166_v7 = vrot.slane %v165_v57, 1  ;;  %v173_v8 = vrot.slane %v172_v58, 1  ;;  %v200_v10 = vadd.f32 %v199_v60, %v198_v50 }
  0x1f   : > { %v180_v9 = vrot.slane %v179_v59, 1  ;;  %v531_v14 = vadd.f32 %v152_v0, %v151_v51  ;;  %v187_v16 = vrot.slane %v186_v2, 1  ;;  %v194_v17 = vrot.slane %v193_v3, 1 }
  0x20   : > { %v533_v15 = vadd.f32 %v159_v1, %v158_v52  ;;  %v538_v21 = vadd.f32 %v166_v7, %v165_v57  ;;  %v540_v22 = vadd.f32 %v173_v8, %v172_v58  ;;  %v201_v24 = vrot.slane %v200_v10, 1 }
  0x21   : > { %v542_v23 = vadd.f32 %v180_v9, %v179_v59  ;;  %v546_v28 = vadd.f32 %v187_v16, %v186_v2  ;;  %v548_v29 = vadd.f32 %v194_v17, %v193_v3  ;;  %v203_v30 = vadd.f32 %v139_v5, %v123_v55 }
  0x22   : > { %v210_v31 = vadd.f32 %v140_v6, %v124_v56  ;;  %v202_v32 = vadd.f32 %v201_v24, %v200_v10  ;;  %v217_v33 = vadd.f32 %v141_v11, %v125_v61  ;;  %v224_v34 = vadd.f32 %v142_v12, %v126_v62 }
  0x23   : > { %v231_v35 = vadd.f32 %v143_v13, %v127_v63  ;;  %v204_v36 = vrot.slane %v203_v30, 4  ;;  %v238_v38 = vadd.f32 %v144_v19, %v128_v4  ;;  %v245_v39 = vadd.f32 %v145_v20, %v129_v18 }
  0x24   : > { %v211_v37 = vrot.slane %v210_v31, 4  ;;  %v218_v40 = vrot.slane %v217_v33, 4  ;;  %v225_v41 = vrot.slane %v224_v34, 4  ;;  %v252_v43 = vadd.f32 %v146_v27, %v130_v25 }
  0x25   : > { %v232_v42 = vrot.slane %v231_v35, 4  ;;  %v205_v44 = vadd.f32 %v204_v36, %v203_v30  ;;  %v239_v46 = vrot.slane %v238_v38, 4  ;;  %v246_v47 = vrot.slane %v245_v39, 4 }
  0x26   : > { %v212_v45 = vadd.f32 %v211_v37, %v210_v31  ;;  %v219_v48 = vadd.f32 %v218_v40, %v217_v33  ;;  %v226_v49 = vadd.f32 %v225_v41, %v224_v34  ;;  %v253_v51 = vrot.slane %v252_v43, 4 }
  0x27   : > { %v233_v50 = vadd.f32 %v232_v42, %v231_v35  ;;  %v206_v52 = vrot.slane %v205_v44, 2  ;;  %v240_v54 = vadd.f32 %v239_v46, %v238_v38  ;;  %v247_v55 = vadd.f32 %v246_v47, %v245_v39 }
  0x28   : > { %v213_v53 = vrot.slane %v212_v45, 2  ;;  %v220_v56 = vrot.slane %v219_v48, 2  ;;  %v227_v57 = vrot.slane %v226_v49, 2  ;;  %v254_v59 = vadd.f32 %v253_v51, %v252_v43 }
  0x29   : > { %v234_v58 = vrot.slane %v233_v50, 2  ;;  %v207_v60 = vadd.f32 %v206_v52, %v205_v44  ;;  %v241_v62 = vrot.slane %v240_v54, 2  ;;  %v248_v63 = vrot.slane %v247_v55, 2 }
  0x2a   : > { %v214_v61 = vadd.f32 %v213_v53, %v212_v45  ;;  %v221_v0 = vadd.f32 %v220_v56, %v219_v48  ;;  %v228_v1 = vadd.f32 %v227_v57, %v226_v49  ;;  %v255_v3 = vrot.slane %v254_v59, 2 }
  0x2b   : > { %v235_v2 = vadd.f32 %v234_v58, %v233_v50  ;;  %v208_v4 = vrot.slane %v207_v60, 1  ;;  %v242_v6 = vadd.f32 %v241_v62, %v240_v54  ;;  %v249_v7 = vadd.f32 %v248_v63, %v247_v55 }
  0x2c   : > { %v215_v5 = vrot.slane %v214_v61, 1  ;;  %v222_v8 = vrot.slane %v221_v0, 1  ;;  %v229_v9 = vrot.slane %v228_v1, 1  ;;  %v256_v11 = vadd.f32 %v255_v3, %v254_v59 }
  0x2d   : > { %v236_v10 = vrot.slane %v235_v2, 1  ;;  %v209_v12 = vadd.f32 %v208_v4, %v207_v60  ;;  %v243_v16 = vrot.slane %v242_v6, 1  ;;  %v250_v17 = vrot.slane %v249_v7, 1 }
  0x2e   : > { %v216_v13 = vadd.f32 %v215_v5, %v214_v61  ;;  %v223_v18 = vadd.f32 %v222_v8, %v221_v0  ;;  %v230_v19 = vadd.f32 %v229_v9, %v228_v1  ;;  %v257_v24 = vrot.slane %v256_v11, 1 }
  0x2f   : > { %v237_v20 = vadd.f32 %v236_v10, %v235_v2  ;;  %v244_v25 = vadd.f32 %v243_v16, %v242_v6  ;;  %v251_v27 = vadd.f32 %v250_v17, %v249_v7  ;;  %v260_v30 = vmul.f32 0.0625, %v531_v14 }
  0x30   : > { %v261_v31 = vmul.f32 0.0625, %v533_v15  ;;  %v258_v33 = vadd.f32 %v257_v24, %v256_v11  ;;  %v262_v34 = vmul.f32 0.0625, %v538_v21  ;;  %v263_v35 = vmul.f32 0.0625, %v540_v22 }
  0x31   : > { %v264_v36 = vmul.f32 0.0625, %v542_v23  ;;  %v265_v37 = vmul.f32 0.0625, %v546_v28  ;;  %v266_v38 = vmul.f32 0.0625, %v548_v29  ;;  %v267_v39 = vmul.f32 0.0625, %v202_v32 }
  0x32   : > { %v268_v40 = vmul.f32 0.0625, %v209_v12  ;;  %v269_v41 = vmul.f32 0.0625, %v216_v13  ;;  %v270_v42 = vmul.f32 0.0625, %v223_v18  ;;  %v271_v43 = vmul.f32 0.0625, %v230_v19 }
  0x33   : > { %v272_v44 = vmul.f32 0.0625, %v237_v20  ;;  %v273_v14 = vmul.f32 0.0625, %v244_v25  ;;  %v274_v45 = vmul.f32 0.0625, %v251_v27  ;;  %v275_v15 = vmul.f32 0.0625, %v258_v33 }
  0x34   : > { %v292_v46 = vcombine.low %v260_v30, %v261_v31  ;;  %v293_v21 = vcombine.low %v262_v34, %v263_v35  ;;  %v294_v47 = vcombine.low %v264_v36, %v265_v37  ;;  %v295_v22 = vcombine.low %v266_v38, %v267_v39 }
  0x35   : > { %v341_v48 = vcombine.low %v268_v40, %v269_v41  ;;  %v342_v28 = vcombine.low %v270_v42, %v271_v43  ;;  %v343_v49 = vcombine.low %v272_v44, %v273_v14  ;;  %v344_v29 = vcombine.low %v274_v45, %v275_v15 }
  0x36   : > { %v302_v23 = vrot.slane %v292_v46, %v518_v26  ;;  %v309_v32 = vrot.slane %v293_v21, %v518_v26  ;;  %v316_v50 = vrot.slane %v294_v47, %v518_v26  ;;  %v323_v51 = vrot.slane %v295_v22, %v518_v26 }
  0x37   : > { %v351_v52 = vrot.slane %v341_v48, %v518_v26  ;;  %v358_v53 = vrot.slane %v342_v28, %v518_v26  ;;  %v365_v54 = vrot.slane %v343_v49, %v518_v26  ;;  %v372_v55 = vrot.slane %v344_v29, %v518_v26 }
  0x38   : > { %v324_v56 = vcombine.low %v302_v23, %v309_v32  ;;  %v325_v57 = vcombine.low %v316_v50, %v323_v51 }
  0x39   : > { %v373_v58 = vcombine.low %v351_v52, %v358_v53  ;;  %v374_v59 = vcombine.low %v365_v54, %v372_v55 }
  0x3a   : > { %v332_v60 = vrot.slane %v324_v56, %v518_v26  ;;  %v339_v61 = vrot.slane %v325_v57, %v518_v26 }
  0x3b   : > { %v381_v62 = vrot.slane %v373_v58, %v518_v26  ;;  %v388_v63 = vrot.slane %v374_v59, %v518_v26 }
  0x3c   : > { %v340_v0 = vcombine.low %v332_v60, %v339_v61 }
  0x3d   : > { %v389_v1 = vcombine.low %v381_v62, %v388_v63 }
  0x3e   : > { %392 = vst [vmem:[%s114_s15] sm:$0xff] %v340_v0 }
  0x3f   : > { %393 = vst [vmem:[%s114_s15 + $0x8] sm:$0xff] %v389_v1 }
  0x40 PF: > { %s11_s6 = sadd.s32 1, %s473_s6  }
  0x41   : > { %p8_p4 = scmp.ge.s32.totalorder %s11_s6, 4  }
  0x43   :  { %10 = sbr.rel (!%p8_p4) target bundleno = 1 (0x1), region = 54 }

// kernel: attention_modules_forward.10
= control target key start
LH: loop header
LB: loop body
LE: loop exit
PB: predicated region body
PF: predicated region fallthrough
CT: control target
= control target key end

     0   :  { %s1948_s12 = smov 0   ;;  %s1950_s13 = smov 0   ;;  %s2318_s0 = inlined_call_operand.vmem [shape: bf16[128,2560], index: 0, kind: input, shape index: {}]   ;;  %s2319_s1 = inlined_call_operand.vmem [shape: bf16[2560,256], index: 1, kind: input, shape index: {}]   ;;  %s2320_s2 = inlined_call_operand.vmem [shape: f32[1,256], index: 2, kind: input, shape index: {}]   ;;  %s2321_s3 = inlined_call_operand.vmem [shape: f32[128,256], index: 3, kind: output, shape index: {}]  }
   0x1   :  { %s1952_s14 = smov 0   ;;  %s1954_s15 = smov 0  }
   0x2   :  { %s1956_s16 = smov 0  }
   0x3 LB: > { %s25_s17 = sadd.s32 1, %s1921_s15  ;;  %p48_p1 = scmp.ne.s32.totalorder %s1913_s13, %s1909_s12  ;;  %s1925_s16 = sphi %s1956_s16, %s13_s16   ;;  %s1921_s15 = sphi %s1954_s15, %s2325_s15   ;;  %s1917_s14 = sphi %s1952_s14, %s2324_s14   ;;  %s1913_s13 = sphi %s1950_s13, %s2323_s13   ;;  %s1909_s12 = sphi %s1948_s12, %s2322_s12  }
   0x4   : > { %p26_p0 = scmp.ge.s32.totalorder %s25_s17, 5  ;;  %p49_p2 = scmp.eq.s32.totalorder %s1925_s16, 0 }
   0x5   : > { %s41_s19 = sadd.s32 1, %s1913_s13  ;;  %p1557_p5 = scmp.ge.s32.totalorder %s1925_s16, 5 }
   0x6   : > { %s2327_s17 = smov (%p26_p0, %s25_s17), 0  ;;  %p50_p3 = por %p49_p2, %p48_p1 }
   0x7   : > { %s37_s18 = ssub.s32 %s1921_s15, %s2327_s17  ;;  %164 = sbr.rel (%p1557_p5) target bundleno = 34 (0x22), region = 20 }
   0x8   : > { %p39_p4 = scmp.eq.s32.totalorder %s37_s18, 0 }
   0xa   : > { %s1983_s20 = scalar_select %p39_p4, %s1913_s13, %s41_s19  }
   0xe   : > { %167 = sbr.rel (!%p50_p3) target bundleno = 34 (0x22), region = 24  ;;  %s169_s21 = sand.u32 (%p50_p3), 1, %s1913_s13  }
   0xf   : > { %s1668_s22 = sshll.u32 (%p50_p3), %s1921_s15, 4  ;;  %s1558_s23 = sshll.u32 (%p50_p3), %s169_s21, 8 }
  0x10   : > { %s1991_s26 = scalar_lea.vmem (%p50_p3), %s2318_s0, %s1668_s22  ;;  %s1996_s27 = scalar_lea.vmem (%p50_p3), [#allocation3], %s1558_s23 }
  0x11   : > { %v190_v0 = vld [vmem:[%s1991_s26] sm:$0xff] (%p50_p3)  ;;  %v192_v1 = vld [vmem:[%s1991_s26 + $0x8] sm:$0xff] (%p50_p3)  ;;  %v194_v2 = vld [vmem:[%s1991_s26 + $0x50] sm:$0xff] (%p50_p3) }
  0x12   : > { %191 = vst [vmem:[%s1996_s27] sm:$0xff] (%p50_p3), %v190_v0  ;;  %193 = vst [vmem:[%s1996_s27 + $0x8] sm:$0xff] (%p50_p3), %v192_v1  ;;  %v196_v3 = vld [vmem:[%s1991_s26 + $0x58] sm:$0xff] (%p50_p3)  ;;  %v198_v4 = vld [vmem:[%s1991_s26 + $0xa0] sm:$0xff] (%p50_p3) }
  0x13   : > { %195 = vst [vmem:[%s1996_s27 + $0x10] sm:$0xff] (%p50_p3), %v194_v2  ;;  %v200_v5 = vld [vmem:[%s1991_s26 + $0xa8] sm:$0xff] (%p50_p3)  ;;  %197 = vst [vmem:[%s1996_s27 + $0x18] sm:$0xff] (%p50_p3), %v196_v3  ;;  %v202_v6 = vld [vmem:[%s1991_s26 + $0xf0] sm:$0xff] (%p50_p3) }
  0x14   : > { %199 = vst [vmem:[%s1996_s27 + $0x20] sm:$0xff] (%p50_p3), %v198_v4  ;;  %201 = vst [vmem:[%s1996_s27 + $0x28] sm:$0xff] (%p50_p3), %v200_v5  ;;  %v204_v7 = vld [vmem:[%s1991_s26 + $0xf8] sm:$0xff] (%p50_p3)  ;;  %v206_v8 = vld [vmem:[%s1991_s26 + $0x140] sm:$0xff] (%p50_p3) }
  0x15   : > { %203 = vst [vmem:[%s1996_s27 + $0x30] sm:$0xff] %v202_v6  ;;  %205 = vst [vmem:[%s1996_s27 + $0x38] sm:$0xff] %v204_v7  ;;  %v208_v9 = vld [vmem:[%s1991_s26 + $0x148] sm:$0xff]  ;;  %v210_v10 = vld [vmem:[%s1991_s26 + $0x190] sm:$0xff] }
  0x16   : > { %207 = vst [vmem:[%s1996_s27 + $0x40] sm:$0xff] %v206_v8  ;;  %v212_v11 = vld [vmem:[%s1991_s26 + $0x198] sm:$0xff]  ;;  %209 = vst [vmem:[%s1996_s27 + $0x48] sm:$0xff] %v208_v9  ;;  %v214_v12 = vld [vmem:[%s1991_s26 + $0x1e0] sm:$0xff] }
  0x17   : > { %211 = vst [vmem:[%s1996_s27 + $0x50] sm:$0xff] %v210_v10  ;;  %213 = vst [vmem:[%s1996_s27 + $0x58] sm:$0xff] %v212_v11  ;;  %v216_v13 = vld [vmem:[%s1991_s26 + $0x1e8] sm:$0xff]  ;;  %v218_v14 = vld [vmem:[%s1991_s26 + $0x230] sm:$0xff] }
  0x18   : > { %215 = vst [vmem:[%s1996_s27 + $0x60] sm:$0xff] %v214_v12  ;;  %217 = vst [vmem:[%s1996_s27 + $0x68] sm:$0xff] %v216_v13  ;;  %v220_v15 = vld [vmem:[%s1991_s26 + $0x238] sm:$0xff]  ;;  %v222_v16 = vld [vmem:[%s1991_s26 + $0x280] sm:$0xff] }
  0x19   : > { %219 = vst [vmem:[%s1996_s27 + $0x70] sm:$0xff] %v218_v14  ;;  %v224_v17 = vld [vmem:[%s1991_s26 + $0x288] sm:$0xff]  ;;  %221 = vst [vmem:[%s1996_s27 + $0x78] sm:$0xff] %v220_v15  ;;  %v226_v18 = vld [vmem:[%s1991_s26 + $0x2d0] sm:$0xff] }
  0x1a   : > { %223 = vst [vmem:[%s1996_s27 + $0x80] sm:$0xff] %v222_v16  ;;  %225 = vst [vmem:[%s1996_s27 + $0x88] sm:$0xff] %v224_v17  ;;  %v228_v19 = vld [vmem:[%s1991_s26 + $0x2d8] sm:$0xff]  ;;  %v230_v20 = vld [vmem:[%s1991_s26 + $0x320] sm:$0xff] }
  0x1b   : > { %227 = vst [vmem:[%s1996_s27 + $0x90] sm:$0xff] %v226_v18  ;;  %229 = vst [vmem:[%s1996_s27 + $0x98] sm:$0xff] %v228_v19  ;;  %v232_v21 = vld [vmem:[%s1991_s26 + $0x328] sm:$0xff]  ;;  %v234_v22 = vld [vmem:[%s1991_s26 + $0x370] sm:$0xff] }
  0x1c   : > { %231 = vst [vmem:[%s1996_s27 + $0xa0] sm:$0xff] %v230_v20  ;;  %v236_v23 = vld [vmem:[%s1991_s26 + $0x378] sm:$0xff]  ;;  %233 = vst [vmem:[%s1996_s27 + $0xa8] sm:$0xff] %v232_v21  ;;  %v238_v24 = vld [vmem:[%s1991_s26 + $0x3c0] sm:$0xff] }
  0x1d   : > { %235 = vst [vmem:[%s1996_s27 + $0xb0] sm:$0xff] %v234_v22  ;;  %237 = vst [vmem:[%s1996_s27 + $0xb8] sm:$0xff] %v236_v23  ;;  %v240_v25 = vld [vmem:[%s1991_s26 + $0x3c8] sm:$0xff]  ;;  %v242_v26 = vld [vmem:[%s1991_s26 + $0x410] sm:$0xff] }
  0x1e   : > { %239 = vst [vmem:[%s1996_s27 + $0xc0] sm:$0xff] %v238_v24  ;;  %241 = vst [vmem:[%s1996_s27 + $0xc8] sm:$0xff] %v240_v25  ;;  %v244_v27 = vld [vmem:[%s1991_s26 + $0x418] sm:$0xff]  ;;  %v246_v28 = vld [vmem:[%s1991_s26 + $0x460] sm:$0xff] }
  0x1f   : > { %243 = vst [vmem:[%s1996_s27 + $0xd0] sm:$0xff] %v242_v26  ;;  %v248_v29 = vld [vmem:[%s1991_s26 + $0x468] sm:$0xff]  ;;  %245 = vst [vmem:[%s1996_s27 + $0xd8] sm:$0xff] %v244_v27  ;;  %v250_v30 = vld [vmem:[%s1991_s26 + $0x4b0] sm:$0xff] }
  0x20   : > { %247 = vst [vmem:[%s1996_s27 + $0xe0] sm:$0xff] %v246_v28  ;;  %249 = vst [vmem:[%s1996_s27 + $0xe8] sm:$0xff] %v248_v29  ;;  %v252_v31 = vld [vmem:[%s1991_s26 + $0x4b8] sm:$0xff] }
  0x21   : > { %251 = vst [vmem:[%s1996_s27 + $0xf0] sm:$0xff] %v250_v30  ;;  %253 = vst [vmem:[%s1996_s27 + $0xf8] sm:$0xff] %v252_v31 }
  0x22 PF: > { %p1561_p6 = scmp.ge.s32.totalorder %s1925_s16, 1  ;;  %p273_p7 = scmp.lt.s32.totalorder %s1925_s16, 6 }
  0x24   : > { %p274_p8 = pnand %p1561_p6, %p273_p7 }
  0x25   : > { %s280_s28 = sand.u32 (!%p274_p8), 1, %s1909_s12   ;;  %s1563_s29 = sshll.u32 (!%p274_p8), %s1917_s14, 6 }
  0x26   : > { %277 = sbr.rel (%p274_p8) target bundleno = 417 (0x1a1), region = 51  ;;  %s1562_s30 = sshll.u32 (!%p274_p8), %s280_s28, 8 }
  0x27   : > { %p326_p9 = scmp.lt.s32.totalorder (!%p274_p8), %s1563_s29, 319  ;;  %s2068_s8 = scalar_lea.vmem (!%p274_p8), [#allocation3], %s1562_s30 }
  0x28   : > { %p1566_p10 = scmp.ne.s32.totalorder (!%p274_p8), %s1917_s14, 0 }
  0x2d   : > { %s2329_s29 = smov (!%p326_p9, %s1563_s29), 319  ;;  %356 = sbr.rel (%p1566_p10) target bundleno = 63 (0x3f), region = 59 }
  0x2e   : > { %s1669_s4 = sshll.u32 %s2329_s29, 3  ;;  %v1927_v32 = vmov (!%p1566_p10), 0.0  }
  0x2f   : > { %s2066_s7 = scalar_lea.vmem %s2319_s1, %s1669_s4  ;;  %357 = vst [vmem:[#allocation2] sm:$0xff] (!%p1566_p10), %v1927_v32  ;;  %358 = vst [vmem:[#allocation2 + $0x8] sm:$0xff] (!%p1566_p10), %v1927_v32 }
  0x30   : > { %359 = vst [vmem:[#allocation2 + $0x10] sm:$0xff] (!%p1566_p10), %v1927_v32  ;;  %360 = vst [vmem:[#allocation2 + $0x18] sm:$0xff] (!%p1566_p10), %v1927_v32 }
  0x31   : > { %361 = vst [vmem:[#allocation2 + $0x20] sm:$0xff] (!%p1566_p10), %v1927_v32  ;;  %362 = vst [vmem:[#allocation2 + $0x28] sm:$0xff] (!%p1566_p10), %v1927_v32 }
  0x32   : > { %363 = vst [vmem:[#allocation2 + $0x30] sm:$0xff] (!%p1566_p10), %v1927_v32  ;;  %364 = vst [vmem:[#allocation2 + $0x38] sm:$0xff] (!%p1566_p10), %v1927_v32 }
  0x33   : > { %365 = vst [vmem:[#allocation2 + $0x40] sm:$0xff] (!%p1566_p10), %v1927_v32  ;;  %366 = vst [vmem:[#allocation2 + $0x48] sm:$0xff] (!%p1566_p10), %v1927_v32 }
  0x34   : > { %367 = vst [vmem:[#allocation2 + $0x50] sm:$0xff] %v1927_v32  ;;  %368 = vst [vmem:[#allocation2 + $0x58] sm:$0xff] %v1927_v32 }
  0x35   : > { %369 = vst [vmem:[#allocation2 + $0x60] sm:$0xff] %v1927_v32  ;;  %370 = vst [vmem:[#allocation2 + $0x68] sm:$0xff] %v1927_v32 }
  0x36   : > { %371 = vst [vmem:[#allocation2 + $0x70] sm:$0xff] %v1927_v32  ;;  %372 = vst [vmem:[#allocation2 + $0x78] sm:$0xff] %v1927_v32 }
  0x37   : > { %373 = vst [vmem:[#allocation2 + $0x80] sm:$0xff] %v1927_v32  ;;  %374 = vst [vmem:[#allocation2 + $0x88] sm:$0xff] %v1927_v32 }
  0x38   : > { %375 = vst [vmem:[#allocation2 + $0x90] sm:$0xff] %v1927_v32  ;;  %376 = vst [vmem:[#allocation2 + $0x98] sm:$0xff] %v1927_v32 }
  0x39   : > { %377 = vst [vmem:[#allocation2 + $0xa0] sm:$0xff] %v1927_v32  ;;  %378 = vst [vmem:[#allocation2 + $0xa8] sm:$0xff] %v1927_v32 }
  0x3a   : > { %379 = vst [vmem:[#allocation2 + $0xb0] sm:$0xff] %v1927_v32  ;;  %380 = vst [vmem:[#allocation2 + $0xb8] sm:$0xff] %v1927_v32 }
  0x3b   : > { %381 = vst [vmem:[#allocation2 + $0xc0] sm:$0xff] %v1927_v32  ;;  %382 = vst [vmem:[#allocation2 + $0xc8] sm:$0xff] %v1927_v32 }
  0x3c   : > { %383 = vst [vmem:[#allocation2 + $0xd0] sm:$0xff] %v1927_v32  ;;  %384 = vst [vmem:[#allocation2 + $0xd8] sm:$0xff] %v1927_v32 }
  0x3d   : > { %385 = vst [vmem:[#allocation2 + $0xe0] sm:$0xff] %v1927_v32  ;;  %386 = vst [vmem:[#allocation2 + $0xe8] sm:$0xff] %v1927_v32 }
  0x3e   : > { %387 = vst [vmem:[#allocation2 + $0xf0] sm:$0xff] %v1927_v32  ;;  %388 = vst [vmem:[#allocation2 + $0xf8] sm:$0xff] %v1927_v32 }
  0x3f PF: > { %v1743_v33 = vld [vmem:[%s2066_s7 + $0x4] ss:$8 sps:$4 sm:$0xff]   ;;  %v1747_v35 = vld [vmem:[%s2066_s7] ss:$8 sps:$4 sm:$0xff]   ;;  %v1749_v37 = vld [vmem:[%s2066_s7 + $0x14] ss:$8 sps:$4 sm:$0xff]  }
  0x40   : > { %v1745_v34 = vld [vmem:[%s2066_s7 + $0x104] ss:$8 sps:$4 sm:$0xff]   ;;  %997 = vmatprep.subr.bf16.mxu1 %v1743_v33  ;;  %v1748_v36 = vld [vmem:[%s2066_s7 + $0x100] ss:$8 sps:$4 sm:$0xff]   ;;  %v1751_v38 = vld [vmem:[%s2066_s7 + $0x114] ss:$8 sps:$4 sm:$0xff]  }
  0x41   : > { %1110 = vmatprep.subr.bf16.mxu0 %v1745_v34  ;;  %998 = vmatpush1.bf16.msra.mxu1 %v1747_v35  ;;  %v1753_v39 = vld [vmem:[%s2066_s7 + $0x10] ss:$8 sps:$4 sm:$0xff]   ;;  %v1755_v41 = vld [vmem:[%s2066_s7 + $0x24] ss:$8 sps:$4 sm:$0xff]   ;;  %v1759_v43 = vld [vmem:[%s2066_s7 + $0x20] ss:$8 sps:$4 sm:$0xff]  }
  0x42   : > { %1111 = vmatpush1.bf16.msra.mxu0 %v1748_v36  ;;  %999 = vmatprep.subr.bf16.mxu1 %v1749_v37  ;;  %v1754_v40 = vld [vmem:[%s2066_s7 + $0x110] ss:$8 sps:$4 sm:$0xff]   ;;  %v1757_v42 = vld [vmem:[%s2066_s7 + $0x124] ss:$8 sps:$4 sm:$0xff]   ;;  %v1760_v44 = vld [vmem:[%s2066_s7 + $0x120] ss:$8 sps:$4 sm:$0xff]  }
  0x43   : > { %1112 = vmatprep.subr.bf16.mxu0 %v1751_v38  ;;  %v1761_v45 = vld [vmem:[%s2066_s7 + $0x34] ss:$8 sps:$4 sm:$0xff]   ;;  %v1765_v47 = vld [vmem:[%s2066_s7 + $0x30] ss:$8 sps:$4 sm:$0xff]   ;;  %v1767_v49 = vld [vmem:[%s2066_s7 + $0x44] ss:$8 sps:$4 sm:$0xff]  }
  0x44   : > { %v1763_v46 = vld [vmem:[%s2066_s7 + $0x134] ss:$8 sps:$4 sm:$0xff]   ;;  %v1766_v48 = vld [vmem:[%s2066_s7 + $0x130] ss:$8 sps:$4 sm:$0xff]   ;;  %v1769_v50 = vld [vmem:[%s2066_s7 + $0x144] ss:$8 sps:$4 sm:$0xff]  }
  0x45   : > { %1000 = vmatpush1.bf16.msra.mxu1 %v1753_v39  ;;  %v1771_v51 = vld [vmem:[%s2066_s7 + $0x40] ss:$8 sps:$4 sm:$0xff]   ;;  %v1773_v53 = vld [vmem:[%s2066_s7 + $0x54] ss:$8 sps:$4 sm:$0xff]   ;;  %v1777_v55 = vld [vmem:[%s2066_s7 + $0x50] ss:$8 sps:$4 sm:$0xff]  }
  0x46   : > { %1113 = vmatpush1.bf16.msra.mxu0 %v1754_v40  ;;  %1001 = vmatprep.subr.bf16.mxu1 %v1755_v41  ;;  %v1772_v52 = vld [vmem:[%s2066_s7 + $0x140] ss:$8 sps:$4 sm:$0xff]   ;;  %v1775_v54 = vld [vmem:[%s2066_s7 + $0x154] ss:$8 sps:$4 sm:$0xff]   ;;  %v1778_v56 = vld [vmem:[%s2066_s7 + $0x150] ss:$8 sps:$4 sm:$0xff]  }
  0x47   : > { %1114 = vmatprep.subr.bf16.mxu0 %v1757_v42  ;;  %v1779_v57 = vld [vmem:[%s2066_s7 + $0x64] ss:$8 sps:$4 sm:$0xff]   ;;  %v1783_v59 = vld [vmem:[%s2066_s7 + $0x60] ss:$8 sps:$4 sm:$0xff]   ;;  %v1785_v61 = vld [vmem:[%s2066_s7 + $0x74] ss:$8 sps:$4 sm:$0xff]  }
  0x48   : > { %v1781_v58 = vld [vmem:[%s2066_s7 + $0x164] ss:$8 sps:$4 sm:$0xff]   ;;  %v1784_v60 = vld [vmem:[%s2066_s7 + $0x160] ss:$8 sps:$4 sm:$0xff]   ;;  %v1787_v62 = vld [vmem:[%s2066_s7 + $0x174] ss:$8 sps:$4 sm:$0xff]  }
  0x49   : > { %1002 = vmatpush1.bf16.msra.mxu1 %v1759_v43  ;;  %v1789_v63 = vld [vmem:[%s2066_s7 + $0x70] ss:$8 sps:$4 sm:$0xff]   ;;  %v1791_v1 = vld [vmem:[%s2066_s7 + $0x84] ss:$8 sps:$4 sm:$0xff]   ;;  %v1795_v3 = vld [vmem:[%s2066_s7 + $0x80] ss:$8 sps:$4 sm:$0xff]  }
  0x4a   : > { %1115 = vmatpush1.bf16.msra.mxu0 %v1760_v44  ;;  %1003 = vmatprep.subr.bf16.mxu1 %v1761_v45  ;;  %v1790_v0 = vld [vmem:[%s2066_s7 + $0x170] ss:$8 sps:$4 sm:$0xff]   ;;  %v1793_v2 = vld [vmem:[%s2066_s7 + $0x184] ss:$8 sps:$4 sm:$0xff]   ;;  %v1796_v4 = vld [vmem:[%s2066_s7 + $0x180] ss:$8 sps:$4 sm:$0xff]  }
  0x4b   : > { %1116 = vmatprep.subr.bf16.mxu0 %v1763_v46  ;;  %v1797_v5 = vld [vmem:[%s2066_s7 + $0x94] ss:$8 sps:$4 sm:$0xff]   ;;  %v1801_v7 = vld [vmem:[%s2066_s7 + $0x90] ss:$8 sps:$4 sm:$0xff]   ;;  %v1803_v9 = vld [vmem:[%s2066_s7 + $0xa4] ss:$8 sps:$4 sm:$0xff]  }
  0x4c   : > { %v1799_v6 = vld [vmem:[%s2066_s7 + $0x194] ss:$8 sps:$4 sm:$0xff]   ;;  %v1802_v8 = vld [vmem:[%s2066_s7 + $0x190] ss:$8 sps:$4 sm:$0xff]   ;;  %v1805_v10 = vld [vmem:[%s2066_s7 + $0x1a4] ss:$8 sps:$4 sm:$0xff]  }
  0x4d   : > { %1004 = vmatpush1.bf16.msra.mxu1 %v1765_v47  ;;  %v1807_v11 = vld [vmem:[%s2066_s7 + $0xa0] ss:$8 sps:$4 sm:$0xff]   ;;  %v1809_v13 = vld [vmem:[%s2066_s7 + $0xb4] ss:$8 sps:$4 sm:$0xff]   ;;  %v1813_v15 = vld [vmem:[%s2066_s7 + $0xb0] ss:$8 sps:$4 sm:$0xff]  }
  0x4e   : > { %1117 = vmatpush1.bf16.msra.mxu0 %v1766_v48  ;;  %1005 = vmatprep.subr.bf16.mxu1 %v1767_v49  ;;  %v1808_v12 = vld [vmem:[%s2066_s7 + $0x1a0] ss:$8 sps:$4 sm:$0xff]   ;;  %v1811_v14 = vld [vmem:[%s2066_s7 + $0x1b4] ss:$8 sps:$4 sm:$0xff]   ;;  %v1814_v16 = vld [vmem:[%s2066_s7 + $0x1b0] ss:$8 sps:$4 sm:$0xff]  }
  0x4f   : > { %1118 = vmatprep.subr.bf16.mxu0 %v1769_v50  ;;  %v1815_v17 = vld [vmem:[%s2066_s7 + $0xc4] ss:$8 sps:$4 sm:$0xff]   ;;  %v1819_v21 = vld [vmem:[%s2066_s7 + $0xc0] ss:$8 sps:$4 sm:$0xff]   ;;  %v1821_v23 = vld [vmem:[%s2066_s7 + $0xd4] ss:$8 sps:$4 sm:$0xff]  }
  0x50   : > { %v1841_v18 = vld [vmem:[%s2068_s8 + $0x4] ss:$16 sps:$4 sm:$0xff]   ;;  %v1844_v20 = vld [vmem:[%s2068_s8 + $0xc] ss:$16 sps:$4 sm:$0xff]   ;;  %v1820_v22 = vld [vmem:[%s2066_s7 + $0x1c0] ss:$8 sps:$4 sm:$0xff]  }
  0x51   : > { %1006 = vmatpush1.bf16.msra.mxu1 %v1771_v51  ;;  %v1817_v19 = vld [vmem:[%s2066_s7 + $0x1c4] ss:$8 sps:$4 sm:$0xff]   ;;  %1029 = vmatprep.mubr.bf16.mxu1 %v1841_v18  ;;  %v1823_v24 = vld [vmem:[%s2066_s7 + $0x1d4] ss:$8 sps:$4 sm:$0xff]   ;;  %v1825_v25 = vld [vmem:[%s2066_s7 + $0xd0] ss:$8 sps:$4 sm:$0xff]  }
  0x52   : > { %1119 = vmatpush1.bf16.msra.mxu0 %v1772_v52  ;;  %1007 = vmatprep.subr.bf16.mxu1 %v1773_v53  ;;  %v1826_v26 = vld [vmem:[%s2066_s7 + $0x1d0] ss:$8 sps:$4 sm:$0xff]   ;;  %v1827_v27 = vld [vmem:[%s2066_s7 + $0xe4] ss:$8 sps:$4 sm:$0xff]   ;;  %v1831_v29 = vld [vmem:[%s2066_s7 + $0xe0] ss:$8 sps:$4 sm:$0xff]  }
  0x53   : > { %1120 = vmatprep.subr.bf16.mxu0 %v1775_v54  ;;  %1142 = vmatprep.mubr.bf16.mxu0 %v1844_v20  ;;  %v1829_v28 = vld [vmem:[%s2066_s7 + $0x1e4] ss:$8 sps:$4 sm:$0xff]   ;;  %v1832_v30 = vld [vmem:[%s2066_s7 + $0x1e0] ss:$8 sps:$4 sm:$0xff]   ;;  %v1833_v31 = vld [vmem:[%s2066_s7 + $0xf4] ss:$8 sps:$4 sm:$0xff]  }
  0x54   : > { %v1835_v32 = vld [vmem:[%s2066_s7 + $0x1f4] ss:$8 sps:$4 sm:$0xff]   ;;  %v1837_v33 = vld [vmem:[%s2066_s7 + $0xf0] ss:$8 sps:$4 sm:$0xff]   ;;  %p1663_p11 = scmp.ne.s32.totalorder %s1917_s14, 4 }
  0x55   : > { %1008 = vmatpush1.bf16.msra.mxu1 %v1777_v55  ;;  %v1838_v34 = vld [vmem:[%s2066_s7 + $0x1f0] ss:$8 sps:$4 sm:$0xff]   ;;  %v1845_v37 = vld [vmem:[%s2068_s8 + $0x24] ss:$16 sps:$4 sm:$0xff]   ;;  %v1847_v38 = vld [vmem:[%s2068_s8 + $0x2c] ss:$16 sps:$4 sm:$0xff]  }
  0x56   : > { %1121 = vmatpush1.bf16.msra.mxu0 %v1778_v56  ;;  %1009 = vmatprep.subr.bf16.mxu1 %v1779_v57  ;;  %v1839_v35 = vld [vmem:[%s2068_s8] ss:$16 sps:$4 sm:$0xff]   ;;  %v1842_v36 = vld [vmem:[%s2068_s8 + $0x8] ss:$16 sps:$4 sm:$0xff]   ;;  %v1851_v41 = vld [vmem:[%s2068_s8 + $0x44] ss:$16 sps:$4 sm:$0xff]  }
  0x57   : > { %1122 = vmatprep.subr.bf16.mxu0 %v1781_v58  ;;  %v1849_v39 = vld [vmem:[%s2068_s8 + $0x20] ss:$16 sps:$4 sm:$0xff]   ;;  %v1850_v40 = vld [vmem:[%s2068_s8 + $0x28] ss:$16 sps:$4 sm:$0xff]   ;;  %v1853_v42 = vld [vmem:[%s2068_s8 + $0x4c] ss:$16 sps:$4 sm:$0xff]  }
  0x58   : > { %v1855_v43 = vld [vmem:[%s2068_s8 + $0x40] ss:$16 sps:$4 sm:$0xff]   ;;  %v1856_v44 = vld [vmem:[%s2068_s8 + $0x48] ss:$16 sps:$4 sm:$0xff]   ;;  %v1857_v45 = vld [vmem:[%s2068_s8 + $0x64] ss:$16 sps:$4 sm:$0xff]  }
  0x59   : > { %1010 = vmatpush1.bf16.msra.mxu1 %v1783_v59  ;;  %v1859_v46 = vld [vmem:[%s2068_s8 + $0x6c] ss:$16 sps:$4 sm:$0xff]   ;;  %v1861_v47 = vld [vmem:[%s2068_s8 + $0x60] ss:$16 sps:$4 sm:$0xff]   ;;  %v1862_v48 = vld [vmem:[%s2068_s8 + $0x68] ss:$16 sps:$4 sm:$0xff]  }
  0x5a   : > { %1123 = vmatpush1.bf16.msra.mxu0 %v1784_v60  ;;  %1011 = vmatprep.subr.bf16.mxu1 %v1785_v61  ;;  %v1863_v49 = vld [vmem:[%s2068_s8 + $0x84] ss:$16 sps:$4 sm:$0xff]   ;;  %v1865_v50 = vld [vmem:[%s2068_s8 + $0x8c] ss:$16 sps:$4 sm:$0xff]   ;;  %v1867_v51 = vld [vmem:[%s2068_s8 + $0x80] ss:$16 sps:$4 sm:$0xff]  }
  0x5b   : > { %1124 = vmatprep.subr.bf16.mxu0 %v1787_v62  ;;  %v1868_v52 = vld [vmem:[%s2068_s8 + $0x88] ss:$16 sps:$4 sm:$0xff]   ;;  %v1869_v53 = vld [vmem:[%s2068_s8 + $0xa4] ss:$16 sps:$4 sm:$0xff]   ;;  %v1871_v54 = vld [vmem:[%s2068_s8 + $0xac] ss:$16 sps:$4 sm:$0xff]  }
  0x5c   : > { %v1873_v55 = vld [vmem:[%s2068_s8 + $0xa0] ss:$16 sps:$4 sm:$0xff]   ;;  %v1874_v56 = vld [vmem:[%s2068_s8 + $0xa8] ss:$16 sps:$4 sm:$0xff]   ;;  %v1875_v57 = vld [vmem:[%s2068_s8 + $0xc4] ss:$16 sps:$4 sm:$0xff]  }
  0x5d   : > { %1012 = vmatpush1.bf16.msra.mxu1 %v1789_v63  ;;  %v1877_v58 = vld [vmem:[%s2068_s8 + $0xcc] ss:$16 sps:$4 sm:$0xff]   ;;  %v1879_v59 = vld [vmem:[%s2068_s8 + $0xc0] ss:$16 sps:$4 sm:$0xff]   ;;  %v1880_v60 = vld [vmem:[%s2068_s8 + $0xc8] ss:$16 sps:$4 sm:$0xff]  }
  0x5e   : > { %1125 = vmatpush1.bf16.msra.mxu0 %v1790_v0  ;;  %1013 = vmatprep.subr.bf16.mxu1 %v1791_v1  ;;  %v1881_v61 = vld [vmem:[%s2068_s8 + $0xe4] ss:$16 sps:$4 sm:$0xff]   ;;  %v1883_v62 = vld [vmem:[%s2068_s8 + $0xec] ss:$16 sps:$4 sm:$0xff]   ;;  %v1885_v63 = vld [vmem:[%s2068_s8 + $0xe0] ss:$16 sps:$4 sm:$0xff]  }
  0x5f   : > { %1126 = vmatprep.subr.bf16.mxu0 %v1793_v2  ;;  %v1886_v0 = vld [vmem:[%s2068_s8 + $0xe8] ss:$16 sps:$4 sm:$0xff]   ;;  %v389_v2 = vld [vmem:[#allocation2] sm:$0xff] }
  0x61   : > { %1014 = vmatpush1.bf16.msra.mxu1 %v1795_v3 }
  0x62   : > { %1127 = vmatpush1.bf16.msra.mxu0 %v1796_v4  ;;  %1015 = vmatprep.subr.bf16.mxu1 %v1797_v5 }
  0x63   : > { %1128 = vmatprep.subr.bf16.mxu0 %v1799_v6  ;;  %v390_v6 = vld [vmem:[#allocation2 + $0x8] sm:$0xff] }
  0x65   : > { %1016 = vmatpush1.bf16.msra.mxu1 %v1801_v7 }
  0x66   : > { %1129 = vmatpush1.bf16.msra.mxu0 %v1802_v8  ;;  %1017 = vmatprep.subr.bf16.mxu1 %v1803_v9 }
  0x67   : > { %1130 = vmatprep.subr.bf16.mxu0 %v1805_v10  ;;  %v391_v10 = vld [vmem:[#allocation2 + $0x10] sm:$0xff] }
  0x69   : > { %1018 = vmatpush1.bf16.msra.mxu1 %v1807_v11 }
  0x6a   : > { %1131 = vmatpush1.bf16.msra.mxu0 %v1808_v12  ;;  %1019 = vmatprep.subr.bf16.mxu1 %v1809_v13 }
  0x6b   : > { %1132 = vmatprep.subr.bf16.mxu0 %v1811_v14 }
  0x6d   : > { %1020 = vmatpush1.bf16.msra.mxu1 %v1813_v15  ;;  %v392_v15 = vld [vmem:[#allocation2 + $0x18] sm:$0xff] }
  0x6e   : > { %1133 = vmatpush1.bf16.msra.mxu0 %v1814_v16  ;;  %1021 = vmatprep.subr.bf16.mxu1 %v1815_v17 }
  0x6f   : > { %1134 = vmatprep.subr.bf16.mxu0 %v1817_v19 }
  0x71   : > { %1022 = vmatpush1.bf16.msra.mxu1 %v1819_v21 }
  0x72   : > { %1135 = vmatpush1.bf16.msra.mxu0 %v1820_v22  ;;  %1023 = vmatprep.subr.bf16.mxu1 %v1821_v23  ;;  %v393_v22 = vld [vmem:[#allocation2 + $0x20] sm:$0xff] }
  0x73   : > { %1136 = vmatprep.subr.bf16.mxu0 %v1823_v24 }
  0x75   : > { %1024 = vmatpush1.bf16.msra.mxu1 %v1825_v25 }
  0x76   : > { %1137 = vmatpush1.bf16.msra.mxu0 %v1826_v26  ;;  %1025 = vmatprep.subr.bf16.mxu1 %v1827_v27  ;;  %v394_v26 = vld [vmem:[#allocation2 + $0x28] sm:$0xff] }
  0x77   : > { %1138 = vmatprep.subr.bf16.mxu0 %v1829_v28 }
  0x79   : > { %1026 = vmatpush1.bf16.msra.mxu1 %v1831_v29 }
  0x7a   : > { %1139 = vmatpush1.bf16.msra.mxu0 %v1832_v30  ;;  %1027 = vmatprep.subr.bf16.mxu1 %v1833_v31  ;;  %v395_v30 = vld [vmem:[#allocation2 + $0x30] sm:$0xff] }
  0x7b   : > { %1140 = vmatprep.subr.bf16.mxu0 %v1835_v32 }
  0x7d   : > { %1028 = vmatpush1.bf16.msra.mxu1 %v1837_v33 }
  0x7e   : > { %1141 = vmatpush1.bf16.msra.mxu0 %v1838_v34 }
  0x80   : > { %1030 = vmatmul.mubr.bf16.vlgmr.msra.gmra.mrb[0].mxu1 %v1839_v35  ;;  %v396_v35 = vld [vmem:[#allocation2 + $0x38] sm:$0xff] }
  0x81   : > { %1143 = vmatmul.mubr.bf16.vlgmr.msra.gmra.mrb[0].mxu0 %v1842_v36  ;;  %1039 = vmatprep.mubr.bf16.mxu1 %v1845_v37 }
  0x82   : > { %1152 = vmatprep.mubr.bf16.mxu0 %v1847_v38 }
  0x88   : > { %1040 = vmatmul.mubr.bf16.gmra.mrb[4].mxu1 %v1849_v39 }
  0x89   : > { %1153 = vmatmul.mubr.bf16.gmra.mrb[4].mxu0 %v1850_v40  ;;  %1049 = vmatprep.mubr.bf16.mxu1 %v1851_v41 }
  0x8a   : > { %1162 = vmatprep.mubr.bf16.mxu0 %v1853_v42  ;;  %v397_v42 = vld [vmem:[#allocation2 + $0x40] sm:$0xff] }
  0x90   : > { %1050 = vmatmul.mubr.bf16.gmra.mrb[8].mxu1 %v1855_v43 }
  0x91   : > { %1163 = vmatmul.mubr.bf16.gmra.mrb[8].mxu0 %v1856_v44  ;;  %1059 = vmatprep.mubr.bf16.mxu1 %v1857_v45 }
  0x92   : > { %1172 = vmatprep.mubr.bf16.mxu0 %v1859_v46  ;;  %v398_v46 = vld [vmem:[#allocation2 + $0x48] sm:$0xff] }
  0x98   : > { %1060 = vmatmul.mubr.bf16.gmra.mrb[12].mxu1 %v1861_v47 }
  0x99   : > { %1173 = vmatmul.mubr.bf16.gmra.mrb[12].mxu0 %v1862_v48  ;;  %1069 = vmatprep.mubr.bf16.mxu1 %v1863_v49 }
  0x9a   : > { %1182 = vmatprep.mubr.bf16.mxu0 %v1865_v50  ;;  %v399_v50 = vld [vmem:[#allocation2 + $0x50] sm:$0xff] }
  0xa0   : > { %1070 = vmatmul.mubr.bf16.gmra.mrb[16].mxu1 %v1867_v51 }
  0xa1   : > { %1183 = vmatmul.mubr.bf16.gmra.mrb[16].mxu0 %v1868_v52  ;;  %1079 = vmatprep.mubr.bf16.mxu1 %v1869_v53 }
  0xa2   : > { %1192 = vmatprep.mubr.bf16.mxu0 %v1871_v54 }
  0xa8   : > { %1080 = vmatmul.mubr.bf16.gmra.mrb[20].mxu1 %v1873_v55  ;;  %v400_v55 = vld [vmem:[#allocation2 + $0x58] sm:$0xff] }
  0xa9   : > { %1193 = vmatmul.mubr.bf16.gmra.mrb[20].mxu0 %v1874_v56  ;;  %1089 = vmatprep.mubr.bf16.mxu1 %v1875_v57 }
  0xaa   : > { %1202 = vmatprep.mubr.bf16.mxu0 %v1877_v58 }
  0xb0   : > { %1090 = vmatmul.mubr.bf16.gmra.mrb[24].mxu1 %v1879_v59 }
  0xb1   : > { %1203 = vmatmul.mubr.bf16.gmra.mrb[24].mxu0 %v1880_v60  ;;  %1099 = vmatprep.mubr.bf16.mxu1 %v1881_v61 }
  0xb2   : > { %1212 = vmatprep.mubr.bf16.mxu0 %v1883_v62  ;;  %v401_v62 = vld [vmem:[#allocation2 + $0x60] sm:$0xff] }
  0xb8   : > { %1100 = vmatmul.mubr.bf16.gmra.mrb[28].mxu1 %v1885_v63 }
  0xb9   : > { %1213 = vmatmul.mubr.bf16.gmra.mrb[28].mxu0 %v1886_v0 }
 0x153   : > { %v1031_v1 = vpop.f32.mrb[0].mxu1 }
 0x154   : > { %v1144_v3 = vpop.f32.mrb[0].mxu0  ;;  %v1033_v5 = vpop.f32.mrb[1].mxu1 }
 0x155   : > { %v1145_v4 = vadd.f32 %v1144_v3, %v1031_v1  ;;  %v1146_v7 = vpop.f32.mrb[1].mxu0  ;;  %v1035_v9 = vpop.f32.mrb[2].mxu1 }
 0x156   : > { %v1147_v8 = vadd.f32 %v1146_v7, %v1033_v5  ;;  %v1148_v11 = vpop.f32.mrb[2].mxu0  ;;  %v1037_v14 = vpop.f32.mrb[3].mxu1 }
 0x157   : > { %v1223_v12 = vadd.f32 %v1145_v4, %v389_v2  ;;  %v1149_v13 = vadd.f32 %v1148_v11, %v1035_v9  ;;  %v1150_v16 = vpop.f32.mrb[3].mxu0  ;;  %v402_v2 = vld [vmem:[#allocation2 + $0x68] sm:$0xff]  ;;  %v404_v11 = vld [vmem:[#allocation2 + $0x78] sm:$0xff] }
 0x158   : > { %v1224_v17 = vadd.f32 %v1147_v8, %v390_v6  ;;  %v1151_v18 = vadd.f32 %v1150_v16, %v1037_v14  ;;  %v403_v6 = vld [vmem:[#allocation2 + $0x70] sm:$0xff] }
 0x159   : > { %1255 = vst [vmem:[#allocation2] sm:$0xff] %v1223_v12  ;;  %v1225_v19 = vadd.f32 %v1149_v13, %v391_v10 }
 0x15a   : > { %1256 = vst [vmem:[#allocation2 + $0x8] sm:$0xff] %v1224_v17  ;;  %v1226_v20 = vadd.f32 %v1151_v18, %v392_v15  ;;  %v405_v18 = vld [vmem:[#allocation2 + $0x80] sm:$0xff] }
 0x15b   : > { %1257 = vst [vmem:[#allocation2 + $0x10] sm:$0xff] %v1225_v19  ;;  %v1041_v21 = vpop.f32.mrb[4].mxu1 }
 0x15c   : > { %1258 = vst [vmem:[#allocation2 + $0x18] sm:$0xff] %v1226_v20  ;;  %v1154_v23 = vpop.f32.mrb[4].mxu0  ;;  %v1043_v25 = vpop.f32.mrb[5].mxu1 }
 0x15d   : > { %v1155_v24 = vadd.f32 %v1154_v23, %v1041_v21  ;;  %v1156_v27 = vpop.f32.mrb[5].mxu0  ;;  %v1045_v29 = vpop.f32.mrb[6].mxu1 }
 0x15e   : > { %v1157_v28 = vadd.f32 %v1156_v27, %v1043_v25  ;;  %v1158_v31 = vpop.f32.mrb[6].mxu0  ;;  %v1047_v34 = vpop.f32.mrb[7].mxu1 }
 0x15f   : > { %v1227_v32 = vadd.f32 %v1155_v24, %v393_v22  ;;  %v1159_v33 = vadd.f32 %v1158_v31, %v1045_v29  ;;  %v1160_v36 = vpop.f32.mrb[7].mxu0  ;;  %v406_v22 = vld [vmem:[#allocation2 + $0x88] sm:$0xff]  ;;  %v408_v31 = vld [vmem:[#allocation2 + $0x98] sm:$0xff] }
 0x160   : > { %v1228_v37 = vadd.f32 %v1157_v28, %v394_v26  ;;  %v1161_v38 = vadd.f32 %v1160_v36, %v1047_v34  ;;  %v407_v26 = vld [vmem:[#allocation2 + $0x90] sm:$0xff] }
 0x161   : > { %1259 = vst [vmem:[#allocation2 + $0x20] sm:$0xff] %v1227_v32  ;;  %v1229_v39 = vadd.f32 %v1159_v33, %v395_v30 }
 0x162   : > { %1260 = vst [vmem:[#allocation2 + $0x28] sm:$0xff] %v1228_v37  ;;  %v1230_v40 = vadd.f32 %v1161_v38, %v396_v35  ;;  %v409_v38 = vld [vmem:[#allocation2 + $0xa0] sm:$0xff] }
 0x163   : > { %1261 = vst [vmem:[#allocation2 + $0x30] sm:$0xff] %v1229_v39  ;;  %v1051_v41 = vpop.f32.mrb[8].mxu1 }
 0x164   : > { %1262 = vst [vmem:[#allocation2 + $0x38] sm:$0xff] %v1230_v40  ;;  %v1164_v43 = vpop.f32.mrb[8].mxu0  ;;  %v1053_v45 = vpop.f32.mrb[9].mxu1 }
 0x165   : > { %v1165_v44 = vadd.f32 %v1164_v43, %v1051_v41  ;;  %v1166_v47 = vpop.f32.mrb[9].mxu0  ;;  %v1055_v49 = vpop.f32.mrb[10].mxu1 }
 0x166   : > { %v1167_v48 = vadd.f32 %v1166_v47, %v1053_v45  ;;  %v1168_v51 = vpop.f32.mrb[10].mxu0  ;;  %v1057_v54 = vpop.f32.mrb[11].mxu1 }
 0x167   : > { %v1231_v52 = vadd.f32 %v1165_v44, %v397_v42  ;;  %v1169_v53 = vadd.f32 %v1168_v51, %v1055_v49  ;;  %v1170_v56 = vpop.f32.mrb[11].mxu0  ;;  %v410_v42 = vld [vmem:[#allocation2 + $0xa8] sm:$0xff]  ;;  %v412_v51 = vld [vmem:[#allocation2 + $0xb8] sm:$0xff] }
 0x168   : > { %v1232_v57 = vadd.f32 %v1167_v48, %v398_v46  ;;  %v1171_v58 = vadd.f32 %v1170_v56, %v1057_v54  ;;  %v411_v46 = vld [vmem:[#allocation2 + $0xb0] sm:$0xff] }
 0x169   : > { %1263 = vst [vmem:[#allocation2 + $0x40] sm:$0xff] %v1231_v52  ;;  %v1233_v59 = vadd.f32 %v1169_v53, %v399_v50 }
 0x16a   : > { %1264 = vst [vmem:[#allocation2 + $0x48] sm:$0xff] %v1232_v57  ;;  %v1234_v60 = vadd.f32 %v1171_v58, %v400_v55  ;;  %v413_v58 = vld [vmem:[#allocation2 + $0xc0] sm:$0xff] }
 0x16b   : > { %1265 = vst [vmem:[#allocation2 + $0x50] sm:$0xff] %v1233_v59  ;;  %v1061_v61 = vpop.f32.mrb[12].mxu1 }
 0x16c   : > { %1266 = vst [vmem:[#allocation2 + $0x58] sm:$0xff] %v1234_v60  ;;  %v1174_v63 = vpop.f32.mrb[12].mxu0  ;;  %v1063_v1 = vpop.f32.mrb[13].mxu1 }
 0x16d   : > { %v1175_v0 = vadd.f32 %v1174_v63, %v1061_v61  ;;  %v1176_v3 = vpop.f32.mrb[13].mxu0  ;;  %v1065_v5 = vpop.f32.mrb[14].mxu1 }
 0x16e   : > { %v1177_v4 = vadd.f32 %v1176_v3, %v1063_v1  ;;  %v1178_v7 = vpop.f32.mrb[14].mxu0  ;;  %v1067_v10 = vpop.f32.mrb[15].mxu1 }
 0x16f   : > { %v1235_v8 = vadd.f32 %v1175_v0, %v401_v62  ;;  %v1179_v9 = vadd.f32 %v1178_v7, %v1065_v5  ;;  %v1180_v12 = vpop.f32.mrb[15].mxu0  ;;  %v414_v62 = vld [vmem:[#allocation2 + $0xc8] sm:$0xff]  ;;  %v416_v7 = vld [vmem:[#allocation2 + $0xd8] sm:$0xff] }
 0x170   : > { %v1236_v13 = vadd.f32 %v1177_v4, %v402_v2  ;;  %v1181_v14 = vadd.f32 %v1180_v12, %v1067_v10  ;;  %v415_v2 = vld [vmem:[#allocation2 + $0xd0] sm:$0xff] }
 0x171   : > { %1267 = vst [vmem:[#allocation2 + $0x60] sm:$0xff] %v1235_v8  ;;  %v1237_v15 = vadd.f32 %v1179_v9, %v403_v6 }
 0x172   : > { %1268 = vst [vmem:[#allocation2 + $0x68] sm:$0xff] %v1236_v13  ;;  %v1238_v16 = vadd.f32 %v1181_v14, %v404_v11  ;;  %v417_v14 = vld [vmem:[#allocation2 + $0xe0] sm:$0xff] }
 0x173   : > { %1269 = vst [vmem:[#allocation2 + $0x70] sm:$0xff] %v1237_v15  ;;  %v1071_v17 = vpop.f32.mrb[16].mxu1 }
 0x174   : > { %1270 = vst [vmem:[#allocation2 + $0x78] sm:$0xff] %v1238_v16  ;;  %v1184_v19 = vpop.f32.mrb[16].mxu0  ;;  %v1073_v21 = vpop.f32.mrb[17].mxu1 }
 0x175   : > { %v1185_v20 = vadd.f32 %v1184_v19, %v1071_v17  ;;  %v1186_v23 = vpop.f32.mrb[17].mxu0  ;;  %v1075_v25 = vpop.f32.mrb[18].mxu1 }
 0x176   : > { %v1187_v24 = vadd.f32 %v1186_v23, %v1073_v21  ;;  %v1188_v27 = vpop.f32.mrb[18].mxu0  ;;  %v1077_v30 = vpop.f32.mrb[19].mxu1 }
 0x177   : > { %v1239_v28 = vadd.f32 %v1185_v20, %v405_v18  ;;  %v1189_v29 = vadd.f32 %v1188_v27, %v1075_v25  ;;  %v1190_v32 = vpop.f32.mrb[19].mxu0  ;;  %v418_v18 = vld [vmem:[#allocation2 + $0xe8] sm:$0xff]  ;;  %v420_v27 = vld [vmem:[#allocation2 + $0xf8] sm:$0xff] }
 0x178   : > { %v1240_v33 = vadd.f32 %v1187_v24, %v406_v22  ;;  %v1191_v34 = vadd.f32 %v1190_v32, %v1077_v30  ;;  %v419_v22 = vld [vmem:[#allocation2 + $0xf0] sm:$0xff] }
 0x179   : > { %1271 = vst [vmem:[#allocation2 + $0x80] sm:$0xff] %v1239_v28  ;;  %v1241_v35 = vadd.f32 %v1189_v29, %v407_v26 }
 0x17a   : > { %1272 = vst [vmem:[#allocation2 + $0x88] sm:$0xff] %v1240_v33  ;;  %v1242_v36 = vadd.f32 %v1191_v34, %v408_v31  ;;  %v1325_v33 = vlaneseq (!%p1663_p11) }
 0x17b   : > { %1273 = vst [vmem:[#allocation2 + $0x90] sm:$0xff] %v1241_v35  ;;  %v1081_v37 = vpop.f32.mrb[20].mxu1  ;;  %v1323_v35 = vld [vmem:[%s2320_s2] sm:$0x3] (!%p1663_p11) }
 0x17c   : > { %1274 = vst [vmem:[#allocation2 + $0x98] sm:$0xff] %v1242_v36  ;;  %v1194_v39 = vpop.f32.mrb[20].mxu0  ;;  %v1083_v41 = vpop.f32.mrb[21].mxu1  ;;  %v1326_v34 = vshrl.u32 (!%p1663_p11), %v1325_v33, 7  ;;  %v1291_v36 = vld [vmem:[#allocation2] sm:$0xff] (!%p1663_p11) }
 0x17d   : > { %v1195_v40 = vadd.f32 %v1194_v39, %v1081_v37  ;;  %v1196_v43 = vpop.f32.mrb[21].mxu0  ;;  %v1085_v45 = vpop.f32.mrb[22].mxu1 }
 0x17e   : > { %v1197_v44 = vadd.f32 %v1196_v43, %v1083_v41  ;;  %v1198_v47 = vpop.f32.mrb[22].mxu0  ;;  %v1087_v50 = vpop.f32.mrb[23].mxu1  ;;  %v1327_v37 = vsub.s32 (!%p1663_p11), 0, %v1326_v34  ;;  %v1331_v39 = vsub.s32 (!%p1663_p11), 1, %v1326_v34  ;;  %v1294_v41 = vld [vmem:[#allocation2 + $0x18] sm:$0xff] (!%p1663_p11) }
 0x17f   : > { %v1243_v48 = vadd.f32 %v1195_v40, %v409_v38  ;;  %v1199_v49 = vadd.f32 %v1198_v47, %v1085_v45  ;;  %v1200_v52 = vpop.f32.mrb[23].mxu0  ;;  %v1292_v38 = vld [vmem:[#allocation2 + $0x8] sm:$0xff] (!%p1663_p11)  ;;  %v1293_v40 = vld [vmem:[#allocation2 + $0x10] sm:$0xff] (!%p1663_p11)  ;;  %v1298_v47 = vld [vmem:[#allocation2 + $0x38] sm:$0xff] (!%p1663_p11) }
 0x180   : > { %v1244_v53 = vadd.f32 %v1197_v44, %v410_v42  ;;  %v1201_v54 = vadd.f32 %v1200_v52, %v1087_v50  ;;  %v1295_v42 = vld [vmem:[#allocation2 + $0x20] sm:$0xff] (!%p1663_p11)  ;;  %v2171_v43 = vrot.slane (!%p1663_p11), %v1323_v35, %v1327_v37  ;;  %v2173_v44 = vrot.slane (!%p1663_p11), %v1323_v35, %v1331_v39  ;;  %v1296_v45 = vld [vmem:[#allocation2 + $0x28] sm:$0xff] (!%p1663_p11) }
 0x181   : > { %1275 = vst [vmem:[#allocation2 + $0xa0] sm:$0xff] %v1243_v48  ;;  %v1245_v55 = vadd.f32 %v1199_v49, %v411_v46  ;;  %v1297_v46 = vld [vmem:[#allocation2 + $0x30] sm:$0xff] (!%p1663_p11)  ;;  %v1299_v52 = vld [vmem:[#allocation2 + $0x40] sm:$0xff] (!%p1663_p11) }
 0x182   : > { %1276 = vst [vmem:[#allocation2 + $0xa8] sm:$0xff] %v1244_v53  ;;  %v1246_v56 = vadd.f32 %v1201_v54, %v412_v51  ;;  %v1335_v48 = vadd.f32 (!%p1663_p11), %v2171_v43, %v1291_v36  ;;  %v1336_v49 = vadd.f32 (!%p1663_p11), %v2173_v44, %v1292_v38  ;;  %v1337_v50 = vadd.f32 (!%p1663_p11), %v2171_v43, %v1293_v40  ;;  %v1300_v53 = vld [vmem:[#allocation2 + $0x48] sm:$0xff] (!%p1663_p11)  ;;  %v1301_v54 = vld [vmem:[#allocation2 + $0x50] sm:$0xff] (!%p1663_p11) }
 0x183   : > { %1277 = vst [vmem:[#allocation2 + $0xb0] sm:$0xff] %v1245_v55  ;;  %v1091_v57 = vpop.f32.mrb[24].mxu1  ;;  %v1338_v51 = vadd.f32 (!%p1663_p11), %v2173_v44, %v1294_v41  ;;  %v1339_v55 = vadd.f32 (!%p1663_p11), %v2171_v43, %v1295_v42 }
 0x184   : > { %1278 = vst [vmem:[#allocation2 + $0xb8] sm:$0xff] %v1246_v56  ;;  %v1204_v59 = vpop.f32.mrb[24].mxu0  ;;  %v1093_v61 = vpop.f32.mrb[25].mxu1  ;;  %v1340_v56 = vadd.f32 (!%p1663_p11), %v2173_v44, %v1296_v45 }
 0x185   : > { %v1205_v60 = vadd.f32 %v1204_v59, %v1091_v57  ;;  %v1206_v63 = vpop.f32.mrb[25].mxu0  ;;  %v1095_v1 = vpop.f32.mrb[26].mxu1  ;;  %v1341_v57 = vadd.f32 (!%p1663_p11), %v2171_v43, %v1297_v46  ;;  %v1302_v59 = vld [vmem:[#allocation2 + $0x58] sm:$0xff] (!%p1663_p11) }
 0x186   : > { %v1207_v0 = vadd.f32 %v1206_v63, %v1093_v61  ;;  %v1208_v3 = vpop.f32.mrb[26].mxu0  ;;  %v1097_v6 = vpop.f32.mrb[27].mxu1  ;;  %v1304_v61 = vld [vmem:[#allocation2 + $0x68] sm:$0xff] (!%p1663_p11)  ;;  %v1368_v63 = vmax.f32 (!%p1663_p11), %v1336_v49, 0.0 }
 0x187   : > { %v1247_v4 = vadd.f32 %v1205_v60, %v413_v58  ;;  %v1209_v5 = vadd.f32 %v1208_v3, %v1095_v1  ;;  %v1210_v8 = vpop.f32.mrb[27].mxu0  ;;  %v1342_v58 = vadd.f32 (!%p1663_p11), %v2173_v44, %v1298_v47  ;;  %v1303_v60 = vld [vmem:[#allocation2 + $0x60] sm:$0xff] (!%p1663_p11)  ;;  %v1370_v1 = vmax.f32 (!%p1663_p11), %v1338_v51, 0.0  ;;  %v1306_v3 = vld [vmem:[#allocation2 + $0x78] sm:$0xff] (!%p1663_p11) }
 0x188   : > { %v1248_v9 = vadd.f32 %v1207_v0, %v414_v62  ;;  %v1211_v10 = vadd.f32 %v1210_v8, %v1097_v6  ;;  %v1367_v62 = vmax.f32 (!%p1663_p11), %v1335_v48, 0.0  ;;  %v1369_v0 = vmax.f32 (!%p1663_p11), %v1337_v50, 0.0  ;;  %1400 = vst [vmem:[%s2321_s3 + $0x8] sm:$0xff] (!%p1663_p11), %v1368_v63 }
 0x189   : > { %1279 = vst [vmem:[#allocation2 + $0xc0] sm:$0xff] %v1247_v4  ;;  %v1249_v11 = vadd.f32 %v1209_v5, %v415_v2  ;;  %v1305_v2 = vld [vmem:[#allocation2 + $0x70] sm:$0xff] (!%p1663_p11)  ;;  %v1371_v4 = vmax.f32 (!%p1663_p11), %v1339_v55, 0.0  ;;  %v1372_v5 = vmax.f32 (!%p1663_p11), %v1340_v56, 0.0  ;;  %v1373_v6 = vmax.f32 (!%p1663_p11), %v1341_v57, 0.0  ;;  %1402 = vst [vmem:[%s2321_s3 + $0x18] sm:$0xff] (!%p1663_p11), %v1370_v1 }
 0x18a   : > { %1280 = vst [vmem:[#allocation2 + $0xc8] sm:$0xff] %v1248_v9  ;;  %v1250_v12 = vadd.f32 %v1211_v10, %v416_v7  ;;  %v1374_v7 = vmax.f32 (!%p1663_p11), %v1342_v58, 0.0  ;;  %1399 = vst [vmem:[%s2321_s3] sm:$0xff] (!%p1663_p11), %v1367_v62  ;;  %v1343_v8 = vadd.f32 (!%p1663_p11), %v2171_v43, %v1299_v52  ;;  %v1344_v9 = vadd.f32 (!%p1663_p11), %v2173_v44, %v1300_v53 }
 0x18b   : > { %1281 = vst [vmem:[#allocation2 + $0xd0] sm:$0xff] %v1249_v11  ;;  %v1101_v13 = vpop.f32.mrb[28].mxu1  ;;  %1401 = vst [vmem:[%s2321_s3 + $0x10] sm:$0xff] (!%p1663_p11), %v1369_v0  ;;  %v1345_v10 = vadd.f32 (!%p1663_p11), %v2171_v43, %v1301_v54  ;;  %v1346_v11 = vadd.f32 (!%p1663_p11), %v2173_v44, %v1302_v59 }
 0x18c   : > { %1282 = vst [vmem:[#allocation2 + $0xd8] sm:$0xff] %v1250_v12  ;;  %v1214_v15 = vpop.f32.mrb[28].mxu0  ;;  %v1103_v17 = vpop.f32.mrb[29].mxu1  ;;  %v1307_v12 = vld [vmem:[#allocation2 + $0x80] sm:$0xff] (!%p1663_p11)  ;;  %1403 = vst [vmem:[%s2321_s3 + $0x20] sm:$0xff] (!%p1663_p11), %v1371_v4 }
 0x18d   : > { %v1215_v16 = vadd.f32 %v1214_v15, %v1101_v13  ;;  %v1216_v19 = vpop.f32.mrb[29].mxu0  ;;  %v1105_v21 = vpop.f32.mrb[30].mxu1  ;;  %v1308_v13 = vld [vmem:[#allocation2 + $0x88] sm:$0xff] (!%p1663_p11)  ;;  %1404 = vst [vmem:[%s2321_s3 + $0x28] sm:$0xff] (!%p1663_p11), %v1372_v5  ;;  %1405 = vst [vmem:[%s2321_s3 + $0x30] sm:$0xff] (!%p1663_p11), %v1373_v6  ;;  %v1347_v15 = vadd.f32 (!%p1663_p11), %v2171_v43, %v1303_v60 }
 0x18e   : > { %v1217_v20 = vadd.f32 %v1216_v19, %v1103_v17  ;;  %v1218_v23 = vpop.f32.mrb[30].mxu0  ;;  %v1107_v26 = vpop.f32.mrb[31].mxu1  ;;  %1290 = sbr.rel (%p1663_p11) target bundleno = 417 (0x1a1), region = 63  ;;  %1406 = vst [vmem:[%s2321_s3 + $0x38] sm:$0xff] (!%p1663_p11), %v1374_v7  ;;  %v1349_v17 = vadd.f32 (!%p1663_p11), %v2171_v43, %v1305_v2  ;;  %v1310_v19 = vld [vmem:[#allocation2 + $0x98] sm:$0xff] (!%p1663_p11)  ;;  %v1352_v33 = vadd.f32 (!%p1663_p11), %v2173_v44, %v1308_v13 }
 0x18f   : > { %v1251_v24 = vadd.f32 %v1215_v16, %v417_v14  ;;  %v1219_v25 = vadd.f32 %v1218_v23, %v1105_v21  ;;  %v1220_v28 = vpop.f32.mrb[31].mxu0  ;;  %v1309_v14 = vld [vmem:[#allocation2 + $0x90] sm:$0xff] (!%p1663_p11)  ;;  %v1348_v16 = vadd.f32 (!%p1663_p11), %v2173_v44, %v1304_v61  ;;  %v1312_v21 = vld [vmem:[#allocation2 + $0xa8] sm:$0xff] (!%p1663_p11)  ;;  %v1376_v23 = vmax.f32 (!%p1663_p11), %v1344_v9, 0.0 }
 0x190   : > { %v1252_v29 = vadd.f32 %v1217_v20, %v418_v18  ;;  %v1221_v30 = vadd.f32 %v1220_v28, %v1107_v26  ;;  %v1350_v18 = vadd.f32 (!%p1663_p11), %v2173_v44, %v1306_v3  ;;  %v1311_v20 = vld [vmem:[#allocation2 + $0xa0] sm:$0xff] (!%p1663_p11)  ;;  %v1313_v26 = vld [vmem:[#allocation2 + $0xb0] sm:$0xff] (!%p1663_p11)  ;;  %v1379_v28 = vmax.f32 (!%p1663_p11), %v1347_v15, 0.0 }
 0x191   : > { %1283 = vst [vmem:[#allocation2 + $0xe0] sm:$0xff] %v1251_v24  ;;  %v1253_v31 = vadd.f32 %v1219_v25, %v419_v22  ;;  %v1375_v22 = vmax.f32 (!%p1663_p11), %v1343_v8, 0.0  ;;  %v1377_v24 = vmax.f32 (!%p1663_p11), %v1345_v10, 0.0  ;;  %v1378_v25 = vmax.f32 (!%p1663_p11), %v1346_v11, 0.0  ;;  %1408 = vst [vmem:[%s2321_s3 + $0x48] sm:$0xff] (!%p1663_p11), %v1376_v23  ;;  %v1315_v36 = vld [vmem:[#allocation2 + $0xc0] sm:$0xff] (!%p1663_p11) }
 0x192   : > { %1284 = vst [vmem:[#allocation2 + $0xe8] sm:$0xff] %v1252_v29  ;;  %v1254_v32 = vadd.f32 %v1221_v30, %v420_v27  ;;  %v1314_v27 = vld [vmem:[#allocation2 + $0xb8] sm:$0xff] (!%p1663_p11)  ;;  %v1380_v29 = vmax.f32 (!%p1663_p11), %v1348_v16, 0.0  ;;  %v1381_v30 = vmax.f32 (!%p1663_p11), %v1349_v17, 0.0  ;;  %v1353_v34 = vadd.f32 (!%p1663_p11), %v2171_v43, %v1309_v14  ;;  %v1316_v37 = vld [vmem:[#allocation2 + $0xc8] sm:$0xff] (!%p1663_p11)  ;;  %v1317_v38 = vld [vmem:[#allocation2 + $0xd0] sm:$0xff] (!%p1663_p11) }
 0x193   : > { %1285 = vst [vmem:[#allocation2 + $0xf0] sm:$0xff] %v1253_v31  ;;  %v1382_v31 = vmax.f32 (!%p1663_p11), %v1350_v18, 0.0  ;;  %1407 = vst [vmem:[%s2321_s3 + $0x40] sm:$0xff] (!%p1663_p11), %v1375_v22  ;;  %v1354_v35 = vadd.f32 (!%p1663_p11), %v2173_v44, %v1310_v19  ;;  %v1355_v39 = vadd.f32 (!%p1663_p11), %v2171_v43, %v1311_v20  ;;  %v1356_v40 = vadd.f32 (!%p1663_p11), %v2173_v44, %v1312_v21  ;;  %v1318_v45 = vld [vmem:[#allocation2 + $0xd8] sm:$0xff] (!%p1663_p11) }
 0x194   : > { %1286 = vst [vmem:[#allocation2 + $0xf8] sm:$0xff] %v1254_v32  ;;  %1409 = vst [vmem:[%s2321_s3 + $0x50] sm:$0xff] (!%p1663_p11), %v1377_v24  ;;  %v1351_v32 = vadd.f32 (!%p1663_p11), %v2171_v43, %v1307_v12  ;;  %v1357_v41 = vadd.f32 (!%p1663_p11), %v2171_v43, %v1313_v26  ;;  %v1358_v42 = vadd.f32 (!%p1663_p11), %v2173_v44, %v1314_v27  ;;  %v1384_v49 = vmax.f32 (!%p1663_p11), %v1352_v33, 0.0 }
 0x195   : > { %1410 = vst [vmem:[%s2321_s3 + $0x58] sm:$0xff] %v1378_v25  ;;  %1411 = vst [vmem:[%s2321_s3 + $0x60] sm:$0xff] %v1379_v28  ;;  %v1385_v50 = vmax.f32 %v1353_v34, 0.0  ;;  %v1386_v51 = vmax.f32 %v1354_v35, 0.0  ;;  %v1387_v54 = vmax.f32 %v1355_v39, 0.0  ;;  %v1388_v55 = vmax.f32 %v1356_v40, 0.0 }
 0x196   : > { %1412 = vst [vmem:[%s2321_s3 + $0x68] sm:$0xff] %v1380_v29  ;;  %1413 = vst [vmem:[%s2321_s3 + $0x70] sm:$0xff] %v1381_v30  ;;  %v1383_v48 = vmax.f32 %v1351_v32, 0.0  ;;  %v1389_v56 = vmax.f32 %v1357_v41, 0.0  ;;  %v1390_v57 = vmax.f32 %v1358_v42, 0.0  ;;  %v1359_v58 = vadd.f32 %v2171_v43, %v1315_v36 }
 0x197   : > { %1414 = vst [vmem:[%s2321_s3 + $0x78] sm:$0xff] %v1382_v31  ;;  %1416 = vst [vmem:[%s2321_s3 + $0x88] sm:$0xff] %v1384_v49  ;;  %v1360_v59 = vadd.f32 %v2173_v44, %v1316_v37  ;;  %v1361_v60 = vadd.f32 %v2171_v43, %v1317_v38  ;;  %v1362_v61 = vadd.f32 %v2173_v44, %v1318_v45 }
 0x198   : > { %v1319_v46 = vld [vmem:[#allocation2 + $0xe0] sm:$0xff]  ;;  %1415 = vst [vmem:[%s2321_s3 + $0x80] sm:$0xff] %v1383_v48  ;;  %1417 = vst [vmem:[%s2321_s3 + $0x90] sm:$0xff] %v1385_v50  ;;  %v1391_v2 = vmax.f32 %v1359_v58, 0.0 }
 0x199   : > { %v1320_v47 = vld [vmem:[#allocation2 + $0xe8] sm:$0xff]  ;;  %1418 = vst [vmem:[%s2321_s3 + $0x98] sm:$0xff] %v1386_v51  ;;  %1419 = vst [vmem:[%s2321_s3 + $0xa0] sm:$0xff] %v1387_v54  ;;  %v1363_v62 = vadd.f32 %v2171_v43, %v1319_v46  ;;  %v1392_v3 = vmax.f32 %v1360_v59, 0.0  ;;  %v1393_v4 = vmax.f32 %v1361_v60, 0.0  ;;  %v1394_v5 = vmax.f32 %v1362_v61, 0.0 }
 0x19a   : > { %v1321_v52 = vld [vmem:[#allocation2 + $0xf0] sm:$0xff]  ;;  %1420 = vst [vmem:[%s2321_s3 + $0xa8] sm:$0xff] %v1388_v55  ;;  %1421 = vst [vmem:[%s2321_s3 + $0xb0] sm:$0xff] %v1389_v56  ;;  %v1364_v63 = vadd.f32 %v2173_v44, %v1320_v47 }
 0x19b   : > { %v1322_v53 = vld [vmem:[#allocation2 + $0xf8] sm:$0xff]  ;;  %1422 = vst [vmem:[%s2321_s3 + $0xb8] sm:$0xff] %v1390_v57  ;;  %v1365_v0 = vadd.f32 %v2171_v43, %v1321_v52  ;;  %v1395_v6 = vmax.f32 %v1363_v62, 0.0  ;;  %1423 = vst [vmem:[%s2321_s3 + $0xc0] sm:$0xff] %v1391_v2 }
 0x19c   : > { %v1366_v1 = vadd.f32 %v2173_v44, %v1322_v53  ;;  %v1396_v7 = vmax.f32 %v1364_v63, 0.0  ;;  %1424 = vst [vmem:[%s2321_s3 + $0xc8] sm:$0xff] %v1392_v3  ;;  %1425 = vst [vmem:[%s2321_s3 + $0xd0] sm:$0xff] %v1393_v4 }
 0x19d   : > { %v1397_v8 = vmax.f32 %v1365_v0, 0.0  ;;  %1426 = vst [vmem:[%s2321_s3 + $0xd8] sm:$0xff] %v1394_v5  ;;  %1427 = vst [vmem:[%s2321_s3 + $0xe0] sm:$0xff] %v1395_v6 }
 0x19e   : > { %v1398_v9 = vmax.f32 %v1366_v1, 0.0  ;;  %1428 = vst [vmem:[%s2321_s3 + $0xe8] sm:$0xff] %v1396_v7 }
 0x19f   : > { %1429 = vst [vmem:[%s2321_s3 + $0xf0] sm:$0xff] %v1397_v8 }
 0x1a0   : > { %1430 = vst [vmem:[%s2321_s3 + $0xf8] sm:$0xff] %v1398_v9 }
 0x1a1 PF: > { %s13_s16 = sadd.s32 1, %s1925_s16   ;;  %s2322_s12 = smov %s1913_s13 }
 0x1a2   : > { %p10_p12 = scmp.ge.s32.totalorder %s13_s16, 7   ;;  %s2323_s13 = smov %s1983_s20 }
 0x1a3   : > { %s2324_s14 = smov %s1921_s15  ;;  %s2325_s15 = smov %s2327_s17 }
 0x1a4   :  { %12 = sbr.rel (!%p10_p12) target bundleno = 3 (0x3), region = 104 }

// kernel: attention_modules_forward.12
= control target key start
LH: loop header
LB: loop body
LE: loop exit
PB: predicated region body
PF: predicated region fallthrough
CT: control target
= control target key end

     0   :  { %s1512_s12 = smov 0   ;;  %s1514_s13 = smov 0   ;;  %s1824_s0 = inlined_call_operand.vmem [shape: bf16[8,2048], index: 0, kind: input, shape index: {}]   ;;  %s1825_s1 = inlined_call_operand.vmem [shape: bf16[2048,512], index: 1, kind: input, shape index: {}]   ;;  %s1826_s2 = inlined_call_operand.vmem [shape: f32[1,512], index: 2, kind: input, shape index: {}]   ;;  %s1827_s3 = inlined_call_operand.vmem [shape: f32[8,512], index: 3, kind: output, shape index: {}]  }
   0x1   :  { %s1516_s14 = smov 0   ;;  %s1518_s15 = smov 0  }
   0x2   :  { %s1520_s16 = smov 0   ;;  %s1522_s17 = smov 0  }
   0x3   :  { %s1524_s18 = smov 0  }
   0x4 LB: > { %s25_s19 = sadd.s32 1, %s1481_s16  ;;  %s28_s20 = sadd.s32 1, %s1485_s17  ;;  %s1489_s18 = sphi %s1524_s18, %s13_s18   ;;  %s1485_s17 = sphi %s1522_s17, %s1833_s17   ;;  %s1481_s16 = sphi %s1520_s16, %s1832_s16   ;;  %s1477_s15 = sphi %s1518_s15, %s1831_s15   ;;  %s1473_s14 = sphi %s1516_s14, %s1830_s14   ;;  %s1469_s13 = sphi %s1514_s13, %s1829_s13   ;;  %s1465_s12 = sphi %s1512_s12, %s1828_s12  }
   0x5   : > { %p26_p0 = scmp.ge.s32.totalorder %s25_s19, 4  ;;  %p76_p1 = scmp.ne.s32.totalorder %s1469_s13, %s1465_s12 }
   0x6   : > { %p77_p2 = scmp.eq.s32.totalorder %s1489_s18, 0  ;;  %s69_s24 = sadd.s32 1, %s1469_s13 }
   0x7   : > { %s1835_s19 = smov (%p26_p0, %s25_s19), 0  ;;  %s1837_s20 = smov (!%p26_p0, %s28_s20), %s1485_s17 }
   0x8   : > { %p78_p3 = por %p77_p2, %p76_p1  ;;  %p30_p4 = scmp.ge.s32.totalorder %s1837_s20, 2 }
   0x9   : > { %s64_s21 = ssub.s32 %s1481_s16, %s1835_s19  ;;  %p1192_p6 = scmp.ge.s32.totalorder %s1489_s18, 8 }
   0xa   : > { %s1839_s20 = smov (%p30_p4, %s1837_s20), 0 }
   0xb   : > { %s65_s22 = ssub.s32 %s1485_s17, %s1839_s20  ;;  %156 = sbr.rel (%p1192_p6) target bundleno = 57 (0x39), region = 16 }
   0xc   : > { %s66_s23 = sor.u32 %s65_s22, %s64_s21 }
   0xd   : > { %p67_p5 = scmp.eq.s32.totalorder %s66_s23, 0 }
   0xf   : > { %s1563_s25 = scalar_select %p67_p5, %s1469_s13, %s69_s24  }
  0x12   : > { %172 = sbr.rel (!%p78_p3) target bundleno = 57 (0x39), region = 24  ;;  %s174_s26 = sand.u32 (%p78_p3), 1, %s1469_s13  }
  0x13   : > { %s1195_s27 = sshll.u32 (%p78_p3), %s1485_s17, 1  ;;  %s1193_s28 = sshll.u32 (%p78_p3), %s174_s26, 9 }
  0x14   : > { %s1277_s29 = sshll.u32 (%p78_p3), %s1481_s16, 8  ;;  %s1577_s8 = scalar_lea.vmem (%p78_p3), [#allocation3], %s1193_s28 }
  0x15   : > { %s180_s30 = sadd.s32 (%p78_p3), %s1277_s29, %s1195_s27 }
  0x16   : > { %s1197_s4 = sshll.u32 (%p78_p3), %s180_s30, 2 }
  0x17   : > { %s1572_s7 = scalar_lea.vmem (%p78_p3), %s1825_s1, %s1197_s4 }
  0x18   : > { %v336_v0 = vld [vmem:[%s1572_s7] sm:$0xff] (%p78_p3)  ;;  %v338_v1 = vld [vmem:[%s1572_s7 + $0x10] sm:$0xff] (%p78_p3) }
  0x19   : > { %v340_v2 = vld [vmem:[%s1572_s7 + $0x20] sm:$0xff]  ;;  %337 = vst [vmem:[%s1577_s8] sm:$0xff] %v336_v0  ;;  %339 = vst [vmem:[%s1577_s8 + $0x8] sm:$0xff] %v338_v1  ;;  %v342_v3 = vld [vmem:[%s1572_s7 + $0x30] sm:$0xff] }
  0x1a   : > { %341 = vst [vmem:[%s1577_s8 + $0x10] sm:$0xff] %v340_v2  ;;  %v344_v4 = vld [vmem:[%s1572_s7 + $0x40] sm:$0xff]  ;;  %v346_v5 = vld [vmem:[%s1572_s7 + $0x50] sm:$0xff]  ;;  %343 = vst [vmem:[%s1577_s8 + $0x18] sm:$0xff] %v342_v3 }
  0x1b   : > { %345 = vst [vmem:[%s1577_s8 + $0x20] sm:$0xff] %v344_v4  ;;  %347 = vst [vmem:[%s1577_s8 + $0x28] sm:$0xff] %v346_v5  ;;  %v348_v6 = vld [vmem:[%s1572_s7 + $0x60] sm:$0xff]  ;;  %v350_v7 = vld [vmem:[%s1572_s7 + $0x70] sm:$0xff] }
  0x1c   : > { %v352_v8 = vld [vmem:[%s1572_s7 + $0x80] sm:$0xff]  ;;  %349 = vst [vmem:[%s1577_s8 + $0x30] sm:$0xff] %v348_v6  ;;  %351 = vst [vmem:[%s1577_s8 + $0x38] sm:$0xff] %v350_v7  ;;  %v354_v9 = vld [vmem:[%s1572_s7 + $0x90] sm:$0xff] }
  0x1d   : > { %353 = vst [vmem:[%s1577_s8 + $0x40] sm:$0xff] %v352_v8  ;;  %v356_v10 = vld [vmem:[%s1572_s7 + $0xa0] sm:$0xff]  ;;  %v358_v11 = vld [vmem:[%s1572_s7 + $0xb0] sm:$0xff]  ;;  %355 = vst [vmem:[%s1577_s8 + $0x48] sm:$0xff] %v354_v9 }
  0x1e   : > { %357 = vst [vmem:[%s1577_s8 + $0x50] sm:$0xff] %v356_v10  ;;  %359 = vst [vmem:[%s1577_s8 + $0x58] sm:$0xff] %v358_v11  ;;  %v360_v12 = vld [vmem:[%s1572_s7 + $0xc0] sm:$0xff]  ;;  %v362_v13 = vld [vmem:[%s1572_s7 + $0xd0] sm:$0xff] }
  0x1f   : > { %v364_v14 = vld [vmem:[%s1572_s7 + $0xe0] sm:$0xff]  ;;  %361 = vst [vmem:[%s1577_s8 + $0x60] sm:$0xff] %v360_v12  ;;  %363 = vst [vmem:[%s1577_s8 + $0x68] sm:$0xff] %v362_v13  ;;  %v366_v15 = vld [vmem:[%s1572_s7 + $0xf0] sm:$0xff] }
  0x20   : > { %365 = vst [vmem:[%s1577_s8 + $0x70] sm:$0xff] %v364_v14  ;;  %v368_v16 = vld [vmem:[%s1572_s7 + $0x100] sm:$0xff]  ;;  %v370_v17 = vld [vmem:[%s1572_s7 + $0x110] sm:$0xff]  ;;  %367 = vst [vmem:[%s1577_s8 + $0x78] sm:$0xff] %v366_v15 }
  0x21   : > { %369 = vst [vmem:[%s1577_s8 + $0x80] sm:$0xff] %v368_v16  ;;  %371 = vst [vmem:[%s1577_s8 + $0x88] sm:$0xff] %v370_v17  ;;  %v372_v18 = vld [vmem:[%s1572_s7 + $0x120] sm:$0xff]  ;;  %v374_v19 = vld [vmem:[%s1572_s7 + $0x130] sm:$0xff] }
  0x22   : > { %v376_v20 = vld [vmem:[%s1572_s7 + $0x140] sm:$0xff]  ;;  %373 = vst [vmem:[%s1577_s8 + $0x90] sm:$0xff] %v372_v18  ;;  %375 = vst [vmem:[%s1577_s8 + $0x98] sm:$0xff] %v374_v19  ;;  %v378_v21 = vld [vmem:[%s1572_s7 + $0x150] sm:$0xff] }
  0x23   : > { %377 = vst [vmem:[%s1577_s8 + $0xa0] sm:$0xff] %v376_v20  ;;  %v380_v22 = vld [vmem:[%s1572_s7 + $0x160] sm:$0xff]  ;;  %v382_v23 = vld [vmem:[%s1572_s7 + $0x170] sm:$0xff]  ;;  %379 = vst [vmem:[%s1577_s8 + $0xa8] sm:$0xff] %v378_v21 }
  0x24   : > { %381 = vst [vmem:[%s1577_s8 + $0xb0] sm:$0xff] %v380_v22  ;;  %383 = vst [vmem:[%s1577_s8 + $0xb8] sm:$0xff] %v382_v23  ;;  %v384_v24 = vld [vmem:[%s1572_s7 + $0x180] sm:$0xff]  ;;  %v386_v25 = vld [vmem:[%s1572_s7 + $0x190] sm:$0xff] }
  0x25   : > { %v388_v26 = vld [vmem:[%s1572_s7 + $0x1a0] sm:$0xff]  ;;  %385 = vst [vmem:[%s1577_s8 + $0xc0] sm:$0xff] %v384_v24  ;;  %387 = vst [vmem:[%s1577_s8 + $0xc8] sm:$0xff] %v386_v25  ;;  %v390_v27 = vld [vmem:[%s1572_s7 + $0x1b0] sm:$0xff] }
  0x26   : > { %389 = vst [vmem:[%s1577_s8 + $0xd0] sm:$0xff] %v388_v26  ;;  %v392_v28 = vld [vmem:[%s1572_s7 + $0x1c0] sm:$0xff]  ;;  %v394_v29 = vld [vmem:[%s1572_s7 + $0x1d0] sm:$0xff]  ;;  %391 = vst [vmem:[%s1577_s8 + $0xd8] sm:$0xff] %v390_v27 }
  0x27   : > { %393 = vst [vmem:[%s1577_s8 + $0xe0] sm:$0xff] %v392_v28  ;;  %395 = vst [vmem:[%s1577_s8 + $0xe8] sm:$0xff] %v394_v29  ;;  %v396_v30 = vld [vmem:[%s1572_s7 + $0x1e0] sm:$0xff]  ;;  %v398_v31 = vld [vmem:[%s1572_s7 + $0x1f0] sm:$0xff] }
  0x28   : > { %v400_v32 = vld [vmem:[%s1572_s7 + $0x200] sm:$0xff]  ;;  %397 = vst [vmem:[%s1577_s8 + $0xf0] sm:$0xff] %v396_v30  ;;  %399 = vst [vmem:[%s1577_s8 + $0xf8] sm:$0xff] %v398_v31  ;;  %v402_v33 = vld [vmem:[%s1572_s7 + $0x210] sm:$0xff] }
  0x29   : > { %401 = vst [vmem:[%s1577_s8 + $0x100] sm:$0xff] %v400_v32  ;;  %v404_v34 = vld [vmem:[%s1572_s7 + $0x220] sm:$0xff]  ;;  %v406_v35 = vld [vmem:[%s1572_s7 + $0x230] sm:$0xff]  ;;  %403 = vst [vmem:[%s1577_s8 + $0x108] sm:$0xff] %v402_v33 }
  0x2a   : > { %405 = vst [vmem:[%s1577_s8 + $0x110] sm:$0xff] %v404_v34  ;;  %407 = vst [vmem:[%s1577_s8 + $0x118] sm:$0xff] %v406_v35  ;;  %v408_v36 = vld [vmem:[%s1572_s7 + $0x240] sm:$0xff]  ;;  %v410_v37 = vld [vmem:[%s1572_s7 + $0x250] sm:$0xff] }
  0x2b   : > { %v412_v38 = vld [vmem:[%s1572_s7 + $0x260] sm:$0xff]  ;;  %409 = vst [vmem:[%s1577_s8 + $0x120] sm:$0xff] %v408_v36  ;;  %411 = vst [vmem:[%s1577_s8 + $0x128] sm:$0xff] %v410_v37  ;;  %v414_v39 = vld [vmem:[%s1572_s7 + $0x270] sm:$0xff] }
  0x2c   : > { %413 = vst [vmem:[%s1577_s8 + $0x130] sm:$0xff] %v412_v38  ;;  %v416_v40 = vld [vmem:[%s1572_s7 + $0x280] sm:$0xff]  ;;  %v418_v41 = vld [vmem:[%s1572_s7 + $0x290] sm:$0xff]  ;;  %415 = vst [vmem:[%s1577_s8 + $0x138] sm:$0xff] %v414_v39 }
  0x2d   : > { %417 = vst [vmem:[%s1577_s8 + $0x140] sm:$0xff] %v416_v40  ;;  %419 = vst [vmem:[%s1577_s8 + $0x148] sm:$0xff] %v418_v41  ;;  %v420_v42 = vld [vmem:[%s1572_s7 + $0x2a0] sm:$0xff]  ;;  %v422_v43 = vld [vmem:[%s1572_s7 + $0x2b0] sm:$0xff] }
  0x2e   : > { %v424_v44 = vld [vmem:[%s1572_s7 + $0x2c0] sm:$0xff]  ;;  %421 = vst [vmem:[%s1577_s8 + $0x150] sm:$0xff] %v420_v42  ;;  %423 = vst [vmem:[%s1577_s8 + $0x158] sm:$0xff] %v422_v43  ;;  %v426_v45 = vld [vmem:[%s1572_s7 + $0x2d0] sm:$0xff] }
  0x2f   : > { %425 = vst [vmem:[%s1577_s8 + $0x160] sm:$0xff] %v424_v44  ;;  %v428_v46 = vld [vmem:[%s1572_s7 + $0x2e0] sm:$0xff]  ;;  %v430_v47 = vld [vmem:[%s1572_s7 + $0x2f0] sm:$0xff]  ;;  %427 = vst [vmem:[%s1577_s8 + $0x168] sm:$0xff] %v426_v45 }
  0x30   : > { %429 = vst [vmem:[%s1577_s8 + $0x170] sm:$0xff] %v428_v46  ;;  %431 = vst [vmem:[%s1577_s8 + $0x178] sm:$0xff] %v430_v47  ;;  %v432_v48 = vld [vmem:[%s1572_s7 + $0x300] sm:$0xff]  ;;  %v434_v49 = vld [vmem:[%s1572_s7 + $0x310] sm:$0xff] }
  0x31   : > { %v436_v50 = vld [vmem:[%s1572_s7 + $0x320] sm:$0xff]  ;;  %433 = vst [vmem:[%s1577_s8 + $0x180] sm:$0xff] %v432_v48  ;;  %435 = vst [vmem:[%s1577_s8 + $0x188] sm:$0xff] %v434_v49  ;;  %v438_v51 = vld [vmem:[%s1572_s7 + $0x330] sm:$0xff] }
  0x32   : > { %437 = vst [vmem:[%s1577_s8 + $0x190] sm:$0xff] %v436_v50  ;;  %v440_v52 = vld [vmem:[%s1572_s7 + $0x340] sm:$0xff]  ;;  %v442_v53 = vld [vmem:[%s1572_s7 + $0x350] sm:$0xff]  ;;  %439 = vst [vmem:[%s1577_s8 + $0x198] sm:$0xff] %v438_v51 }
  0x33   : > { %441 = vst [vmem:[%s1577_s8 + $0x1a0] sm:$0xff] %v440_v52  ;;  %443 = vst [vmem:[%s1577_s8 + $0x1a8] sm:$0xff] %v442_v53  ;;  %v444_v54 = vld [vmem:[%s1572_s7 + $0x360] sm:$0xff]  ;;  %v446_v55 = vld [vmem:[%s1572_s7 + $0x370] sm:$0xff] }
  0x34   : > { %v448_v56 = vld [vmem:[%s1572_s7 + $0x380] sm:$0xff]  ;;  %445 = vst [vmem:[%s1577_s8 + $0x1b0] sm:$0xff] %v444_v54  ;;  %447 = vst [vmem:[%s1577_s8 + $0x1b8] sm:$0xff] %v446_v55  ;;  %v450_v57 = vld [vmem:[%s1572_s7 + $0x390] sm:$0xff] }
  0x35   : > { %449 = vst [vmem:[%s1577_s8 + $0x1c0] sm:$0xff] %v448_v56  ;;  %v452_v58 = vld [vmem:[%s1572_s7 + $0x3a0] sm:$0xff]  ;;  %v454_v59 = vld [vmem:[%s1572_s7 + $0x3b0] sm:$0xff]  ;;  %451 = vst [vmem:[%s1577_s8 + $0x1c8] sm:$0xff] %v450_v57 }
  0x36   : > { %453 = vst [vmem:[%s1577_s8 + $0x1d0] sm:$0xff] %v452_v58  ;;  %455 = vst [vmem:[%s1577_s8 + $0x1d8] sm:$0xff] %v454_v59  ;;  %v456_v60 = vld [vmem:[%s1572_s7 + $0x3c0] sm:$0xff]  ;;  %v458_v61 = vld [vmem:[%s1572_s7 + $0x3d0] sm:$0xff] }
  0x37   : > { %v460_v62 = vld [vmem:[%s1572_s7 + $0x3e0] sm:$0xff]  ;;  %457 = vst [vmem:[%s1577_s8 + $0x1e0] sm:$0xff] %v456_v60  ;;  %459 = vst [vmem:[%s1577_s8 + $0x1e8] sm:$0xff] %v458_v61  ;;  %v462_v63 = vld [vmem:[%s1572_s7 + $0x3f0] sm:$0xff] }
  0x38   : > { %461 = vst [vmem:[%s1577_s8 + $0x1f0] sm:$0xff] %v460_v62  ;;  %463 = vst [vmem:[%s1577_s8 + $0x1f8] sm:$0xff] %v462_v63 }
  0x39 PF: > { %p1198_p7 = scmp.ge.s32.totalorder %s1489_s18, 1  ;;  %p476_p8 = scmp.lt.s32.totalorder %s1489_s18, 9 }
  0x3b   : > { %p477_p9 = pnand %p1198_p7, %p476_p8 }
  0x3c   : > { %s483_s9 = sand.u32 (!%p477_p9), 1, %s1465_s12   ;;  %s1200_s10 = sshll.u32 (!%p477_p9), %s1473_s14, 2 }
  0x3d   : > { %480 = sbr.rel (%p477_p9) target bundleno = 372 (0x174), region = 66  ;;  %s1199_s11 = sshll.u32 (!%p477_p9), %s483_s9, 9 }
  0x3e   : > { %p526_p10 = scmp.lt.s32.totalorder (!%p477_p9), %s1200_s10, 15  ;;  %s1202_s21 = sshll.u32 (!%p477_p9), %s1477_s15, 1 }
  0x3f   : > { %p536_p11 = scmp.lt.s32.totalorder (!%p477_p9), %s1202_s21, 3  ;;  %s1726_s5 = scalar_lea.vmem (!%p477_p9), [#allocation3], %s1199_s11 }
  0x40   : > { %p1205_p12 = scmp.ne.s32.totalorder (!%p477_p9), %s1473_s14, 0 }
  0x44   : > { %s1841_s10 = smov (!%p526_p10, %s1200_s10), 15  ;;  %s1843_s21 = smov (!%p536_p11, %s1202_s21), 3 }
  0x45   : > { %s1201_s22 = sshll.u32 %s1841_s10, 2  ;;  %s538_s12 = scalar_lea.vmem %s1826_s2, %s1843_s21  ;;  %v1491_v0 = vmov (!%p1205_p12), 0.0  }
  0x46   : > { %s1712_s26 = scalar_lea.vmem %s1824_s0, %s1201_s22  ;;  %s1204_s29 = sshll.u32 %s1843_s21, 3  ;;  %554 = vst [vmem:[#allocation2] sm:$0xff] (!%p1205_p12), %v1491_v0  ;;  %555 = vst [vmem:[#allocation2 + $0x8] sm:$0xff] (!%p1205_p12), %v1491_v0 }
  0x47   : > { %s1724_s15 = scalar_lea.vmem %s1827_s3, %s1204_s29  ;;  %553 = sbr.rel (%p1205_p12) target bundleno = 78 (0x4e), region = 74 }
  0x4e PF: > { %v1335_v1 = vld [vmem:[%s1726_s5 + $0x4] ss:$8 sps:$4 sm:$0xff]   ;;  %v1339_v3 = vld [vmem:[%s1726_s5] ss:$8 sps:$4 sm:$0xff]   ;;  %v1341_v5 = vld [vmem:[%s1726_s5 + $0x14] ss:$8 sps:$4 sm:$0xff]  }
  0x4f   : > { %v1337_v2 = vld [vmem:[%s1726_s5 + $0x104] ss:$8 sps:$4 sm:$0xff]   ;;  %958 = vmatprep.subr.bf16.mxu0 %v1335_v1  ;;  %v1340_v4 = vld [vmem:[%s1726_s5 + $0x100] ss:$8 sps:$4 sm:$0xff]   ;;  %v1343_v6 = vld [vmem:[%s1726_s5 + $0x114] ss:$8 sps:$4 sm:$0xff]  }
  0x50   : > { %999 = vmatprep.subr.bf16.mxu1 %v1337_v2  ;;  %959 = vmatpush1.bf16.msra.mxu0 %v1339_v3  ;;  %v1345_v7 = vld [vmem:[%s1726_s5 + $0x10] ss:$8 sps:$4 sm:$0xff]   ;;  %v1347_v9 = vld [vmem:[%s1726_s5 + $0x24] ss:$8 sps:$4 sm:$0xff]   ;;  %v1351_v11 = vld [vmem:[%s1726_s5 + $0x20] ss:$8 sps:$4 sm:$0xff]  }
  0x51   : > { %1000 = vmatpush1.bf16.msra.mxu1 %v1340_v4  ;;  %960 = vmatprep.subr.bf16.mxu0 %v1341_v5  ;;  %v1346_v8 = vld [vmem:[%s1726_s5 + $0x110] ss:$8 sps:$4 sm:$0xff]   ;;  %v1349_v10 = vld [vmem:[%s1726_s5 + $0x124] ss:$8 sps:$4 sm:$0xff]   ;;  %v1352_v12 = vld [vmem:[%s1726_s5 + $0x120] ss:$8 sps:$4 sm:$0xff]  }
  0x52   : > { %1001 = vmatprep.subr.bf16.mxu1 %v1343_v6  ;;  %v1353_v13 = vld [vmem:[%s1726_s5 + $0x34] ss:$8 sps:$4 sm:$0xff]   ;;  %v1357_v15 = vld [vmem:[%s1726_s5 + $0x30] ss:$8 sps:$4 sm:$0xff]   ;;  %v1359_v17 = vld [vmem:[%s1726_s5 + $0x44] ss:$8 sps:$4 sm:$0xff]  }
  0x53   : > { %v1355_v14 = vld [vmem:[%s1726_s5 + $0x134] ss:$8 sps:$4 sm:$0xff]   ;;  %v1358_v16 = vld [vmem:[%s1726_s5 + $0x130] ss:$8 sps:$4 sm:$0xff]   ;;  %v1361_v18 = vld [vmem:[%s1726_s5 + $0x144] ss:$8 sps:$4 sm:$0xff]  }
  0x54   : > { %961 = vmatpush1.bf16.msra.mxu0 %v1345_v7  ;;  %v1363_v19 = vld [vmem:[%s1726_s5 + $0x40] ss:$8 sps:$4 sm:$0xff]   ;;  %v1365_v21 = vld [vmem:[%s1726_s5 + $0x54] ss:$8 sps:$4 sm:$0xff]   ;;  %v1369_v23 = vld [vmem:[%s1726_s5 + $0x50] ss:$8 sps:$4 sm:$0xff]  }
  0x55   : > { %1002 = vmatpush1.bf16.msra.mxu1 %v1346_v8  ;;  %962 = vmatprep.subr.bf16.mxu0 %v1347_v9  ;;  %v1364_v20 = vld [vmem:[%s1726_s5 + $0x140] ss:$8 sps:$4 sm:$0xff]   ;;  %v1367_v22 = vld [vmem:[%s1726_s5 + $0x154] ss:$8 sps:$4 sm:$0xff]   ;;  %v1370_v24 = vld [vmem:[%s1726_s5 + $0x150] ss:$8 sps:$4 sm:$0xff]  }
  0x56   : > { %1003 = vmatprep.subr.bf16.mxu1 %v1349_v10  ;;  %v1371_v25 = vld [vmem:[%s1726_s5 + $0x64] ss:$8 sps:$4 sm:$0xff]   ;;  %v1375_v27 = vld [vmem:[%s1726_s5 + $0x60] ss:$8 sps:$4 sm:$0xff]   ;;  %v1377_v29 = vld [vmem:[%s1726_s5 + $0x74] ss:$8 sps:$4 sm:$0xff]  }
  0x57   : > { %v1373_v26 = vld [vmem:[%s1726_s5 + $0x164] ss:$8 sps:$4 sm:$0xff]   ;;  %v1376_v28 = vld [vmem:[%s1726_s5 + $0x160] ss:$8 sps:$4 sm:$0xff]   ;;  %v1379_v30 = vld [vmem:[%s1726_s5 + $0x174] ss:$8 sps:$4 sm:$0xff]  }
  0x58   : > { %963 = vmatpush1.bf16.msra.mxu0 %v1351_v11  ;;  %v1381_v31 = vld [vmem:[%s1726_s5 + $0x70] ss:$8 sps:$4 sm:$0xff]   ;;  %v1383_v33 = vld [vmem:[%s1726_s5 + $0x84] ss:$8 sps:$4 sm:$0xff]   ;;  %v1387_v35 = vld [vmem:[%s1726_s5 + $0x80] ss:$8 sps:$4 sm:$0xff]  }
  0x59   : > { %1004 = vmatpush1.bf16.msra.mxu1 %v1352_v12  ;;  %964 = vmatprep.subr.bf16.mxu0 %v1353_v13  ;;  %v1382_v32 = vld [vmem:[%s1726_s5 + $0x170] ss:$8 sps:$4 sm:$0xff]   ;;  %v1385_v34 = vld [vmem:[%s1726_s5 + $0x184] ss:$8 sps:$4 sm:$0xff]   ;;  %v1388_v36 = vld [vmem:[%s1726_s5 + $0x180] ss:$8 sps:$4 sm:$0xff]  }
  0x5a   : > { %1005 = vmatprep.subr.bf16.mxu1 %v1355_v14  ;;  %v1389_v37 = vld [vmem:[%s1726_s5 + $0x94] ss:$8 sps:$4 sm:$0xff]   ;;  %v1393_v39 = vld [vmem:[%s1726_s5 + $0x90] ss:$8 sps:$4 sm:$0xff]   ;;  %v1395_v41 = vld [vmem:[%s1726_s5 + $0xa4] ss:$8 sps:$4 sm:$0xff]  }
  0x5b   : > { %v1391_v38 = vld [vmem:[%s1726_s5 + $0x194] ss:$8 sps:$4 sm:$0xff]   ;;  %v1394_v40 = vld [vmem:[%s1726_s5 + $0x190] ss:$8 sps:$4 sm:$0xff]   ;;  %v1397_v42 = vld [vmem:[%s1726_s5 + $0x1a4] ss:$8 sps:$4 sm:$0xff]  }
  0x5c   : > { %965 = vmatpush1.bf16.msra.mxu0 %v1357_v15  ;;  %v1399_v43 = vld [vmem:[%s1726_s5 + $0xa0] ss:$8 sps:$4 sm:$0xff]   ;;  %v1401_v45 = vld [vmem:[%s1726_s5 + $0xb4] ss:$8 sps:$4 sm:$0xff]   ;;  %v1405_v50 = vld [vmem:[%s1726_s5 + $0xb0] ss:$8 sps:$4 sm:$0xff]  }
  0x5d   : > { %1006 = vmatpush1.bf16.msra.mxu1 %v1358_v16  ;;  %966 = vmatprep.subr.bf16.mxu0 %v1359_v17  ;;  %v1400_v44 = vld [vmem:[%s1726_s5 + $0x1a0] ss:$8 sps:$4 sm:$0xff]   ;;  %v1403_v46 = vld [vmem:[%s1726_s5 + $0x1b4] ss:$8 sps:$4 sm:$0xff]   ;;  %v1406_v51 = vld [vmem:[%s1726_s5 + $0x1b0] ss:$8 sps:$4 sm:$0xff]  }
  0x5e   : > { %1007 = vmatprep.subr.bf16.mxu1 %v1361_v18  ;;  %v558_v47 = vld [vmem:[%s1712_s26] sm:$0xff]  ;;  %v559_v49 = vld [vmem:[%s1712_s26 + $0x8] sm:$0xff]  ;;  %v1407_v53 = vld [vmem:[%s1726_s5 + $0xc4] ss:$8 sps:$4 sm:$0xff]   ;;  %p1274_p13 = scmp.ne.s32.totalorder %s1473_s14, 3 }
  0x5f   : > { %v1207_v48 = vcombine.high %v558_v47, %v558_v47  ;;  %v1209_v52 = vcombine.high %v559_v49, %v559_v49  ;;  %v1409_v54 = vld [vmem:[%s1726_s5 + $0x1c4] ss:$8 sps:$4 sm:$0xff]   ;;  %v1411_v55 = vld [vmem:[%s1726_s5 + $0xc0] ss:$8 sps:$4 sm:$0xff]   ;;  %v1413_v57 = vld [vmem:[%s1726_s5 + $0xd4] ss:$8 sps:$4 sm:$0xff]   ;;  %v1206_v5 = vcombine.low %v558_v47, %v558_v47  ;;  %v1208_v6 = vcombine.low %v559_v49, %v559_v49 }
  0x60   : > { %967 = vmatpush1.bf16.msra.mxu0 %v1363_v19  ;;  %v1412_v56 = vld [vmem:[%s1726_s5 + $0x1c0] ss:$8 sps:$4 sm:$0xff]   ;;  %v1415_v58 = vld [vmem:[%s1726_s5 + $0x1d4] ss:$8 sps:$4 sm:$0xff]   ;;  %v1417_v59 = vld [vmem:[%s1726_s5 + $0xd0] ss:$8 sps:$4 sm:$0xff]  }
  0x61   : > { %1008 = vmatpush1.bf16.msra.mxu1 %v1364_v20  ;;  %968 = vmatprep.subr.bf16.mxu0 %v1365_v21  ;;  %v1418_v60 = vld [vmem:[%s1726_s5 + $0x1d0] ss:$8 sps:$4 sm:$0xff]   ;;  %v1419_v61 = vld [vmem:[%s1726_s5 + $0xe4] ss:$8 sps:$4 sm:$0xff]   ;;  %v1423_v63 = vld [vmem:[%s1726_s5 + $0xe0] ss:$8 sps:$4 sm:$0xff]   ;;  %v1052_v21 = vlaneseq (!%p1274_p13) }
  0x62   : > { %1009 = vmatprep.subr.bf16.mxu1 %v1367_v22  ;;  %990 = vmatprep.mubr.bf16.mxu0 %v1207_v48  ;;  %v1421_v62 = vld [vmem:[%s1726_s5 + $0x1e4] ss:$8 sps:$4 sm:$0xff]   ;;  %v1424_v0 = vld [vmem:[%s1726_s5 + $0x1e0] ss:$8 sps:$4 sm:$0xff]   ;;  %v1425_v1 = vld [vmem:[%s1726_s5 + $0xf4] ss:$8 sps:$4 sm:$0xff]  }
  0x63   : > { %1031 = vmatprep.mubr.bf16.mxu1 %v1209_v52  ;;  %v1427_v2 = vld [vmem:[%s1726_s5 + $0x1f4] ss:$8 sps:$4 sm:$0xff]   ;;  %v1429_v3 = vld [vmem:[%s1726_s5 + $0xf0] ss:$8 sps:$4 sm:$0xff]   ;;  %v1053_v22 = vshrl.u32 (!%p1274_p13), %v1052_v21, 7 }
  0x64   : > { %969 = vmatpush1.bf16.msra.mxu0 %v1369_v23  ;;  %v1430_v4 = vld [vmem:[%s1726_s5 + $0x1f0] ss:$8 sps:$4 sm:$0xff]  }
  0x65   : > { %1010 = vmatpush1.bf16.msra.mxu1 %v1370_v24  ;;  %970 = vmatprep.subr.bf16.mxu0 %v1371_v25  ;;  %v556_v8 = vld [vmem:[#allocation2] sm:$0xff]  ;;  %v557_v12 = vld [vmem:[#allocation2 + $0x8] sm:$0xff]  ;;  %v1054_v24 = vsub.s32 (!%p1274_p13), 0, %v1053_v22  ;;  %v1058_v25 = vsub.s32 (!%p1274_p13), 1, %v1053_v22 }
  0x66   : > { %1011 = vmatprep.subr.bf16.mxu1 %v1373_v26  ;;  %v1050_v23 = vld [vmem:[%s538_s12] sm:$0x3] (!%p1274_p13) }
  0x68   : > { %971 = vmatpush1.bf16.msra.mxu0 %v1375_v27 }
  0x69   : > { %1012 = vmatpush1.bf16.msra.mxu1 %v1376_v28  ;;  %972 = vmatprep.subr.bf16.mxu0 %v1377_v29  ;;  %v1055_v28 = vrot.slane (!%p1274_p13), %v1050_v23, %v1054_v24  ;;  %v1059_v29 = vrot.slane (!%p1274_p13), %v1050_v23, %v1058_v25 }
  0x6a   : > { %1013 = vmatprep.subr.bf16.mxu1 %v1379_v30 }
  0x6c   : > { %973 = vmatpush1.bf16.msra.mxu0 %v1381_v31 }
  0x6d   : > { %1014 = vmatpush1.bf16.msra.mxu1 %v1382_v32  ;;  %974 = vmatprep.subr.bf16.mxu0 %v1383_v33 }
  0x6e   : > { %1015 = vmatprep.subr.bf16.mxu1 %v1385_v34 }
  0x70   : > { %975 = vmatpush1.bf16.msra.mxu0 %v1387_v35 }
  0x71   : > { %1016 = vmatpush1.bf16.msra.mxu1 %v1388_v36  ;;  %976 = vmatprep.subr.bf16.mxu0 %v1389_v37 }
  0x72   : > { %1017 = vmatprep.subr.bf16.mxu1 %v1391_v38 }
  0x74   : > { %977 = vmatpush1.bf16.msra.mxu0 %v1393_v39 }
  0x75   : > { %1018 = vmatpush1.bf16.msra.mxu1 %v1394_v40  ;;  %978 = vmatprep.subr.bf16.mxu0 %v1395_v41 }
  0x76   : > { %1019 = vmatprep.subr.bf16.mxu1 %v1397_v42 }
  0x78   : > { %979 = vmatpush1.bf16.msra.mxu0 %v1399_v43 }
  0x79   : > { %1020 = vmatpush1.bf16.msra.mxu1 %v1400_v44  ;;  %980 = vmatprep.subr.bf16.mxu0 %v1401_v45 }
  0x7a   : > { %1021 = vmatprep.subr.bf16.mxu1 %v1403_v46 }
  0x7c   : > { %981 = vmatpush1.bf16.msra.mxu0 %v1405_v50 }
  0x7d   : > { %1022 = vmatpush1.bf16.msra.mxu1 %v1406_v51  ;;  %982 = vmatprep.subr.bf16.mxu0 %v1407_v53 }
  0x7e   : > { %1023 = vmatprep.subr.bf16.mxu1 %v1409_v54 }
  0x80   : > { %983 = vmatpush1.bf16.msra.mxu0 %v1411_v55 }
  0x81   : > { %1024 = vmatpush1.bf16.msra.mxu1 %v1412_v56  ;;  %984 = vmatprep.subr.bf16.mxu0 %v1413_v57 }
  0x82   : > { %1025 = vmatprep.subr.bf16.mxu1 %v1415_v58 }
  0x84   : > { %985 = vmatpush1.bf16.msra.mxu0 %v1417_v59 }
  0x85   : > { %1026 = vmatpush1.bf16.msra.mxu1 %v1418_v60  ;;  %986 = vmatprep.subr.bf16.mxu0 %v1419_v61 }
  0x86   : > { %1027 = vmatprep.subr.bf16.mxu1 %v1421_v62 }
  0x88   : > { %987 = vmatpush1.bf16.msra.mxu0 %v1423_v63 }
  0x89   : > { %1028 = vmatpush1.bf16.msra.mxu1 %v1424_v0  ;;  %988 = vmatprep.subr.bf16.mxu0 %v1425_v1 }
  0x8a   : > { %1029 = vmatprep.subr.bf16.mxu1 %v1427_v2 }
  0x8c   : > { %989 = vmatpush1.bf16.msra.mxu0 %v1429_v3 }
  0x8d   : > { %1030 = vmatpush1.bf16.msra.mxu1 %v1430_v4 }
  0x8f   : > { %991 = vmatmul.mubr.bf16.vlgmr.msra.gmra.mrb[0].mxu0 %v1206_v5 }
  0x90   : > { %1032 = vmatmul.mubr.bf16.vlgmr.msra.gmra.mrb[0].mxu1 %v1208_v6 }
 0x162   : > { %v992_v7 = vpop.f32.mrb[0].mxu0 }
 0x163   : > { %v1033_v9 = vpop.f32.mrb[0].mxu1  ;;  %v994_v11 = vpop.f32.mrb[1].mxu0  ;;  %1047 = sbr.rel (%p1274_p13) target bundleno = 372 (0x174), region = 78 }
 0x164   : > { %v1034_v10 = vadd.f32 %v1033_v9, %v992_v7  ;;  %v1035_v13 = vpop.f32.mrb[1].mxu1  ;;  %v996_v15 = vpop.f32.mrb[2].mxu0 }
 0x165   : > { %v1036_v14 = vadd.f32 %v1035_v13, %v994_v11  ;;  %v1037_v16 = vpop.f32.mrb[2].mxu1  ;;  %v997_v18 = vpop.f32.mrb[3].mxu0 }
 0x166   : > { %v1040_v17 = vadd.f32 %v1034_v10, %v556_v8  ;;  %v1038_v19 = vpop.f32.mrb[3].mxu1 }
 0x167   : > { %v1041_v20 = vadd.f32 %v1036_v14, %v557_v12 }
 0x168   : > { %1042 = vst [vmem:[#allocation2] sm:$0xff] %v1040_v17 }
 0x169   : > { %1043 = vst [vmem:[#allocation2 + $0x8] sm:$0xff] %v1041_v20 }
 0x16f   : > { %v1048_v26 = vld [vmem:[#allocation2] sm:$0xff] }
 0x170   : > { %v1049_v27 = vld [vmem:[#allocation2 + $0x8] sm:$0xff]  ;;  %v1062_v30 = vadd.f32 %v1055_v28, %v1048_v26 }
 0x171   : > { %v1063_v31 = vadd.f32 %v1059_v29, %v1049_v27 }
 0x172   : > { %1064 = vst [vmem:[%s1724_s15] sm:$0xff] %v1062_v30 }
 0x173   : > { %1065 = vst [vmem:[%s1724_s15 + $0x8] sm:$0xff] %v1063_v31 }
 0x174 PF: > { %s13_s18 = sadd.s32 1, %s1489_s18   ;;  %s1828_s12 = smov %s1469_s13 }
 0x175   : > { %p10_p0 = scmp.ge.s32.totalorder %s13_s18, 10   ;;  %s1829_s13 = smov %s1563_s25 }
 0x176   : > { %s1830_s14 = smov %s1481_s16  ;;  %s1831_s15 = smov %s1485_s17 }
 0x177   : > { %s1832_s16 = smov %s1835_s19  ;;  %s1833_s17 = smov %s1839_s20 }
 0x178   :  { %12 = sbr.rel (!%p10_p0) target bundleno = 4 (0x4), region = 119 }

// kernel: attention_modules_forward.13
= control target key start
LH: loop header
LB: loop body
LE: loop exit
PB: predicated region body
PF: predicated region fallthrough
CT: control target
= control target key end

     0   :  { %s930_s1 = inlined_call_operand.vmem [shape: bf16[512,256], index: 1, kind: input, shape index: {}]   ;;  %s931_s0 = inlined_call_operand.vmem [shape: bf16[8,512], index: 0, kind: input, shape index: {}]   ;;  %s932_s2 = inlined_call_operand.vmem [shape: f32[1,256], index: 2, kind: input, shape index: {}]   ;;  %s933_s3 = inlined_call_operand.vmem [shape: f32[8,256], index: 3, kind: output, shape index: {}]  }
   0x1   :  { %v603_v0 = vld [vmem:[%s930_s1 + $0x4] ss:$8 sps:$4 sm:$0xff]   ;;  %v607_v2 = vld [vmem:[%s930_s1] ss:$8 sps:$4 sm:$0xff]   ;;  %v609_v4 = vld [vmem:[%s930_s1 + $0x14] ss:$8 sps:$4 sm:$0xff]  }
   0x2   :  { %v605_v1 = vld [vmem:[%s930_s1 + $0x104] ss:$8 sps:$4 sm:$0xff]   ;;  %422 = vmatprep.subr.bf16.mxu0 %v603_v0  ;;  %v608_v3 = vld [vmem:[%s930_s1 + $0x100] ss:$8 sps:$4 sm:$0xff]   ;;  %v611_v5 = vld [vmem:[%s930_s1 + $0x114] ss:$8 sps:$4 sm:$0xff]  }
   0x3   :  { %463 = vmatprep.subr.bf16.mxu1 %v605_v1  ;;  %423 = vmatpush1.bf16.msra.mxu0 %v607_v2  ;;  %v613_v6 = vld [vmem:[%s930_s1 + $0x10] ss:$8 sps:$4 sm:$0xff]   ;;  %v615_v8 = vld [vmem:[%s930_s1 + $0x24] ss:$8 sps:$4 sm:$0xff]   ;;  %v619_v10 = vld [vmem:[%s930_s1 + $0x20] ss:$8 sps:$4 sm:$0xff]  }
   0x4   :  { %464 = vmatpush1.bf16.msra.mxu1 %v608_v3  ;;  %424 = vmatprep.subr.bf16.mxu0 %v609_v4  ;;  %v614_v7 = vld [vmem:[%s930_s1 + $0x110] ss:$8 sps:$4 sm:$0xff]   ;;  %v617_v9 = vld [vmem:[%s930_s1 + $0x124] ss:$8 sps:$4 sm:$0xff]   ;;  %v620_v11 = vld [vmem:[%s930_s1 + $0x120] ss:$8 sps:$4 sm:$0xff]  }
   0x5   :  { %465 = vmatprep.subr.bf16.mxu1 %v611_v5  ;;  %v621_v12 = vld [vmem:[%s930_s1 + $0x34] ss:$8 sps:$4 sm:$0xff]   ;;  %v625_v14 = vld [vmem:[%s930_s1 + $0x30] ss:$8 sps:$4 sm:$0xff]   ;;  %v627_v16 = vld [vmem:[%s930_s1 + $0x44] ss:$8 sps:$4 sm:$0xff]  }
   0x6   :  { %v623_v13 = vld [vmem:[%s930_s1 + $0x134] ss:$8 sps:$4 sm:$0xff]   ;;  %v626_v15 = vld [vmem:[%s930_s1 + $0x130] ss:$8 sps:$4 sm:$0xff]   ;;  %v629_v17 = vld [vmem:[%s930_s1 + $0x144] ss:$8 sps:$4 sm:$0xff]  }
   0x7   :  { %425 = vmatpush1.bf16.msra.mxu0 %v613_v6  ;;  %v631_v18 = vld [vmem:[%s930_s1 + $0x40] ss:$8 sps:$4 sm:$0xff]   ;;  %v633_v20 = vld [vmem:[%s930_s1 + $0x54] ss:$8 sps:$4 sm:$0xff]   ;;  %v637_v22 = vld [vmem:[%s930_s1 + $0x50] ss:$8 sps:$4 sm:$0xff]   ;;  %v515_v6 = vlaneseq }
   0x8   :  { %466 = vmatpush1.bf16.msra.mxu1 %v614_v7  ;;  %426 = vmatprep.subr.bf16.mxu0 %v615_v8  ;;  %v632_v19 = vld [vmem:[%s930_s1 + $0x140] ss:$8 sps:$4 sm:$0xff]   ;;  %v635_v21 = vld [vmem:[%s930_s1 + $0x154] ss:$8 sps:$4 sm:$0xff]   ;;  %v638_v23 = vld [vmem:[%s930_s1 + $0x150] ss:$8 sps:$4 sm:$0xff]  }
   0x9   :  { %467 = vmatprep.subr.bf16.mxu1 %v617_v9  ;;  %v639_v24 = vld [vmem:[%s930_s1 + $0x64] ss:$8 sps:$4 sm:$0xff]   ;;  %v643_v26 = vld [vmem:[%s930_s1 + $0x60] ss:$8 sps:$4 sm:$0xff]   ;;  %v645_v28 = vld [vmem:[%s930_s1 + $0x74] ss:$8 sps:$4 sm:$0xff]  }
   0xa   :  { %v641_v25 = vld [vmem:[%s930_s1 + $0x164] ss:$8 sps:$4 sm:$0xff]   ;;  %v644_v27 = vld [vmem:[%s930_s1 + $0x160] ss:$8 sps:$4 sm:$0xff]   ;;  %v647_v29 = vld [vmem:[%s930_s1 + $0x174] ss:$8 sps:$4 sm:$0xff]  }
   0xb   :  { %427 = vmatpush1.bf16.msra.mxu0 %v619_v10  ;;  %v649_v30 = vld [vmem:[%s930_s1 + $0x70] ss:$8 sps:$4 sm:$0xff]   ;;  %v651_v32 = vld [vmem:[%s930_s1 + $0x84] ss:$8 sps:$4 sm:$0xff]   ;;  %v655_v34 = vld [vmem:[%s930_s1 + $0x80] ss:$8 sps:$4 sm:$0xff]  }
   0xc   :  { %468 = vmatpush1.bf16.msra.mxu1 %v620_v11  ;;  %428 = vmatprep.subr.bf16.mxu0 %v621_v12  ;;  %v650_v31 = vld [vmem:[%s930_s1 + $0x170] ss:$8 sps:$4 sm:$0xff]   ;;  %v653_v33 = vld [vmem:[%s930_s1 + $0x184] ss:$8 sps:$4 sm:$0xff]   ;;  %v656_v35 = vld [vmem:[%s930_s1 + $0x180] ss:$8 sps:$4 sm:$0xff]  }
   0xd   :  { %469 = vmatprep.subr.bf16.mxu1 %v623_v13  ;;  %v657_v36 = vld [vmem:[%s930_s1 + $0x94] ss:$8 sps:$4 sm:$0xff]   ;;  %v661_v38 = vld [vmem:[%s930_s1 + $0x90] ss:$8 sps:$4 sm:$0xff]   ;;  %v663_v40 = vld [vmem:[%s930_s1 + $0xa4] ss:$8 sps:$4 sm:$0xff]  }
   0xe   :  { %v659_v37 = vld [vmem:[%s930_s1 + $0x194] ss:$8 sps:$4 sm:$0xff]   ;;  %v662_v39 = vld [vmem:[%s930_s1 + $0x190] ss:$8 sps:$4 sm:$0xff]   ;;  %v665_v41 = vld [vmem:[%s930_s1 + $0x1a4] ss:$8 sps:$4 sm:$0xff]  }
   0xf   :  { %429 = vmatpush1.bf16.msra.mxu0 %v625_v14  ;;  %v667_v42 = vld [vmem:[%s930_s1 + $0xa0] ss:$8 sps:$4 sm:$0xff]   ;;  %v669_v44 = vld [vmem:[%s930_s1 + $0xb4] ss:$8 sps:$4 sm:$0xff]   ;;  %v673_v49 = vld [vmem:[%s930_s1 + $0xb0] ss:$8 sps:$4 sm:$0xff]  }
  0x10   :  { %470 = vmatpush1.bf16.msra.mxu1 %v626_v15  ;;  %430 = vmatprep.subr.bf16.mxu0 %v627_v16  ;;  %v668_v43 = vld [vmem:[%s930_s1 + $0x1a0] ss:$8 sps:$4 sm:$0xff]   ;;  %v671_v45 = vld [vmem:[%s930_s1 + $0x1b4] ss:$8 sps:$4 sm:$0xff]   ;;  %v674_v50 = vld [vmem:[%s930_s1 + $0x1b0] ss:$8 sps:$4 sm:$0xff]  }
  0x11   :  { %471 = vmatprep.subr.bf16.mxu1 %v629_v17  ;;  %v22_v46 = vld [vmem:[%s931_s0] sm:$0xff]  ;;  %v23_v48 = vld [vmem:[%s931_s0 + $0x8] sm:$0xff]  ;;  %v681_v56 = vld [vmem:[%s930_s1 + $0xd4] ss:$8 sps:$4 sm:$0xff]   ;;  %v516_v7 = vshrl.u32 %v515_v6, 7 }
  0x12   :  { %v536_v47 = vcombine.high %v22_v46, %v22_v46  ;;  %v538_v51 = vcombine.high %v23_v48, %v23_v48  ;;  %v675_v52 = vld [vmem:[%s930_s1 + $0xc4] ss:$8 sps:$4 sm:$0xff]   ;;  %v679_v54 = vld [vmem:[%s930_s1 + $0xc0] ss:$8 sps:$4 sm:$0xff]   ;;  %v683_v57 = vld [vmem:[%s930_s1 + $0x1d4] ss:$8 sps:$4 sm:$0xff]   ;;  %v535_v4 = vcombine.low %v22_v46, %v22_v46  ;;  %v537_v5 = vcombine.low %v23_v48, %v23_v48 }
  0x13   :  { %431 = vmatpush1.bf16.msra.mxu0 %v631_v18  ;;  %v677_v53 = vld [vmem:[%s930_s1 + $0x1c4] ss:$8 sps:$4 sm:$0xff]   ;;  %v680_v55 = vld [vmem:[%s930_s1 + $0x1c0] ss:$8 sps:$4 sm:$0xff]   ;;  %v685_v58 = vld [vmem:[%s930_s1 + $0xd0] ss:$8 sps:$4 sm:$0xff]  }
  0x14   :  { %472 = vmatpush1.bf16.msra.mxu1 %v632_v19  ;;  %432 = vmatprep.subr.bf16.mxu0 %v633_v20  ;;  %v686_v59 = vld [vmem:[%s930_s1 + $0x1d0] ss:$8 sps:$4 sm:$0xff]   ;;  %v687_v60 = vld [vmem:[%s930_s1 + $0xe4] ss:$8 sps:$4 sm:$0xff]   ;;  %v691_v62 = vld [vmem:[%s930_s1 + $0xe0] ss:$8 sps:$4 sm:$0xff]  }
  0x15   :  { %473 = vmatprep.subr.bf16.mxu1 %v635_v21  ;;  %454 = vmatprep.mubr.bf16.mxu0 %v536_v47  ;;  %v689_v61 = vld [vmem:[%s930_s1 + $0x1e4] ss:$8 sps:$4 sm:$0xff]   ;;  %v692_v63 = vld [vmem:[%s930_s1 + $0x1e0] ss:$8 sps:$4 sm:$0xff]   ;;  %v693_v0 = vld [vmem:[%s930_s1 + $0xf4] ss:$8 sps:$4 sm:$0xff]  }
  0x16   :  { %495 = vmatprep.mubr.bf16.mxu1 %v538_v51  ;;  %v695_v1 = vld [vmem:[%s930_s1 + $0x1f4] ss:$8 sps:$4 sm:$0xff]   ;;  %v697_v2 = vld [vmem:[%s930_s1 + $0xf0] ss:$8 sps:$4 sm:$0xff]   ;;  %v517_v8 = vsub.s32 0, %v516_v7  ;;  %v521_v10 = vsub.s32 1, %v516_v7 }
  0x17   :  { %433 = vmatpush1.bf16.msra.mxu0 %v637_v22  ;;  %v698_v3 = vld [vmem:[%s930_s1 + $0x1f0] ss:$8 sps:$4 sm:$0xff]   ;;  %v513_v9 = vld [vmem:[%s932_s2] sm:$0x3] }
  0x18   :  { %474 = vmatpush1.bf16.msra.mxu1 %v638_v23  ;;  %434 = vmatprep.subr.bf16.mxu0 %v639_v24  ;;  %v518_v11 = vrot.slane %v513_v9, %v517_v8  ;;  %v522_v14 = vrot.slane %v513_v9, %v521_v10 }
  0x19   :  { %475 = vmatprep.subr.bf16.mxu1 %v641_v25 }
  0x1b   :  { %435 = vmatpush1.bf16.msra.mxu0 %v643_v26 }
  0x1c   :  { %476 = vmatpush1.bf16.msra.mxu1 %v644_v27  ;;  %436 = vmatprep.subr.bf16.mxu0 %v645_v28 }
  0x1d   :  { %477 = vmatprep.subr.bf16.mxu1 %v647_v29 }
  0x1f   :  { %437 = vmatpush1.bf16.msra.mxu0 %v649_v30 }
  0x20   :  { %478 = vmatpush1.bf16.msra.mxu1 %v650_v31  ;;  %438 = vmatprep.subr.bf16.mxu0 %v651_v32 }
  0x21   :  { %479 = vmatprep.subr.bf16.mxu1 %v653_v33 }
  0x23   :  { %439 = vmatpush1.bf16.msra.mxu0 %v655_v34 }
  0x24   :  { %480 = vmatpush1.bf16.msra.mxu1 %v656_v35  ;;  %440 = vmatprep.subr.bf16.mxu0 %v657_v36 }
  0x25   :  { %481 = vmatprep.subr.bf16.mxu1 %v659_v37 }
  0x27   :  { %441 = vmatpush1.bf16.msra.mxu0 %v661_v38 }
  0x28   :  { %482 = vmatpush1.bf16.msra.mxu1 %v662_v39  ;;  %442 = vmatprep.subr.bf16.mxu0 %v663_v40 }
  0x29   :  { %483 = vmatprep.subr.bf16.mxu1 %v665_v41 }
  0x2b   :  { %443 = vmatpush1.bf16.msra.mxu0 %v667_v42 }
  0x2c   :  { %484 = vmatpush1.bf16.msra.mxu1 %v668_v43  ;;  %444 = vmatprep.subr.bf16.mxu0 %v669_v44 }
  0x2d   :  { %485 = vmatprep.subr.bf16.mxu1 %v671_v45 }
  0x2f   :  { %445 = vmatpush1.bf16.msra.mxu0 %v673_v49 }
  0x30   :  { %486 = vmatpush1.bf16.msra.mxu1 %v674_v50  ;;  %446 = vmatprep.subr.bf16.mxu0 %v675_v52 }
  0x31   :  { %487 = vmatprep.subr.bf16.mxu1 %v677_v53 }
  0x33   :  { %447 = vmatpush1.bf16.msra.mxu0 %v679_v54 }
  0x34   :  { %488 = vmatpush1.bf16.msra.mxu1 %v680_v55  ;;  %448 = vmatprep.subr.bf16.mxu0 %v681_v56 }
  0x35   :  { %489 = vmatprep.subr.bf16.mxu1 %v683_v57 }
  0x37   :  { %449 = vmatpush1.bf16.msra.mxu0 %v685_v58 }
  0x38   :  { %490 = vmatpush1.bf16.msra.mxu1 %v686_v59  ;;  %450 = vmatprep.subr.bf16.mxu0 %v687_v60 }
  0x39   :  { %491 = vmatprep.subr.bf16.mxu1 %v689_v61 }
  0x3b   :  { %451 = vmatpush1.bf16.msra.mxu0 %v691_v62 }
  0x3c   :  { %492 = vmatpush1.bf16.msra.mxu1 %v692_v63  ;;  %452 = vmatprep.subr.bf16.mxu0 %v693_v0 }
  0x3d   :  { %493 = vmatprep.subr.bf16.mxu1 %v695_v1 }
  0x3f   :  { %453 = vmatpush1.bf16.msra.mxu0 %v697_v2 }
  0x40   :  { %494 = vmatpush1.bf16.msra.mxu1 %v698_v3 }
  0x42   :  { %455 = vmatmul.mubr.bf16.vlgmr.msra.gmra.mrb[0].mxu0 %v535_v4 }
  0x43   :  { %496 = vmatmul.mubr.bf16.vlgmr.msra.gmra.mrb[0].mxu1 %v537_v5 }
 0x115   :  { %v456_v12 = vpop.f32.mrb[0].mxu0 }
 0x116   :  { %v497_v13 = vpop.f32.mrb[0].mxu1  ;;  %v458_v16 = vpop.f32.mrb[1].mxu0 }
 0x117   :  { %v498_v15 = vadd.f32 %v497_v13, %v456_v12  ;;  %v499_v17 = vpop.f32.mrb[1].mxu1  ;;  %v460_v19 = vpop.f32.mrb[2].mxu0 }
 0x118   :  { %v500_v18 = vadd.f32 %v499_v17, %v458_v16  ;;  %v501_v20 = vpop.f32.mrb[2].mxu1  ;;  %v461_v22 = vpop.f32.mrb[3].mxu0 }
 0x119   :  { %v525_v21 = vadd.f32 %v518_v11, %v498_v15  ;;  %v502_v23 = vpop.f32.mrb[3].mxu1 }
 0x11a   :  { %v526_v24 = vadd.f32 %v522_v14, %v500_v18 }
 0x11b   :  { %v527_v25 = vmax.f32 %v525_v21, 0.0 }
 0x11c   :  { %v528_v26 = vmax.f32 %v526_v24, 0.0 }
 0x11d   :  { %529 = vst [vmem:[%s933_s3] sm:$0xff] %v527_v25 }
 0x11e   :  { %530 = vst [vmem:[%s933_s3 + $0x8] sm:$0xff] %v528_v26 }

// kernel: attention_modules_forward.14
= control target key start
LH: loop header
LB: loop body
LE: loop exit
PB: predicated region body
PF: predicated region fallthrough
CT: control target
= control target key end

     0   :  { %v274_v35 = vlaneseq  ;;  %s526_s1 = inlined_call_operand.vmem [shape: bf16[256,256], index: 1, kind: input, shape index: {}]   ;;  %s527_s0 = inlined_call_operand.vmem [shape: bf16[8,256], index: 0, kind: input, shape index: {}]   ;;  %s528_s2 = inlined_call_operand.vmem [shape: f32[1,256], index: 2, kind: input, shape index: {}]   ;;  %s529_s3 = inlined_call_operand.vmem [shape: f32[8,256], index: 3, kind: output, shape index: {}]  }
   0x1   :  { %v340_v0 = vld [vmem:[%s526_s1 + $0x4] ss:$8 sps:$4 sm:$0xff]   ;;  %v342_v1 = vld [vmem:[%s526_s1] ss:$8 sps:$4 sm:$0xff]   ;;  %v343_v2 = vld [vmem:[%s526_s1 + $0x14] ss:$8 sps:$4 sm:$0xff]  }
   0x2   :  { %222 = vmatprep.subr.bf16.mxu0 %v340_v0  ;;  %v345_v3 = vld [vmem:[%s526_s1 + $0x10] ss:$8 sps:$4 sm:$0xff]   ;;  %v346_v4 = vld [vmem:[%s526_s1 + $0x24] ss:$8 sps:$4 sm:$0xff]   ;;  %v348_v5 = vld [vmem:[%s526_s1 + $0x20] ss:$8 sps:$4 sm:$0xff]  }
   0x3   :  { %223 = vmatpush1.bf16.msra.mxu0 %v342_v1  ;;  %v349_v6 = vld [vmem:[%s526_s1 + $0x34] ss:$8 sps:$4 sm:$0xff]   ;;  %v351_v7 = vld [vmem:[%s526_s1 + $0x30] ss:$8 sps:$4 sm:$0xff]   ;;  %v352_v8 = vld [vmem:[%s526_s1 + $0x44] ss:$8 sps:$4 sm:$0xff]  }
   0x4   :  { %224 = vmatprep.subr.bf16.mxu0 %v343_v2  ;;  %v354_v9 = vld [vmem:[%s526_s1 + $0x40] ss:$8 sps:$4 sm:$0xff]   ;;  %v355_v10 = vld [vmem:[%s526_s1 + $0x54] ss:$8 sps:$4 sm:$0xff]   ;;  %v357_v11 = vld [vmem:[%s526_s1 + $0x50] ss:$8 sps:$4 sm:$0xff]  }
   0x5   :  { %v358_v12 = vld [vmem:[%s526_s1 + $0x64] ss:$8 sps:$4 sm:$0xff]   ;;  %v360_v15 = vld [vmem:[%s526_s1 + $0x60] ss:$8 sps:$4 sm:$0xff]   ;;  %v361_v16 = vld [vmem:[%s526_s1 + $0x74] ss:$8 sps:$4 sm:$0xff]  }
   0x6   :  { %v22_v13 = vld [vmem:[%s527_s0] sm:$0xff]  ;;  %v363_v17 = vld [vmem:[%s526_s1 + $0x70] ss:$8 sps:$4 sm:$0xff]   ;;  %v367_v20 = vld [vmem:[%s526_s1 + $0x94] ss:$8 sps:$4 sm:$0xff]   ;;  %v275_v36 = vshrl.u32 %v274_v35, 7 }
   0x7   :  { %225 = vmatpush1.bf16.msra.mxu0 %v345_v3  ;;  %v305_v14 = vcombine.high %v22_v13, %v22_v13  ;;  %v364_v18 = vld [vmem:[%s526_s1 + $0x84] ss:$8 sps:$4 sm:$0xff]   ;;  %v366_v19 = vld [vmem:[%s526_s1 + $0x80] ss:$8 sps:$4 sm:$0xff]   ;;  %v369_v21 = vld [vmem:[%s526_s1 + $0x90] ss:$8 sps:$4 sm:$0xff]   ;;  %v304_v34 = vcombine.low %v22_v13, %v22_v13 }
   0x8   :  { %226 = vmatprep.subr.bf16.mxu0 %v346_v4  ;;  %v370_v22 = vld [vmem:[%s526_s1 + $0xa4] ss:$8 sps:$4 sm:$0xff]   ;;  %v372_v23 = vld [vmem:[%s526_s1 + $0xa0] ss:$8 sps:$4 sm:$0xff]   ;;  %v373_v24 = vld [vmem:[%s526_s1 + $0xb4] ss:$8 sps:$4 sm:$0xff]  }
   0x9   :  { %254 = vmatprep.mubr.bf16.mxu0 %v305_v14  ;;  %v375_v25 = vld [vmem:[%s526_s1 + $0xb0] ss:$8 sps:$4 sm:$0xff]   ;;  %v376_v26 = vld [vmem:[%s526_s1 + $0xc4] ss:$8 sps:$4 sm:$0xff]   ;;  %v378_v27 = vld [vmem:[%s526_s1 + $0xc0] ss:$8 sps:$4 sm:$0xff]  }
   0xa   :  { %v379_v28 = vld [vmem:[%s526_s1 + $0xd4] ss:$8 sps:$4 sm:$0xff]   ;;  %v381_v29 = vld [vmem:[%s526_s1 + $0xd0] ss:$8 sps:$4 sm:$0xff]   ;;  %v382_v30 = vld [vmem:[%s526_s1 + $0xe4] ss:$8 sps:$4 sm:$0xff]  }
   0xb   :  { %227 = vmatpush1.bf16.msra.mxu0 %v348_v5  ;;  %v384_v31 = vld [vmem:[%s526_s1 + $0xe0] ss:$8 sps:$4 sm:$0xff]   ;;  %v385_v32 = vld [vmem:[%s526_s1 + $0xf4] ss:$8 sps:$4 sm:$0xff]   ;;  %v387_v33 = vld [vmem:[%s526_s1 + $0xf0] ss:$8 sps:$4 sm:$0xff]  }
   0xc   :  { %228 = vmatprep.subr.bf16.mxu0 %v349_v6  ;;  %v276_v37 = vsub.s32 0, %v275_v36  ;;  %v272_v38 = vld [vmem:[%s528_s2] sm:$0x3]  ;;  %v280_v39 = vsub.s32 1, %v275_v36 }
   0xe   :  { %v277_v40 = vrot.slane %v272_v38, %v276_v37  ;;  %v281_v41 = vrot.slane %v272_v38, %v280_v39 }
   0xf   :  { %229 = vmatpush1.bf16.msra.mxu0 %v351_v7 }
  0x10   :  { %230 = vmatprep.subr.bf16.mxu0 %v352_v8 }
  0x13   :  { %231 = vmatpush1.bf16.msra.mxu0 %v354_v9 }
  0x14   :  { %232 = vmatprep.subr.bf16.mxu0 %v355_v10 }
  0x17   :  { %233 = vmatpush1.bf16.msra.mxu0 %v357_v11 }
  0x18   :  { %234 = vmatprep.subr.bf16.mxu0 %v358_v12 }
  0x1b   :  { %235 = vmatpush1.bf16.msra.mxu0 %v360_v15 }
  0x1c   :  { %236 = vmatprep.subr.bf16.mxu0 %v361_v16 }
  0x1f   :  { %237 = vmatpush1.bf16.msra.mxu0 %v363_v17 }
  0x20   :  { %238 = vmatprep.subr.bf16.mxu0 %v364_v18 }
  0x23   :  { %239 = vmatpush1.bf16.msra.mxu0 %v366_v19 }
  0x24   :  { %240 = vmatprep.subr.bf16.mxu0 %v367_v20 }
  0x27   :  { %241 = vmatpush1.bf16.msra.mxu0 %v369_v21 }
  0x28   :  { %242 = vmatprep.subr.bf16.mxu0 %v370_v22 }
  0x2b   :  { %243 = vmatpush1.bf16.msra.mxu0 %v372_v23 }
  0x2c   :  { %244 = vmatprep.subr.bf16.mxu0 %v373_v24 }
  0x2f   :  { %245 = vmatpush1.bf16.msra.mxu0 %v375_v25 }
  0x30   :  { %246 = vmatprep.subr.bf16.mxu0 %v376_v26 }
  0x33   :  { %247 = vmatpush1.bf16.msra.mxu0 %v378_v27 }
  0x34   :  { %248 = vmatprep.subr.bf16.mxu0 %v379_v28 }
  0x37   :  { %249 = vmatpush1.bf16.msra.mxu0 %v381_v29 }
  0x38   :  { %250 = vmatprep.subr.bf16.mxu0 %v382_v30 }
  0x3b   :  { %251 = vmatpush1.bf16.msra.mxu0 %v384_v31 }
  0x3c   :  { %252 = vmatprep.subr.bf16.mxu0 %v385_v32 }
  0x3f   :  { %253 = vmatpush1.bf16.msra.mxu0 %v387_v33 }
  0x42   :  { %255 = vmatmul.mubr.bf16.vlgmr.msra.gmra.mrb[0].mxu0 %v304_v34 }
 0x115   :  { %v256_v42 = vpop.f32.mrb[0].mxu0 }
 0x116   :  { %v284_v43 = vadd.f32 %v277_v40, %v256_v42  ;;  %v258_v44 = vpop.f32.mrb[1].mxu0 }
 0x117   :  { %v285_v45 = vadd.f32 %v281_v41, %v258_v44  ;;  %v260_v46 = vpop.f32.mrb[2].mxu0 }
 0x118   :  { %v338_v47 = vmul.f32 -1.442695, %v284_v43  ;;  %v261_v48 = vpop.f32.mrb[3].mxu0 }
 0x119   :  { %v339_v49 = vmul.f32 -1.442695, %v285_v45 }
 0x11a   :  { %390 = vpow2.f32 %v338_v47 }
 0x11b   :  { %392 = vpow2.f32 %v339_v49 }
 0x124   :  { %v391_v50 = vpop.eup %390 }
 0x125   :  { %v393_v51 = vpop.eup %392  ;;  %v292_v52 = vadd.f32 1.0, %v391_v50 }
 0x126   :  { %v293_v53 = vadd.f32 1.0, %v393_v51 }
 0x127   :  { %394 = vrcp.f32 %v292_v52 }
 0x128   :  { %396 = vrcp.f32 %v293_v53 }
 0x131   :  { %v395_v54 = vpop.eup %394 }
 0x132   :  { %v397_v55 = vpop.eup %396  ;;  %298 = vst [vmem:[%s529_s3] sm:$0xff] %v395_v54 }
 0x133   :  { %299 = vst [vmem:[%s529_s3 + $0x8] sm:$0xff] %v397_v55 }

// kernel: attention_modules_forward.15
= control target key start
LH: loop header
LB: loop body
LE: loop exit
PB: predicated region body
PF: predicated region fallthrough
CT: control target
= control target key end

     0   :  { %11 = vsyncpa [#allocation3], 0  ;;  %s1325_s0 = inlined_call_operand.vmem [shape: f32[2,64,256], index: 0, kind: input, shape index: {}]   ;;  %s1326_s1 = inlined_call_operand.vmem [shape: bf16[256,128], index: 1, kind: input, shape index: {}]   ;;  %s1327_s2 = inlined_call_operand.vmem [shape: f32[1,128], index: 2, kind: input, shape index: {}]   ;;  %s1328_s3 = inlined_call_operand.vmem [shape: f32[2,1,256], index: 3, kind: input, shape index: {}]   ;;  %s1329_s4 = inlined_call_operand.hbm [shape: f32[2,64,256], index: 4, kind: output, shape index: {0}]   ;;  %s1330_s5 = inlined_call_operand.vmem [shape: f32[2,64,2], index: 5, kind: output, shape index: {1}]  }
   0x1   :  { %13 = vsyncpa [#allocation3 + $0x1], 0  ;;  %s1073_s18 = smov 0   ;;  %s1075_s19 = smov 0  }
   0x2   :  { %s1077_s20 = smov 0   ;;  %s1079_s21 = smov 0  }
   0x3   :  { %s1081_s22 = smov 0   ;;  %s1083_s23 = smov 0  }
   0x4 LB: > { %s795_s24 = sadd.s32 4294967295, %s1038_s23   ;;  %s796_s25 = sadd.s32 4294967294, %s1038_s23   ;;  %s1038_s23 = sphi %s1083_s23, %s19_s23   ;;  %s1034_s22 = sphi %s1081_s22, %s1337_s22   ;;  %s1030_s21 = sphi %s1079_s21, %s1336_s21   ;;  %s1026_s20 = sphi %s1077_s20, %s1335_s20   ;;  %s1022_s19 = sphi %s1075_s19, %s1334_s19   ;;  %s1018_s18 = sphi %s1073_s18, %s1333_s18  }
   0x5   : > { %s31_s26 = sadd.s32 1, %s1034_s22  ;;  %s136_s27 = sadd.s32 1, %s1026_s20 }
   0x6   : > { %p33_p0 = scmp.ge.s32.totalorder %s31_s26, 2  ;;  %p146_p1 = scmp.ne.s32.totalorder %s1026_s20, %s1022_s19 }
   0x7   : > { %p147_p2 = scmp.eq.s32.totalorder %s795_s24, 1  ;;  %p152_p3 = scmp.ne.s32.totalorder %s1022_s19, %s1018_s18 }
   0x8   : > { %s1339_s26 = smov (%p33_p0, %s31_s26), 0  ;;  %p153_p5 = scmp.eq.s32.totalorder %s796_s25, 1 }
   0x9   : > { %p1113_p4 = por %p147_p2, %p146_p1  ;;  %s131_s29 = ssub.s32 %s1034_s22, %s1339_s26 }
   0xa   : > { %p799_p6 = scmp.ge.s32.totalorder %s1038_s23, 1  ;;  %p134_p7 = scmp.eq.s32.totalorder %s131_s29, 0 }
   0xb   : > { %p1120_p8 = por %p153_p5, %p152_p3  ;;  %p226_p9 = scmp.lt.s32.totalorder %s1038_s23, 3 }
   0xc   : > { %s1126_s6 = scalar_select %p134_p7, %s1026_s20, %s136_s27  }
   0xd   : > { %p227_p10 = pnand %p799_p6, %p226_p9 }
   0xe   : > { %v944_v0 = vld [vmem:[%s1326_s1 + $0x40] sm:$0xff] (!%p227_p10)   ;;  %v946_v2 = vld [vmem:[%s1326_s1 + $0x48] sm:$0xff] (!%p227_p10)   ;;  %p273_p11 = scmp.lt.s32.totalorder (!%p227_p10), %s1030_s21, 1  ;;  %v948_v4 = vld [vmem:[%s1326_s1 + $0x50] sm:$0xff] (!%p227_p10)   ;;  %v317_v5 = vlaneseq (!%p227_p10)  ;;  %s258_s13 = sand.u32 (!%p227_p10), 1, %s1022_s19  }
   0xf   : > { %230 = sbr.rel (%p227_p10) target bundleno = 440 (0x1b8), region = 36  ;;  %v945_v1 = vld [vmem:[%s1326_s1] sm:$0xff] (!%p227_p10)   ;;  %831 = vmatprep.subr.bf16.mxu0 (!%p227_p10), %v944_v0  ;;  %871 = vmatprep.subr.bf16.mxu1 (!%p227_p10), %v944_v0  ;;  %v947_v3 = vld [vmem:[%s1326_s1 + $0x8] sm:$0xff] (!%p227_p10)   ;;  %v949_v6 = vld [vmem:[%s1326_s1 + $0x10] sm:$0xff] (!%p227_p10)  }
  0x10   : > { %832 = vmatpush3.bf16.msra.mxu0 (!%p227_p10), %v945_v1  ;;  %879 = vmatpush3.bf16.msra.mxu1 (!%p227_p10), %v945_v1  ;;  %v950_v7 = vld [vmem:[%s1326_s1 + $0x58] sm:$0xff] (!%p227_p10)   ;;  %v318_v8 = vshrl.u32 (!%p227_p10), %v317_v5, 7  ;;  %v952_v10 = vld [vmem:[%s1326_s1 + $0x60] sm:$0xff] (!%p227_p10)   ;;  %v954_v14 = vld [vmem:[%s1326_s1 + $0x68] sm:$0xff] (!%p227_p10)  }
  0x11   : > { %833 = vmatprep.subr.bf16.mxu0 (!%p227_p10), %v946_v2  ;;  %872 = vmatprep.subr.bf16.mxu1 (!%p227_p10), %v946_v2  ;;  %v951_v9 = vld [vmem:[%s1326_s1 + $0x18] sm:$0xff] (!%p227_p10)   ;;  %v953_v13 = vld [vmem:[%s1326_s1 + $0x20] sm:$0xff] (!%p227_p10)   ;;  %v955_v24 = vld [vmem:[%s1326_s1 + $0x28] sm:$0xff] (!%p227_p10)  }
  0x12   : > { %v319_v11 = vsub.s32 (!%p227_p10), 0, %v318_v8  ;;  %v323_v12 = vsub.s32 (!%p227_p10), 1, %v318_v8  ;;  %v956_v30 = vld [vmem:[%s1326_s1 + $0x70] sm:$0xff] (!%p227_p10)   ;;  %v958_v49 = vld [vmem:[%s1326_s1 + $0x78] sm:$0xff] (!%p227_p10)  }
  0x13   : > { %v957_v44 = vld [vmem:[%s1326_s1 + $0x30] sm:$0xff] (!%p227_p10)   ;;  %v959_v56 = vld [vmem:[%s1326_s1 + $0x38] sm:$0xff] (!%p227_p10)  }
  0x14   : > { %834 = vmatpush3.bf16.msra.mxu0 (!%p227_p10), %v947_v3  ;;  %880 = vmatpush3.bf16.msra.mxu1 (!%p227_p10), %v947_v3  ;;  %v806_v3 = vld [vmem:[%s1327_s2] ss:$0 sm:$0xff] (!%p227_p10) }
  0x15   : > { %835 = vmatprep.subr.bf16.mxu0 (!%p227_p10), %v948_v4  ;;  %873 = vmatprep.subr.bf16.mxu1 (!%p227_p10), %v948_v4 }
  0x16   : > { %s1145_s17 = scalar_select %p273_p11, %s1030_s21, 1 }
  0x18   : > { %s828_s7 = sshll.u32 %s1145_s17, 7  ;;  %s803_s8 = sshll.u32 %s1145_s17, 1  ;;  %836 = vmatpush3.bf16.msra.mxu0 %v949_v6  ;;  %881 = vmatpush3.bf16.msra.mxu1 %v949_v6 }
  0x19   : > { %837 = vmatprep.subr.bf16.mxu0 %v950_v7  ;;  %874 = vmatprep.subr.bf16.mxu1 %v950_v7  ;;  %s1165_s16 = scalar_lea.vmem %s1325_s0, %s828_s7  ;;  %s286_s27 = scalar_lea.vmem %s1328_s3, %s803_s8 }
  0x1a   : > { %s800_s7 = sshll.u32 %s258_s13, 7  ;;  %v300_v15 = vld [vmem:[%s1165_s16 + $0x8] sm:$0xff]  ;;  %v302_v16 = vld [vmem:[%s1165_s16 + $0x18] sm:$0xff]  ;;  %v315_v17 = vld [vmem:[%s286_s27] sm:$0x3]  ;;  %s830_s8 = sshll.u32 %s1030_s21, 11 }
  0x1b   : > { %v320_v18 = vrot.slane %v315_v17, %v319_v11  ;;  %v324_v19 = vrot.slane %v315_v17, %v323_v12  ;;  %v360_v20 = vpack.c.bf16 %v302_v16, %v300_v15  ;;  %v308_v21 = vld [vmem:[%s1165_s16 + $0x48] sm:$0xff]  ;;  %v310_v22 = vld [vmem:[%s1165_s16 + $0x58] sm:$0xff]  ;;  %v1186_v28 = vld [vmem:[%s1165_s16] sm:$0xff]  ;;  %s1198_s24 = scalar_lea.vmem [#allocation2], %s800_s7  ;;  %s1243_s25 = scalar_lea.hbm %s1329_s4, %s830_s8 }
  0x1c   : > { %838 = vmatpush3.bf16.msra.mxu0 %v951_v9  ;;  %882 = vmatpush3.bf16.msra.mxu1 %v951_v9  ;;  %v364_v23 = vpack.c.bf16 %v310_v22, %v308_v21  ;;  %v1189_v29 = vld [vmem:[%s1165_s16 + $0x10] sm:$0xff]  ;;  %v307_v34 = vld [vmem:[%s1165_s16 + $0x40] sm:$0xff]  ;;  %v304_v38 = vld [vmem:[%s1165_s16 + $0x28] sm:$0xff]  ;;  %s660_s12 = sshll.u32 %s1198_s24, 4  ;;  %s1249_s27 = scalar_lea.sflag [#allocation3], %s258_s13  ;;  %s1245_s12 = int_to_ptr.vmem [resolvable:$true] %s660_s12 }
  0x1d   : > { %839 = vmatprep.subr.bf16.mxu0 %v952_v10  ;;  %875 = vmatprep.subr.bf16.mxu1 %v952_v10  ;;  %v328_v25 = vmul.f32 %v324_v19, %v300_v15  ;;  %v330_v26 = vmul.f32 %v324_v19, %v302_v16  ;;  %v336_v27 = vmul.f32 %v324_v19, %v308_v21  ;;  %v309_v35 = vld [vmem:[%s1165_s16 + $0x50] sm:$0xff]  ;;  %v306_v39 = vld [vmem:[%s1165_s16 + $0x38] sm:$0xff]  ;;  %v303_v42 = vld [vmem:[%s1165_s16 + $0x20] sm:$0xff]  ;;  %s960_s29 = scalar_lea.vmem %s1245_s12, 2048  ;;  %s1040_s21 = smov [#allocation2]  }
  0x1e   : > { %v338_v31 = vmul.f32 %v324_v19, %v310_v22  ;;  %v327_v32 = vmul.f32 %v320_v18, %v1186_v28  ;;  %v329_v33 = vmul.f32 %v320_v18, %v1189_v29  ;;  %534 = vmatprep.mubr.bf16.mxu0 %v360_v20  ;;  %550 = vmatprep.mubr.bf16.mxu1 %v364_v23  ;;  %v305_v43 = vld [vmem:[%s1165_s16 + $0x30] sm:$0xff]  ;;  %v312_v47 = vld [vmem:[%s1165_s16 + $0x68] sm:$0xff]  ;;  %v314_v48 = vld [vmem:[%s1165_s16 + $0x78] sm:$0xff]  ;;  %p961_p12 = scmp.ne.s32.totalorder %s1245_s12, %s960_s29 }
  0x1f   : > { %344 = vst [vmem:[%s1198_s24 + $0x8] sm:$0xff] %v328_v25  ;;  %346 = vst [vmem:[%s1198_s24 + $0x18] sm:$0xff] %v330_v26  ;;  %v335_v36 = vmul.f32 %v320_v18, %v307_v34  ;;  %v337_v37 = vmul.f32 %v320_v18, %v309_v35  ;;  %v332_v40 = vmul.f32 %v324_v19, %v304_v38  ;;  %v311_v52 = vld [vmem:[%s1165_s16 + $0x60] sm:$0xff]  ;;  %v313_v53 = vld [vmem:[%s1165_s16 + $0x70] sm:$0xff] }
  0x20   : > { %840 = vmatpush3.bf16.msra.mxu0 %v953_v13  ;;  %883 = vmatpush3.bf16.msra.mxu1 %v953_v13  ;;  %352 = vst [vmem:[%s1198_s24 + $0x48] sm:$0xff] %v336_v27  ;;  %354 = vst [vmem:[%s1198_s24 + $0x58] sm:$0xff] %v338_v31  ;;  %v334_v41 = vmul.f32 %v324_v19, %v306_v39  ;;  %v331_v45 = vmul.f32 %v320_v18, %v303_v42  ;;  %p962_p13 = pnand %p961_p12, %p1113_p4 }
  0x21   : > { %841 = vmatprep.subr.bf16.mxu0 %v954_v14  ;;  %876 = vmatprep.subr.bf16.mxu1 %v954_v14  ;;  %343 = vst [vmem:[%s1198_s24] sm:$0xff] %v327_v32  ;;  %345 = vst [vmem:[%s1198_s24 + $0x10] sm:$0xff] %v329_v33  ;;  %v333_v46 = vmul.f32 %v320_v18, %v305_v43  ;;  %v340_v50 = vmul.f32 %v324_v19, %v312_v47 }
  0x22   : > { %351 = vst [vmem:[%s1198_s24 + $0x40] sm:$0xff] %v335_v36  ;;  %353 = vst [vmem:[%s1198_s24 + $0x50] sm:$0xff] %v337_v37  ;;  %v342_v51 = vmul.f32 %v324_v19, %v314_v48  ;;  %v339_v54 = vmul.f32 %v320_v18, %v311_v52  ;;  %v341_v55 = vmul.f32 %v320_v18, %v313_v53  ;;  %p963_p0 = pneg %p962_p13 }
  0x23   : > { %348 = vst [vmem:[%s1198_s24 + $0x28] sm:$0xff] %v332_v40  ;;  %350 = vst [vmem:[%s1198_s24 + $0x38] sm:$0xff] %v334_v41  ;;  %v359_v57 = vpack.c.bf16 %v1189_v29, %v1186_v28  ;;  %v363_v58 = vpack.c.bf16 %v309_v35, %v307_v34  ;;  %v362_v59 = vpack.c.bf16 %v306_v39, %v304_v38 }
  0x24   : > { %842 = vmatpush3.bf16.msra.mxu0 %v955_v24  ;;  %884 = vmatpush3.bf16.msra.mxu1 %v955_v24  ;;  %347 = vst [vmem:[%s1198_s24 + $0x20] sm:$0xff] %v331_v45  ;;  %349 = vst [vmem:[%s1198_s24 + $0x30] sm:$0xff] %v333_v46  ;;  %v366_v60 = vpack.c.bf16 %v314_v48, %v312_v47  ;;  %v361_v61 = vpack.c.bf16 %v305_v43, %v303_v42 }
  0x25   : > { %843 = vmatprep.subr.bf16.mxu0 %v956_v30  ;;  %877 = vmatprep.subr.bf16.mxu1 %v956_v30  ;;  %356 = vst [vmem:[%s1198_s24 + $0x68] sm:$0xff] %v340_v50  ;;  %358 = vst [vmem:[%s1198_s24 + $0x78] sm:$0xff] %v342_v51  ;;  %v365_v62 = vpack.c.bf16 %v313_v53, %v311_v52 }
  0x26   : > { %355 = vst [vmem:[%s1198_s24 + $0x60] sm:$0xff] %v339_v54  ;;  %357 = vst [vmem:[%s1198_s24 + $0x70] sm:$0xff] %v341_v55  ;;  %s964_s24 = sshll.u32 %s1040_s21, 4  ;;  %s965_s24 = int_to_ptr.vmem [resolvable:$false] %s964_s24 }
  0x27   : > { %s966_s9 = scalar_lea.vmem %s965_s24, 4096  ;;  %p967_p1 = scmp.lt.s32.totalorder %s1245_s12, %s965_s24 }
  0x28   : > { %844 = vmatpush3.bf16.msra.mxu0 %v957_v44  ;;  %885 = vmatpush3.bf16.msra.mxu1 %v957_v44  ;;  %p968_p2 = scmp.lt.s32.totalorder %s966_s9, %s960_s29 }
  0x29   : > { %845 = vmatprep.subr.bf16.mxu0 %v958_v49  ;;  %878 = vmatprep.subr.bf16.mxu1 %v958_v49 }
  0x2a   : > { %p969_p3 = por %p968_p2, %p967_p1 }
  0x2c   : > { %846 = vmatpush3.bf16.msra.mxu0 %v959_v56  ;;  %886 = vmatpush3.bf16.msra.mxu1 %v959_v56  ;;  %p970_p5 = pnand %p969_p3, %p963_p0 }
  0x2f   : > { %535 = vmatmul.mubr.bf16.vlgmr.msra.gmra.mrb[0].mxu0 %v359_v57  ;;  %551 = vmatmul.mubr.bf16.vlgmr.msra.gmra.mrb[0].mxu1 %v363_v58 }
  0x30   : > { %542 = vmatprep.mubr.bf16.mxu0 %v362_v59  ;;  %558 = vmatprep.mubr.bf16.mxu1 %v366_v60 }
  0x37   : > { %543 = vmatmul.mubr.bf16.gmra.mrb[4].mxu0 %v361_v61  ;;  %559 = vmatmul.mubr.bf16.gmra.mrb[4].mxu1 %v365_v62 }
 0x102   : > { %v847_v63 = vpop.f32.mrb[0].mxu0  ;;  %v859_v0 = vpop.f32.mrb[0].mxu1 }
 0x103   : > { %v848_v1 = vpop.f32.mrb[1].mxu0  ;;  %v860_v2 = vpop.f32.mrb[1].mxu1 }
 0x104   : > { %v849_v4 = vadd.f32 %v848_v1, %v847_v63  ;;  %v861_v5 = vadd.f32 %v860_v2, %v859_v0  ;;  %v850_v6 = vpop.f32.mrb[2].mxu0  ;;  %v862_v7 = vpop.f32.mrb[2].mxu1 }
 0x105   : > { %v851_v8 = vpop.f32.mrb[3].mxu0  ;;  %v863_v9 = vpop.f32.mrb[3].mxu1 }
 0x106   : > { %v852_v10 = vadd.f32 %v851_v8, %v850_v6  ;;  %v864_v11 = vadd.f32 %v863_v9, %v862_v7  ;;  %v537_v12 = vadd.f32 %v849_v4, %v806_v3  ;;  %v553_v15 = vadd.f32 %v861_v5, %v806_v3 }
 0x108   : > { %v567_v13 = vmax.f32 %v537_v12, 0.0  ;;  %v556_v14 = vadd.f32 %v864_v11, %v806_v3  ;;  %v540_v18 = vadd.f32 %v852_v10, %v806_v3  ;;  %v571_v23 = vmax.f32 %v553_v15, 0.0 }
 0x10a   : > { %591 = vadd.xlane.f32.xlu0 %v567_v13  ;;  %v572_v16 = vmax.f32 %v556_v14, 0.0  ;;  %v853_v17 = vpop.f32.mrb[4].mxu0  ;;  %v865_v19 = vpop.f32.mrb[4].mxu1  ;;  %v568_v30 = vmax.f32 %v540_v18, 0.0 }
 0x10b   : > { %v854_v20 = vpop.f32.mrb[5].mxu0  ;;  %v866_v21 = vpop.f32.mrb[5].mxu1 }
 0x10c   : > { %601 = vadd.xlane.f32.xlu1 %v572_v16  ;;  %v855_v22 = vadd.f32 %v854_v20, %v853_v17  ;;  %v856_v24 = vpop.f32.mrb[6].mxu0  ;;  %v867_v25 = vadd.f32 %v866_v21, %v865_v19  ;;  %v868_v26 = vpop.f32.mrb[6].mxu1 }
 0x10d   : > { %v857_v27 = vpop.f32.mrb[7].mxu0  ;;  %v869_v28 = vpop.f32.mrb[7].mxu1 }
 0x10e   : > { %599 = vadd.xlane.f32.xlu0 %v571_v23  ;;  %v858_v29 = vadd.f32 %v857_v27, %v856_v24  ;;  %v870_v31 = vadd.f32 %v869_v28, %v868_v26  ;;  %v545_v32 = vadd.f32 %v855_v22, %v806_v3  ;;  %v561_v35 = vadd.f32 %v867_v25, %v806_v3 }
 0x110   : > { %577 = vmax.xlane.f32.xlu1 %v568_v30  ;;  %v569_v33 = vmax.f32 %v545_v32, 0.0  ;;  %v548_v34 = vadd.f32 %v858_v29, %v806_v3  ;;  %v573_v37 = vmax.f32 %v561_v35, 0.0  ;;  %v564_v38 = vadd.f32 %v870_v31, %v806_v3 }
 0x112   : > { %575 = vmax.xlane.f32.xlu0 %v567_v13  ;;  %v570_v36 = vmax.f32 %v548_v34, 0.0  ;;  %v574_v39 = vmax.f32 %v564_v38, 0.0 }
 0x114   : > { %585 = vmax.xlane.f32.xlu1 %v572_v16 }
 0x116   : > { %583 = vmax.xlane.f32.xlu0 %v571_v23 }
 0x118   : > { %595 = vadd.xlane.f32.xlu1 %v569_v33 }
 0x11a   : > { %593 = vadd.xlane.f32.xlu0 %v568_v30 }
 0x11c   : > { %597 = vadd.xlane.f32.xlu1 %v570_v36 }
 0x11e   : > { %603 = vadd.xlane.f32.xlu0 %v573_v37 }
 0x120   : > { %605 = vadd.xlane.f32.xlu1 %v574_v39 }
 0x122   : > { %579 = vmax.xlane.f32.xlu0 %v569_v33 }
 0x124   : > { %581 = vmax.xlane.f32.xlu1 %v570_v36 }
 0x126   : > { %587 = vmax.xlane.f32.xlu0 %v573_v37 }
 0x128   : > { %589 = vmax.xlane.f32.xlu1 %v574_v39 }
 0x129   : > { %973 = shalt.err (!%p970_p5)
}
 0x12a   : > { %s974_s13 = scalar_lea.hbm %s1243_s25, 2048  ;;  %s978_s16 = scalar_lea.hbm %s1329_s4, 4096 }
 0x12b   : > { %p975_p6 = scmp.ne.s32.totalorder %s1243_s25, %s974_s13  ;;  %p979_p10 = scmp.lt.u32.totalorder %s1243_s25, %s1329_s4 }
 0x12c   : > { %p980_p11 = scmp.lt.u32.totalorder %s978_s16, %s974_s13  ;;  %p982_p13 = scmp.lt.u32.totalorder %s974_s13, %s1243_s25 }
 0x12d   : > { %p976_p7 = pnand %p975_p6, %p1113_p4 }
 0x12e   : > { %p981_p12 = por %p980_p11, %p979_p10 }
 0x12f   : > { %p977_p9 = pneg %p976_p7 }
 0x130   : > { %p983_p0 = por %p982_p13, %p981_p12 }
 0x132   : > { %p984_p1 = pnand %p983_p0, %p977_p9 }
 0x134   : > { %987 = shalt.err (!%p984_p1)
}
 0x135   : > { %s1041_s14 = smov 256   ;;  %s1042_s15 = smov 16   ;;  %vm616_vm0 = vcmask 7168   ;;  %vm625_vm1 = vcmask 15360  }
 0x136   : > { %887 = dma.vmem_to_hbm [thread:$0]  (%p1113_p4), %s1245_s12, 2048, %s1243_s25, %s1249_s27, %s1041_s14, %s1041_s14, %s1042_s15  }
 0x137   : > { %s829_s29 = sshll.u32 %s1145_s17, 6 }
 0x138   : > { %s1277_s9 = scalar_lea.vmem %s1330_s5, %s829_s29 }
 0x197   : > { %v592_v40 = vpop.xlane.xlu0 %591 }
 0x198   : > { %v608_v44 = vmul.f32 0.0078125, %v592_v40 }
 0x199   : > { %v602_v41 = vpop.xlane.xlu1 %601 }
 0x19a   : > { %v613_v46 = vmul.f32 0.0078125, %v602_v41 }
 0x19b   : > { %v600_v42 = vpop.xlane.xlu0 %599 }
 0x19c   : > { %v612_v49 = vmul.f32 0.0078125, %v600_v42 }
 0x19d   : > { %v578_v43 = vpop.xlane.xlu1 %577 }
 0x19f   : > { %v576_v45 = vpop.xlane.xlu0 %575 }
 0x1a0   : > { %v617_v47 = vsel %vm616_vm0, %v576_v45, %v608_v44 }
 0x1a1   : > { %626 = vst.msk [vmem:[%s1277_s9] sm:$0xff] %vm625_vm1, %v617_v47  ;;  %v586_v48 = vpop.xlane.xlu1 %585 }
 0x1a2   : > { %v622_v50 = vsel %vm616_vm0, %v586_v48, %v613_v46 }
 0x1a3   : > { %631 = vst.msk [vmem:[%s1277_s9 + $0x28] sm:$0xff] %vm625_vm1, %v622_v50  ;;  %v584_v51 = vpop.xlane.xlu0 %583 }
 0x1a4   : > { %v621_v52 = vsel %vm616_vm0, %v584_v51, %v612_v49 }
 0x1a5   : > { %630 = vst.msk [vmem:[%s1277_s9 + $0x20] sm:$0xff] %vm625_vm1, %v621_v52  ;;  %v596_v53 = vpop.xlane.xlu1 %595 }
 0x1a6   : > { %v610_v60 = vmul.f32 0.0078125, %v596_v53 }
 0x1a7   : > { %v594_v54 = vpop.xlane.xlu0 %593 }
 0x1a8   : > { %v609_v55 = vmul.f32 0.0078125, %v594_v54 }
 0x1a9   : > { %v598_v56 = vpop.xlane.xlu1 %597 }
 0x1aa   : > { %v618_v57 = vsel %vm616_vm0, %v578_v43, %v609_v55  ;;  %v611_v62 = vmul.f32 0.0078125, %v598_v56 }
 0x1ab   : > { %627 = vst.msk [vmem:[%s1277_s9 + $0x8] sm:$0xff] %vm625_vm1, %v618_v57  ;;  %v604_v58 = vpop.xlane.xlu0 %603 }
 0x1ac   : > { %v614_v1 = vmul.f32 0.0078125, %v604_v58 }
 0x1ad   : > { %v606_v59 = vpop.xlane.xlu1 %605 }
 0x1ae   : > { %v615_v4 = vmul.f32 0.0078125, %v606_v59 }
 0x1af   : > { %v580_v61 = vpop.xlane.xlu0 %579 }
 0x1b0   : > { %v619_v63 = vsel %vm616_vm0, %v580_v61, %v610_v60 }
 0x1b1   : > { %628 = vst.msk [vmem:[%s1277_s9 + $0x10] sm:$0xff] %vm625_vm1, %v619_v63  ;;  %v582_v0 = vpop.xlane.xlu1 %581 }
 0x1b2   : > { %v620_v2 = vsel %vm616_vm0, %v582_v0, %v611_v62 }
 0x1b3   : > { %629 = vst.msk [vmem:[%s1277_s9 + $0x18] sm:$0xff] %vm625_vm1, %v620_v2  ;;  %v588_v3 = vpop.xlane.xlu0 %587 }
 0x1b4   : > { %v623_v5 = vsel %vm616_vm0, %v588_v3, %v614_v1 }
 0x1b5   : > { %632 = vst.msk [vmem:[%s1277_s9 + $0x30] sm:$0xff] %vm625_vm1, %v623_v5  ;;  %v590_v6 = vpop.xlane.xlu1 %589 }
 0x1b6   : > { %v624_v7 = vsel %vm616_vm0, %v590_v6, %v615_v4 }
 0x1b7   : > { %633 = vst.msk [vmem:[%s1277_s9 + $0x38] sm:$0xff] %vm625_vm1, %v624_v7 }
 0x1b8 PF: > { %p893_p4 = scmp.ge.s32.totalorder %s1038_s23, 2  ;;  %s679_s28 = sand.u32 1, %s1018_s18  }
 0x1b9   : > { %s680_s17 = scalar_lea.sflag [#allocation3], %s679_s28 }
 0x1ba   : > { %p890_p2 = pnand %p893_p4, %p1120_p8 }
 0x1bc   : > { %1013 = dma.done.wait (!%p890_p2), %s680_s17, 2048  }
 0x1bd   : > { %1015 = vsyncadd (!%p890_p2), %s680_s17, 4294965248  ;;  %s19_s23 = sadd.s32 1, %s1038_s23   ;;  %s1333_s18 = smov %s1022_s19 }
 0x1be   : > { %p16_p3 = scmp.ge.s32.totalorder %s19_s23, 4   ;;  %s1334_s19 = smov %s1026_s20 }
 0x1bf   : > { %s1335_s20 = smov %s1126_s6  ;;  %s1336_s21 = smov %s1034_s22 }
 0x1c0   : > { %s1337_s22 = smov %s1339_s26  ;;  %18 = sbr.rel (!%p16_p3) target bundleno = 4 (0x4), region = 86 }
 0x1c7   :  { %697 = vsyncpa [#allocation3], 1 }
 0x1c8   :  { %699 = vsyncpa [#allocation3 + $0x1], 1 }

// kernel: attention_modules_forward.16
= control target key start
LH: loop header
LB: loop body
LE: loop exit
PB: predicated region body
PF: predicated region fallthrough
CT: control target
= control target key end

     0   :  { %7 = vsyncpa [#allocation4], 0  ;;  %s1095_s0 = inlined_call_operand.vmem [shape: f32[2,2,12,12], index: 0, kind: input, shape index: {}]   ;;  %s1096_s1 = inlined_call_operand.vmem [shape: f32[51], index: 1, kind: input, shape index: {}]   ;;  %s1097_s2 = inlined_call_operand.hbm [shape: f32[2,8,8], index: 2, kind: output, shape index: {}]  }
   0x1   :  { %8 = vsyncpa [#allocation3], 0 }
   0x2   :  { %10 = vsyncpa [#allocation3 + $0x1], 0  ;;  %s855_s9 = smov 0   ;;  %s857_s10 = smov 0  }
   0x3   :  { %s859_s11 = smov 0   ;;  %s861_s12 = smov 0  }
   0x4 LB: > { %s876_s13 = sadd.s32 4294967295, %s832_s12   ;;  %s623_s14 = sadd.s32 4294967294, %s832_s12   ;;  %s832_s12 = sphi %s861_s12, %s1104_s12   ;;  %s828_s11 = sphi %s859_s11, %s1103_s11   ;;  %s824_s10 = sphi %s857_s10, %s1102_s10   ;;  %s820_s9 = sphi %s855_s9, %s1101_s9  }
   0x5   : > { %s880_s15 = sadd.s32 1, %s832_s12   ;;  %s70_s16 = sadd.s32 1, %s828_s11 }
   0x6   : > { %s67_s17 = ssub.s32 %s832_s12, %s880_s15  ;;  %p80_p0 = scmp.ne.s32.totalorder %s828_s11, %s824_s10 }
   0x7   : > { %p68_p1 = scmp.eq.s32.totalorder %s67_s17, 0  ;;  %p81_p2 = scmp.eq.s32.totalorder %s876_s13, 1 }
   0x8   : > { %p86_p3 = scmp.ne.s32.totalorder %s824_s10, %s820_s9  ;;  %p87_p4 = scmp.eq.s32.totalorder %s623_s14, 1 }
   0x9   : > { %s891_s18 = scalar_select %p68_p1, %s828_s11, %s70_s16  }
   0xa   : > { %p893_p5 = por %p81_p2, %p80_p0  ;;  %p897_p6 = por %p87_p4, %p86_p3 }
   0xb   : > { %p624_p7 = scmp.ge.s32.totalorder %s832_s12, 1  ;;  %p94_p8 = scmp.lt.s32.totalorder %s832_s12, 3 }
   0xc   : > { %p707_p9 = scmp.eq.s32.totalorder %s876_s13, 0  ;;  %s107_s24 = sshll.u32 %s1096_s1, 4  ;;  %s108_s24 = int_to_ptr.vmem [resolvable:$true] %s107_s24 }
   0xd   : > { %p904_p10 = pnand %p624_p7, %p94_p8  ;;  %s751_s25 = scalar_lea.vmem %s108_s24, 16 }
   0xe   : > { %p752_p13 = scmp.ne.s32.totalorder %s108_s24, %s751_s25  ;;  %p759_p3 = scmp.lt.s32.totalorder %s108_s24, %s108_s24 }
   0xf   : > { %p699_p11 = pneg %p904_p10  ;;  %p760_p4 = scmp.lt.s32.totalorder %s751_s25, %s751_s25 }
  0x11   : > { %p700_p12 = pnand %p707_p9, %p699_p11  ;;  %p761_p7 = por %p760_p4, %p759_p3 }
  0x13   : > { %p753_p0 = pneg %p700_p12 }
  0x15   : > { %p754_p1 = pnand %p753_p0, %p752_p13 }
  0x17   : > { %p755_p2 = pneg %p754_p1 }
  0x19   : > { %p762_p8 = pnand %p761_p7, %p755_p2 }
  0x1b   : > { %765 = shalt.err (!%p762_p8)
}
  0x1c   : > { %s834_s26 = smov [#allocation2]   ;;  %128 = sbr.rel (%p904_p10) target bundleno = 304 (0x130), region = 28 }
  0x1d   : > { %702 = dma.vmem_to_smem (!%p700_p12), %s108_s24, 16, %s834_s26, [#allocation4]  }
  0x23   : > { %811 = dma.done.wait (%p707_p9), [#allocation4], 16  }
  0x24   : > { %813 = vsyncadd (%p707_p9), [#allocation4], 4294967280 }
  0x25   : > { %134 = sfence }
  0x26   : > { %p151_p11 = scmp.lt.s32.totalorder %s876_s13, 1  ;;  %s632_s27 = sld [smem:[#allocation2 + $0x1]]  ;;  %vm536_vm0 = vcmask 64512  }
  0x27   : > { %s634_s28 = sld [smem:[#allocation2 + $0x3]]  ;;  %s633_s30 = sld [smem:[#allocation2 + $0x2]] }
  0x28   : > { %s152_s29 = scalar_select %p151_p11, %s876_s13, 1 }
  0x29   : > { %s635_s7 = sld [smem:[#allocation2 + $0x4]]  ;;  %s637_s8 = sld [smem:[#allocation2 + $0x6]] }
  0x2a   : > { %s692_s3 = sshll.u32 %s152_s29, 5  ;;  %s638_s14 = sld [smem:[#allocation2 + $0x7]] }
  0x2b   : > { %s926_s6 = scalar_lea.vmem %s1095_s0, %s692_s3  ;;  %s639_s16 = sld [smem:[#allocation2 + $0x8]] }
  0x2c   : > { %v929_v0 = vld [vmem:[%s926_s6] sm:$0xff]  ;;  %v162_v1 = vstv %s632_s27  ;;  %s640_s17 = sld [smem:[#allocation2 + $0x9]]  ;;  %s835_s21 = smov 127   ;;  %v982_v45 = vld [vmem:[%s926_s6 + $0x10] sm:$0xff] }
  0x2d   : > { %v163_v2 = vmul.f32 %v162_v1, %v929_v0  ;;  %v178_v3 = vstv %s634_s28  ;;  %v170_v5 = vstv %s633_s30  ;;  %s836_s22 = smov 125   ;;  %v937_v7 = vld [vmem:[%s926_s6 + $0x1] sm:$0xff]  ;;  %s642_s23 = sld [smem:[#allocation2 + $0xb]]  ;;  %v993_v54 = vld [vmem:[%s926_s6 + $0x11] sm:$0xff] }
  0x2e   : > { %v179_v4 = vmul.f32 %v178_v3, %v929_v0  ;;  %v171_v6 = vmul.f32 %v170_v5, %v929_v0  ;;  %s643_s24 = sld [smem:[#allocation2 + $0xc]]  ;;  %s837_s25 = smov 126   ;;  %v949_v18 = vld [vmem:[%s926_s6 + $0x2] sm:$0xff]  ;;  %v1004_v63 = vld [vmem:[%s926_s6 + $0x12] sm:$0xff] }
  0x2f   : > { %165 = vrot.lane.b32.xlu0 %v163_v2, %s835_s21  ;;  %v186_v8 = vstv %s635_s7  ;;  %v199_v10 = vstv %s637_s8  ;;  %s838_s26 = smov 124   ;;  %s644_s27 = sld [smem:[#allocation2 + $0xd]]  ;;  %v960_v27 = vld [vmem:[%s926_s6 + $0x3] sm:$0xff] }
  0x30   : > { %181 = vrot.lane.b32.xlu1 %v179_v4, %s836_s22  ;;  %v187_v9 = vmul.f32 %v186_v8, %v929_v0  ;;  %v200_v11 = vmul.f32 %v199_v10, %v937_v7  ;;  %v207_v12 = vstv %s638_s14  ;;  %s645_s28 = sld [smem:[#allocation2 + $0xe]]  ;;  %s647_s29 = sld [smem:[#allocation2 + $0x10]]  ;;  %v971_v36 = vld [vmem:[%s926_s6 + $0x4] sm:$0xff]  ;;  %v1015_v10 = vld [vmem:[%s926_s6 + $0x13] sm:$0xff] }
  0x31   : > { %v208_v13 = vmul.f32 %v207_v12, %v937_v7  ;;  %v215_v14 = vstv %s639_s16  ;;  %s648_s30 = sld [smem:[#allocation2 + $0x11]]  ;;  %s649_s3 = sld [smem:[#allocation2 + $0x12]] }
  0x32   : > { %v223_v15 = vstv %s640_s17  ;;  %v216_v16 = vmul.f32 %v215_v14, %v937_v7  ;;  %s650_s4 = sld [smem:[#allocation2 + $0x13]]  ;;  %s652_s5 = sld [smem:[#allocation2 + $0x15]] }
  0x33   : > { %173 = vrot.lane.b32.xlu0 %v171_v6, %s837_s25  ;;  %v224_v17 = vmul.f32 %v223_v15, %v937_v7  ;;  %v236_v19 = vstv %s642_s23  ;;  %s653_s7 = sld [smem:[#allocation2 + $0x16]]  ;;  %s654_s8 = sld [smem:[#allocation2 + $0x17]] }
  0x34   : > { %189 = vrot.lane.b32.xlu1 %v187_v9, %s838_s26  ;;  %v244_v20 = vstv %s643_s24  ;;  %v237_v21 = vmul.f32 %v236_v19, %v949_v18  ;;  %s655_s14 = sld [smem:[#allocation2 + $0x18]]  ;;  %s658_s16 = sld [smem:[#allocation2 + $0x1a]] }
  0x35   : > { %v245_v22 = vmul.f32 %v244_v20, %v949_v18  ;;  %v252_v23 = vstv %s644_s27  ;;  %s659_s17 = sld [smem:[#allocation2 + $0x1b]]  ;;  %s660_s23 = sld [smem:[#allocation2 + $0x1c]]  ;;  %v1026_v20 = vld [vmem:[%s926_s6 + $0x14] sm:$0xff] }
  0x36   : > { %v260_v24 = vstv %s645_s28  ;;  %v253_v25 = vmul.f32 %v252_v23, %v949_v18  ;;  %v273_v28 = vstv %s647_s29  ;;  %s661_s24 = sld [smem:[#allocation2 + $0x1d]]  ;;  %s664_s27 = sld [smem:[#allocation2 + $0x1f]] }
  0x37   : > { %202 = vrot.lane.b32.xlu0 %v200_v11, %s835_s21  ;;  %v261_v26 = vmul.f32 %v260_v24, %v949_v18  ;;  %v281_v29 = vstv %s648_s30  ;;  %v274_v30 = vmul.f32 %v273_v28, %v960_v27  ;;  %v289_v32 = vstv %s649_s3  ;;  %s665_s28 = sld [smem:[#allocation2 + $0x20]]  ;;  %s666_s29 = sld [smem:[#allocation2 + $0x21]] }
  0x38   : > { %210 = vrot.lane.b32.xlu1 %v208_v13, %s837_s25  ;;  %v282_v31 = vmul.f32 %v281_v29, %v960_v27  ;;  %v297_v33 = vstv %s650_s4  ;;  %v290_v34 = vmul.f32 %v289_v32, %v960_v27  ;;  %v310_v37 = vstv %s652_s5  ;;  %s667_s30 = sld [smem:[#allocation2 + $0x22]]  ;;  %s670_s3 = sld [smem:[#allocation2 + $0x24]] }
  0x39   : > { %v298_v35 = vmul.f32 %v297_v33, %v960_v27  ;;  %v318_v38 = vstv %s653_s7  ;;  %v311_v39 = vmul.f32 %v310_v37, %v971_v36  ;;  %v326_v41 = vstv %s654_s8  ;;  %s671_s4 = sld [smem:[#allocation2 + $0x25]]  ;;  %s672_s5 = sld [smem:[#allocation2 + $0x26]] }
  0x3a   : > { %v319_v40 = vmul.f32 %v318_v38, %v971_v36  ;;  %v334_v42 = vstv %s655_s14  ;;  %v327_v43 = vmul.f32 %v326_v41, %v971_v36  ;;  %v348_v46 = vstv %s658_s16  ;;  %s673_s7 = sld [smem:[#allocation2 + $0x27]]  ;;  %s676_s8 = sld [smem:[#allocation2 + $0x29]] }
  0x3b   : > { %218 = vrot.lane.b32.xlu0 %v216_v16, %s836_s22  ;;  %v335_v44 = vmul.f32 %v334_v42, %v971_v36  ;;  %v356_v47 = vstv %s659_s17  ;;  %v349_v48 = vmul.f32 %v982_v45, %v348_v46  ;;  %v364_v50 = vstv %s660_s23  ;;  %s677_s14 = sld [smem:[#allocation2 + $0x2a]]  ;;  %s678_s16 = sld [smem:[#allocation2 + $0x2b]] }
  0x3c   : > { %226 = vrot.lane.b32.xlu1 %v224_v17, %s838_s26  ;;  %v357_v49 = vmul.f32 %v982_v45, %v356_v47  ;;  %v372_v51 = vstv %s661_s24  ;;  %v365_v52 = vmul.f32 %v982_v45, %v364_v50  ;;  %v385_v55 = vstv %s664_s27  ;;  %s679_s17 = sld [smem:[#allocation2 + $0x2c]]  ;;  %s682_s23 = sld [smem:[#allocation2 + $0x2e]] }
  0x3d   : > { %v373_v53 = vmul.f32 %v982_v45, %v372_v51  ;;  %v393_v56 = vstv %s665_s28  ;;  %v386_v57 = vmul.f32 %v993_v54, %v385_v55  ;;  %v401_v59 = vstv %s666_s29  ;;  %s683_s24 = sld [smem:[#allocation2 + $0x2f]]  ;;  %s684_s27 = sld [smem:[#allocation2 + $0x30]] }
  0x3e   : > { %v394_v58 = vmul.f32 %v993_v54, %v393_v56  ;;  %v409_v60 = vstv %s667_s30  ;;  %v402_v61 = vmul.f32 %v993_v54, %v401_v59  ;;  %v422_v1 = vstv %s670_s3  ;;  %s685_s28 = sld [smem:[#allocation2 + $0x31]]  ;;  %s156_s6 = sld [smem:[#allocation2]] }
  0x3f   : > { %239 = vrot.lane.b32.xlu0 %v237_v21, %s835_s21  ;;  %v410_v62 = vmul.f32 %v993_v54, %v409_v60  ;;  %v430_v2 = vstv %s671_s4  ;;  %v423_v3 = vmul.f32 %v1004_v63, %v422_v1  ;;  %v438_v5 = vstv %s672_s5  ;;  %s636_s29 = sld [smem:[#allocation2 + $0x5]]  ;;  %s662_s30 = sld [smem:[#allocation2 + $0x1e]] }
  0x40   : > { %247 = vrot.lane.b32.xlu1 %v245_v22, %s837_s25  ;;  %v431_v4 = vmul.f32 %v1004_v63, %v430_v2  ;;  %v446_v6 = vstv %s673_s7  ;;  %v439_v8 = vmul.f32 %v1004_v63, %v438_v5  ;;  %v459_v11 = vstv %s676_s8  ;;  %s668_s3 = sld [smem:[#allocation2 + $0x23]]  ;;  %s674_s4 = sld [smem:[#allocation2 + $0x28]] }
  0x41   : > { %v447_v9 = vmul.f32 %v1004_v63, %v446_v6  ;;  %v467_v12 = vstv %s677_s14  ;;  %v460_v13 = vmul.f32 %v1015_v10, %v459_v11  ;;  %v475_v15 = vstv %s678_s16  ;;  %s680_s5 = sld [smem:[#allocation2 + $0x2d]]  ;;  %s686_s7 = sld [smem:[#allocation2 + $0x32]] }
  0x42   : > { %v468_v14 = vmul.f32 %v1015_v10, %v467_v12  ;;  %v483_v16 = vstv %s679_s17  ;;  %v476_v17 = vmul.f32 %v1015_v10, %v475_v15  ;;  %v496_v21 = vstv %s682_s23  ;;  %s148_s8 = sand.u32 1, %s824_s10   ;;  %s689_s16 = sshll.u32 %s876_s13, 7 }
  0x43   : > { %255 = vrot.lane.b32.xlu0 %v253_v25, %s836_s22  ;;  %v484_v19 = vmul.f32 %v1015_v10, %v483_v16  ;;  %v504_v22 = vstv %s683_s24  ;;  %v497_v23 = vmul.f32 %v1026_v20, %v496_v21  ;;  %v512_v25 = vstv %s684_s27  ;;  %s629_s14 = sshll.u32 %s148_s8, 3  ;;  %s839_s13 = smov [#allocation5]  }
  0x44   : > { %263 = vrot.lane.b32.xlu1 %v261_v26, %s838_s26  ;;  %v505_v24 = vmul.f32 %v1026_v20, %v504_v22  ;;  %v520_v26 = vstv %s685_s28  ;;  %v513_v28 = vmul.f32 %v1026_v20, %v512_v25  ;;  %s150_s17 = scalar_lea.vmem [#allocation5], %s629_s14  ;;  %s1053_s28 = scalar_lea.hbm %s1097_s2, %s689_s16 }
  0x45   : > { %v521_v29 = vmul.f32 %v1026_v20, %v520_v26  ;;  %v195_v37 = vstv %s636_s29  ;;  %s552_s23 = sshll.u32 %s150_s17, 4  ;;  %s1055_s23 = int_to_ptr.vmem [resolvable:$true] %s552_s23 }
  0x46   : > { %v196_v41 = vmul.f32 %v195_v37, %v937_v7  ;;  %s766_s29 = scalar_lea.vmem %s1055_s23, 128 }
  0x47   : > { %276 = vrot.lane.b32.xlu0 %v274_v30, %s835_s21  ;;  %v158_v30 = vstv %s156_s6  ;;  %s539_s6 = scalar_lea.sflag [#allocation3], %s148_s8  ;;  %p767_p9 = scmp.ne.s32.totalorder %s1055_s23, %s766_s29 }
  0x48   : > { %284 = vrot.lane.b32.xlu1 %v282_v31, %s837_s25  ;;  %v159_v31 = vmul.f32 %v158_v30, %v929_v0 }
  0x49   : > { %p768_p10 = pnand %p767_p9, %p893_p5 }
  0x4b   : > { %292 = vrot.lane.b32.xlu0 %v290_v34, %s836_s22  ;;  %p769_p12 = pneg %p768_p10 }
  0x4c   : > { %300 = vrot.lane.b32.xlu1 %v298_v35, %s838_s26 }
  0x4f   : > { %313 = vrot.lane.b32.xlu0 %v311_v39, %s835_s21 }
  0x50   : > { %321 = vrot.lane.b32.xlu1 %v319_v40, %s837_s25 }
  0x53   : > { %329 = vrot.lane.b32.xlu0 %v327_v43, %s836_s22 }
  0x54   : > { %337 = vrot.lane.b32.xlu1 %v335_v44, %s838_s26 }
  0x57   : > { %351 = vrot.lane.b32.xlu0 %v349_v48, %s835_s21 }
  0x58   : > { %359 = vrot.lane.b32.xlu1 %v357_v49, %s837_s25 }
  0x5b   : > { %367 = vrot.lane.b32.xlu0 %v365_v52, %s836_s22 }
  0x5c   : > { %375 = vrot.lane.b32.xlu1 %v373_v53, %s838_s26 }
  0x5f   : > { %388 = vrot.lane.b32.xlu0 %v386_v57, %s835_s21 }
  0x60   : > { %396 = vrot.lane.b32.xlu1 %v394_v58, %s837_s25 }
  0x63   : > { %404 = vrot.lane.b32.xlu0 %v402_v61, %s836_s22 }
  0x64   : > { %412 = vrot.lane.b32.xlu1 %v410_v62, %s838_s26 }
  0x67   : > { %425 = vrot.lane.b32.xlu0 %v423_v3, %s835_s21 }
  0x68   : > { %433 = vrot.lane.b32.xlu1 %v431_v4, %s837_s25 }
  0x6b   : > { %441 = vrot.lane.b32.xlu0 %v439_v8, %s836_s22 }
  0x6c   : > { %449 = vrot.lane.b32.xlu1 %v447_v9, %s838_s26 }
  0x6f   : > { %462 = vrot.lane.b32.xlu0 %v460_v13, %s835_s21 }
  0x70   : > { %470 = vrot.lane.b32.xlu1 %v468_v14, %s837_s25 }
  0x73   : > { %478 = vrot.lane.b32.xlu0 %v476_v17, %s836_s22 }
  0x74   : > { %486 = vrot.lane.b32.xlu1 %v484_v19, %s838_s26 }
  0x77   : > { %499 = vrot.lane.b32.xlu0 %v497_v23, %s835_s21  ;;  %s641_s21 = sld [smem:[#allocation2 + $0xa]] }
  0x78   : > { %507 = vrot.lane.b32.xlu1 %v505_v24, %s837_s25  ;;  %s651_s25 = sld [smem:[#allocation2 + $0x14]] }
  0x7b   : > { %515 = vrot.lane.b32.xlu0 %v513_v28, %s836_s22  ;;  %s646_s22 = sld [smem:[#allocation2 + $0xf]] }
  0x7c   : > { %523 = vrot.lane.b32.xlu1 %v521_v29, %s838_s26  ;;  %s656_s26 = sld [smem:[#allocation2 + $0x19]] }
  0x7d   : > { %v232_v49 = vstv %s641_s21  ;;  %s770_s21 = sshll.u32 %s839_s13, 4  ;;  %s771_s21 = int_to_ptr.vmem [resolvable:$false] %s770_s21 }
  0x7e   : > { %v233_v52 = vmul.f32 %v232_v49, %v949_v18  ;;  %v306_v18 = vstv %s651_s25  ;;  %p773_p13 = scmp.lt.s32.totalorder %s1055_s23, %s771_s21 }
  0x7f   : > { %v307_v13 = vmul.f32 %v306_v18, %v971_v36  ;;  %v381_v36 = vstv %s662_s30 }
  0x80   : > { %v382_v37 = vmul.f32 %v993_v54, %v381_v36  ;;  %v455_v54 = vstv %s674_s4 }
  0x81   : > { %v269_v7 = vstv %s646_s22  ;;  %s772_s22 = scalar_lea.vmem %s771_s21, 256 }
  0x82   : > { %v270_v1 = vmul.f32 %v269_v7, %v960_v27  ;;  %v344_v27 = vstv %s656_s26  ;;  %p774_p0 = scmp.lt.s32.totalorder %s772_s22, %s766_s29 }
  0x83   : > { %v345_v25 = vmul.f32 %v982_v45, %v344_v27  ;;  %v418_v45 = vstv %s668_s3 }
  0x84   : > { %p775_p1 = por %p774_p0, %p773_p13 }
  0x86   : > { %p776_p2 = pnand %p775_p1, %p769_p12 }
  0xa1   : > { %v166_v32 = vpop.permute.xlu0 %165 }
  0xa2   : > { %v182_v33 = vpop.permute.xlu1 %181  ;;  %v168_v34 = vadd.f32 %v166_v32, %v159_v31 }
  0xa5   : > { %v174_v35 = vpop.permute.xlu0 %173 }
  0xa6   : > { %v176_v38 = vadd.f32 %v174_v35, %v168_v34  ;;  %v190_v39 = vpop.permute.xlu1 %189 }
  0xa8   : > { %v184_v40 = vadd.f32 %v182_v33, %v176_v38 }
  0xa9   : > { %v203_v42 = vpop.permute.xlu0 %202 }
  0xaa   : > { %v192_v43 = vadd.f32 %v190_v39, %v184_v40  ;;  %v211_v44 = vpop.permute.xlu1 %210 }
  0xac   : > { %v197_v46 = vadd.f32 %v196_v41, %v192_v43 }
  0xad   : > { %v219_v48 = vpop.permute.xlu0 %218 }
  0xae   : > { %v205_v47 = vadd.f32 %v203_v42, %v197_v46  ;;  %v227_v0 = vpop.permute.xlu1 %226 }
  0xb0   : > { %v213_v50 = vadd.f32 %v211_v44, %v205_v47 }
  0xb1   : > { %v240_v53 = vpop.permute.xlu0 %239 }
  0xb2   : > { %v221_v51 = vadd.f32 %v219_v48, %v213_v50  ;;  %v248_v56 = vpop.permute.xlu1 %247  ;;  %v419_v48 = vmul.f32 %v1004_v63, %v418_v45  ;;  %v492_v63 = vstv %s680_s5 }
  0xb4   : > { %v229_v55 = vadd.f32 %v227_v0, %v221_v51 }
  0xb5   : > { %v256_v59 = vpop.permute.xlu0 %255 }
  0xb6   : > { %v234_v57 = vadd.f32 %v233_v52, %v229_v55  ;;  %v264_v61 = vpop.permute.xlu1 %263 }
  0xb8   : > { %v242_v58 = vadd.f32 %v240_v53, %v234_v57 }
  0xb9   : > { %v277_v2 = vpop.permute.xlu0 %276 }
  0xba   : > { %v250_v60 = vadd.f32 %v248_v56, %v242_v58  ;;  %v285_v4 = vpop.permute.xlu1 %284  ;;  %v456_v58 = vmul.f32 %v1015_v10, %v455_v54 }
  0xbc   : > { %v258_v62 = vadd.f32 %v256_v59, %v250_v60 }
  0xbd   : > { %v293_v8 = vpop.permute.xlu0 %292 }
  0xbe   : > { %v266_v3 = vadd.f32 %v264_v61, %v258_v62  ;;  %v301_v11 = vpop.permute.xlu1 %300 }
  0xc0   : > { %v271_v5 = vadd.f32 %v270_v1, %v266_v3 }
  0xc1   : > { %v314_v14 = vpop.permute.xlu0 %313 }
  0xc2   : > { %v279_v6 = vadd.f32 %v277_v2, %v271_v5  ;;  %v322_v16 = vpop.permute.xlu1 %321  ;;  %v493_v5 = vmul.f32 %v1026_v20, %v492_v63 }
  0xc4   : > { %v287_v9 = vadd.f32 %v285_v4, %v279_v6 }
  0xc5   : > { %v330_v21 = vpop.permute.xlu0 %329 }
  0xc6   : > { %v295_v12 = vadd.f32 %v293_v8, %v287_v9  ;;  %v338_v23 = vpop.permute.xlu1 %337 }
  0xc8   : > { %v303_v15 = vadd.f32 %v301_v11, %v295_v12 }
  0xc9   : > { %v352_v26 = vpop.permute.xlu0 %351 }
  0xca   : > { %v308_v17 = vadd.f32 %v307_v13, %v303_v15  ;;  %v360_v29 = vpop.permute.xlu1 %359  ;;  %v528_v15 = vstv %s686_s7 }
  0xcc   : > { %v316_v19 = vadd.f32 %v314_v14, %v308_v17 }
  0xcd   : > { %v368_v32 = vpop.permute.xlu0 %367 }
  0xce   : > { %v324_v22 = vadd.f32 %v322_v16, %v316_v19  ;;  %v376_v34 = vpop.permute.xlu1 %375 }
  0xd0   : > { %v332_v24 = vadd.f32 %v330_v21, %v324_v22 }
  0xd1   : > { %v389_v38 = vpop.permute.xlu0 %388 }
  0xd2   : > { %v340_v28 = vadd.f32 %v338_v23, %v332_v24  ;;  %v397_v40 = vpop.permute.xlu1 %396 }
  0xd4   : > { %v346_v30 = vadd.f32 %v345_v25, %v340_v28 }
  0xd5   : > { %v405_v43 = vpop.permute.xlu0 %404 }
  0xd6   : > { %v354_v31 = vadd.f32 %v352_v26, %v346_v30  ;;  %v413_v46 = vpop.permute.xlu1 %412 }
  0xd8   : > { %v362_v33 = vadd.f32 %v360_v29, %v354_v31 }
  0xd9   : > { %v426_v49 = vpop.permute.xlu0 %425 }
  0xda   : > { %v370_v35 = vadd.f32 %v368_v32, %v362_v33  ;;  %v434_v0 = vpop.permute.xlu1 %433 }
  0xdc   : > { %v378_v39 = vadd.f32 %v376_v34, %v370_v35 }
  0xdd   : > { %v442_v53 = vpop.permute.xlu0 %441 }
  0xde   : > { %v383_v41 = vadd.f32 %v382_v37, %v378_v39  ;;  %v450_v56 = vpop.permute.xlu1 %449 }
  0xe0   : > { %v391_v42 = vadd.f32 %v389_v38, %v383_v41 }
  0xe1   : > { %v463_v59 = vpop.permute.xlu0 %462 }
  0xe2   : > { %v399_v44 = vadd.f32 %v397_v40, %v391_v42  ;;  %v471_v60 = vpop.permute.xlu1 %470 }
  0xe4   : > { %v407_v47 = vadd.f32 %v405_v43, %v399_v44 }
  0xe5   : > { %v479_v1 = vpop.permute.xlu0 %478 }
  0xe6   : > { %v415_v50 = vadd.f32 %v413_v46, %v407_v47  ;;  %v487_v3 = vpop.permute.xlu1 %486 }
  0xe8   : > { %v420_v51 = vadd.f32 %v419_v48, %v415_v50 }
  0xe9   : > { %v500_v6 = vpop.permute.xlu0 %499 }
  0xea   : > { %v428_v52 = vadd.f32 %v426_v49, %v420_v51  ;;  %v508_v18 = vpop.permute.xlu1 %507 }
  0xec   : > { %v436_v55 = vadd.f32 %v434_v0, %v428_v52 }
  0xed   : > { %v516_v11 = vpop.permute.xlu0 %515 }
  0xee   : > { %v444_v57 = vadd.f32 %v442_v53, %v436_v55  ;;  %v524_v13 = vpop.permute.xlu1 %523 }
  0xf0   : > { %v452_v7 = vadd.f32 %v450_v56, %v444_v57 }
  0xf2   : > { %v457_v61 = vadd.f32 %v456_v58, %v452_v7 }
  0xf4   : > { %v465_v62 = vadd.f32 %v463_v59, %v457_v61 }
  0xf6   : > { %v473_v2 = vadd.f32 %v471_v60, %v465_v62 }
  0xf8   : > { %v481_v4 = vadd.f32 %v479_v1, %v473_v2 }
  0xfa   : > { %v489_v8 = vadd.f32 %v487_v3, %v481_v4 }
  0xfc   : > { %v494_v9 = vadd.f32 %v493_v5, %v489_v8 }
  0xfe   : > { %v502_v10 = vadd.f32 %v500_v6, %v494_v9 }
 0x100   : > { %v510_v12 = vadd.f32 %v508_v18, %v502_v10 }
 0x102   : > { %v518_v14 = vadd.f32 %v516_v11, %v510_v12 }
 0x104   : > { %v526_v16 = vadd.f32 %v524_v13, %v518_v14 }
 0x106   : > { %v529_v17 = vadd.f32 %v528_v15, %v526_v16 }
 0x108   : > { %v687_v19 = vmul.f32 -1.442695, %v529_v17 }
 0x10a   : > { %747 = vpow2.f32 %v687_v19 }
 0x114   : > { %v748_v21 = vpop.eup %747 }
 0x115   : > { %v533_v20 = vadd.f32 1.0, %v748_v21 }
 0x117   : > { %749 = vrcp.f32 %v533_v20 }
 0x121   : > { %v750_v27 = vpop.eup %749 }
 0x122   : > { %537 = vst.msk [vmem:[%s150_s17] sm:$0xff] %vm536_vm0, %v750_v27 }
 0x123   : > { %779 = shalt.err (!%p776_p2)
}
 0x124   : > { %s780_s25 = scalar_lea.hbm %s1053_s28, 128  ;;  %s784_s3 = scalar_lea.hbm %s1097_s2, 256 }
 0x125   : > { %p781_p3 = scmp.ne.s32.totalorder %s1053_s28, %s780_s25  ;;  %p785_p8 = scmp.lt.u32.totalorder %s1053_s28, %s1097_s2 }
 0x126   : > { %p786_p11 = scmp.lt.u32.totalorder %s784_s3, %s780_s25  ;;  %p788_p10 = scmp.lt.u32.totalorder %s780_s25, %s1053_s28 }
 0x127   : > { %p782_p4 = pnand %p781_p3, %p893_p5 }
 0x128   : > { %p787_p9 = por %p786_p11, %p785_p8 }
 0x129   : > { %p783_p7 = pneg %p782_p4 }
 0x12a   : > { %p789_p12 = por %p788_p10, %p787_p9 }
 0x12c   : > { %p790_p13 = pnand %p789_p12, %p783_p7 }
 0x12e   : > { %793 = shalt.err (!%p790_p13)
}
 0x12f   : > { %697 = dma.vmem_to_hbm [thread:$0]  (%p893_p5), %s1055_s23, 128, %s1053_s28, %s539_s6  }
 0x130 PF: > { %p709_p0 = scmp.ge.s32.totalorder %s832_s12, 2  ;;  %s564_s7 = sand.u32 1, %s820_s9  }
 0x131   : > { %s565_s8 = scalar_lea.sflag [#allocation3], %s564_s7 }
 0x132   : > { %p704_p1 = pnand %p709_p0, %p897_p6 }
 0x134   : > { %815 = dma.done.wait (!%p704_p1), %s565_s8, 128  }
 0x135   : > { %817 = vsyncadd (!%p704_p1), %s565_s8, 4294967168  ;;  %p13_p2 = scmp.ge.s32.totalorder %s880_s15, 4   ;;  %s1101_s9 = smov %s824_s10 }
 0x136   : > { %s1102_s10 = smov %s828_s11  ;;  %s1103_s11 = smov %s891_s18 }
 0x137   : > { %s1104_s12 = smov %s880_s15  ;;  %15 = sbr.rel (!%p13_p2) target bundleno = 4 (0x4), region = 69 }
 0x13e   :  { %570 = vsyncpa [#allocation3], 1 }
 0x13f   :  { %572 = vsyncpa [#allocation3 + $0x1], 1 }
 0x140   :  { %573 = vsyncpa [#allocation4], 1 }
 0x141   :  { %575 = vsyncpa [#allocation4 + $0x1], 1 }

// kernel: attention_modules_forward.17
= control target key start
LH: loop header
LB: loop body
LE: loop exit
PB: predicated region body
PF: predicated region fallthrough
CT: control target
= control target key end

     0   :  { %s1180_s12 = smov 0   ;;  %s1182_s13 = smov 0   ;;  %s1330_s0 = inlined_call_operand.vmem [shape: bf16[16384,128], index: 0, kind: input, shape index: {}]   ;;  %s1331_s1 = inlined_call_operand.vmem [shape: bf16[128,128], index: 1, kind: input, shape index: {}]   ;;  %s1332_s2 = inlined_call_operand.vmem [shape: f32[1,128], index: 2, kind: input, shape index: {}]   ;;  %s1333_s3 = inlined_call_operand.vmem [shape: f32[16384,128], index: 3, kind: output, shape index: {}]  }
   0x1   :  { %s1184_s14 = smov 0  }
   0x2 LB: > { %s32_s15 = sadd.s32 1, %s1154_s13  ;;  %p968_p0 = scmp.ge.s32.totalorder %s1158_s14, 1  ;;  %s1158_s14 = sphi %s1184_s14, %s13_s14   ;;  %s1154_s13 = sphi %s1182_s13, %s1335_s13   ;;  %s1150_s12 = sphi %s1180_s12, %s1334_s12  }
   0x3   : > { %p34_p1 = scmp.ge.s32.totalorder %s32_s15, 64  ;;  %p188_p2 = scmp.lt.s32.totalorder %s1158_s14, 65 }
   0x5   : > { %s1337_s15 = smov (%p34_p1, %s32_s15), 0  ;;  %p189_p3 = pnand %p968_p0, %p188_p2 }
   0x6   : > { %v1112_v0 = vld [vmem:[%s1331_s1] sm:$0xff] (!%p189_p3)   ;;  %s969_s18 = sshll.u32 (!%p189_p3), %s1150_s12, 5  ;;  %v1113_v1 = vld [vmem:[%s1331_s1 + $0x8] sm:$0xff] (!%p189_p3)   ;;  %v1114_v2 = vld [vmem:[%s1331_s1 + $0x10] sm:$0xff] (!%p189_p3)  }
   0x7   : > { %192 = sbr.rel (%p189_p3) target bundleno = 281 (0x119), region = 32  ;;  %p230_p4 = scmp.lt.s32.totalorder (!%p189_p3), %s969_s18, 2047  ;;  %1024 = vmatprep.subr.bf16.mxu0 (!%p189_p3), %v1112_v0  ;;  %1072 = vmatprep.subr.bf16.mxu1 (!%p189_p3), %v1112_v0  ;;  %v1115_v3 = vld [vmem:[%s1331_s1 + $0x18] sm:$0xff] (!%p189_p3)   ;;  %v1116_v6 = vld [vmem:[%s1331_s1 + $0x20] sm:$0xff] (!%p189_p3)   ;;  %v1117_v7 = vld [vmem:[%s1331_s1 + $0x28] sm:$0xff] (!%p189_p3)  }
   0x8   : > { %1025 = vmatpush3.bf16.msra.mxu0 (!%p189_p3), %v1112_v0  ;;  %1080 = vmatpush3.bf16.msra.mxu1 (!%p189_p3), %v1112_v0  ;;  %v1118_v8 = vld [vmem:[%s1331_s1 + $0x30] sm:$0xff] (!%p189_p3)   ;;  %v1119_v9 = vld [vmem:[%s1331_s1 + $0x38] sm:$0xff] (!%p189_p3)   ;;  %v1250_v24 = vld [vmem:[%s1332_s2] ss:$0 sm:$0xff] (!%p189_p3) }
   0x9   : > { %1026 = vmatprep.subr.bf16.mxu0 (!%p189_p3), %v1113_v1  ;;  %1073 = vmatprep.subr.bf16.mxu1 (!%p189_p3), %v1113_v1 }
   0xc   : > { %1027 = vmatpush3.bf16.msra.mxu0 (!%p189_p3), %v1113_v1  ;;  %1081 = vmatpush3.bf16.msra.mxu1 (!%p189_p3), %v1113_v1 }
   0xd   : > { %1028 = vmatprep.subr.bf16.mxu0 (!%p189_p3), %v1114_v2  ;;  %1074 = vmatprep.subr.bf16.mxu1 (!%p189_p3), %v1114_v2 }
   0xe   : > { %s1339_s18 = smov (!%p230_p4, %s969_s18), 2047 }
   0xf   : > { %s970_s23 = sshll.u32 %s1339_s18, 2  ;;  %s972_s10 = sshll.u32 %s1339_s18, 3 }
  0x10   : > { %s1213_s26 = scalar_lea.vmem %s1330_s0, %s970_s23  ;;  %1029 = vmatpush3.bf16.msra.mxu0 %v1114_v2  ;;  %1082 = vmatpush3.bf16.msra.mxu1 %v1114_v2  ;;  %s1255_s19 = scalar_lea.vmem %s1333_s3, %s972_s10 }
  0x11   : > { %v1120_v4 = vld [vmem:[%s1213_s26] sm:$0xff]   ;;  %1030 = vmatprep.subr.bf16.mxu0 %v1115_v3  ;;  %1075 = vmatprep.subr.bf16.mxu1 %v1115_v3  ;;  %v1122_v10 = vld [vmem:[%s1213_s26 + $0x8] sm:$0xff]   ;;  %v1124_v12 = vld [vmem:[%s1213_s26 + $0x10] sm:$0xff]  }
  0x12   : > { %v1121_v5 = vld [vmem:[%s1213_s26 + $0x40] sm:$0xff]   ;;  %1040 = vmatprep.mubr.bf16.mxu0 %v1120_v4  ;;  %v1123_v11 = vld [vmem:[%s1213_s26 + $0x48] sm:$0xff]   ;;  %v1125_v13 = vld [vmem:[%s1213_s26 + $0x50] sm:$0xff]  }
  0x13   : > { %1056 = vmatprep.mubr.bf16.mxu1 %v1121_v5  ;;  %v1126_v14 = vld [vmem:[%s1213_s26 + $0x18] sm:$0xff]   ;;  %v1128_v16 = vld [vmem:[%s1213_s26 + $0x20] sm:$0xff]   ;;  %v1130_v18 = vld [vmem:[%s1213_s26 + $0x28] sm:$0xff]  }
  0x14   : > { %1031 = vmatpush3.bf16.msra.mxu0 %v1115_v3  ;;  %1083 = vmatpush3.bf16.msra.mxu1 %v1115_v3  ;;  %v1127_v15 = vld [vmem:[%s1213_s26 + $0x58] sm:$0xff]   ;;  %v1129_v17 = vld [vmem:[%s1213_s26 + $0x60] sm:$0xff]   ;;  %v1131_v19 = vld [vmem:[%s1213_s26 + $0x68] sm:$0xff]  }
  0x15   : > { %1032 = vmatprep.subr.bf16.mxu0 %v1116_v6  ;;  %1076 = vmatprep.subr.bf16.mxu1 %v1116_v6  ;;  %v1132_v20 = vld [vmem:[%s1213_s26 + $0x30] sm:$0xff]   ;;  %v1134_v22 = vld [vmem:[%s1213_s26 + $0x38] sm:$0xff]  }
  0x16   : > { %v1133_v21 = vld [vmem:[%s1213_s26 + $0x70] sm:$0xff]   ;;  %v1135_v23 = vld [vmem:[%s1213_s26 + $0x78] sm:$0xff]  }
  0x18   : > { %1033 = vmatpush3.bf16.msra.mxu0 %v1116_v6  ;;  %1084 = vmatpush3.bf16.msra.mxu1 %v1116_v6 }
  0x19   : > { %1034 = vmatprep.subr.bf16.mxu0 %v1117_v7  ;;  %1077 = vmatprep.subr.bf16.mxu1 %v1117_v7 }
  0x1c   : > { %1035 = vmatpush3.bf16.msra.mxu0 %v1117_v7  ;;  %1085 = vmatpush3.bf16.msra.mxu1 %v1117_v7 }
  0x1d   : > { %1036 = vmatprep.subr.bf16.mxu0 %v1118_v8  ;;  %1078 = vmatprep.subr.bf16.mxu1 %v1118_v8 }
  0x20   : > { %1037 = vmatpush3.bf16.msra.mxu0 %v1118_v8  ;;  %1086 = vmatpush3.bf16.msra.mxu1 %v1118_v8 }
  0x21   : > { %1038 = vmatprep.subr.bf16.mxu0 %v1119_v9  ;;  %1079 = vmatprep.subr.bf16.mxu1 %v1119_v9 }
  0x24   : > { %1039 = vmatpush3.bf16.msra.mxu0 %v1119_v9  ;;  %1087 = vmatpush3.bf16.msra.mxu1 %v1119_v9 }
  0x27   : > { %1041 = vmatmul.mubr.bf16.vlgmr.msra.gmra.mrb[0].mxu0 %v1122_v10  ;;  %1057 = vmatmul.mubr.bf16.vlgmr.msra.gmra.mrb[0].mxu1 %v1123_v11 }
  0x28   : > { %1044 = vmatprep.mubr.bf16.mxu0 %v1124_v12  ;;  %1060 = vmatprep.mubr.bf16.mxu1 %v1125_v13 }
  0x2f   : > { %1045 = vmatmul.mubr.bf16.gmra.mrb[4].mxu0 %v1126_v14  ;;  %1061 = vmatmul.mubr.bf16.gmra.mrb[4].mxu1 %v1127_v15 }
  0x30   : > { %1048 = vmatprep.mubr.bf16.mxu0 %v1128_v16  ;;  %1064 = vmatprep.mubr.bf16.mxu1 %v1129_v17 }
  0x37   : > { %1049 = vmatmul.mubr.bf16.gmra.mrb[8].mxu0 %v1130_v18  ;;  %1065 = vmatmul.mubr.bf16.gmra.mrb[8].mxu1 %v1131_v19 }
  0x38   : > { %1052 = vmatprep.mubr.bf16.mxu0 %v1132_v20  ;;  %1068 = vmatprep.mubr.bf16.mxu1 %v1133_v21 }
  0x3f   : > { %1053 = vmatmul.mubr.bf16.gmra.mrb[12].mxu0 %v1134_v22  ;;  %1069 = vmatmul.mubr.bf16.gmra.mrb[12].mxu1 %v1135_v23 }
  0xfa   : > { %v1042_v25 = vpop.f32.mrb[0].mxu0  ;;  %v1058_v26 = vpop.f32.mrb[0].mxu1 }
  0xfb   : > { %v789_v27 = vadd.f32 %v1042_v25, %v1250_v24  ;;  %v805_v28 = vadd.f32 %v1058_v26, %v1250_v24  ;;  %v554_v29 = vpop.f32.mrb[1].mxu0  ;;  %v618_v30 = vpop.f32.mrb[1].mxu1 }
  0xfc   : > { %v787_v31 = vadd.f32 %v1250_v24, %v554_v29  ;;  %v803_v32 = vadd.f32 %v1250_v24, %v618_v30  ;;  %v1043_v33 = vpop.f32.mrb[2].mxu0  ;;  %v1059_v34 = vpop.f32.mrb[2].mxu1 }
  0xfd   : > { %821 = vst [vmem:[%s1255_s19 + $0x10] sm:$0xff] %v789_v27  ;;  %837 = vst [vmem:[%s1255_s19 + $0x90] sm:$0xff] %v805_v28  ;;  %v790_v35 = vadd.f32 %v1043_v33, %v1250_v24  ;;  %v806_v36 = vadd.f32 %v1059_v34, %v1250_v24  ;;  %v557_v37 = vpop.f32.mrb[3].mxu0  ;;  %v621_v38 = vpop.f32.mrb[3].mxu1 }
  0xfe   : > { %819 = vst [vmem:[%s1255_s19] sm:$0xff] %v787_v31  ;;  %835 = vst [vmem:[%s1255_s19 + $0x80] sm:$0xff] %v803_v32  ;;  %v788_v39 = vadd.f32 %v1250_v24, %v557_v37  ;;  %v804_v40 = vadd.f32 %v1250_v24, %v621_v38 }
  0xff   : > { %822 = vst [vmem:[%s1255_s19 + $0x18] sm:$0xff] %v790_v35  ;;  %838 = vst [vmem:[%s1255_s19 + $0x98] sm:$0xff] %v806_v36 }
 0x100   : > { %820 = vst [vmem:[%s1255_s19 + $0x8] sm:$0xff] %v788_v39  ;;  %836 = vst [vmem:[%s1255_s19 + $0x88] sm:$0xff] %v804_v40 }
 0x102   : > { %v1046_v41 = vpop.f32.mrb[4].mxu0  ;;  %v1062_v42 = vpop.f32.mrb[4].mxu1 }
 0x103   : > { %v793_v43 = vadd.f32 %v1046_v41, %v1250_v24  ;;  %v809_v44 = vadd.f32 %v1062_v42, %v1250_v24  ;;  %v570_v45 = vpop.f32.mrb[5].mxu0  ;;  %v634_v46 = vpop.f32.mrb[5].mxu1 }
 0x104   : > { %v791_v47 = vadd.f32 %v1250_v24, %v570_v45  ;;  %v807_v48 = vadd.f32 %v1250_v24, %v634_v46  ;;  %v1047_v49 = vpop.f32.mrb[6].mxu0  ;;  %v1063_v50 = vpop.f32.mrb[6].mxu1 }
 0x105   : > { %825 = vst [vmem:[%s1255_s19 + $0x30] sm:$0xff] %v793_v43  ;;  %841 = vst [vmem:[%s1255_s19 + $0xb0] sm:$0xff] %v809_v44  ;;  %v794_v51 = vadd.f32 %v1047_v49, %v1250_v24  ;;  %v810_v52 = vadd.f32 %v1063_v50, %v1250_v24  ;;  %v573_v53 = vpop.f32.mrb[7].mxu0  ;;  %v637_v54 = vpop.f32.mrb[7].mxu1 }
 0x106   : > { %823 = vst [vmem:[%s1255_s19 + $0x20] sm:$0xff] %v791_v47  ;;  %839 = vst [vmem:[%s1255_s19 + $0xa0] sm:$0xff] %v807_v48  ;;  %v792_v55 = vadd.f32 %v1250_v24, %v573_v53  ;;  %v808_v56 = vadd.f32 %v1250_v24, %v637_v54 }
 0x107   : > { %826 = vst [vmem:[%s1255_s19 + $0x38] sm:$0xff] %v794_v51  ;;  %842 = vst [vmem:[%s1255_s19 + $0xb8] sm:$0xff] %v810_v52 }
 0x108   : > { %824 = vst [vmem:[%s1255_s19 + $0x28] sm:$0xff] %v792_v55  ;;  %840 = vst [vmem:[%s1255_s19 + $0xa8] sm:$0xff] %v808_v56 }
 0x10a   : > { %v1050_v57 = vpop.f32.mrb[8].mxu0  ;;  %v1066_v58 = vpop.f32.mrb[8].mxu1 }
 0x10b   : > { %v797_v59 = vadd.f32 %v1050_v57, %v1250_v24  ;;  %v813_v60 = vadd.f32 %v1066_v58, %v1250_v24  ;;  %v586_v61 = vpop.f32.mrb[9].mxu0  ;;  %v650_v62 = vpop.f32.mrb[9].mxu1 }
 0x10c   : > { %v795_v63 = vadd.f32 %v1250_v24, %v586_v61  ;;  %v811_v0 = vadd.f32 %v1250_v24, %v650_v62  ;;  %v1051_v1 = vpop.f32.mrb[10].mxu0  ;;  %v1067_v2 = vpop.f32.mrb[10].mxu1 }
 0x10d   : > { %829 = vst [vmem:[%s1255_s19 + $0x50] sm:$0xff] %v797_v59  ;;  %845 = vst [vmem:[%s1255_s19 + $0xd0] sm:$0xff] %v813_v60  ;;  %v798_v3 = vadd.f32 %v1051_v1, %v1250_v24  ;;  %v814_v4 = vadd.f32 %v1067_v2, %v1250_v24  ;;  %v589_v5 = vpop.f32.mrb[11].mxu0  ;;  %v653_v6 = vpop.f32.mrb[11].mxu1 }
 0x10e   : > { %827 = vst [vmem:[%s1255_s19 + $0x40] sm:$0xff] %v795_v63  ;;  %843 = vst [vmem:[%s1255_s19 + $0xc0] sm:$0xff] %v811_v0  ;;  %v796_v7 = vadd.f32 %v1250_v24, %v589_v5  ;;  %v812_v8 = vadd.f32 %v1250_v24, %v653_v6 }
 0x10f   : > { %830 = vst [vmem:[%s1255_s19 + $0x58] sm:$0xff] %v798_v3  ;;  %846 = vst [vmem:[%s1255_s19 + $0xd8] sm:$0xff] %v814_v4 }
 0x110   : > { %828 = vst [vmem:[%s1255_s19 + $0x48] sm:$0xff] %v796_v7  ;;  %844 = vst [vmem:[%s1255_s19 + $0xc8] sm:$0xff] %v812_v8 }
 0x112   : > { %v1054_v9 = vpop.f32.mrb[12].mxu0  ;;  %v1070_v10 = vpop.f32.mrb[12].mxu1 }
 0x113   : > { %v801_v11 = vadd.f32 %v1054_v9, %v1250_v24  ;;  %v817_v12 = vadd.f32 %v1070_v10, %v1250_v24  ;;  %v602_v13 = vpop.f32.mrb[13].mxu0  ;;  %v666_v14 = vpop.f32.mrb[13].mxu1 }
 0x114   : > { %v799_v15 = vadd.f32 %v1250_v24, %v602_v13  ;;  %v815_v16 = vadd.f32 %v1250_v24, %v666_v14  ;;  %v1055_v17 = vpop.f32.mrb[14].mxu0  ;;  %v1071_v18 = vpop.f32.mrb[14].mxu1 }
 0x115   : > { %833 = vst [vmem:[%s1255_s19 + $0x70] sm:$0xff] %v801_v11  ;;  %849 = vst [vmem:[%s1255_s19 + $0xf0] sm:$0xff] %v817_v12  ;;  %v802_v19 = vadd.f32 %v1055_v17, %v1250_v24  ;;  %v818_v20 = vadd.f32 %v1071_v18, %v1250_v24  ;;  %v605_v21 = vpop.f32.mrb[15].mxu0  ;;  %v669_v22 = vpop.f32.mrb[15].mxu1 }
 0x116   : > { %831 = vst [vmem:[%s1255_s19 + $0x60] sm:$0xff] %v799_v15  ;;  %847 = vst [vmem:[%s1255_s19 + $0xe0] sm:$0xff] %v815_v16  ;;  %v800_v23 = vadd.f32 %v1250_v24, %v605_v21  ;;  %v816_v25 = vadd.f32 %v1250_v24, %v669_v22 }
 0x117   : > { %834 = vst [vmem:[%s1255_s19 + $0x78] sm:$0xff] %v802_v19  ;;  %850 = vst [vmem:[%s1255_s19 + $0xf8] sm:$0xff] %v818_v20 }
 0x118   : > { %832 = vst [vmem:[%s1255_s19 + $0x68] sm:$0xff] %v800_v23  ;;  %848 = vst [vmem:[%s1255_s19 + $0xe8] sm:$0xff] %v816_v25 }
 0x119 PF: > { %s13_s14 = sadd.s32 1, %s1158_s14   ;;  %s1334_s12 = smov %s1154_s13 }
 0x11a   : > { %p10_p5 = scmp.ge.s32.totalorder %s13_s14, 66   ;;  %s1335_s13 = smov %s1337_s15 }
 0x11c   :  { %12 = sbr.rel (!%p10_p5) target bundleno = 2 (0x2), region = 76 }

// kernel: attention_modules_forward.18
= control target key start
LH: loop header
LB: loop body
LE: loop exit
PB: predicated region body
PF: predicated region fallthrough
CT: control target
= control target key end

     0   :  { %s1180_s12 = smov 0   ;;  %s1182_s13 = smov 0   ;;  %s1330_s0 = inlined_call_operand.vmem [shape: bf16[32768,128], index: 0, kind: input, shape index: {}]   ;;  %s1331_s1 = inlined_call_operand.vmem [shape: bf16[128,128], index: 1, kind: input, shape index: {}]   ;;  %s1332_s2 = inlined_call_operand.vmem [shape: f32[1,128], index: 2, kind: input, shape index: {}]   ;;  %s1333_s3 = inlined_call_operand.vmem [shape: f32[32768,128], index: 3, kind: output, shape index: {}]  }
   0x1   :  { %s1184_s14 = smov 0  }
   0x2 LB: > { %s32_s15 = sadd.s32 1, %s1154_s13  ;;  %p968_p0 = scmp.ge.s32.totalorder %s1158_s14, 1  ;;  %s1158_s14 = sphi %s1184_s14, %s13_s14   ;;  %s1154_s13 = sphi %s1182_s13, %s1335_s13   ;;  %s1150_s12 = sphi %s1180_s12, %s1334_s12  }
   0x3   : > { %p34_p1 = scmp.ge.s32.totalorder %s32_s15, 128  ;;  %p188_p2 = scmp.lt.s32.totalorder %s1158_s14, 129 }
   0x5   : > { %s1337_s15 = smov (%p34_p1, %s32_s15), 0  ;;  %p189_p3 = pnand %p968_p0, %p188_p2 }
   0x6   : > { %v1112_v0 = vld [vmem:[%s1331_s1] sm:$0xff] (!%p189_p3)   ;;  %s969_s18 = sshll.u32 (!%p189_p3), %s1150_s12, 5  ;;  %v1113_v1 = vld [vmem:[%s1331_s1 + $0x8] sm:$0xff] (!%p189_p3)   ;;  %v1114_v2 = vld [vmem:[%s1331_s1 + $0x10] sm:$0xff] (!%p189_p3)  }
   0x7   : > { %192 = sbr.rel (%p189_p3) target bundleno = 281 (0x119), region = 32  ;;  %p230_p4 = scmp.lt.s32.totalorder (!%p189_p3), %s969_s18, 4095  ;;  %1024 = vmatprep.subr.bf16.mxu0 (!%p189_p3), %v1112_v0  ;;  %1072 = vmatprep.subr.bf16.mxu1 (!%p189_p3), %v1112_v0  ;;  %v1115_v3 = vld [vmem:[%s1331_s1 + $0x18] sm:$0xff] (!%p189_p3)   ;;  %v1116_v6 = vld [vmem:[%s1331_s1 + $0x20] sm:$0xff] (!%p189_p3)   ;;  %v1117_v7 = vld [vmem:[%s1331_s1 + $0x28] sm:$0xff] (!%p189_p3)  }
   0x8   : > { %1025 = vmatpush3.bf16.msra.mxu0 (!%p189_p3), %v1112_v0  ;;  %1080 = vmatpush3.bf16.msra.mxu1 (!%p189_p3), %v1112_v0  ;;  %v1118_v8 = vld [vmem:[%s1331_s1 + $0x30] sm:$0xff] (!%p189_p3)   ;;  %v1119_v9 = vld [vmem:[%s1331_s1 + $0x38] sm:$0xff] (!%p189_p3)   ;;  %v1250_v24 = vld [vmem:[%s1332_s2] ss:$0 sm:$0xff] (!%p189_p3) }
   0x9   : > { %1026 = vmatprep.subr.bf16.mxu0 (!%p189_p3), %v1113_v1  ;;  %1073 = vmatprep.subr.bf16.mxu1 (!%p189_p3), %v1113_v1 }
   0xc   : > { %1027 = vmatpush3.bf16.msra.mxu0 (!%p189_p3), %v1113_v1  ;;  %1081 = vmatpush3.bf16.msra.mxu1 (!%p189_p3), %v1113_v1 }
   0xd   : > { %1028 = vmatprep.subr.bf16.mxu0 (!%p189_p3), %v1114_v2  ;;  %1074 = vmatprep.subr.bf16.mxu1 (!%p189_p3), %v1114_v2 }
   0xe   : > { %s1339_s18 = smov (!%p230_p4, %s969_s18), 4095 }
   0xf   : > { %s970_s23 = sshll.u32 %s1339_s18, 2  ;;  %s972_s10 = sshll.u32 %s1339_s18, 3 }
  0x10   : > { %s1213_s26 = scalar_lea.vmem %s1330_s0, %s970_s23  ;;  %1029 = vmatpush3.bf16.msra.mxu0 %v1114_v2  ;;  %1082 = vmatpush3.bf16.msra.mxu1 %v1114_v2  ;;  %s1255_s19 = scalar_lea.vmem %s1333_s3, %s972_s10 }
  0x11   : > { %v1120_v4 = vld [vmem:[%s1213_s26] sm:$0xff]   ;;  %1030 = vmatprep.subr.bf16.mxu0 %v1115_v3  ;;  %1075 = vmatprep.subr.bf16.mxu1 %v1115_v3  ;;  %v1122_v10 = vld [vmem:[%s1213_s26 + $0x8] sm:$0xff]   ;;  %v1124_v12 = vld [vmem:[%s1213_s26 + $0x10] sm:$0xff]  }
  0x12   : > { %v1121_v5 = vld [vmem:[%s1213_s26 + $0x40] sm:$0xff]   ;;  %1040 = vmatprep.mubr.bf16.mxu0 %v1120_v4  ;;  %v1123_v11 = vld [vmem:[%s1213_s26 + $0x48] sm:$0xff]   ;;  %v1125_v13 = vld [vmem:[%s1213_s26 + $0x50] sm:$0xff]  }
  0x13   : > { %1056 = vmatprep.mubr.bf16.mxu1 %v1121_v5  ;;  %v1126_v14 = vld [vmem:[%s1213_s26 + $0x18] sm:$0xff]   ;;  %v1128_v16 = vld [vmem:[%s1213_s26 + $0x20] sm:$0xff]   ;;  %v1130_v18 = vld [vmem:[%s1213_s26 + $0x28] sm:$0xff]  }
  0x14   : > { %1031 = vmatpush3.bf16.msra.mxu0 %v1115_v3  ;;  %1083 = vmatpush3.bf16.msra.mxu1 %v1115_v3  ;;  %v1127_v15 = vld [vmem:[%s1213_s26 + $0x58] sm:$0xff]   ;;  %v1129_v17 = vld [vmem:[%s1213_s26 + $0x60] sm:$0xff]   ;;  %v1131_v19 = vld [vmem:[%s1213_s26 + $0x68] sm:$0xff]  }
  0x15   : > { %1032 = vmatprep.subr.bf16.mxu0 %v1116_v6  ;;  %1076 = vmatprep.subr.bf16.mxu1 %v1116_v6  ;;  %v1132_v20 = vld [vmem:[%s1213_s26 + $0x30] sm:$0xff]   ;;  %v1134_v22 = vld [vmem:[%s1213_s26 + $0x38] sm:$0xff]  }
  0x16   : > { %v1133_v21 = vld [vmem:[%s1213_s26 + $0x70] sm:$0xff]   ;;  %v1135_v23 = vld [vmem:[%s1213_s26 + $0x78] sm:$0xff]  }
  0x18   : > { %1033 = vmatpush3.bf16.msra.mxu0 %v1116_v6  ;;  %1084 = vmatpush3.bf16.msra.mxu1 %v1116_v6 }
  0x19   : > { %1034 = vmatprep.subr.bf16.mxu0 %v1117_v7  ;;  %1077 = vmatprep.subr.bf16.mxu1 %v1117_v7 }
  0x1c   : > { %1035 = vmatpush3.bf16.msra.mxu0 %v1117_v7  ;;  %1085 = vmatpush3.bf16.msra.mxu1 %v1117_v7 }
  0x1d   : > { %1036 = vmatprep.subr.bf16.mxu0 %v1118_v8  ;;  %1078 = vmatprep.subr.bf16.mxu1 %v1118_v8 }
  0x20   : > { %1037 = vmatpush3.bf16.msra.mxu0 %v1118_v8  ;;  %1086 = vmatpush3.bf16.msra.mxu1 %v1118_v8 }
  0x21   : > { %1038 = vmatprep.subr.bf16.mxu0 %v1119_v9  ;;  %1079 = vmatprep.subr.bf16.mxu1 %v1119_v9 }
  0x24   : > { %1039 = vmatpush3.bf16.msra.mxu0 %v1119_v9  ;;  %1087 = vmatpush3.bf16.msra.mxu1 %v1119_v9 }
  0x27   : > { %1041 = vmatmul.mubr.bf16.vlgmr.msra.gmra.mrb[0].mxu0 %v1122_v10  ;;  %1057 = vmatmul.mubr.bf16.vlgmr.msra.gmra.mrb[0].mxu1 %v1123_v11 }
  0x28   : > { %1044 = vmatprep.mubr.bf16.mxu0 %v1124_v12  ;;  %1060 = vmatprep.mubr.bf16.mxu1 %v1125_v13 }
  0x2f   : > { %1045 = vmatmul.mubr.bf16.gmra.mrb[4].mxu0 %v1126_v14  ;;  %1061 = vmatmul.mubr.bf16.gmra.mrb[4].mxu1 %v1127_v15 }
  0x30   : > { %1048 = vmatprep.mubr.bf16.mxu0 %v1128_v16  ;;  %1064 = vmatprep.mubr.bf16.mxu1 %v1129_v17 }
  0x37   : > { %1049 = vmatmul.mubr.bf16.gmra.mrb[8].mxu0 %v1130_v18  ;;  %1065 = vmatmul.mubr.bf16.gmra.mrb[8].mxu1 %v1131_v19 }
  0x38   : > { %1052 = vmatprep.mubr.bf16.mxu0 %v1132_v20  ;;  %1068 = vmatprep.mubr.bf16.mxu1 %v1133_v21 }
  0x3f   : > { %1053 = vmatmul.mubr.bf16.gmra.mrb[12].mxu0 %v1134_v22  ;;  %1069 = vmatmul.mubr.bf16.gmra.mrb[12].mxu1 %v1135_v23 }
  0xfa   : > { %v1042_v25 = vpop.f32.mrb[0].mxu0  ;;  %v1058_v26 = vpop.f32.mrb[0].mxu1 }
  0xfb   : > { %v789_v27 = vadd.f32 %v1042_v25, %v1250_v24  ;;  %v805_v28 = vadd.f32 %v1058_v26, %v1250_v24  ;;  %v554_v29 = vpop.f32.mrb[1].mxu0  ;;  %v618_v30 = vpop.f32.mrb[1].mxu1 }
  0xfc   : > { %v787_v31 = vadd.f32 %v1250_v24, %v554_v29  ;;  %v803_v32 = vadd.f32 %v1250_v24, %v618_v30  ;;  %v1043_v33 = vpop.f32.mrb[2].mxu0  ;;  %v1059_v34 = vpop.f32.mrb[2].mxu1 }
  0xfd   : > { %821 = vst [vmem:[%s1255_s19 + $0x10] sm:$0xff] %v789_v27  ;;  %837 = vst [vmem:[%s1255_s19 + $0x90] sm:$0xff] %v805_v28  ;;  %v790_v35 = vadd.f32 %v1043_v33, %v1250_v24  ;;  %v806_v36 = vadd.f32 %v1059_v34, %v1250_v24  ;;  %v557_v37 = vpop.f32.mrb[3].mxu0  ;;  %v621_v38 = vpop.f32.mrb[3].mxu1 }
  0xfe   : > { %819 = vst [vmem:[%s1255_s19] sm:$0xff] %v787_v31  ;;  %835 = vst [vmem:[%s1255_s19 + $0x80] sm:$0xff] %v803_v32  ;;  %v788_v39 = vadd.f32 %v1250_v24, %v557_v37  ;;  %v804_v40 = vadd.f32 %v1250_v24, %v621_v38 }
  0xff   : > { %822 = vst [vmem:[%s1255_s19 + $0x18] sm:$0xff] %v790_v35  ;;  %838 = vst [vmem:[%s1255_s19 + $0x98] sm:$0xff] %v806_v36 }
 0x100   : > { %820 = vst [vmem:[%s1255_s19 + $0x8] sm:$0xff] %v788_v39  ;;  %836 = vst [vmem:[%s1255_s19 + $0x88] sm:$0xff] %v804_v40 }
 0x102   : > { %v1046_v41 = vpop.f32.mrb[4].mxu0  ;;  %v1062_v42 = vpop.f32.mrb[4].mxu1 }
 0x103   : > { %v793_v43 = vadd.f32 %v1046_v41, %v1250_v24  ;;  %v809_v44 = vadd.f32 %v1062_v42, %v1250_v24  ;;  %v570_v45 = vpop.f32.mrb[5].mxu0  ;;  %v634_v46 = vpop.f32.mrb[5].mxu1 }
 0x104   : > { %v791_v47 = vadd.f32 %v1250_v24, %v570_v45  ;;  %v807_v48 = vadd.f32 %v1250_v24, %v634_v46  ;;  %v1047_v49 = vpop.f32.mrb[6].mxu0  ;;  %v1063_v50 = vpop.f32.mrb[6].mxu1 }
 0x105   : > { %825 = vst [vmem:[%s1255_s19 + $0x30] sm:$0xff] %v793_v43  ;;  %841 = vst [vmem:[%s1255_s19 + $0xb0] sm:$0xff] %v809_v44  ;;  %v794_v51 = vadd.f32 %v1047_v49, %v1250_v24  ;;  %v810_v52 = vadd.f32 %v1063_v50, %v1250_v24  ;;  %v573_v53 = vpop.f32.mrb[7].mxu0  ;;  %v637_v54 = vpop.f32.mrb[7].mxu1 }
 0x106   : > { %823 = vst [vmem:[%s1255_s19 + $0x20] sm:$0xff] %v791_v47  ;;  %839 = vst [vmem:[%s1255_s19 + $0xa0] sm:$0xff] %v807_v48  ;;  %v792_v55 = vadd.f32 %v1250_v24, %v573_v53  ;;  %v808_v56 = vadd.f32 %v1250_v24, %v637_v54 }
 0x107   : > { %826 = vst [vmem:[%s1255_s19 + $0x38] sm:$0xff] %v794_v51  ;;  %842 = vst [vmem:[%s1255_s19 + $0xb8] sm:$0xff] %v810_v52 }
 0x108   : > { %824 = vst [vmem:[%s1255_s19 + $0x28] sm:$0xff] %v792_v55  ;;  %840 = vst [vmem:[%s1255_s19 + $0xa8] sm:$0xff] %v808_v56 }
 0x10a   : > { %v1050_v57 = vpop.f32.mrb[8].mxu0  ;;  %v1066_v58 = vpop.f32.mrb[8].mxu1 }
 0x10b   : > { %v797_v59 = vadd.f32 %v1050_v57, %v1250_v24  ;;  %v813_v60 = vadd.f32 %v1066_v58, %v1250_v24  ;;  %v586_v61 = vpop.f32.mrb[9].mxu0  ;;  %v650_v62 = vpop.f32.mrb[9].mxu1 }
 0x10c   : > { %v795_v63 = vadd.f32 %v1250_v24, %v586_v61  ;;  %v811_v0 = vadd.f32 %v1250_v24, %v650_v62  ;;  %v1051_v1 = vpop.f32.mrb[10].mxu0  ;;  %v1067_v2 = vpop.f32.mrb[10].mxu1 }
 0x10d   : > { %829 = vst [vmem:[%s1255_s19 + $0x50] sm:$0xff] %v797_v59  ;;  %845 = vst [vmem:[%s1255_s19 + $0xd0] sm:$0xff] %v813_v60  ;;  %v798_v3 = vadd.f32 %v1051_v1, %v1250_v24  ;;  %v814_v4 = vadd.f32 %v1067_v2, %v1250_v24  ;;  %v589_v5 = vpop.f32.mrb[11].mxu0  ;;  %v653_v6 = vpop.f32.mrb[11].mxu1 }
 0x10e   : > { %827 = vst [vmem:[%s1255_s19 + $0x40] sm:$0xff] %v795_v63  ;;  %843 = vst [vmem:[%s1255_s19 + $0xc0] sm:$0xff] %v811_v0  ;;  %v796_v7 = vadd.f32 %v1250_v24, %v589_v5  ;;  %v812_v8 = vadd.f32 %v1250_v24, %v653_v6 }
 0x10f   : > { %830 = vst [vmem:[%s1255_s19 + $0x58] sm:$0xff] %v798_v3  ;;  %846 = vst [vmem:[%s1255_s19 + $0xd8] sm:$0xff] %v814_v4 }
 0x110   : > { %828 = vst [vmem:[%s1255_s19 + $0x48] sm:$0xff] %v796_v7  ;;  %844 = vst [vmem:[%s1255_s19 + $0xc8] sm:$0xff] %v812_v8 }
 0x112   : > { %v1054_v9 = vpop.f32.mrb[12].mxu0  ;;  %v1070_v10 = vpop.f32.mrb[12].mxu1 }
 0x113   : > { %v801_v11 = vadd.f32 %v1054_v9, %v1250_v24  ;;  %v817_v12 = vadd.f32 %v1070_v10, %v1250_v24  ;;  %v602_v13 = vpop.f32.mrb[13].mxu0  ;;  %v666_v14 = vpop.f32.mrb[13].mxu1 }
 0x114   : > { %v799_v15 = vadd.f32 %v1250_v24, %v602_v13  ;;  %v815_v16 = vadd.f32 %v1250_v24, %v666_v14  ;;  %v1055_v17 = vpop.f32.mrb[14].mxu0  ;;  %v1071_v18 = vpop.f32.mrb[14].mxu1 }
 0x115   : > { %833 = vst [vmem:[%s1255_s19 + $0x70] sm:$0xff] %v801_v11  ;;  %849 = vst [vmem:[%s1255_s19 + $0xf0] sm:$0xff] %v817_v12  ;;  %v802_v19 = vadd.f32 %v1055_v17, %v1250_v24  ;;  %v818_v20 = vadd.f32 %v1071_v18, %v1250_v24  ;;  %v605_v21 = vpop.f32.mrb[15].mxu0  ;;  %v669_v22 = vpop.f32.mrb[15].mxu1 }
 0x116   : > { %831 = vst [vmem:[%s1255_s19 + $0x60] sm:$0xff] %v799_v15  ;;  %847 = vst [vmem:[%s1255_s19 + $0xe0] sm:$0xff] %v815_v16  ;;  %v800_v23 = vadd.f32 %v1250_v24, %v605_v21  ;;  %v816_v25 = vadd.f32 %v1250_v24, %v669_v22 }
 0x117   : > { %834 = vst [vmem:[%s1255_s19 + $0x78] sm:$0xff] %v802_v19  ;;  %850 = vst [vmem:[%s1255_s19 + $0xf8] sm:$0xff] %v818_v20 }
 0x118   : > { %832 = vst [vmem:[%s1255_s19 + $0x68] sm:$0xff] %v800_v23  ;;  %848 = vst [vmem:[%s1255_s19 + $0xe8] sm:$0xff] %v816_v25 }
 0x119 PF: > { %s13_s14 = sadd.s32 1, %s1158_s14   ;;  %s1334_s12 = smov %s1154_s13 }
 0x11a   : > { %p10_p5 = scmp.ge.s32.totalorder %s13_s14, 130   ;;  %s1335_s13 = smov %s1337_s15 }
 0x11c   :  { %12 = sbr.rel (!%p10_p5) target bundleno = 2 (0x2), region = 76 }

// kernel: attention_modules_forward.19
= control target key start
LH: loop header
LB: loop body
LE: loop exit
PB: predicated region body
PF: predicated region fallthrough
CT: control target
= control target key end

     0   :  { %7 = vsyncpa [#allocation3], 0  ;;  %s2493_s0 = inlined_call_operand.vmem [shape: f32[2,2048,8,8], index: 0, kind: input, shape index: {}]   ;;  %s2494_s1 = inlined_call_operand.hbm [shape: f32[2,1,8,8], index: 1, kind: input, shape index: {}]   ;;  %s2495_s2 = inlined_call_operand.vmem [shape: f32[2,2048,8,8], index: 2, kind: output, shape index: {}]  }
   0x1   :  { %9 = vsyncpa [#allocation3 + $0x1], 0  ;;  %s1305_s9 = smov 0   ;;  %s1307_s10 = smov 0  }
   0x2   :  { %s1309_s11 = smov 0   ;;  %s1311_s12 = smov 0  }
   0x3   :  { %s1313_s13 = smov 0   ;;  %s1315_s14 = smov 0  }
   0x4   :  { %s1317_s15 = smov 0   ;;  %s1319_s16 = smov 0  }
   0x5 LB: > { %s1103_s17 = sadd.s32 4294967295, %s1287_s16   ;;  %s24_s18 = sadd.s32 1, %s1279_s14  ;;  %s1287_s16 = sphi %s1319_s16, %s15_s16   ;;  %s1283_s15 = sphi %s1317_s15, %s2507_s15   ;;  %s1279_s14 = sphi %s1315_s14, %s2506_s14   ;;  %s1275_s13 = sphi %s1313_s13, %s2505_s13   ;;  %s1271_s12 = sphi %s1311_s12, %s2504_s12   ;;  %s1267_s11 = sphi %s1309_s11, %s2503_s11   ;;  %s1263_s10 = sphi %s1307_s10, %s2502_s10   ;;  %s1259_s9 = sphi %s1305_s9, %s2501_s9  }
   0x6   : > { %p25_p0 = scmp.ge.s32.totalorder %s24_s18, 8  ;;  %s27_s19 = sadd.s32 1, %s1283_s15 }
   0x7   : > { %s62_s20 = sadd.s32 1, %s1267_s11  ;;  %p69_p1 = scmp.ne.s32.totalorder %s1267_s11, %s1263_s10 }
   0x8   : > { %s2509_s18 = smov (%p25_p0, %s24_s18), 0  ;;  %s2511_s19 = smov (!%p25_p0, %s27_s19), %s1283_s15 }
   0x9   : > { %p70_p2 = scmp.eq.s32.totalorder %s1287_s16, 0  ;;  %p75_p3 = scmp.ne.s32.totalorder %s1263_s10, %s1259_s9 }
   0xa   : > { %p29_p4 = scmp.ge.s32.totalorder %s2511_s19, 2  ;;  %p76_p5 = scmp.eq.s32.totalorder %s1103_s17, 0 }
   0xb   : > { %p1354_p6 = por %p70_p2, %p69_p1  ;;  %p1125_p8 = scmp.lt.s32.totalorder %s1287_s16, 16 }
   0xc   : > { %s2513_s19 = smov (%p29_p4, %s2511_s19), 0  ;;  %p1360_p7 = por %p76_p5, %p75_p3 }
   0xd   : > { %s59_s23 = ssub.s32 %s1283_s15, %s2513_s19  ;;  %s140_s24 = sand.u32 1, %s1267_s11  }
   0xe   : > { %p60_p9 = scmp.eq.s32.totalorder %s59_s23, 0  ;;  %s1107_s25 = sshll.u32 %s140_s24, 3 }
   0xf   : > { %s1108_s26 = sshll.u32 %s1283_s15, 7  ;;  %s144_s3 = scalar_lea.vmem [#allocation2], %s1107_s25 }
  0x10   : > { %s1370_s27 = scalar_select %p60_p9, %s1267_s11, %s62_s20  }
  0x11   : > { %s1375_s30 = scalar_lea.hbm %s2494_s1, %s1108_s26  ;;  %s151_s4 = sshll.u32 %s144_s3, 4  ;;  %s1383_s4 = int_to_ptr.vmem [resolvable:$true] %s151_s4 }
  0x12   : > { %p1379_p10 = pnand %p1125_p8, %p1354_p6  ;;  %s141_s6 = scalar_lea.sflag [#allocation3], %s140_s24 }
  0x13   : > { %s1191_s7 = scalar_lea.hbm %s1375_s30, 128  ;;  %s1196_s17 = scalar_lea.hbm %s2494_s1, 256 }
  0x14   : > { %p1192_p13 = scmp.ne.s32.totalorder %s1375_s30, %s1191_s7  ;;  %p1193_p0 = pneg %p1379_p10 }
  0x15   : > { %p1197_p3 = scmp.lt.u32.totalorder %s1375_s30, %s2494_s1  ;;  %p1198_p4 = scmp.lt.u32.totalorder %s1196_s17, %s1191_s7 }
  0x16   : > { %p1194_p1 = pnand %p1193_p0, %p1192_p13  ;;  %p1200_p6 = scmp.lt.u32.totalorder %s1191_s7, %s1375_s30 }
  0x17   : > { %p1199_p5 = por %p1198_p4, %p1197_p3 }
  0x18   : > { %p1195_p2 = pneg %p1194_p1 }
  0x19   : > { %p1201_p8 = por %p1200_p6, %p1199_p5 }
  0x1b   : > { %p1202_p9 = pnand %p1201_p8, %p1195_p2 }
  0x1d   : > { %1205 = shalt.err (!%p1202_p9)
}
  0x1e   : > { %s1206_s23 = scalar_lea.vmem %s1383_s4, 128  ;;  %s1289_s24 = smov [#allocation2]  }
  0x1f   : > { %p1207_p13 = scmp.ne.s32.totalorder %s1383_s4, %s1206_s23  ;;  %s1211_s25 = sshll.u32 %s1289_s24, 4  ;;  %s1212_s25 = int_to_ptr.vmem [resolvable:$false] %s1211_s25 }
  0x20   : > { %s1213_s26 = scalar_lea.vmem %s1212_s25, 256  ;;  %p1214_p12 = scmp.lt.s32.totalorder %s1383_s4, %s1212_s25 }
  0x21   : > { %p1209_p1 = pnand %p1207_p13, %p1193_p0  ;;  %p1215_p3 = scmp.lt.s32.totalorder %s1213_s26, %s1206_s23 }
  0x23   : > { %p1210_p11 = pneg %p1209_p1  ;;  %p1216_p4 = por %p1215_p3, %p1214_p12 }
  0x25   : > { %p1217_p5 = pnand %p1216_p4, %p1210_p11 }
  0x27   : > { %1220 = shalt.err (!%p1217_p5)
}
  0x28   : > { %1124 = dma.hbm_to_vmem [thread:$0]  (!%p1379_p10), %s1375_s30, 128, %s1383_s4, %s141_s6  }
  0x29   : > { %p2499_p2 = scmp.lt.s32.totalorder %s1287_s16, 17  ;;  %p2500_p6 = scmp.ge.s32.totalorder %s1287_s16, 1 }
  0x2b   : > { %p157_p0 = pnand %p2500_p6, %p2499_p2 }
  0x2c   : > { %s162_s28 = sand.u32 (!%p157_p0), 1, %s1263_s10  }
  0x2d   : > { %160 = sbr.rel (%p157_p0) target bundleno = 192 (0xc0), region = 28  ;;  %s1417_s29 = sshll.u32 (!%p157_p0), %s162_s28, 3 }
  0x2e   : > { %s163_s3 = scalar_lea.sflag (!%p157_p0), [#allocation3], %s162_s28  ;;  %s166_s7 = scalar_lea.vmem (!%p157_p0), [#allocation2], %s1417_s29 }
  0x34   : > { %1254 = dma.done.wait (%p1360_p7), %s163_s3, 128  }
  0x35   : > { %1256 = vsyncadd (%p1360_p7), %s163_s3, 4294967168  ;;  %s1111_s30 = sshll.u32 %s1271_s12, 8  ;;  %p201_p10 = scmp.lt.s32.totalorder %s1275_s13, 1  ;;  %v1434_v0 = vld [vmem:[%s166_s7] sm:$0xff]  ;;  %vm733_vm0 = vcmask 64512  }
  0x36   : > { %p203_p11 = scmp.lt.s32.totalorder %s1111_s30, 2047 }
  0x37   : > { %s2515_s13 = smov (!%p201_p10, %s1275_s13), 1 }
  0x38   : > { %s2517_s30 = smov (!%p203_p11, %s1111_s30), 2047  ;;  %s1112_s4 = sshll.u32 %s2515_s13, 11 }
  0x39   : > { %s206_s5 = sadd.s32 %s1112_s4, %s2517_s30 }
  0x3a   : > { %s1113_s6 = sshll.u32 %s206_s5, 3 }
  0x3b   : > { %s1430_s17 = scalar_lea.vmem %s2493_s0, %s1113_s6  ;;  %s1439_s13 = scalar_lea.vmem %s2495_s2, %s1113_s6 }
  0x3c   : > { %v220_v1 = vld [vmem:[%s1430_s17] sm:$0xff]  ;;  %v221_v2 = vld [vmem:[%s1430_s17 + $0x8] sm:$0xff]  ;;  %v222_v3 = vld [vmem:[%s1430_s17 + $0x10] sm:$0xff] }
  0x3d   : > { %v477_v4 = vmul.f32 %v1434_v0, %v220_v1  ;;  %v478_v5 = vmul.f32 %v1434_v0, %v221_v2  ;;  %v479_v6 = vmul.f32 %v1434_v0, %v222_v3  ;;  %v223_v7 = vld [vmem:[%s1430_s17 + $0x18] sm:$0xff]  ;;  %v224_v8 = vld [vmem:[%s1430_s17 + $0x20] sm:$0xff]  ;;  %v225_v9 = vld [vmem:[%s1430_s17 + $0x28] sm:$0xff] }
  0x3e   : > { %v480_v10 = vmul.f32 %v1434_v0, %v223_v7  ;;  %v481_v11 = vmul.f32 %v1434_v0, %v224_v8  ;;  %v482_v12 = vmul.f32 %v1434_v0, %v225_v9  ;;  %v226_v13 = vld [vmem:[%s1430_s17 + $0x30] sm:$0xff]  ;;  %v227_v14 = vld [vmem:[%s1430_s17 + $0x38] sm:$0xff]  ;;  %v228_v15 = vld [vmem:[%s1430_s17 + $0x40] sm:$0xff] }
  0x3f   : > { %734 = vst.msk [vmem:[%s1439_s13] sm:$0xff] %vm733_vm0, %v477_v4  ;;  %735 = vst.msk [vmem:[%s1439_s13 + $0x8] sm:$0xff] %vm733_vm0, %v478_v5  ;;  %v483_v16 = vmul.f32 %v1434_v0, %v226_v13  ;;  %v484_v17 = vmul.f32 %v1434_v0, %v227_v14  ;;  %v485_v18 = vmul.f32 %v1434_v0, %v228_v15  ;;  %v229_v19 = vld [vmem:[%s1430_s17 + $0x48] sm:$0xff]  ;;  %v230_v20 = vld [vmem:[%s1430_s17 + $0x50] sm:$0xff] }
  0x40   : > { %736 = vst.msk [vmem:[%s1439_s13 + $0x10] sm:$0xff] %vm733_vm0, %v479_v6  ;;  %v231_v21 = vld [vmem:[%s1430_s17 + $0x58] sm:$0xff]  ;;  %737 = vst.msk [vmem:[%s1439_s13 + $0x18] sm:$0xff] %vm733_vm0, %v480_v10  ;;  %v486_v22 = vmul.f32 %v1434_v0, %v229_v19  ;;  %v487_v23 = vmul.f32 %v1434_v0, %v230_v20  ;;  %v232_v25 = vld [vmem:[%s1430_s17 + $0x60] sm:$0xff] }
  0x41   : > { %738 = vst.msk [vmem:[%s1439_s13 + $0x20] sm:$0xff] %vm733_vm0, %v481_v11  ;;  %739 = vst.msk [vmem:[%s1439_s13 + $0x28] sm:$0xff] %vm733_vm0, %v482_v12  ;;  %v488_v24 = vmul.f32 %v1434_v0, %v231_v21  ;;  %v233_v26 = vld [vmem:[%s1430_s17 + $0x68] sm:$0xff]  ;;  %v234_v27 = vld [vmem:[%s1430_s17 + $0x70] sm:$0xff]  ;;  %v489_v28 = vmul.f32 %v1434_v0, %v232_v25 }
  0x42   : > { %740 = vst.msk [vmem:[%s1439_s13 + $0x30] sm:$0xff] %vm733_vm0, %v483_v16  ;;  %741 = vst.msk [vmem:[%s1439_s13 + $0x38] sm:$0xff] %vm733_vm0, %v484_v17  ;;  %v490_v29 = vmul.f32 %v1434_v0, %v233_v26  ;;  %v491_v30 = vmul.f32 %v1434_v0, %v234_v27  ;;  %v235_v31 = vld [vmem:[%s1430_s17 + $0x78] sm:$0xff]  ;;  %v236_v32 = vld [vmem:[%s1430_s17 + $0x80] sm:$0xff] }
  0x43   : > { %742 = vst.msk [vmem:[%s1439_s13 + $0x40] sm:$0xff] %vm733_vm0, %v485_v18  ;;  %v237_v33 = vld [vmem:[%s1430_s17 + $0x88] sm:$0xff]  ;;  %743 = vst.msk [vmem:[%s1439_s13 + $0x48] sm:$0xff] %vm733_vm0, %v486_v22  ;;  %v492_v34 = vmul.f32 %v1434_v0, %v235_v31  ;;  %v493_v35 = vmul.f32 %v1434_v0, %v236_v32  ;;  %v238_v37 = vld [vmem:[%s1430_s17 + $0x90] sm:$0xff] }
  0x44   : > { %744 = vst.msk [vmem:[%s1439_s13 + $0x50] sm:$0xff] %vm733_vm0, %v487_v23  ;;  %745 = vst.msk [vmem:[%s1439_s13 + $0x58] sm:$0xff] %vm733_vm0, %v488_v24  ;;  %v494_v36 = vmul.f32 %v1434_v0, %v237_v33  ;;  %v239_v38 = vld [vmem:[%s1430_s17 + $0x98] sm:$0xff]  ;;  %v240_v39 = vld [vmem:[%s1430_s17 + $0xa0] sm:$0xff]  ;;  %v495_v40 = vmul.f32 %v1434_v0, %v238_v37 }
  0x45   : > { %746 = vst.msk [vmem:[%s1439_s13 + $0x60] sm:$0xff] %vm733_vm0, %v489_v28  ;;  %747 = vst.msk [vmem:[%s1439_s13 + $0x68] sm:$0xff] %vm733_vm0, %v490_v29  ;;  %v496_v41 = vmul.f32 %v1434_v0, %v239_v38  ;;  %v497_v42 = vmul.f32 %v1434_v0, %v240_v39  ;;  %v241_v43 = vld [vmem:[%s1430_s17 + $0xa8] sm:$0xff]  ;;  %v242_v44 = vld [vmem:[%s1430_s17 + $0xb0] sm:$0xff] }
  0x46   : > { %748 = vst.msk [vmem:[%s1439_s13 + $0x70] sm:$0xff] %vm733_vm0, %v491_v30  ;;  %v243_v45 = vld [vmem:[%s1430_s17 + $0xb8] sm:$0xff]  ;;  %749 = vst.msk [vmem:[%s1439_s13 + $0x78] sm:$0xff] %vm733_vm0, %v492_v34  ;;  %v498_v46 = vmul.f32 %v1434_v0, %v241_v43  ;;  %v499_v47 = vmul.f32 %v1434_v0, %v242_v44  ;;  %v244_v49 = vld [vmem:[%s1430_s17 + $0xc0] sm:$0xff] }
  0x47   : > { %750 = vst.msk [vmem:[%s1439_s13 + $0x80] sm:$0xff] %vm733_vm0, %v493_v35  ;;  %751 = vst.msk [vmem:[%s1439_s13 + $0x88] sm:$0xff] %vm733_vm0, %v494_v36  ;;  %v500_v48 = vmul.f32 %v1434_v0, %v243_v45  ;;  %v245_v50 = vld [vmem:[%s1430_s17 + $0xc8] sm:$0xff]  ;;  %v246_v51 = vld [vmem:[%s1430_s17 + $0xd0] sm:$0xff]  ;;  %v501_v52 = vmul.f32 %v1434_v0, %v244_v49 }
  0x48   : > { %752 = vst.msk [vmem:[%s1439_s13 + $0x90] sm:$0xff] %vm733_vm0, %v495_v40  ;;  %753 = vst.msk [vmem:[%s1439_s13 + $0x98] sm:$0xff] %vm733_vm0, %v496_v41  ;;  %v502_v53 = vmul.f32 %v1434_v0, %v245_v50  ;;  %v503_v54 = vmul.f32 %v1434_v0, %v246_v51  ;;  %v247_v55 = vld [vmem:[%s1430_s17 + $0xd8] sm:$0xff]  ;;  %v248_v56 = vld [vmem:[%s1430_s17 + $0xe0] sm:$0xff] }
  0x49   : > { %754 = vst.msk [vmem:[%s1439_s13 + $0xa0] sm:$0xff] %vm733_vm0, %v497_v42  ;;  %v249_v57 = vld [vmem:[%s1430_s17 + $0xe8] sm:$0xff]  ;;  %755 = vst.msk [vmem:[%s1439_s13 + $0xa8] sm:$0xff] %vm733_vm0, %v498_v46  ;;  %v504_v58 = vmul.f32 %v1434_v0, %v247_v55  ;;  %v505_v59 = vmul.f32 %v1434_v0, %v248_v56  ;;  %v250_v61 = vld [vmem:[%s1430_s17 + $0xf0] sm:$0xff] }
  0x4a   : > { %756 = vst.msk [vmem:[%s1439_s13 + $0xb0] sm:$0xff] %vm733_vm0, %v499_v47  ;;  %757 = vst.msk [vmem:[%s1439_s13 + $0xb8] sm:$0xff] %vm733_vm0, %v500_v48  ;;  %v506_v60 = vmul.f32 %v1434_v0, %v249_v57  ;;  %v251_v62 = vld [vmem:[%s1430_s17 + $0xf8] sm:$0xff]  ;;  %v252_v63 = vld [vmem:[%s1430_s17 + $0x100] sm:$0xff]  ;;  %v507_v1 = vmul.f32 %v1434_v0, %v250_v61 }
  0x4b   : > { %758 = vst.msk [vmem:[%s1439_s13 + $0xc0] sm:$0xff] %vm733_vm0, %v501_v52  ;;  %759 = vst.msk [vmem:[%s1439_s13 + $0xc8] sm:$0xff] %vm733_vm0, %v502_v53  ;;  %v508_v2 = vmul.f32 %v1434_v0, %v251_v62  ;;  %v509_v3 = vmul.f32 %v1434_v0, %v252_v63  ;;  %v253_v4 = vld [vmem:[%s1430_s17 + $0x108] sm:$0xff]  ;;  %v254_v5 = vld [vmem:[%s1430_s17 + $0x110] sm:$0xff] }
  0x4c   : > { %760 = vst.msk [vmem:[%s1439_s13 + $0xd0] sm:$0xff] %vm733_vm0, %v503_v54  ;;  %v255_v6 = vld [vmem:[%s1430_s17 + $0x118] sm:$0xff]  ;;  %761 = vst.msk [vmem:[%s1439_s13 + $0xd8] sm:$0xff] %vm733_vm0, %v504_v58  ;;  %v510_v7 = vmul.f32 %v1434_v0, %v253_v4  ;;  %v511_v8 = vmul.f32 %v1434_v0, %v254_v5  ;;  %v256_v10 = vld [vmem:[%s1430_s17 + $0x120] sm:$0xff] }
  0x4d   : > { %762 = vst.msk [vmem:[%s1439_s13 + $0xe0] sm:$0xff] %vm733_vm0, %v505_v59  ;;  %763 = vst.msk [vmem:[%s1439_s13 + $0xe8] sm:$0xff] %vm733_vm0, %v506_v60  ;;  %v512_v9 = vmul.f32 %v1434_v0, %v255_v6  ;;  %v257_v11 = vld [vmem:[%s1430_s17 + $0x128] sm:$0xff]  ;;  %v258_v12 = vld [vmem:[%s1430_s17 + $0x130] sm:$0xff]  ;;  %v513_v13 = vmul.f32 %v1434_v0, %v256_v10 }
  0x4e   : > { %764 = vst.msk [vmem:[%s1439_s13 + $0xf0] sm:$0xff] %vm733_vm0, %v507_v1  ;;  %765 = vst.msk [vmem:[%s1439_s13 + $0xf8] sm:$0xff] %vm733_vm0, %v508_v2  ;;  %v514_v14 = vmul.f32 %v1434_v0, %v257_v11  ;;  %v515_v15 = vmul.f32 %v1434_v0, %v258_v12  ;;  %v259_v16 = vld [vmem:[%s1430_s17 + $0x138] sm:$0xff]  ;;  %v260_v17 = vld [vmem:[%s1430_s17 + $0x140] sm:$0xff] }
  0x4f   : > { %766 = vst.msk [vmem:[%s1439_s13 + $0x100] sm:$0xff] %vm733_vm0, %v509_v3  ;;  %v261_v18 = vld [vmem:[%s1430_s17 + $0x148] sm:$0xff]  ;;  %767 = vst.msk [vmem:[%s1439_s13 + $0x108] sm:$0xff] %vm733_vm0, %v510_v7  ;;  %v516_v19 = vmul.f32 %v1434_v0, %v259_v16  ;;  %v517_v20 = vmul.f32 %v1434_v0, %v260_v17  ;;  %v262_v22 = vld [vmem:[%s1430_s17 + $0x150] sm:$0xff] }
  0x50   : > { %768 = vst.msk [vmem:[%s1439_s13 + $0x110] sm:$0xff] %vm733_vm0, %v511_v8  ;;  %769 = vst.msk [vmem:[%s1439_s13 + $0x118] sm:$0xff] %vm733_vm0, %v512_v9  ;;  %v518_v21 = vmul.f32 %v1434_v0, %v261_v18  ;;  %v263_v23 = vld [vmem:[%s1430_s17 + $0x158] sm:$0xff]  ;;  %v264_v24 = vld [vmem:[%s1430_s17 + $0x160] sm:$0xff]  ;;  %v519_v25 = vmul.f32 %v1434_v0, %v262_v22 }
  0x51   : > { %770 = vst.msk [vmem:[%s1439_s13 + $0x120] sm:$0xff] %vm733_vm0, %v513_v13  ;;  %771 = vst.msk [vmem:[%s1439_s13 + $0x128] sm:$0xff] %vm733_vm0, %v514_v14  ;;  %v520_v26 = vmul.f32 %v1434_v0, %v263_v23  ;;  %v521_v27 = vmul.f32 %v1434_v0, %v264_v24  ;;  %v265_v28 = vld [vmem:[%s1430_s17 + $0x168] sm:$0xff]  ;;  %v266_v29 = vld [vmem:[%s1430_s17 + $0x170] sm:$0xff] }
  0x52   : > { %772 = vst.msk [vmem:[%s1439_s13 + $0x130] sm:$0xff] %vm733_vm0, %v515_v15  ;;  %v267_v30 = vld [vmem:[%s1430_s17 + $0x178] sm:$0xff]  ;;  %773 = vst.msk [vmem:[%s1439_s13 + $0x138] sm:$0xff] %vm733_vm0, %v516_v19  ;;  %v522_v31 = vmul.f32 %v1434_v0, %v265_v28  ;;  %v523_v32 = vmul.f32 %v1434_v0, %v266_v29  ;;  %v268_v34 = vld [vmem:[%s1430_s17 + $0x180] sm:$0xff] }
  0x53   : > { %774 = vst.msk [vmem:[%s1439_s13 + $0x140] sm:$0xff] %vm733_vm0, %v517_v20  ;;  %775 = vst.msk [vmem:[%s1439_s13 + $0x148] sm:$0xff] %vm733_vm0, %v518_v21  ;;  %v524_v33 = vmul.f32 %v1434_v0, %v267_v30  ;;  %v269_v35 = vld [vmem:[%s1430_s17 + $0x188] sm:$0xff]  ;;  %v270_v36 = vld [vmem:[%s1430_s17 + $0x190] sm:$0xff]  ;;  %v525_v37 = vmul.f32 %v1434_v0, %v268_v34 }
  0x54   : > { %776 = vst.msk [vmem:[%s1439_s13 + $0x150] sm:$0xff] %vm733_vm0, %v519_v25  ;;  %777 = vst.msk [vmem:[%s1439_s13 + $0x158] sm:$0xff] %vm733_vm0, %v520_v26  ;;  %v526_v38 = vmul.f32 %v1434_v0, %v269_v35  ;;  %v527_v39 = vmul.f32 %v1434_v0, %v270_v36  ;;  %v271_v40 = vld [vmem:[%s1430_s17 + $0x198] sm:$0xff]  ;;  %v272_v41 = vld [vmem:[%s1430_s17 + $0x1a0] sm:$0xff] }
  0x55   : > { %778 = vst.msk [vmem:[%s1439_s13 + $0x160] sm:$0xff] %vm733_vm0, %v521_v27  ;;  %v273_v42 = vld [vmem:[%s1430_s17 + $0x1a8] sm:$0xff]  ;;  %779 = vst.msk [vmem:[%s1439_s13 + $0x168] sm:$0xff] %vm733_vm0, %v522_v31  ;;  %v528_v43 = vmul.f32 %v1434_v0, %v271_v40  ;;  %v529_v44 = vmul.f32 %v1434_v0, %v272_v41  ;;  %v274_v46 = vld [vmem:[%s1430_s17 + $0x1b0] sm:$0xff] }
  0x56   : > { %780 = vst.msk [vmem:[%s1439_s13 + $0x170] sm:$0xff] %vm733_vm0, %v523_v32  ;;  %781 = vst.msk [vmem:[%s1439_s13 + $0x178] sm:$0xff] %vm733_vm0, %v524_v33  ;;  %v530_v45 = vmul.f32 %v1434_v0, %v273_v42  ;;  %v275_v47 = vld [vmem:[%s1430_s17 + $0x1b8] sm:$0xff]  ;;  %v276_v48 = vld [vmem:[%s1430_s17 + $0x1c0] sm:$0xff]  ;;  %v531_v49 = vmul.f32 %v1434_v0, %v274_v46 }
  0x57   : > { %782 = vst.msk [vmem:[%s1439_s13 + $0x180] sm:$0xff] %vm733_vm0, %v525_v37  ;;  %783 = vst.msk [vmem:[%s1439_s13 + $0x188] sm:$0xff] %vm733_vm0, %v526_v38  ;;  %v532_v50 = vmul.f32 %v1434_v0, %v275_v47  ;;  %v533_v51 = vmul.f32 %v1434_v0, %v276_v48  ;;  %v277_v52 = vld [vmem:[%s1430_s17 + $0x1c8] sm:$0xff]  ;;  %v278_v53 = vld [vmem:[%s1430_s17 + $0x1d0] sm:$0xff] }
  0x58   : > { %784 = vst.msk [vmem:[%s1439_s13 + $0x190] sm:$0xff] %vm733_vm0, %v527_v39  ;;  %v279_v54 = vld [vmem:[%s1430_s17 + $0x1d8] sm:$0xff]  ;;  %785 = vst.msk [vmem:[%s1439_s13 + $0x198] sm:$0xff] %vm733_vm0, %v528_v43  ;;  %v534_v55 = vmul.f32 %v1434_v0, %v277_v52  ;;  %v535_v56 = vmul.f32 %v1434_v0, %v278_v53  ;;  %v280_v58 = vld [vmem:[%s1430_s17 + $0x1e0] sm:$0xff] }
  0x59   : > { %786 = vst.msk [vmem:[%s1439_s13 + $0x1a0] sm:$0xff] %vm733_vm0, %v529_v44  ;;  %787 = vst.msk [vmem:[%s1439_s13 + $0x1a8] sm:$0xff] %vm733_vm0, %v530_v45  ;;  %v536_v57 = vmul.f32 %v1434_v0, %v279_v54  ;;  %v281_v59 = vld [vmem:[%s1430_s17 + $0x1e8] sm:$0xff]  ;;  %v282_v60 = vld [vmem:[%s1430_s17 + $0x1f0] sm:$0xff]  ;;  %v537_v61 = vmul.f32 %v1434_v0, %v280_v58 }
  0x5a   : > { %788 = vst.msk [vmem:[%s1439_s13 + $0x1b0] sm:$0xff] %vm733_vm0, %v531_v49  ;;  %789 = vst.msk [vmem:[%s1439_s13 + $0x1b8] sm:$0xff] %vm733_vm0, %v532_v50  ;;  %v538_v62 = vmul.f32 %v1434_v0, %v281_v59  ;;  %v539_v63 = vmul.f32 %v1434_v0, %v282_v60  ;;  %v283_v1 = vld [vmem:[%s1430_s17 + $0x1f8] sm:$0xff]  ;;  %v284_v2 = vld [vmem:[%s1430_s17 + $0x200] sm:$0xff] }
  0x5b   : > { %790 = vst.msk [vmem:[%s1439_s13 + $0x1c0] sm:$0xff] %vm733_vm0, %v533_v51  ;;  %v285_v3 = vld [vmem:[%s1430_s17 + $0x208] sm:$0xff]  ;;  %791 = vst.msk [vmem:[%s1439_s13 + $0x1c8] sm:$0xff] %vm733_vm0, %v534_v55  ;;  %v540_v4 = vmul.f32 %v1434_v0, %v283_v1  ;;  %v541_v5 = vmul.f32 %v1434_v0, %v284_v2  ;;  %v286_v7 = vld [vmem:[%s1430_s17 + $0x210] sm:$0xff] }
  0x5c   : > { %792 = vst.msk [vmem:[%s1439_s13 + $0x1d0] sm:$0xff] %vm733_vm0, %v535_v56  ;;  %793 = vst.msk [vmem:[%s1439_s13 + $0x1d8] sm:$0xff] %vm733_vm0, %v536_v57  ;;  %v542_v6 = vmul.f32 %v1434_v0, %v285_v3  ;;  %v287_v8 = vld [vmem:[%s1430_s17 + $0x218] sm:$0xff]  ;;  %v288_v9 = vld [vmem:[%s1430_s17 + $0x220] sm:$0xff]  ;;  %v543_v10 = vmul.f32 %v1434_v0, %v286_v7 }
  0x5d   : > { %794 = vst.msk [vmem:[%s1439_s13 + $0x1e0] sm:$0xff] %vm733_vm0, %v537_v61  ;;  %795 = vst.msk [vmem:[%s1439_s13 + $0x1e8] sm:$0xff] %vm733_vm0, %v538_v62  ;;  %v544_v11 = vmul.f32 %v1434_v0, %v287_v8  ;;  %v545_v12 = vmul.f32 %v1434_v0, %v288_v9  ;;  %v289_v13 = vld [vmem:[%s1430_s17 + $0x228] sm:$0xff]  ;;  %v290_v14 = vld [vmem:[%s1430_s17 + $0x230] sm:$0xff] }
  0x5e   : > { %796 = vst.msk [vmem:[%s1439_s13 + $0x1f0] sm:$0xff] %vm733_vm0, %v539_v63  ;;  %v291_v15 = vld [vmem:[%s1430_s17 + $0x238] sm:$0xff]  ;;  %797 = vst.msk [vmem:[%s1439_s13 + $0x1f8] sm:$0xff] %vm733_vm0, %v540_v4  ;;  %v546_v16 = vmul.f32 %v1434_v0, %v289_v13  ;;  %v547_v17 = vmul.f32 %v1434_v0, %v290_v14  ;;  %v292_v19 = vld [vmem:[%s1430_s17 + $0x240] sm:$0xff] }
  0x5f   : > { %798 = vst.msk [vmem:[%s1439_s13 + $0x200] sm:$0xff] %vm733_vm0, %v541_v5  ;;  %799 = vst.msk [vmem:[%s1439_s13 + $0x208] sm:$0xff] %vm733_vm0, %v542_v6  ;;  %v548_v18 = vmul.f32 %v1434_v0, %v291_v15  ;;  %v293_v20 = vld [vmem:[%s1430_s17 + $0x248] sm:$0xff]  ;;  %v294_v21 = vld [vmem:[%s1430_s17 + $0x250] sm:$0xff]  ;;  %v549_v22 = vmul.f32 %v1434_v0, %v292_v19 }
  0x60   : > { %800 = vst.msk [vmem:[%s1439_s13 + $0x210] sm:$0xff] %vm733_vm0, %v543_v10  ;;  %801 = vst.msk [vmem:[%s1439_s13 + $0x218] sm:$0xff] %vm733_vm0, %v544_v11  ;;  %v550_v23 = vmul.f32 %v1434_v0, %v293_v20  ;;  %v551_v24 = vmul.f32 %v1434_v0, %v294_v21  ;;  %v295_v25 = vld [vmem:[%s1430_s17 + $0x258] sm:$0xff]  ;;  %v296_v26 = vld [vmem:[%s1430_s17 + $0x260] sm:$0xff] }
  0x61   : > { %802 = vst.msk [vmem:[%s1439_s13 + $0x220] sm:$0xff] %vm733_vm0, %v545_v12  ;;  %v297_v27 = vld [vmem:[%s1430_s17 + $0x268] sm:$0xff]  ;;  %803 = vst.msk [vmem:[%s1439_s13 + $0x228] sm:$0xff] %vm733_vm0, %v546_v16  ;;  %v552_v28 = vmul.f32 %v1434_v0, %v295_v25  ;;  %v553_v29 = vmul.f32 %v1434_v0, %v296_v26  ;;  %v298_v31 = vld [vmem:[%s1430_s17 + $0x270] sm:$0xff] }
  0x62   : > { %804 = vst.msk [vmem:[%s1439_s13 + $0x230] sm:$0xff] %vm733_vm0, %v547_v17  ;;  %805 = vst.msk [vmem:[%s1439_s13 + $0x238] sm:$0xff] %vm733_vm0, %v548_v18  ;;  %v554_v30 = vmul.f32 %v1434_v0, %v297_v27  ;;  %v299_v32 = vld [vmem:[%s1430_s17 + $0x278] sm:$0xff]  ;;  %v300_v33 = vld [vmem:[%s1430_s17 + $0x280] sm:$0xff]  ;;  %v555_v34 = vmul.f32 %v1434_v0, %v298_v31 }
  0x63   : > { %806 = vst.msk [vmem:[%s1439_s13 + $0x240] sm:$0xff] %vm733_vm0, %v549_v22  ;;  %807 = vst.msk [vmem:[%s1439_s13 + $0x248] sm:$0xff] %vm733_vm0, %v550_v23  ;;  %v556_v35 = vmul.f32 %v1434_v0, %v299_v32  ;;  %v557_v36 = vmul.f32 %v1434_v0, %v300_v33  ;;  %v301_v37 = vld [vmem:[%s1430_s17 + $0x288] sm:$0xff]  ;;  %v302_v38 = vld [vmem:[%s1430_s17 + $0x290] sm:$0xff] }
  0x64   : > { %808 = vst.msk [vmem:[%s1439_s13 + $0x250] sm:$0xff] %vm733_vm0, %v551_v24  ;;  %v303_v39 = vld [vmem:[%s1430_s17 + $0x298] sm:$0xff]  ;;  %809 = vst.msk [vmem:[%s1439_s13 + $0x258] sm:$0xff] %vm733_vm0, %v552_v28  ;;  %v558_v40 = vmul.f32 %v1434_v0, %v301_v37  ;;  %v559_v41 = vmul.f32 %v1434_v0, %v302_v38  ;;  %v304_v43 = vld [vmem:[%s1430_s17 + $0x2a0] sm:$0xff] }
  0x65   : > { %810 = vst.msk [vmem:[%s1439_s13 + $0x260] sm:$0xff] %vm733_vm0, %v553_v29  ;;  %811 = vst.msk [vmem:[%s1439_s13 + $0x268] sm:$0xff] %vm733_vm0, %v554_v30  ;;  %v560_v42 = vmul.f32 %v1434_v0, %v303_v39  ;;  %v305_v44 = vld [vmem:[%s1430_s17 + $0x2a8] sm:$0xff]  ;;  %v306_v45 = vld [vmem:[%s1430_s17 + $0x2b0] sm:$0xff]  ;;  %v561_v46 = vmul.f32 %v1434_v0, %v304_v43 }
  0x66   : > { %812 = vst.msk [vmem:[%s1439_s13 + $0x270] sm:$0xff] %vm733_vm0, %v555_v34  ;;  %813 = vst.msk [vmem:[%s1439_s13 + $0x278] sm:$0xff] %vm733_vm0, %v556_v35  ;;  %v562_v47 = vmul.f32 %v1434_v0, %v305_v44  ;;  %v563_v48 = vmul.f32 %v1434_v0, %v306_v45  ;;  %v307_v49 = vld [vmem:[%s1430_s17 + $0x2b8] sm:$0xff]  ;;  %v308_v50 = vld [vmem:[%s1430_s17 + $0x2c0] sm:$0xff] }
  0x67   : > { %814 = vst.msk [vmem:[%s1439_s13 + $0x280] sm:$0xff] %vm733_vm0, %v557_v36  ;;  %v309_v51 = vld [vmem:[%s1430_s17 + $0x2c8] sm:$0xff]  ;;  %815 = vst.msk [vmem:[%s1439_s13 + $0x288] sm:$0xff] %vm733_vm0, %v558_v40  ;;  %v564_v52 = vmul.f32 %v1434_v0, %v307_v49  ;;  %v565_v53 = vmul.f32 %v1434_v0, %v308_v50  ;;  %v310_v55 = vld [vmem:[%s1430_s17 + $0x2d0] sm:$0xff] }
  0x68   : > { %816 = vst.msk [vmem:[%s1439_s13 + $0x290] sm:$0xff] %vm733_vm0, %v559_v41  ;;  %817 = vst.msk [vmem:[%s1439_s13 + $0x298] sm:$0xff] %vm733_vm0, %v560_v42  ;;  %v566_v54 = vmul.f32 %v1434_v0, %v309_v51  ;;  %v311_v56 = vld [vmem:[%s1430_s17 + $0x2d8] sm:$0xff]  ;;  %v312_v57 = vld [vmem:[%s1430_s17 + $0x2e0] sm:$0xff]  ;;  %v567_v58 = vmul.f32 %v1434_v0, %v310_v55 }
  0x69   : > { %818 = vst.msk [vmem:[%s1439_s13 + $0x2a0] sm:$0xff] %vm733_vm0, %v561_v46  ;;  %819 = vst.msk [vmem:[%s1439_s13 + $0x2a8] sm:$0xff] %vm733_vm0, %v562_v47  ;;  %v568_v59 = vmul.f32 %v1434_v0, %v311_v56  ;;  %v569_v60 = vmul.f32 %v1434_v0, %v312_v57  ;;  %v313_v61 = vld [vmem:[%s1430_s17 + $0x2e8] sm:$0xff]  ;;  %v314_v62 = vld [vmem:[%s1430_s17 + $0x2f0] sm:$0xff] }
  0x6a   : > { %820 = vst.msk [vmem:[%s1439_s13 + $0x2b0] sm:$0xff] %vm733_vm0, %v563_v48  ;;  %v315_v63 = vld [vmem:[%s1430_s17 + $0x2f8] sm:$0xff]  ;;  %821 = vst.msk [vmem:[%s1439_s13 + $0x2b8] sm:$0xff] %vm733_vm0, %v564_v52  ;;  %v570_v1 = vmul.f32 %v1434_v0, %v313_v61  ;;  %v571_v2 = vmul.f32 %v1434_v0, %v314_v62  ;;  %v316_v4 = vld [vmem:[%s1430_s17 + $0x300] sm:$0xff] }
  0x6b   : > { %822 = vst.msk [vmem:[%s1439_s13 + $0x2c0] sm:$0xff] %vm733_vm0, %v565_v53  ;;  %823 = vst.msk [vmem:[%s1439_s13 + $0x2c8] sm:$0xff] %vm733_vm0, %v566_v54  ;;  %v572_v3 = vmul.f32 %v1434_v0, %v315_v63  ;;  %v317_v5 = vld [vmem:[%s1430_s17 + $0x308] sm:$0xff]  ;;  %v318_v6 = vld [vmem:[%s1430_s17 + $0x310] sm:$0xff]  ;;  %v573_v7 = vmul.f32 %v1434_v0, %v316_v4 }
  0x6c   : > { %824 = vst.msk [vmem:[%s1439_s13 + $0x2d0] sm:$0xff] %vm733_vm0, %v567_v58  ;;  %825 = vst.msk [vmem:[%s1439_s13 + $0x2d8] sm:$0xff] %vm733_vm0, %v568_v59  ;;  %v574_v8 = vmul.f32 %v1434_v0, %v317_v5  ;;  %v575_v9 = vmul.f32 %v1434_v0, %v318_v6  ;;  %v319_v10 = vld [vmem:[%s1430_s17 + $0x318] sm:$0xff]  ;;  %v320_v11 = vld [vmem:[%s1430_s17 + $0x320] sm:$0xff] }
  0x6d   : > { %826 = vst.msk [vmem:[%s1439_s13 + $0x2e0] sm:$0xff] %vm733_vm0, %v569_v60  ;;  %v321_v12 = vld [vmem:[%s1430_s17 + $0x328] sm:$0xff]  ;;  %827 = vst.msk [vmem:[%s1439_s13 + $0x2e8] sm:$0xff] %vm733_vm0, %v570_v1  ;;  %v576_v13 = vmul.f32 %v1434_v0, %v319_v10  ;;  %v577_v14 = vmul.f32 %v1434_v0, %v320_v11  ;;  %v322_v16 = vld [vmem:[%s1430_s17 + $0x330] sm:$0xff] }
  0x6e   : > { %828 = vst.msk [vmem:[%s1439_s13 + $0x2f0] sm:$0xff] %vm733_vm0, %v571_v2  ;;  %829 = vst.msk [vmem:[%s1439_s13 + $0x2f8] sm:$0xff] %vm733_vm0, %v572_v3  ;;  %v578_v15 = vmul.f32 %v1434_v0, %v321_v12  ;;  %v323_v17 = vld [vmem:[%s1430_s17 + $0x338] sm:$0xff]  ;;  %v324_v18 = vld [vmem:[%s1430_s17 + $0x340] sm:$0xff]  ;;  %v579_v19 = vmul.f32 %v1434_v0, %v322_v16 }
  0x6f   : > { %830 = vst.msk [vmem:[%s1439_s13 + $0x300] sm:$0xff] %vm733_vm0, %v573_v7  ;;  %831 = vst.msk [vmem:[%s1439_s13 + $0x308] sm:$0xff] %vm733_vm0, %v574_v8  ;;  %v580_v20 = vmul.f32 %v1434_v0, %v323_v17  ;;  %v581_v21 = vmul.f32 %v1434_v0, %v324_v18  ;;  %v325_v22 = vld [vmem:[%s1430_s17 + $0x348] sm:$0xff]  ;;  %v326_v23 = vld [vmem:[%s1430_s17 + $0x350] sm:$0xff] }
  0x70   : > { %832 = vst.msk [vmem:[%s1439_s13 + $0x310] sm:$0xff] %vm733_vm0, %v575_v9  ;;  %v327_v24 = vld [vmem:[%s1430_s17 + $0x358] sm:$0xff]  ;;  %833 = vst.msk [vmem:[%s1439_s13 + $0x318] sm:$0xff] %vm733_vm0, %v576_v13  ;;  %v582_v25 = vmul.f32 %v1434_v0, %v325_v22  ;;  %v583_v26 = vmul.f32 %v1434_v0, %v326_v23  ;;  %v328_v28 = vld [vmem:[%s1430_s17 + $0x360] sm:$0xff] }
  0x71   : > { %834 = vst.msk [vmem:[%s1439_s13 + $0x320] sm:$0xff] %vm733_vm0, %v577_v14  ;;  %835 = vst.msk [vmem:[%s1439_s13 + $0x328] sm:$0xff] %vm733_vm0, %v578_v15  ;;  %v584_v27 = vmul.f32 %v1434_v0, %v327_v24  ;;  %v329_v29 = vld [vmem:[%s1430_s17 + $0x368] sm:$0xff]  ;;  %v330_v30 = vld [vmem:[%s1430_s17 + $0x370] sm:$0xff]  ;;  %v585_v31 = vmul.f32 %v1434_v0, %v328_v28 }
  0x72   : > { %836 = vst.msk [vmem:[%s1439_s13 + $0x330] sm:$0xff] %vm733_vm0, %v579_v19  ;;  %837 = vst.msk [vmem:[%s1439_s13 + $0x338] sm:$0xff] %vm733_vm0, %v580_v20  ;;  %v586_v32 = vmul.f32 %v1434_v0, %v329_v29  ;;  %v587_v33 = vmul.f32 %v1434_v0, %v330_v30  ;;  %v331_v34 = vld [vmem:[%s1430_s17 + $0x378] sm:$0xff]  ;;  %v332_v35 = vld [vmem:[%s1430_s17 + $0x380] sm:$0xff] }
  0x73   : > { %838 = vst.msk [vmem:[%s1439_s13 + $0x340] sm:$0xff] %vm733_vm0, %v581_v21  ;;  %v333_v36 = vld [vmem:[%s1430_s17 + $0x388] sm:$0xff]  ;;  %839 = vst.msk [vmem:[%s1439_s13 + $0x348] sm:$0xff] %vm733_vm0, %v582_v25  ;;  %v588_v37 = vmul.f32 %v1434_v0, %v331_v34  ;;  %v589_v38 = vmul.f32 %v1434_v0, %v332_v35  ;;  %v334_v40 = vld [vmem:[%s1430_s17 + $0x390] sm:$0xff] }
  0x74   : > { %840 = vst.msk [vmem:[%s1439_s13 + $0x350] sm:$0xff] %vm733_vm0, %v583_v26  ;;  %841 = vst.msk [vmem:[%s1439_s13 + $0x358] sm:$0xff] %vm733_vm0, %v584_v27  ;;  %v590_v39 = vmul.f32 %v1434_v0, %v333_v36  ;;  %v335_v41 = vld [vmem:[%s1430_s17 + $0x398] sm:$0xff]  ;;  %v336_v42 = vld [vmem:[%s1430_s17 + $0x3a0] sm:$0xff]  ;;  %v591_v43 = vmul.f32 %v1434_v0, %v334_v40 }
  0x75   : > { %842 = vst.msk [vmem:[%s1439_s13 + $0x360] sm:$0xff] %vm733_vm0, %v585_v31  ;;  %843 = vst.msk [vmem:[%s1439_s13 + $0x368] sm:$0xff] %vm733_vm0, %v586_v32  ;;  %v592_v44 = vmul.f32 %v1434_v0, %v335_v41  ;;  %v593_v45 = vmul.f32 %v1434_v0, %v336_v42  ;;  %v337_v46 = vld [vmem:[%s1430_s17 + $0x3a8] sm:$0xff]  ;;  %v338_v47 = vld [vmem:[%s1430_s17 + $0x3b0] sm:$0xff] }
  0x76   : > { %844 = vst.msk [vmem:[%s1439_s13 + $0x370] sm:$0xff] %vm733_vm0, %v587_v33  ;;  %v339_v48 = vld [vmem:[%s1430_s17 + $0x3b8] sm:$0xff]  ;;  %845 = vst.msk [vmem:[%s1439_s13 + $0x378] sm:$0xff] %vm733_vm0, %v588_v37  ;;  %v594_v49 = vmul.f32 %v1434_v0, %v337_v46  ;;  %v595_v50 = vmul.f32 %v1434_v0, %v338_v47  ;;  %v340_v52 = vld [vmem:[%s1430_s17 + $0x3c0] sm:$0xff] }
  0x77   : > { %846 = vst.msk [vmem:[%s1439_s13 + $0x380] sm:$0xff] %vm733_vm0, %v589_v38  ;;  %847 = vst.msk [vmem:[%s1439_s13 + $0x388] sm:$0xff] %vm733_vm0, %v590_v39  ;;  %v596_v51 = vmul.f32 %v1434_v0, %v339_v48  ;;  %v341_v53 = vld [vmem:[%s1430_s17 + $0x3c8] sm:$0xff]  ;;  %v342_v54 = vld [vmem:[%s1430_s17 + $0x3d0] sm:$0xff]  ;;  %v597_v55 = vmul.f32 %v1434_v0, %v340_v52 }
  0x78   : > { %848 = vst.msk [vmem:[%s1439_s13 + $0x390] sm:$0xff] %vm733_vm0, %v591_v43  ;;  %849 = vst.msk [vmem:[%s1439_s13 + $0x398] sm:$0xff] %vm733_vm0, %v592_v44  ;;  %v598_v56 = vmul.f32 %v1434_v0, %v341_v53  ;;  %v599_v57 = vmul.f32 %v1434_v0, %v342_v54  ;;  %v343_v58 = vld [vmem:[%s1430_s17 + $0x3d8] sm:$0xff]  ;;  %v344_v59 = vld [vmem:[%s1430_s17 + $0x3e0] sm:$0xff] }
  0x79   : > { %850 = vst.msk [vmem:[%s1439_s13 + $0x3a0] sm:$0xff] %vm733_vm0, %v593_v45  ;;  %v345_v60 = vld [vmem:[%s1430_s17 + $0x3e8] sm:$0xff]  ;;  %851 = vst.msk [vmem:[%s1439_s13 + $0x3a8] sm:$0xff] %vm733_vm0, %v594_v49  ;;  %v600_v61 = vmul.f32 %v1434_v0, %v343_v58  ;;  %v601_v62 = vmul.f32 %v1434_v0, %v344_v59  ;;  %v346_v1 = vld [vmem:[%s1430_s17 + $0x3f0] sm:$0xff] }
  0x7a   : > { %852 = vst.msk [vmem:[%s1439_s13 + $0x3b0] sm:$0xff] %vm733_vm0, %v595_v50  ;;  %853 = vst.msk [vmem:[%s1439_s13 + $0x3b8] sm:$0xff] %vm733_vm0, %v596_v51  ;;  %v602_v63 = vmul.f32 %v1434_v0, %v345_v60  ;;  %v347_v2 = vld [vmem:[%s1430_s17 + $0x3f8] sm:$0xff]  ;;  %v348_v3 = vld [vmem:[%s1430_s17 + $0x400] sm:$0xff]  ;;  %v603_v4 = vmul.f32 %v1434_v0, %v346_v1 }
  0x7b   : > { %854 = vst.msk [vmem:[%s1439_s13 + $0x3c0] sm:$0xff] %vm733_vm0, %v597_v55  ;;  %855 = vst.msk [vmem:[%s1439_s13 + $0x3c8] sm:$0xff] %vm733_vm0, %v598_v56  ;;  %v604_v5 = vmul.f32 %v1434_v0, %v347_v2  ;;  %v605_v6 = vmul.f32 %v1434_v0, %v348_v3  ;;  %v349_v7 = vld [vmem:[%s1430_s17 + $0x408] sm:$0xff]  ;;  %v350_v8 = vld [vmem:[%s1430_s17 + $0x410] sm:$0xff] }
  0x7c   : > { %856 = vst.msk [vmem:[%s1439_s13 + $0x3d0] sm:$0xff] %vm733_vm0, %v599_v57  ;;  %v351_v9 = vld [vmem:[%s1430_s17 + $0x418] sm:$0xff]  ;;  %857 = vst.msk [vmem:[%s1439_s13 + $0x3d8] sm:$0xff] %vm733_vm0, %v600_v61  ;;  %v606_v10 = vmul.f32 %v1434_v0, %v349_v7  ;;  %v607_v11 = vmul.f32 %v1434_v0, %v350_v8  ;;  %v352_v13 = vld [vmem:[%s1430_s17 + $0x420] sm:$0xff] }
  0x7d   : > { %858 = vst.msk [vmem:[%s1439_s13 + $0x3e0] sm:$0xff] %vm733_vm0, %v601_v62  ;;  %859 = vst.msk [vmem:[%s1439_s13 + $0x3e8] sm:$0xff] %vm733_vm0, %v602_v63  ;;  %v608_v12 = vmul.f32 %v1434_v0, %v351_v9  ;;  %v353_v14 = vld [vmem:[%s1430_s17 + $0x428] sm:$0xff]  ;;  %v354_v15 = vld [vmem:[%s1430_s17 + $0x430] sm:$0xff]  ;;  %v609_v16 = vmul.f32 %v1434_v0, %v352_v13 }
  0x7e   : > { %860 = vst.msk [vmem:[%s1439_s13 + $0x3f0] sm:$0xff] %vm733_vm0, %v603_v4  ;;  %861 = vst.msk [vmem:[%s1439_s13 + $0x3f8] sm:$0xff] %vm733_vm0, %v604_v5  ;;  %v610_v17 = vmul.f32 %v1434_v0, %v353_v14  ;;  %v611_v18 = vmul.f32 %v1434_v0, %v354_v15  ;;  %v355_v19 = vld [vmem:[%s1430_s17 + $0x438] sm:$0xff]  ;;  %v356_v20 = vld [vmem:[%s1430_s17 + $0x440] sm:$0xff] }
  0x7f   : > { %862 = vst.msk [vmem:[%s1439_s13 + $0x400] sm:$0xff] %vm733_vm0, %v605_v6  ;;  %v357_v21 = vld [vmem:[%s1430_s17 + $0x448] sm:$0xff]  ;;  %863 = vst.msk [vmem:[%s1439_s13 + $0x408] sm:$0xff] %vm733_vm0, %v606_v10  ;;  %v612_v22 = vmul.f32 %v1434_v0, %v355_v19  ;;  %v613_v23 = vmul.f32 %v1434_v0, %v356_v20  ;;  %v358_v25 = vld [vmem:[%s1430_s17 + $0x450] sm:$0xff] }
  0x80   : > { %864 = vst.msk [vmem:[%s1439_s13 + $0x410] sm:$0xff] %vm733_vm0, %v607_v11  ;;  %865 = vst.msk [vmem:[%s1439_s13 + $0x418] sm:$0xff] %vm733_vm0, %v608_v12  ;;  %v614_v24 = vmul.f32 %v1434_v0, %v357_v21  ;;  %v359_v26 = vld [vmem:[%s1430_s17 + $0x458] sm:$0xff]  ;;  %v360_v27 = vld [vmem:[%s1430_s17 + $0x460] sm:$0xff]  ;;  %v615_v28 = vmul.f32 %v1434_v0, %v358_v25 }
  0x81   : > { %866 = vst.msk [vmem:[%s1439_s13 + $0x420] sm:$0xff] %vm733_vm0, %v609_v16  ;;  %867 = vst.msk [vmem:[%s1439_s13 + $0x428] sm:$0xff] %vm733_vm0, %v610_v17  ;;  %v616_v29 = vmul.f32 %v1434_v0, %v359_v26  ;;  %v617_v30 = vmul.f32 %v1434_v0, %v360_v27  ;;  %v361_v31 = vld [vmem:[%s1430_s17 + $0x468] sm:$0xff]  ;;  %v362_v32 = vld [vmem:[%s1430_s17 + $0x470] sm:$0xff] }
  0x82   : > { %868 = vst.msk [vmem:[%s1439_s13 + $0x430] sm:$0xff] %vm733_vm0, %v611_v18  ;;  %v363_v33 = vld [vmem:[%s1430_s17 + $0x478] sm:$0xff]  ;;  %869 = vst.msk [vmem:[%s1439_s13 + $0x438] sm:$0xff] %vm733_vm0, %v612_v22  ;;  %v618_v34 = vmul.f32 %v1434_v0, %v361_v31  ;;  %v619_v35 = vmul.f32 %v1434_v0, %v362_v32  ;;  %v364_v37 = vld [vmem:[%s1430_s17 + $0x480] sm:$0xff] }
  0x83   : > { %870 = vst.msk [vmem:[%s1439_s13 + $0x440] sm:$0xff] %vm733_vm0, %v613_v23  ;;  %871 = vst.msk [vmem:[%s1439_s13 + $0x448] sm:$0xff] %vm733_vm0, %v614_v24  ;;  %v620_v36 = vmul.f32 %v1434_v0, %v363_v33  ;;  %v365_v38 = vld [vmem:[%s1430_s17 + $0x488] sm:$0xff]  ;;  %v366_v39 = vld [vmem:[%s1430_s17 + $0x490] sm:$0xff]  ;;  %v621_v40 = vmul.f32 %v1434_v0, %v364_v37 }
  0x84   : > { %872 = vst.msk [vmem:[%s1439_s13 + $0x450] sm:$0xff] %vm733_vm0, %v615_v28  ;;  %873 = vst.msk [vmem:[%s1439_s13 + $0x458] sm:$0xff] %vm733_vm0, %v616_v29  ;;  %v622_v41 = vmul.f32 %v1434_v0, %v365_v38  ;;  %v623_v42 = vmul.f32 %v1434_v0, %v366_v39  ;;  %v367_v43 = vld [vmem:[%s1430_s17 + $0x498] sm:$0xff]  ;;  %v368_v44 = vld [vmem:[%s1430_s17 + $0x4a0] sm:$0xff] }
  0x85   : > { %874 = vst.msk [vmem:[%s1439_s13 + $0x460] sm:$0xff] %vm733_vm0, %v617_v30  ;;  %v369_v45 = vld [vmem:[%s1430_s17 + $0x4a8] sm:$0xff]  ;;  %875 = vst.msk [vmem:[%s1439_s13 + $0x468] sm:$0xff] %vm733_vm0, %v618_v34  ;;  %v624_v46 = vmul.f32 %v1434_v0, %v367_v43  ;;  %v625_v47 = vmul.f32 %v1434_v0, %v368_v44  ;;  %v370_v49 = vld [vmem:[%s1430_s17 + $0x4b0] sm:$0xff] }
  0x86   : > { %876 = vst.msk [vmem:[%s1439_s13 + $0x470] sm:$0xff] %vm733_vm0, %v619_v35  ;;  %877 = vst.msk [vmem:[%s1439_s13 + $0x478] sm:$0xff] %vm733_vm0, %v620_v36  ;;  %v626_v48 = vmul.f32 %v1434_v0, %v369_v45  ;;  %v371_v50 = vld [vmem:[%s1430_s17 + $0x4b8] sm:$0xff]  ;;  %v372_v51 = vld [vmem:[%s1430_s17 + $0x4c0] sm:$0xff]  ;;  %v627_v52 = vmul.f32 %v1434_v0, %v370_v49 }
  0x87   : > { %878 = vst.msk [vmem:[%s1439_s13 + $0x480] sm:$0xff] %vm733_vm0, %v621_v40  ;;  %879 = vst.msk [vmem:[%s1439_s13 + $0x488] sm:$0xff] %vm733_vm0, %v622_v41  ;;  %v628_v53 = vmul.f32 %v1434_v0, %v371_v50  ;;  %v629_v54 = vmul.f32 %v1434_v0, %v372_v51  ;;  %v373_v55 = vld [vmem:[%s1430_s17 + $0x4c8] sm:$0xff]  ;;  %v374_v56 = vld [vmem:[%s1430_s17 + $0x4d0] sm:$0xff] }
  0x88   : > { %880 = vst.msk [vmem:[%s1439_s13 + $0x490] sm:$0xff] %vm733_vm0, %v623_v42  ;;  %v375_v57 = vld [vmem:[%s1430_s17 + $0x4d8] sm:$0xff]  ;;  %881 = vst.msk [vmem:[%s1439_s13 + $0x498] sm:$0xff] %vm733_vm0, %v624_v46  ;;  %v630_v58 = vmul.f32 %v1434_v0, %v373_v55  ;;  %v631_v59 = vmul.f32 %v1434_v0, %v374_v56  ;;  %v376_v61 = vld [vmem:[%s1430_s17 + $0x4e0] sm:$0xff] }
  0x89   : > { %882 = vst.msk [vmem:[%s1439_s13 + $0x4a0] sm:$0xff] %vm733_vm0, %v625_v47  ;;  %883 = vst.msk [vmem:[%s1439_s13 + $0x4a8] sm:$0xff] %vm733_vm0, %v626_v48  ;;  %v632_v60 = vmul.f32 %v1434_v0, %v375_v57  ;;  %v377_v62 = vld [vmem:[%s1430_s17 + $0x4e8] sm:$0xff]  ;;  %v378_v63 = vld [vmem:[%s1430_s17 + $0x4f0] sm:$0xff]  ;;  %v633_v1 = vmul.f32 %v1434_v0, %v376_v61 }
  0x8a   : > { %884 = vst.msk [vmem:[%s1439_s13 + $0x4b0] sm:$0xff] %vm733_vm0, %v627_v52  ;;  %885 = vst.msk [vmem:[%s1439_s13 + $0x4b8] sm:$0xff] %vm733_vm0, %v628_v53  ;;  %v634_v2 = vmul.f32 %v1434_v0, %v377_v62  ;;  %v635_v3 = vmul.f32 %v1434_v0, %v378_v63  ;;  %v379_v4 = vld [vmem:[%s1430_s17 + $0x4f8] sm:$0xff]  ;;  %v380_v5 = vld [vmem:[%s1430_s17 + $0x500] sm:$0xff] }
  0x8b   : > { %886 = vst.msk [vmem:[%s1439_s13 + $0x4c0] sm:$0xff] %vm733_vm0, %v629_v54  ;;  %v381_v6 = vld [vmem:[%s1430_s17 + $0x508] sm:$0xff]  ;;  %887 = vst.msk [vmem:[%s1439_s13 + $0x4c8] sm:$0xff] %vm733_vm0, %v630_v58  ;;  %v636_v7 = vmul.f32 %v1434_v0, %v379_v4  ;;  %v637_v8 = vmul.f32 %v1434_v0, %v380_v5  ;;  %v382_v10 = vld [vmem:[%s1430_s17 + $0x510] sm:$0xff] }
  0x8c   : > { %888 = vst.msk [vmem:[%s1439_s13 + $0x4d0] sm:$0xff] %vm733_vm0, %v631_v59  ;;  %889 = vst.msk [vmem:[%s1439_s13 + $0x4d8] sm:$0xff] %vm733_vm0, %v632_v60  ;;  %v638_v9 = vmul.f32 %v1434_v0, %v381_v6  ;;  %v383_v11 = vld [vmem:[%s1430_s17 + $0x518] sm:$0xff]  ;;  %v384_v12 = vld [vmem:[%s1430_s17 + $0x520] sm:$0xff]  ;;  %v639_v13 = vmul.f32 %v1434_v0, %v382_v10 }
  0x8d   : > { %890 = vst.msk [vmem:[%s1439_s13 + $0x4e0] sm:$0xff] %vm733_vm0, %v633_v1  ;;  %891 = vst.msk [vmem:[%s1439_s13 + $0x4e8] sm:$0xff] %vm733_vm0, %v634_v2  ;;  %v640_v14 = vmul.f32 %v1434_v0, %v383_v11  ;;  %v641_v15 = vmul.f32 %v1434_v0, %v384_v12  ;;  %v385_v16 = vld [vmem:[%s1430_s17 + $0x528] sm:$0xff]  ;;  %v386_v17 = vld [vmem:[%s1430_s17 + $0x530] sm:$0xff] }
  0x8e   : > { %892 = vst.msk [vmem:[%s1439_s13 + $0x4f0] sm:$0xff] %vm733_vm0, %v635_v3  ;;  %v387_v18 = vld [vmem:[%s1430_s17 + $0x538] sm:$0xff]  ;;  %893 = vst.msk [vmem:[%s1439_s13 + $0x4f8] sm:$0xff] %vm733_vm0, %v636_v7  ;;  %v642_v19 = vmul.f32 %v1434_v0, %v385_v16  ;;  %v643_v20 = vmul.f32 %v1434_v0, %v386_v17  ;;  %v388_v22 = vld [vmem:[%s1430_s17 + $0x540] sm:$0xff] }
  0x8f   : > { %894 = vst.msk [vmem:[%s1439_s13 + $0x500] sm:$0xff] %vm733_vm0, %v637_v8  ;;  %895 = vst.msk [vmem:[%s1439_s13 + $0x508] sm:$0xff] %vm733_vm0, %v638_v9  ;;  %v644_v21 = vmul.f32 %v1434_v0, %v387_v18  ;;  %v389_v23 = vld [vmem:[%s1430_s17 + $0x548] sm:$0xff]  ;;  %v390_v24 = vld [vmem:[%s1430_s17 + $0x550] sm:$0xff]  ;;  %v645_v25 = vmul.f32 %v1434_v0, %v388_v22 }
  0x90   : > { %896 = vst.msk [vmem:[%s1439_s13 + $0x510] sm:$0xff] %vm733_vm0, %v639_v13  ;;  %897 = vst.msk [vmem:[%s1439_s13 + $0x518] sm:$0xff] %vm733_vm0, %v640_v14  ;;  %v646_v26 = vmul.f32 %v1434_v0, %v389_v23  ;;  %v647_v27 = vmul.f32 %v1434_v0, %v390_v24  ;;  %v391_v28 = vld [vmem:[%s1430_s17 + $0x558] sm:$0xff]  ;;  %v392_v29 = vld [vmem:[%s1430_s17 + $0x560] sm:$0xff] }
  0x91   : > { %898 = vst.msk [vmem:[%s1439_s13 + $0x520] sm:$0xff] %vm733_vm0, %v641_v15  ;;  %v393_v30 = vld [vmem:[%s1430_s17 + $0x568] sm:$0xff]  ;;  %899 = vst.msk [vmem:[%s1439_s13 + $0x528] sm:$0xff] %vm733_vm0, %v642_v19  ;;  %v394_v34 = vld [vmem:[%s1430_s17 + $0x570] sm:$0xff] }
  0x92   : > { %900 = vst.msk [vmem:[%s1439_s13 + $0x530] sm:$0xff] %vm733_vm0, %v643_v20  ;;  %901 = vst.msk [vmem:[%s1439_s13 + $0x538] sm:$0xff] %vm733_vm0, %v644_v21  ;;  %v2124_v31 = vld [vmem:[%s166_s7] sm:$0xff]  ;;  %v395_v35 = vld [vmem:[%s1430_s17 + $0x578] sm:$0xff] }
  0x93   : > { %v648_v32 = vmul.f32 %v2124_v31, %v391_v28  ;;  %v649_v0 = vmul.f32 %v2124_v31, %v392_v29  ;;  %v650_v33 = vmul.f32 %v2124_v31, %v393_v30  ;;  %v396_v36 = vld [vmem:[%s1430_s17 + $0x580] sm:$0xff]  ;;  %902 = vst.msk [vmem:[%s1439_s13 + $0x540] sm:$0xff] %vm733_vm0, %v645_v25  ;;  %903 = vst.msk [vmem:[%s1439_s13 + $0x548] sm:$0xff] %vm733_vm0, %v646_v26  ;;  %v397_v40 = vld [vmem:[%s1430_s17 + $0x588] sm:$0xff] }
  0x94   : > { %904 = vst.msk [vmem:[%s1439_s13 + $0x550] sm:$0xff] %vm733_vm0, %v647_v27  ;;  %v651_v37 = vmul.f32 %v2124_v31, %v394_v34  ;;  %v652_v38 = vmul.f32 %v2124_v31, %v395_v35  ;;  %v653_v39 = vmul.f32 %v2124_v31, %v396_v36  ;;  %v398_v41 = vld [vmem:[%s1430_s17 + $0x590] sm:$0xff]  ;;  %v399_v42 = vld [vmem:[%s1430_s17 + $0x598] sm:$0xff]  ;;  %v654_v43 = vmul.f32 %v2124_v31, %v397_v40  ;;  %v400_v46 = vld [vmem:[%s1430_s17 + $0x5a0] sm:$0xff] }
  0x95   : > { %905 = vst.msk [vmem:[%s1439_s13 + $0x558] sm:$0xff] %vm733_vm0, %v648_v32  ;;  %906 = vst.msk [vmem:[%s1439_s13 + $0x560] sm:$0xff] %vm733_vm0, %v649_v0  ;;  %v655_v44 = vmul.f32 %v2124_v31, %v398_v41  ;;  %v656_v45 = vmul.f32 %v2124_v31, %v399_v42  ;;  %v401_v47 = vld [vmem:[%s1430_s17 + $0x5a8] sm:$0xff]  ;;  %v402_v48 = vld [vmem:[%s1430_s17 + $0x5b0] sm:$0xff]  ;;  %v657_v49 = vmul.f32 %v2124_v31, %v400_v46 }
  0x96   : > { %907 = vst.msk [vmem:[%s1439_s13 + $0x568] sm:$0xff] %vm733_vm0, %v650_v33  ;;  %908 = vst.msk [vmem:[%s1439_s13 + $0x570] sm:$0xff] %vm733_vm0, %v651_v37  ;;  %v658_v50 = vmul.f32 %v2124_v31, %v401_v47  ;;  %v659_v51 = vmul.f32 %v2124_v31, %v402_v48  ;;  %v403_v52 = vld [vmem:[%s1430_s17 + $0x5b8] sm:$0xff]  ;;  %v404_v53 = vld [vmem:[%s1430_s17 + $0x5c0] sm:$0xff] }
  0x97   : > { %909 = vst.msk [vmem:[%s1439_s13 + $0x578] sm:$0xff] %vm733_vm0, %v652_v38  ;;  %910 = vst.msk [vmem:[%s1439_s13 + $0x580] sm:$0xff] %vm733_vm0, %v653_v39  ;;  %v405_v54 = vld [vmem:[%s1430_s17 + $0x5c8] sm:$0xff]  ;;  %v660_v55 = vmul.f32 %v2124_v31, %v403_v52  ;;  %v661_v56 = vmul.f32 %v2124_v31, %v404_v53  ;;  %v406_v58 = vld [vmem:[%s1430_s17 + $0x5d0] sm:$0xff] }
  0x98   : > { %911 = vst.msk [vmem:[%s1439_s13 + $0x588] sm:$0xff] %vm733_vm0, %v654_v43  ;;  %912 = vst.msk [vmem:[%s1439_s13 + $0x590] sm:$0xff] %vm733_vm0, %v655_v44  ;;  %v662_v57 = vmul.f32 %v2124_v31, %v405_v54  ;;  %v407_v59 = vld [vmem:[%s1430_s17 + $0x5d8] sm:$0xff]  ;;  %v408_v60 = vld [vmem:[%s1430_s17 + $0x5e0] sm:$0xff]  ;;  %v663_v61 = vmul.f32 %v2124_v31, %v406_v58 }
  0x99   : > { %913 = vst.msk [vmem:[%s1439_s13 + $0x598] sm:$0xff] %vm733_vm0, %v656_v45  ;;  %914 = vst.msk [vmem:[%s1439_s13 + $0x5a0] sm:$0xff] %vm733_vm0, %v657_v49  ;;  %v664_v62 = vmul.f32 %v2124_v31, %v407_v59  ;;  %v665_v63 = vmul.f32 %v2124_v31, %v408_v60  ;;  %v409_v1 = vld [vmem:[%s1430_s17 + $0x5e8] sm:$0xff]  ;;  %v410_v2 = vld [vmem:[%s1430_s17 + $0x5f0] sm:$0xff] }
  0x9a   : > { %915 = vst.msk [vmem:[%s1439_s13 + $0x5a8] sm:$0xff] %vm733_vm0, %v658_v50  ;;  %916 = vst.msk [vmem:[%s1439_s13 + $0x5b0] sm:$0xff] %vm733_vm0, %v659_v51  ;;  %v411_v3 = vld [vmem:[%s1430_s17 + $0x5f8] sm:$0xff]  ;;  %v666_v4 = vmul.f32 %v2124_v31, %v409_v1  ;;  %v667_v5 = vmul.f32 %v2124_v31, %v410_v2  ;;  %v412_v7 = vld [vmem:[%s1430_s17 + $0x600] sm:$0xff] }
  0x9b   : > { %917 = vst.msk [vmem:[%s1439_s13 + $0x5b8] sm:$0xff] %vm733_vm0, %v660_v55  ;;  %918 = vst.msk [vmem:[%s1439_s13 + $0x5c0] sm:$0xff] %vm733_vm0, %v661_v56  ;;  %v668_v6 = vmul.f32 %v2124_v31, %v411_v3  ;;  %v413_v8 = vld [vmem:[%s1430_s17 + $0x608] sm:$0xff]  ;;  %v414_v9 = vld [vmem:[%s1430_s17 + $0x610] sm:$0xff]  ;;  %v669_v10 = vmul.f32 %v2124_v31, %v412_v7 }
  0x9c   : > { %919 = vst.msk [vmem:[%s1439_s13 + $0x5c8] sm:$0xff] %vm733_vm0, %v662_v57  ;;  %920 = vst.msk [vmem:[%s1439_s13 + $0x5d0] sm:$0xff] %vm733_vm0, %v663_v61  ;;  %v670_v11 = vmul.f32 %v2124_v31, %v413_v8  ;;  %v671_v12 = vmul.f32 %v2124_v31, %v414_v9  ;;  %v415_v13 = vld [vmem:[%s1430_s17 + $0x618] sm:$0xff]  ;;  %v416_v14 = vld [vmem:[%s1430_s17 + $0x620] sm:$0xff] }
  0x9d   : > { %921 = vst.msk [vmem:[%s1439_s13 + $0x5d8] sm:$0xff] %vm733_vm0, %v664_v62  ;;  %922 = vst.msk [vmem:[%s1439_s13 + $0x5e0] sm:$0xff] %vm733_vm0, %v665_v63  ;;  %v417_v15 = vld [vmem:[%s1430_s17 + $0x628] sm:$0xff]  ;;  %v672_v16 = vmul.f32 %v2124_v31, %v415_v13  ;;  %v673_v17 = vmul.f32 %v2124_v31, %v416_v14  ;;  %v418_v19 = vld [vmem:[%s1430_s17 + $0x630] sm:$0xff] }
  0x9e   : > { %923 = vst.msk [vmem:[%s1439_s13 + $0x5e8] sm:$0xff] %vm733_vm0, %v666_v4  ;;  %924 = vst.msk [vmem:[%s1439_s13 + $0x5f0] sm:$0xff] %vm733_vm0, %v667_v5  ;;  %v674_v18 = vmul.f32 %v2124_v31, %v417_v15  ;;  %v419_v20 = vld [vmem:[%s1430_s17 + $0x638] sm:$0xff]  ;;  %v420_v21 = vld [vmem:[%s1430_s17 + $0x640] sm:$0xff]  ;;  %v675_v22 = vmul.f32 %v2124_v31, %v418_v19 }
  0x9f   : > { %925 = vst.msk [vmem:[%s1439_s13 + $0x5f8] sm:$0xff] %vm733_vm0, %v668_v6  ;;  %926 = vst.msk [vmem:[%s1439_s13 + $0x600] sm:$0xff] %vm733_vm0, %v669_v10  ;;  %v676_v23 = vmul.f32 %v2124_v31, %v419_v20  ;;  %v677_v24 = vmul.f32 %v2124_v31, %v420_v21  ;;  %v421_v25 = vld [vmem:[%s1430_s17 + $0x648] sm:$0xff]  ;;  %v422_v26 = vld [vmem:[%s1430_s17 + $0x650] sm:$0xff] }
  0xa0   : > { %927 = vst.msk [vmem:[%s1439_s13 + $0x608] sm:$0xff] %vm733_vm0, %v670_v11  ;;  %928 = vst.msk [vmem:[%s1439_s13 + $0x610] sm:$0xff] %vm733_vm0, %v671_v12  ;;  %v423_v27 = vld [vmem:[%s1430_s17 + $0x658] sm:$0xff]  ;;  %v678_v28 = vmul.f32 %v2124_v31, %v421_v25  ;;  %v679_v29 = vmul.f32 %v2124_v31, %v422_v26  ;;  %v424_v32 = vld [vmem:[%s1430_s17 + $0x660] sm:$0xff] }
  0xa1   : > { %929 = vst.msk [vmem:[%s1439_s13 + $0x618] sm:$0xff] %vm733_vm0, %v672_v16  ;;  %930 = vst.msk [vmem:[%s1439_s13 + $0x620] sm:$0xff] %vm733_vm0, %v673_v17  ;;  %v680_v30 = vmul.f32 %v2124_v31, %v423_v27  ;;  %v425_v0 = vld [vmem:[%s1430_s17 + $0x668] sm:$0xff]  ;;  %v426_v33 = vld [vmem:[%s1430_s17 + $0x670] sm:$0xff]  ;;  %v681_v34 = vmul.f32 %v2124_v31, %v424_v32 }
  0xa2   : > { %931 = vst.msk [vmem:[%s1439_s13 + $0x628] sm:$0xff] %vm733_vm0, %v674_v18  ;;  %932 = vst.msk [vmem:[%s1439_s13 + $0x630] sm:$0xff] %vm733_vm0, %v675_v22  ;;  %v682_v35 = vmul.f32 %v2124_v31, %v425_v0  ;;  %v683_v36 = vmul.f32 %v2124_v31, %v426_v33  ;;  %v427_v37 = vld [vmem:[%s1430_s17 + $0x678] sm:$0xff]  ;;  %v428_v38 = vld [vmem:[%s1430_s17 + $0x680] sm:$0xff] }
  0xa3   : > { %933 = vst.msk [vmem:[%s1439_s13 + $0x638] sm:$0xff] %vm733_vm0, %v676_v23  ;;  %934 = vst.msk [vmem:[%s1439_s13 + $0x640] sm:$0xff] %vm733_vm0, %v677_v24  ;;  %v429_v39 = vld [vmem:[%s1430_s17 + $0x688] sm:$0xff]  ;;  %v684_v40 = vmul.f32 %v2124_v31, %v427_v37  ;;  %v685_v41 = vmul.f32 %v2124_v31, %v428_v38  ;;  %v430_v43 = vld [vmem:[%s1430_s17 + $0x690] sm:$0xff] }
  0xa4   : > { %935 = vst.msk [vmem:[%s1439_s13 + $0x648] sm:$0xff] %vm733_vm0, %v678_v28  ;;  %936 = vst.msk [vmem:[%s1439_s13 + $0x650] sm:$0xff] %vm733_vm0, %v679_v29  ;;  %v686_v42 = vmul.f32 %v2124_v31, %v429_v39  ;;  %v431_v44 = vld [vmem:[%s1430_s17 + $0x698] sm:$0xff]  ;;  %v432_v45 = vld [vmem:[%s1430_s17 + $0x6a0] sm:$0xff]  ;;  %v687_v46 = vmul.f32 %v2124_v31, %v430_v43 }
  0xa5   : > { %937 = vst.msk [vmem:[%s1439_s13 + $0x658] sm:$0xff] %vm733_vm0, %v680_v30  ;;  %938 = vst.msk [vmem:[%s1439_s13 + $0x660] sm:$0xff] %vm733_vm0, %v681_v34  ;;  %v688_v47 = vmul.f32 %v2124_v31, %v431_v44  ;;  %v689_v48 = vmul.f32 %v2124_v31, %v432_v45  ;;  %v433_v49 = vld [vmem:[%s1430_s17 + $0x6a8] sm:$0xff]  ;;  %v434_v50 = vld [vmem:[%s1430_s17 + $0x6b0] sm:$0xff] }
  0xa6   : > { %939 = vst.msk [vmem:[%s1439_s13 + $0x668] sm:$0xff] %vm733_vm0, %v682_v35  ;;  %940 = vst.msk [vmem:[%s1439_s13 + $0x670] sm:$0xff] %vm733_vm0, %v683_v36  ;;  %v435_v51 = vld [vmem:[%s1430_s17 + $0x6b8] sm:$0xff]  ;;  %v690_v52 = vmul.f32 %v2124_v31, %v433_v49  ;;  %v691_v53 = vmul.f32 %v2124_v31, %v434_v50  ;;  %v436_v55 = vld [vmem:[%s1430_s17 + $0x6c0] sm:$0xff] }
  0xa7   : > { %941 = vst.msk [vmem:[%s1439_s13 + $0x678] sm:$0xff] %vm733_vm0, %v684_v40  ;;  %942 = vst.msk [vmem:[%s1439_s13 + $0x680] sm:$0xff] %vm733_vm0, %v685_v41  ;;  %v692_v54 = vmul.f32 %v2124_v31, %v435_v51  ;;  %v437_v56 = vld [vmem:[%s1430_s17 + $0x6c8] sm:$0xff]  ;;  %v438_v57 = vld [vmem:[%s1430_s17 + $0x6d0] sm:$0xff]  ;;  %v693_v58 = vmul.f32 %v2124_v31, %v436_v55 }
  0xa8   : > { %943 = vst.msk [vmem:[%s1439_s13 + $0x688] sm:$0xff] %vm733_vm0, %v686_v42  ;;  %944 = vst.msk [vmem:[%s1439_s13 + $0x690] sm:$0xff] %vm733_vm0, %v687_v46  ;;  %v694_v59 = vmul.f32 %v2124_v31, %v437_v56  ;;  %v695_v60 = vmul.f32 %v2124_v31, %v438_v57  ;;  %v439_v61 = vld [vmem:[%s1430_s17 + $0x6d8] sm:$0xff]  ;;  %v440_v62 = vld [vmem:[%s1430_s17 + $0x6e0] sm:$0xff] }
  0xa9   : > { %945 = vst.msk [vmem:[%s1439_s13 + $0x698] sm:$0xff] %vm733_vm0, %v688_v47  ;;  %946 = vst.msk [vmem:[%s1439_s13 + $0x6a0] sm:$0xff] %vm733_vm0, %v689_v48  ;;  %v441_v63 = vld [vmem:[%s1430_s17 + $0x6e8] sm:$0xff]  ;;  %v696_v1 = vmul.f32 %v2124_v31, %v439_v61  ;;  %v697_v2 = vmul.f32 %v2124_v31, %v440_v62  ;;  %v442_v4 = vld [vmem:[%s1430_s17 + $0x6f0] sm:$0xff] }
  0xaa   : > { %947 = vst.msk [vmem:[%s1439_s13 + $0x6a8] sm:$0xff] %vm733_vm0, %v690_v52  ;;  %948 = vst.msk [vmem:[%s1439_s13 + $0x6b0] sm:$0xff] %vm733_vm0, %v691_v53  ;;  %v698_v3 = vmul.f32 %v2124_v31, %v441_v63  ;;  %v443_v5 = vld [vmem:[%s1430_s17 + $0x6f8] sm:$0xff]  ;;  %v444_v6 = vld [vmem:[%s1430_s17 + $0x700] sm:$0xff]  ;;  %v699_v7 = vmul.f32 %v2124_v31, %v442_v4 }
  0xab   : > { %949 = vst.msk [vmem:[%s1439_s13 + $0x6b8] sm:$0xff] %vm733_vm0, %v692_v54  ;;  %950 = vst.msk [vmem:[%s1439_s13 + $0x6c0] sm:$0xff] %vm733_vm0, %v693_v58  ;;  %v700_v8 = vmul.f32 %v2124_v31, %v443_v5  ;;  %v701_v9 = vmul.f32 %v2124_v31, %v444_v6  ;;  %v445_v10 = vld [vmem:[%s1430_s17 + $0x708] sm:$0xff]  ;;  %v446_v11 = vld [vmem:[%s1430_s17 + $0x710] sm:$0xff] }
  0xac   : > { %951 = vst.msk [vmem:[%s1439_s13 + $0x6c8] sm:$0xff] %vm733_vm0, %v694_v59  ;;  %952 = vst.msk [vmem:[%s1439_s13 + $0x6d0] sm:$0xff] %vm733_vm0, %v695_v60  ;;  %v447_v12 = vld [vmem:[%s1430_s17 + $0x718] sm:$0xff]  ;;  %v702_v13 = vmul.f32 %v2124_v31, %v445_v10  ;;  %v703_v14 = vmul.f32 %v2124_v31, %v446_v11  ;;  %v448_v16 = vld [vmem:[%s1430_s17 + $0x720] sm:$0xff] }
  0xad   : > { %953 = vst.msk [vmem:[%s1439_s13 + $0x6d8] sm:$0xff] %vm733_vm0, %v696_v1  ;;  %954 = vst.msk [vmem:[%s1439_s13 + $0x6e0] sm:$0xff] %vm733_vm0, %v697_v2  ;;  %v704_v15 = vmul.f32 %v2124_v31, %v447_v12  ;;  %v449_v17 = vld [vmem:[%s1430_s17 + $0x728] sm:$0xff]  ;;  %v450_v18 = vld [vmem:[%s1430_s17 + $0x730] sm:$0xff]  ;;  %v705_v19 = vmul.f32 %v2124_v31, %v448_v16 }
  0xae   : > { %955 = vst.msk [vmem:[%s1439_s13 + $0x6e8] sm:$0xff] %vm733_vm0, %v698_v3  ;;  %956 = vst.msk [vmem:[%s1439_s13 + $0x6f0] sm:$0xff] %vm733_vm0, %v699_v7  ;;  %v706_v20 = vmul.f32 %v2124_v31, %v449_v17  ;;  %v707_v21 = vmul.f32 %v2124_v31, %v450_v18  ;;  %v451_v22 = vld [vmem:[%s1430_s17 + $0x738] sm:$0xff]  ;;  %v452_v23 = vld [vmem:[%s1430_s17 + $0x740] sm:$0xff] }
  0xaf   : > { %957 = vst.msk [vmem:[%s1439_s13 + $0x6f8] sm:$0xff] %vm733_vm0, %v700_v8  ;;  %958 = vst.msk [vmem:[%s1439_s13 + $0x700] sm:$0xff] %vm733_vm0, %v701_v9  ;;  %v453_v24 = vld [vmem:[%s1430_s17 + $0x748] sm:$0xff]  ;;  %v708_v25 = vmul.f32 %v2124_v31, %v451_v22  ;;  %v709_v26 = vmul.f32 %v2124_v31, %v452_v23  ;;  %v454_v28 = vld [vmem:[%s1430_s17 + $0x750] sm:$0xff] }
  0xb0   : > { %959 = vst.msk [vmem:[%s1439_s13 + $0x708] sm:$0xff] %vm733_vm0, %v702_v13  ;;  %960 = vst.msk [vmem:[%s1439_s13 + $0x710] sm:$0xff] %vm733_vm0, %v703_v14  ;;  %v710_v27 = vmul.f32 %v2124_v31, %v453_v24  ;;  %v455_v29 = vld [vmem:[%s1430_s17 + $0x758] sm:$0xff]  ;;  %v456_v30 = vld [vmem:[%s1430_s17 + $0x760] sm:$0xff]  ;;  %v711_v32 = vmul.f32 %v2124_v31, %v454_v28 }
  0xb1   : > { %961 = vst.msk [vmem:[%s1439_s13 + $0x718] sm:$0xff] %vm733_vm0, %v704_v15  ;;  %962 = vst.msk [vmem:[%s1439_s13 + $0x720] sm:$0xff] %vm733_vm0, %v705_v19  ;;  %v712_v0 = vmul.f32 %v2124_v31, %v455_v29  ;;  %v713_v33 = vmul.f32 %v2124_v31, %v456_v30  ;;  %v457_v34 = vld [vmem:[%s1430_s17 + $0x768] sm:$0xff]  ;;  %v458_v35 = vld [vmem:[%s1430_s17 + $0x770] sm:$0xff] }
  0xb2   : > { %963 = vst.msk [vmem:[%s1439_s13 + $0x728] sm:$0xff] %vm733_vm0, %v706_v20  ;;  %964 = vst.msk [vmem:[%s1439_s13 + $0x730] sm:$0xff] %vm733_vm0, %v707_v21  ;;  %v459_v36 = vld [vmem:[%s1430_s17 + $0x778] sm:$0xff]  ;;  %v714_v37 = vmul.f32 %v2124_v31, %v457_v34  ;;  %v715_v38 = vmul.f32 %v2124_v31, %v458_v35  ;;  %v460_v40 = vld [vmem:[%s1430_s17 + $0x780] sm:$0xff] }
  0xb3   : > { %965 = vst.msk [vmem:[%s1439_s13 + $0x738] sm:$0xff] %vm733_vm0, %v708_v25  ;;  %966 = vst.msk [vmem:[%s1439_s13 + $0x740] sm:$0xff] %vm733_vm0, %v709_v26  ;;  %v716_v39 = vmul.f32 %v2124_v31, %v459_v36  ;;  %v461_v41 = vld [vmem:[%s1430_s17 + $0x788] sm:$0xff]  ;;  %v462_v42 = vld [vmem:[%s1430_s17 + $0x790] sm:$0xff]  ;;  %v717_v43 = vmul.f32 %v2124_v31, %v460_v40 }
  0xb4   : > { %967 = vst.msk [vmem:[%s1439_s13 + $0x748] sm:$0xff] %vm733_vm0, %v710_v27  ;;  %968 = vst.msk [vmem:[%s1439_s13 + $0x750] sm:$0xff] %vm733_vm0, %v711_v32  ;;  %v718_v44 = vmul.f32 %v2124_v31, %v461_v41  ;;  %v719_v45 = vmul.f32 %v2124_v31, %v462_v42  ;;  %v463_v46 = vld [vmem:[%s1430_s17 + $0x798] sm:$0xff]  ;;  %v464_v47 = vld [vmem:[%s1430_s17 + $0x7a0] sm:$0xff] }
  0xb5   : > { %969 = vst.msk [vmem:[%s1439_s13 + $0x758] sm:$0xff] %vm733_vm0, %v712_v0  ;;  %970 = vst.msk [vmem:[%s1439_s13 + $0x760] sm:$0xff] %vm733_vm0, %v713_v33  ;;  %v465_v48 = vld [vmem:[%s1430_s17 + $0x7a8] sm:$0xff]  ;;  %v720_v49 = vmul.f32 %v2124_v31, %v463_v46  ;;  %v721_v50 = vmul.f32 %v2124_v31, %v464_v47  ;;  %v466_v52 = vld [vmem:[%s1430_s17 + $0x7b0] sm:$0xff] }
  0xb6   : > { %971 = vst.msk [vmem:[%s1439_s13 + $0x768] sm:$0xff] %vm733_vm0, %v714_v37  ;;  %972 = vst.msk [vmem:[%s1439_s13 + $0x770] sm:$0xff] %vm733_vm0, %v715_v38  ;;  %v722_v51 = vmul.f32 %v2124_v31, %v465_v48  ;;  %v467_v53 = vld [vmem:[%s1430_s17 + $0x7b8] sm:$0xff]  ;;  %v468_v54 = vld [vmem:[%s1430_s17 + $0x7c0] sm:$0xff]  ;;  %v723_v55 = vmul.f32 %v2124_v31, %v466_v52 }
  0xb7   : > { %973 = vst.msk [vmem:[%s1439_s13 + $0x778] sm:$0xff] %vm733_vm0, %v716_v39  ;;  %974 = vst.msk [vmem:[%s1439_s13 + $0x780] sm:$0xff] %vm733_vm0, %v717_v43  ;;  %v724_v56 = vmul.f32 %v2124_v31, %v467_v53  ;;  %v725_v57 = vmul.f32 %v2124_v31, %v468_v54  ;;  %v469_v58 = vld [vmem:[%s1430_s17 + $0x7c8] sm:$0xff]  ;;  %v470_v59 = vld [vmem:[%s1430_s17 + $0x7d0] sm:$0xff] }
  0xb8   : > { %975 = vst.msk [vmem:[%s1439_s13 + $0x788] sm:$0xff] %vm733_vm0, %v718_v44  ;;  %976 = vst.msk [vmem:[%s1439_s13 + $0x790] sm:$0xff] %vm733_vm0, %v719_v45  ;;  %v471_v60 = vld [vmem:[%s1430_s17 + $0x7d8] sm:$0xff]  ;;  %v726_v61 = vmul.f32 %v2124_v31, %v469_v58  ;;  %v727_v62 = vmul.f32 %v2124_v31, %v470_v59  ;;  %v472_v1 = vld [vmem:[%s1430_s17 + $0x7e0] sm:$0xff] }
  0xb9   : > { %977 = vst.msk [vmem:[%s1439_s13 + $0x798] sm:$0xff] %vm733_vm0, %v720_v49  ;;  %978 = vst.msk [vmem:[%s1439_s13 + $0x7a0] sm:$0xff] %vm733_vm0, %v721_v50  ;;  %v728_v63 = vmul.f32 %v2124_v31, %v471_v60  ;;  %v473_v2 = vld [vmem:[%s1430_s17 + $0x7e8] sm:$0xff]  ;;  %v474_v3 = vld [vmem:[%s1430_s17 + $0x7f0] sm:$0xff]  ;;  %v729_v4 = vmul.f32 %v2124_v31, %v472_v1 }
  0xba   : > { %979 = vst.msk [vmem:[%s1439_s13 + $0x7a8] sm:$0xff] %vm733_vm0, %v722_v51  ;;  %980 = vst.msk [vmem:[%s1439_s13 + $0x7b0] sm:$0xff] %vm733_vm0, %v723_v55  ;;  %v730_v5 = vmul.f32 %v2124_v31, %v473_v2  ;;  %v731_v6 = vmul.f32 %v2124_v31, %v474_v3  ;;  %v475_v7 = vld [vmem:[%s1430_s17 + $0x7f8] sm:$0xff] }
  0xbb   : > { %981 = vst.msk [vmem:[%s1439_s13 + $0x7b8] sm:$0xff] %vm733_vm0, %v724_v56  ;;  %982 = vst.msk [vmem:[%s1439_s13 + $0x7c0] sm:$0xff] %vm733_vm0, %v725_v57  ;;  %v732_v8 = vmul.f32 %v2124_v31, %v475_v7 }
  0xbc   : > { %983 = vst.msk [vmem:[%s1439_s13 + $0x7c8] sm:$0xff] %vm733_vm0, %v726_v61  ;;  %984 = vst.msk [vmem:[%s1439_s13 + $0x7d0] sm:$0xff] %vm733_vm0, %v727_v62 }
  0xbd   : > { %985 = vst.msk [vmem:[%s1439_s13 + $0x7d8] sm:$0xff] %vm733_vm0, %v728_v63  ;;  %986 = vst.msk [vmem:[%s1439_s13 + $0x7e0] sm:$0xff] %vm733_vm0, %v729_v4 }
  0xbe   : > { %987 = vst.msk [vmem:[%s1439_s13 + $0x7e8] sm:$0xff] %vm733_vm0, %v730_v5  ;;  %988 = vst.msk [vmem:[%s1439_s13 + $0x7f0] sm:$0xff] %vm733_vm0, %v731_v6 }
  0xbf   : > { %989 = vst.msk [vmem:[%s1439_s13 + $0x7f8] sm:$0xff] %vm733_vm0, %v732_v8 }
  0xc0 PF: > { %s15_s16 = sadd.s32 1, %s1287_s16   ;;  %s2501_s9 = smov %s1263_s10 }
  0xc1   : > { %p12_p7 = scmp.ge.s32.totalorder %s15_s16, 18   ;;  %s2502_s10 = smov %s1267_s11 }
  0xc2   : > { %s2503_s11 = smov %s1370_s27  ;;  %s2504_s12 = smov %s1279_s14 }
  0xc3   : > { %s2505_s13 = smov %s1283_s15  ;;  %s2506_s14 = smov %s2509_s18 }
  0xc4   : > { %s2507_s15 = smov %s2513_s19  ;;  %14 = sbr.rel (!%p12_p7) target bundleno = 5 (0x5), region = 71 }
  0xcb   :  { %1020 = vsyncpa [#allocation3], 1 }
  0xcc   :  { %1022 = vsyncpa [#allocation3 + $0x1], 1 }

</bundles_post_ra>
